<compile_context>
chip_gen: v5e
topology: v5e:2x2
jax: 0.10.0
libtpu: 0.0.40
codegen_flags: <defaults>
</compile_context>

<pallas_src>
import jax
import jax.numpy as jnp
from jax.experimental import pallas as pl
from jax.experimental.pallas import tpu as pltpu

# ---- Module hyperparameters (MixClassificationBigSNN_expV.__init__) -----------
SEQ_LENGTH = 24
H1, H2, H3 = 256, 256, 256

# ---- norse LIF / LI dynamics constants (defaults, dt = 1e-3) ------------------
DT = 1e-3
TAU_MEM_INV = 100.0              # 1 / 1e-2
TAU_SYN_INV = 200.0              # 1 / 5e-3
DT_TAU_MEM = DT * TAU_MEM_INV    # 0.1
DT_TAU_SYN = DT * TAU_SYN_INV    # 0.2
ONE_M_DTM = 1.0 - DT_TAU_MEM     # 0.9  (membrane decay, v_leak = 0)
ONE_M_DTS = 1.0 - DT_TAU_SYN     # 0.8  (synaptic-current decay)
V_RESET = 0.0
V_TH = 0.23                      # LIFParameters(v_th=0.23) for the hidden LIFCells
ENC_V_TH = 1.0                   # ConstantCurrentLIFEncoder uses default v_th = 1.0

_CHUNK = 2                       # timesteps per bf16 spike-buffer store (2*B=16 rows at B=8)
assert SEQ_LENGTH % _CHUNK == 0


def _snn_kernel(x_ref, w1_ref, b1_ref, w2_ref, b2_ref, w3_ref, b3_ref, wo_ref,
                o_ref,
                enc_spk, cur1_all, z1_all, cur2_all, r1_all, cur3_all, r2_all,
                curo_all):
    B, F = x_ref.shape
    H1_ = w1_ref.shape[1]
    H2_ = w2_ref.shape[1]
    H3_ = w3_ref.shape[1]
    CP = wo_ref.shape[1]
    f32 = jnp.float32
    bf16 = jnp.bfloat16

    # ---- Phase 1: ConstantCurrentLIFEncoder for ALL timesteps (hoisted) -------
    xc = DT_TAU_MEM * x_ref[...]                      # hoisted constant-current term
    venc = jnp.zeros((B, F), f32)
    for c in range(0, SEQ_LENGTH, _CHUNK):
        spk = []
        for _ in range(_CHUNK):
            venc = ONE_M_DTM * venc + xc
            z = venc > ENC_V_TH
            venc = jnp.where(z, V_RESET, venc)
            spk.append(z.astype(f32))                 # exact 0/1
        enc_spk[pl.ds(c * B, _CHUNK * B), :] = (
            jnp.concatenate(spk, axis=0).astype(bf16))

    # ---- Elementwise LIF scan over all timesteps (no matmul inside) -----------
    def lif_scan(cur_ref, spk_ref, H):
        # norse lif_feed_forward_step, constants folded (v_leak = v_reset = 0).
        v = jnp.zeros((B, H), f32)
        i = jnp.zeros((B, H), f32)
        for c in range(0, SEQ_LENGTH, _CHUNK):
            spk = []
            for k in range(_CHUNK):
                cur = cur_ref[pl.ds((c + k) * B, B), :]
                v_dec = ONE_M_DTM * v + DT_TAU_MEM * i
                z = v_dec > V_TH
                v = jnp.where(z, V_RESET, v_dec)
                i = ONE_M_DTS * i + cur
                spk.append(z.astype(f32))             # exact 0/1
            spk_ref[pl.ds(c * B, _CHUNK * B), :] = (
                jnp.concatenate(spk, axis=0).astype(bf16))

    # ---- Phase 2: layer-serial / time-parallel stack (ONE matmul per layer) ---
    cur1_all[...] = (jnp.dot(enc_spk[...], w1_ref[...],
                             preferred_element_type=f32) + b1_ref[...])
    lif_scan(cur1_all, z1_all, H1_)

    cur2_all[...] = (jnp.dot(z1_all[...], w2_ref[...],
                             preferred_element_type=f32) + b2_ref[...])
    lif_scan(cur2_all, r1_all, H2_)                   # r1_all <- z2 spikes
    # residual r1 = z2 + z1 (values in {0,1,2}: exact in bf16); add in f32 (v5e VALU).
    r1_all[...] = (r1_all[...].astype(f32) + z1_all[...].astype(f32)).astype(bf16)

    cur3_all[...] = (jnp.dot(r1_all[...], w3_ref[...],
                             preferred_element_type=f32) + b3_ref[...])
    lif_scan(cur3_all, r2_all, H3_)                   # r2_all <- z3 spikes
    r2_all[...] = (r2_all[...].astype(f32) + r1_all[...].astype(f32)).astype(bf16)

    # LILinearCell input currents for every timestep (norse li_step has no bias).
    curo_all[...] = jnp.dot(r2_all[...], wo_ref[...], preferred_element_type=f32)

    # ---- Phase 3: LI readout scan; decode(voltages) == voltages[-1] -----------
    vo = jnp.zeros((B, CP), f32)
    io = jnp.zeros((B, CP), f32)
    for ts in range(SEQ_LENGTH):
        i_jump = io + curo_all[pl.ds(ts * B, B), :]
        vo = ONE_M_DTM * vo + DT_TAU_MEM * i_jump
        io = ONE_M_DTS * i_jump
    o_ref[...] = vo


def _pick_batch_block(B):
    # Single block for small batches; for large batches split into blocks so the grid can
    # be sharded across TensorCores (v7x megacore) and per-block scratch stays small.
    if B <= 32:
        return B
    for cand in (32, 16, 8):
        if B % cand == 0:
            return cand
    return B


def mix_snn_fusion_forward(x, params):
    """Forward pass of the fusion head given the concatenated feature vector x [B, 2*input_size]."""
    B, F = x.shape
    H1_ = params["w1"].shape[1]
    H2_ = params["w2"].shape[1]
    H3_ = params["w3"].shape[1]
    C = params["w_out"].shape[1]
    CP = max(128, pl.cdiv(C, 128) * 128)              # lane-pad the readout
    FP = max(128, pl.cdiv(F, 128) * 128)              # lane-pad features (e.g. 800 -> 896)

    xp = x.astype(jnp.float32)
    w1 = params["w1"].astype(jnp.bfloat16)
    if FP != F:
        xp = jnp.pad(xp, ((0, 0), (0, FP - F)))       # zero input current -> never spikes
        w1 = jnp.pad(w1, ((0, FP - F), (0, 0)))
    w2 = params["w2"].astype(jnp.bfloat16)
    w3 = params["w3"].astype(jnp.bfloat16)
    wo = jnp.zeros((H3_, CP), jnp.bfloat16).at[:, :C].set(
        params["w_out"].astype(jnp.bfloat16))
    b1 = params["b1"].reshape(1, H1_).astype(jnp.float32)
    b2 = params["b2"].reshape(1, H2_).astype(jnp.float32)
    b3 = params["b3"].reshape(1, H3_).astype(jnp.float32)

    BB = _pick_batch_block(B)
    grid = (B // BB,)
    SB = SEQ_LENGTH * BB

    flops = 2 * SEQ_LENGTH * B * (FP * H1_ + H1_ * H2_ + H2_ * H3_ + H3_ * CP)
    bytes_accessed = (4 * B * FP + 4 * B * CP
                      + 2 * (FP * H1_ + H1_ * H2_ + H2_ * H3_ + H3_ * CP)
                      + 4 * (H1_ + H2_ + H3_))

    out_padded = pl.pallas_call(
        _snn_kernel,
        out_shape=jax.ShapeDtypeStruct((B, CP), jnp.float32),
        grid=grid,
        in_specs=[
            pl.BlockSpec((BB, FP), lambda b: (b, 0)),      # x (batch-blocked)
            pl.BlockSpec((FP, H1_), lambda b: (0, 0)),     # w1
            pl.BlockSpec((1, H1_), lambda b: (0, 0)),      # b1
            pl.BlockSpec((H1_, H2_), lambda b: (0, 0)),    # w2
            pl.BlockSpec((1, H2_), lambda b: (0, 0)),      # b2
            pl.BlockSpec((H2_, H3_), lambda b: (0, 0)),    # w3
            pl.BlockSpec((1, H3_), lambda b: (0, 0)),      # b3
            pl.BlockSpec((H3_, CP), lambda b: (0, 0)),     # w_out
        ],
        out_specs=pl.BlockSpec((BB, CP), lambda b: (b, 0)),
        scratch_shapes=[
            pltpu.VMEM((SB, FP), jnp.bfloat16),    # encoder spikes (all timesteps)
            pltpu.VMEM((SB, H1_), jnp.float32),    # lin1 currents
            pltpu.VMEM((SB, H1_), jnp.bfloat16),   # lif1 spikes z1
            pltpu.VMEM((SB, H2_), jnp.float32),    # lin2 currents
            pltpu.VMEM((SB, H2_), jnp.bfloat16),   # z2, then residual r1 = z2 + z1
            pltpu.VMEM((SB, H3_), jnp.float32),    # lin3 currents
            pltpu.VMEM((SB, H3_), jnp.bfloat16),   # z3, then residual r2 = z3 + r1
            pltpu.VMEM((SB, CP), jnp.float32),     # LI readout currents
        ],
        compiler_params=pltpu.CompilerParams(dimension_semantics=("parallel",)),
        cost_estimate=pl.CostEstimate(flops=int(flops), transcendentals=0,
                                      bytes_accessed=int(bytes_accessed)),
    )(xp, w1, b1, w2, b2, w3, b3, wo)
    return out_padded[:, :C]


# ---------------------------- pure-JAX reference ------------------------------
# Mirrors the module math step-by-step (per-timestep loop); uses the same bf16-rounded
# weights / bf16 spike operands as the kernel (spikes and residual sums are exact in bf16)
# with f32 accumulation, so the comparison isolates kernel correctness rather than
# weight-rounding drift.
def reference_forward(x, params):
    B, F = x.shape
    C = params["w_out"].shape[1]
    w1 = params["w1"].astype(jnp.bfloat16)
    w2 = params["w2"].astype(jnp.bfloat16)
    w3 = params["w3"].astype(jnp.bfloat16)
    wo = params["w_out"].astype(jnp.bfloat16)
    b1, b2, b3 = params["b1"], params["b2"], params["b3"]

    venc = jnp.zeros((B, F), jnp.float32)
    v1 = jnp.zeros((B, H1), jnp.float32); i1 = jnp.zeros((B, H1), jnp.float32)
    v2 = jnp.zeros((B, H2), jnp.float32); i2 = jnp.zeros((B, H2), jnp.float32)
    v3 = jnp.zeros((B, H3), jnp.float32); i3 = jnp.zeros((B, H3), jnp.float32)
    vo = jnp.zeros((B, C), jnp.float32); io = jnp.zeros((B, C), jnp.float32)

    def lif_ff(v, i, cur):
        v_dec = ONE_M_DTM * v + DT_TAU_MEM * i
        z = v_dec > V_TH
        v_new = jnp.where(z, V_RESET, v_dec)
        i_new = ONE_M_DTS * i + cur
        return z.astype(jnp.bfloat16), v_new, i_new

    for _ in range(SEQ_LENGTH):
        venc = ONE_M_DTM * venc + DT_TAU_MEM * x
        z_enc = venc > ENC_V_TH
        venc = jnp.where(z_enc, V_RESET, venc)
        xt = z_enc.astype(jnp.bfloat16)

        cur1 = jnp.dot(xt, w1, preferred_element_type=jnp.float32) + b1
        z1, v1, i1 = lif_ff(v1, i1, cur1)
        cur2 = jnp.dot(z1, w2, preferred_element_type=jnp.float32) + b2
        z2, v2, i2 = lif_ff(v2, i2, cur2)
        r1 = z2 + z1
        cur3 = jnp.dot(r1, w3, preferred_element_type=jnp.float32) + b3
        z3, v3, i3 = lif_ff(v3, i3, cur3)
        r2 = z3 + r1
        i_jump = io + jnp.dot(r2, wo, preferred_element_type=jnp.float32)
        vo = ONE_M_DTM * vo + DT_TAU_MEM * i_jump
        io = ONE_M_DTS * i_jump
    return vo


if __name__ == "__main__":
    # Small, module-consistent shapes: MixClassificationBigSNN_expV(input_size=64, n_classes=10)
    # (the full model uses input_size=400: two r3d_18 heads of 400 concatenated -> 800 features).
    B = 8
    INPUT_SIZE = 64
    FEAT = 2 * INPUT_SIZE        # 128
    N_CLASSES = 10

    key = jax.random.PRNGKey(0)
    kx, k1, kb1, k2, kb2, k3, kb3, k4 = jax.random.split(key, 8)

    params = {
        # nn.Linear(in, out, bias=True) weights stored pre-transposed as [in, out].
        "w1": jax.random.normal(k1, (FEAT, H1), jnp.float32) / jnp.sqrt(FEAT),
        "b1": 0.1 * jax.random.normal(kb1, (H1,), jnp.float32),
        "w2": jax.random.normal(k2, (H1, H2), jnp.float32) / jnp.sqrt(H1),
        "b2": 0.1 * jax.random.normal(kb2, (H2,), jnp.float32),
        "w3": jax.random.normal(k3, (H2, H3), jnp.float32) / jnp.sqrt(H2),
        "b3": 0.1 * jax.random.normal(kb3, (H3,), jnp.float32),
        # LILinearCell: randn(n_classes, 256) * sqrt(2 / n_classes), stored as [256, n_classes].
        "w_out": jax.random.normal(k4, (H3, N_CLASSES), jnp.float32)
                 * jnp.sqrt(2.0 / N_CLASSES),
    }

    x = jax.random.normal(kx, (B, FEAT), jnp.float32)

    out = mix_snn_fusion_forward(x, params)
    out = jax.block_until_ready(out)

    ref = reference_forward(x, params)
    assert out.shape == (B, N_CLASSES)
    err = float(jnp.max(jnp.abs(out - ref)))
    assert jnp.allclose(out, ref, rtol=2e-3, atol=2e-3), f"max abs err = {err}"

    print("KERNEL_OK")
</pallas_src>

<mosaic_0001>
module attributes {stable_mosaic.version = 11 : i64} {
  func.func @_snn_kernel(%arg0: i32, %arg1: memref<8x128xf32, #tpu.memory_space<vmem>>, %arg2: memref<128x256xbf16, #tpu.memory_space<vmem>>, %arg3: memref<1x256xf32, #tpu.memory_space<vmem>>, %arg4: memref<256x256xbf16, #tpu.memory_space<vmem>>, %arg5: memref<1x256xf32, #tpu.memory_space<vmem>>, %arg6: memref<256x256xbf16, #tpu.memory_space<vmem>>, %arg7: memref<1x256xf32, #tpu.memory_space<vmem>>, %arg8: memref<256x128xbf16, #tpu.memory_space<vmem>>, %arg9: memref<8x128xf32, #tpu.memory_space<vmem>>, %arg10: memref<192x128xbf16, #tpu.memory_space<vmem>>, %arg11: memref<192x256xf32, #tpu.memory_space<vmem>>, %arg12: memref<192x256xbf16, #tpu.memory_space<vmem>>, %arg13: memref<192x256xf32, #tpu.memory_space<vmem>>, %arg14: memref<192x256xbf16, #tpu.memory_space<vmem>>, %arg15: memref<192x256xf32, #tpu.memory_space<vmem>>, %arg16: memref<192x256xbf16, #tpu.memory_space<vmem>>, %arg17: memref<192x128xf32, #tpu.memory_space<vmem>>) attributes {dimension_semantics = [#tpu.dimension_semantics<parallel>], iteration_bounds = array<i64: 1>, scalar_prefetch = 0 : i64, scratch_operands = 8 : i64, tpu.core_type = #tpu.core_type<tc>, window_params = [{transform_indices = @transform_0, window_bounds = array<i64: 8, 128>}, {pipeline_mode = #tpu.pipeline_mode<synchronous>, transform_indices = @transform_1, window_bounds = array<i64: 128, 256>}, {pipeline_mode = #tpu.pipeline_mode<synchronous>, transform_indices = @transform_2, window_bounds = array<i64: 1, 256>}, {pipeline_mode = #tpu.pipeline_mode<synchronous>, transform_indices = @transform_3, window_bounds = array<i64: 256, 256>}, {pipeline_mode = #tpu.pipeline_mode<synchronous>, transform_indices = @transform_4, window_bounds = array<i64: 1, 256>}, {pipeline_mode = #tpu.pipeline_mode<synchronous>, transform_indices = @transform_5, window_bounds = array<i64: 256, 256>}, {pipeline_mode = #tpu.pipeline_mode<synchronous>, transform_indices = @transform_6, window_bounds = array<i64: 1, 256>}, {pipeline_mode = #tpu.pipeline_mode<synchronous>, transform_indices = @transform_7, window_bounds = array<i64: 256, 128>}, {transform_indices = @transform_8, window_bounds = array<i64: 8, 128>}]} {
    %c0 = arith.constant 0 : index
    %c0_0 = arith.constant 0 : index
    %0 = vector.load %arg1[%c0, %c0_0] : memref<8x128xf32, #tpu.memory_space<vmem>>, vector<8x128xf32>
    %cst = arith.constant 1.000000e-01 : f32
    %1 = vector.broadcast %cst : f32 to vector<8x128xf32>
    %2 = arith.mulf %1, %0 : vector<8x128xf32>
    %cst_1 = arith.constant 0.000000e+00 : f32
    %3 = vector.broadcast %cst_1 : f32 to vector<8x128xf32>
    %cst_2 = arith.constant 0.899999976 : f32
    %4 = vector.broadcast %cst_2 : f32 to vector<8x128xf32>
    %5 = arith.mulf %4, %3 : vector<8x128xf32>
    %6 = arith.addf %5, %2 : vector<8x128xf32>
    %cst_3 = arith.constant 1.000000e+00 : f32
    %7 = vector.broadcast %cst_3 : f32 to vector<8x128xf32>
    %8 = arith.cmpf ogt, %6, %7 : vector<8x128xf32>
    %cst_4 = arith.constant 0.000000e+00 : f32
    %9 = vector.broadcast %cst_4 : f32 to vector<8x128xf32>
    %10 = arith.select %8, %9, %6 : vector<8x128xi1>, vector<8x128xf32>
    %11 = arith.extui %8 : vector<8x128xi1> to vector<8x128xi32>
    %12 = arith.sitofp %11 : vector<8x128xi32> to vector<8x128xf32>
    %cst_5 = arith.constant 0.899999976 : f32
    %13 = vector.broadcast %cst_5 : f32 to vector<8x128xf32>
    %14 = arith.mulf %13, %10 : vector<8x128xf32>
    %15 = arith.addf %14, %2 : vector<8x128xf32>
    %cst_6 = arith.constant 1.000000e+00 : f32
    %16 = vector.broadcast %cst_6 : f32 to vector<8x128xf32>
    %17 = arith.cmpf ogt, %15, %16 : vector<8x128xf32>
    %cst_7 = arith.constant 0.000000e+00 : f32
    %18 = vector.broadcast %cst_7 : f32 to vector<8x128xf32>
    %19 = arith.select %17, %18, %15 : vector<8x128xi1>, vector<8x128xf32>
    %20 = arith.extui %17 : vector<8x128xi1> to vector<8x128xi32>
    %21 = arith.sitofp %20 : vector<8x128xi32> to vector<8x128xf32>
    %22 = tpu.concatenate %12, %21 in 0 : vector<8x128xf32>, vector<8x128xf32> -> vector<16x128xf32>
    %23 = arith.truncf %22 : vector<16x128xf32> to vector<16x128xbf16>
    %c0_8 = arith.constant 0 : index
    %c0_9 = arith.constant 0 : index
    %24 = vector.load %arg10[%c0_8, %c0_9] : memref<192x128xbf16, #tpu.memory_space<vmem>>, vector<16x128xbf16>
    tpu.vector_store %arg10[%c0_8, %c0_9], %23 {strides = array<i32>} : memref<192x128xbf16, #tpu.memory_space<vmem>>, vector<16x128xbf16>,
    %cst_10 = arith.constant 0.899999976 : f32
    %25 = vector.broadcast %cst_10 : f32 to vector<8x128xf32>
    %26 = arith.mulf %25, %19 : vector<8x128xf32>
    %27 = arith.addf %26, %2 : vector<8x128xf32>
    %cst_11 = arith.constant 1.000000e+00 : f32
    %28 = vector.broadcast %cst_11 : f32 to vector<8x128xf32>
    %29 = arith.cmpf ogt, %27, %28 : vector<8x128xf32>
    %cst_12 = arith.constant 0.000000e+00 : f32
    %30 = vector.broadcast %cst_12 : f32 to vector<8x128xf32>
    %31 = arith.select %29, %30, %27 : vector<8x128xi1>, vector<8x128xf32>
    %32 = arith.extui %29 : vector<8x128xi1> to vector<8x128xi32>
    %33 = arith.sitofp %32 : vector<8x128xi32> to vector<8x128xf32>
    %cst_13 = arith.constant 0.899999976 : f32
    %34 = vector.broadcast %cst_13 : f32 to vector<8x128xf32>
    %35 = arith.mulf %34, %31 : vector<8x128xf32>
    %36 = arith.addf %35, %2 : vector<8x128xf32>
    %cst_14 = arith.constant 1.000000e+00 : f32
    %37 = vector.broadcast %cst_14 : f32 to vector<8x128xf32>
    %38 = arith.cmpf ogt, %36, %37 : vector<8x128xf32>
    %cst_15 = arith.constant 0.000000e+00 : f32
    %39 = vector.broadcast %cst_15 : f32 to vector<8x128xf32>
    %40 = arith.select %38, %39, %36 : vector<8x128xi1>, vector<8x128xf32>
    %41 = arith.extui %38 : vector<8x128xi1> to vector<8x128xi32>
    %42 = arith.sitofp %41 : vector<8x128xi32> to vector<8x128xf32>
    %43 = tpu.concatenate %33, %42 in 0 : vector<8x128xf32>, vector<8x128xf32> -> vector<16x128xf32>
    %44 = arith.truncf %43 : vector<16x128xf32> to vector<16x128xbf16>
    %c16 = arith.constant 16 : index
    %c0_16 = arith.constant 0 : index
    %45 = vector.load %arg10[%c16, %c0_16] : memref<192x128xbf16, #tpu.memory_space<vmem>>, vector<16x128xbf16>
    tpu.vector_store %arg10[%c16, %c0_16], %44 {strides = array<i32>} : memref<192x128xbf16, #tpu.memory_space<vmem>>, vector<16x128xbf16>,
    %cst_17 = arith.constant 0.899999976 : f32
    %46 = vector.broadcast %cst_17 : f32 to vector<8x128xf32>
    %47 = arith.mulf %46, %40 : vector<8x128xf32>
    %48 = arith.addf %47, %2 : vector<8x128xf32>
    %cst_18 = arith.constant 1.000000e+00 : f32
    %49 = vector.broadcast %cst_18 : f32 to vector<8x128xf32>
    %50 = arith.cmpf ogt, %48, %49 : vector<8x128xf32>
    %cst_19 = arith.constant 0.000000e+00 : f32
    %51 = vector.broadcast %cst_19 : f32 to vector<8x128xf32>
    %52 = arith.select %50, %51, %48 : vector<8x128xi1>, vector<8x128xf32>
    %53 = arith.extui %50 : vector<8x128xi1> to vector<8x128xi32>
    %54 = arith.sitofp %53 : vector<8x128xi32> to vector<8x128xf32>
    %cst_20 = arith.constant 0.899999976 : f32
    %55 = vector.broadcast %cst_20 : f32 to vector<8x128xf32>
    %56 = arith.mulf %55, %52 : vector<8x128xf32>
    %57 = arith.addf %56, %2 : vector<8x128xf32>
    %cst_21 = arith.constant 1.000000e+00 : f32
    %58 = vector.broadcast %cst_21 : f32 to vector<8x128xf32>
    %59 = arith.cmpf ogt, %57, %58 : vector<8x128xf32>
    %cst_22 = arith.constant 0.000000e+00 : f32
    %60 = vector.broadcast %cst_22 : f32 to vector<8x128xf32>
    %61 = arith.select %59, %60, %57 : vector<8x128xi1>, vector<8x128xf32>
    %62 = arith.extui %59 : vector<8x128xi1> to vector<8x128xi32>
    %63 = arith.sitofp %62 : vector<8x128xi32> to vector<8x128xf32>
    %64 = tpu.concatenate %54, %63 in 0 : vector<8x128xf32>, vector<8x128xf32> -> vector<16x128xf32>
    %65 = arith.truncf %64 : vector<16x128xf32> to vector<16x128xbf16>
    %c32 = arith.constant 32 : index
    %c0_23 = arith.constant 0 : index
    %66 = vector.load %arg10[%c32, %c0_23] : memref<192x128xbf16, #tpu.memory_space<vmem>>, vector<16x128xbf16>
    tpu.vector_store %arg10[%c32, %c0_23], %65 {strides = array<i32>} : memref<192x128xbf16, #tpu.memory_space<vmem>>, vector<16x128xbf16>,
    %cst_24 = arith.constant 0.899999976 : f32
    %67 = vector.broadcast %cst_24 : f32 to vector<8x128xf32>
    %68 = arith.mulf %67, %61 : vector<8x128xf32>
    %69 = arith.addf %68, %2 : vector<8x128xf32>
    %cst_25 = arith.constant 1.000000e+00 : f32
    %70 = vector.broadcast %cst_25 : f32 to vector<8x128xf32>
    %71 = arith.cmpf ogt, %69, %70 : vector<8x128xf32>
    %cst_26 = arith.constant 0.000000e+00 : f32
    %72 = vector.broadcast %cst_26 : f32 to vector<8x128xf32>
    %73 = arith.select %71, %72, %69 : vector<8x128xi1>, vector<8x128xf32>
    %74 = arith.extui %71 : vector<8x128xi1> to vector<8x128xi32>
    %75 = arith.sitofp %74 : vector<8x128xi32> to vector<8x128xf32>
    %cst_27 = arith.constant 0.899999976 : f32
    %76 = vector.broadcast %cst_27 : f32 to vector<8x128xf32>
    %77 = arith.mulf %76, %73 : vector<8x128xf32>
    %78 = arith.addf %77, %2 : vector<8x128xf32>
    %cst_28 = arith.constant 1.000000e+00 : f32
    %79 = vector.broadcast %cst_28 : f32 to vector<8x128xf32>
    %80 = arith.cmpf ogt, %78, %79 : vector<8x128xf32>
    %cst_29 = arith.constant 0.000000e+00 : f32
    %81 = vector.broadcast %cst_29 : f32 to vector<8x128xf32>
    %82 = arith.select %80, %81, %78 : vector<8x128xi1>, vector<8x128xf32>
    %83 = arith.extui %80 : vector<8x128xi1> to vector<8x128xi32>
    %84 = arith.sitofp %83 : vector<8x128xi32> to vector<8x128xf32>
    %85 = tpu.concatenate %75, %84 in 0 : vector<8x128xf32>, vector<8x128xf32> -> vector<16x128xf32>
    %86 = arith.truncf %85 : vector<16x128xf32> to vector<16x128xbf16>
    %c48 = arith.constant 48 : index
    %c0_30 = arith.constant 0 : index
    %87 = vector.load %arg10[%c48, %c0_30] : memref<192x128xbf16, #tpu.memory_space<vmem>>, vector<16x128xbf16>
    tpu.vector_store %arg10[%c48, %c0_30], %86 {strides = array<i32>} : memref<192x128xbf16, #tpu.memory_space<vmem>>, vector<16x128xbf16>,
    %cst_31 = arith.constant 0.899999976 : f32
    %88 = vector.broadcast %cst_31 : f32 to vector<8x128xf32>
    %89 = arith.mulf %88, %82 : vector<8x128xf32>
    %90 = arith.addf %89, %2 : vector<8x128xf32>
    %cst_32 = arith.constant 1.000000e+00 : f32
    %91 = vector.broadcast %cst_32 : f32 to vector<8x128xf32>
    %92 = arith.cmpf ogt, %90, %91 : vector<8x128xf32>
    %cst_33 = arith.constant 0.000000e+00 : f32
    %93 = vector.broadcast %cst_33 : f32 to vector<8x128xf32>
    %94 = arith.select %92, %93, %90 : vector<8x128xi1>, vector<8x128xf32>
    %95 = arith.extui %92 : vector<8x128xi1> to vector<8x128xi32>
    %96 = arith.sitofp %95 : vector<8x128xi32> to vector<8x128xf32>
    %cst_34 = arith.constant 0.899999976 : f32
    %97 = vector.broadcast %cst_34 : f32 to vector<8x128xf32>
    %98 = arith.mulf %97, %94 : vector<8x128xf32>
    %99 = arith.addf %98, %2 : vector<8x128xf32>
    %cst_35 = arith.constant 1.000000e+00 : f32
    %100 = vector.broadcast %cst_35 : f32 to vector<8x128xf32>
    %101 = arith.cmpf ogt, %99, %100 : vector<8x128xf32>
    %cst_36 = arith.constant 0.000000e+00 : f32
    %102 = vector.broadcast %cst_36 : f32 to vector<8x128xf32>
    %103 = arith.select %101, %102, %99 : vector<8x128xi1>, vector<8x128xf32>
    %104 = arith.extui %101 : vector<8x128xi1> to vector<8x128xi32>
    %105 = arith.sitofp %104 : vector<8x128xi32> to vector<8x128xf32>
    %106 = tpu.concatenate %96, %105 in 0 : vector<8x128xf32>, vector<8x128xf32> -> vector<16x128xf32>
    %107 = arith.truncf %106 : vector<16x128xf32> to vector<16x128xbf16>
    %c64 = arith.constant 64 : index
    %c0_37 = arith.constant 0 : index
    %108 = vector.load %arg10[%c64, %c0_37] : memref<192x128xbf16, #tpu.memory_space<vmem>>, vector<16x128xbf16>
    tpu.vector_store %arg10[%c64, %c0_37], %107 {strides = array<i32>} : memref<192x128xbf16, #tpu.memory_space<vmem>>, vector<16x128xbf16>,
    %cst_38 = arith.constant 0.899999976 : f32
    %109 = vector.broadcast %cst_38 : f32 to vector<8x128xf32>
    %110 = arith.mulf %109, %103 : vector<8x128xf32>
    %111 = arith.addf %110, %2 : vector<8x128xf32>
    %cst_39 = arith.constant 1.000000e+00 : f32
    %112 = vector.broadcast %cst_39 : f32 to vector<8x128xf32>
    %113 = arith.cmpf ogt, %111, %112 : vector<8x128xf32>
    %cst_40 = arith.constant 0.000000e+00 : f32
    %114 = vector.broadcast %cst_40 : f32 to vector<8x128xf32>
    %115 = arith.select %113, %114, %111 : vector<8x128xi1>, vector<8x128xf32>
    %116 = arith.extui %113 : vector<8x128xi1> to vector<8x128xi32>
    %117 = arith.sitofp %116 : vector<8x128xi32> to vector<8x128xf32>
    %cst_41 = arith.constant 0.899999976 : f32
    %118 = vector.broadcast %cst_41 : f32 to vector<8x128xf32>
    %119 = arith.mulf %118, %115 : vector<8x128xf32>
    %120 = arith.addf %119, %2 : vector<8x128xf32>
    %cst_42 = arith.constant 1.000000e+00 : f32
    %121 = vector.broadcast %cst_42 : f32 to vector<8x128xf32>
    %122 = arith.cmpf ogt, %120, %121 : vector<8x128xf32>
    %cst_43 = arith.constant 0.000000e+00 : f32
    %123 = vector.broadcast %cst_43 : f32 to vector<8x128xf32>
    %124 = arith.select %122, %123, %120 : vector<8x128xi1>, vector<8x128xf32>
    %125 = arith.extui %122 : vector<8x128xi1> to vector<8x128xi32>
    %126 = arith.sitofp %125 : vector<8x128xi32> to vector<8x128xf32>
    %127 = tpu.concatenate %117, %126 in 0 : vector<8x128xf32>, vector<8x128xf32> -> vector<16x128xf32>
    %128 = arith.truncf %127 : vector<16x128xf32> to vector<16x128xbf16>
    %c80 = arith.constant 80 : index
    %c0_44 = arith.constant 0 : index
    %129 = vector.load %arg10[%c80, %c0_44] : memref<192x128xbf16, #tpu.memory_space<vmem>>, vector<16x128xbf16>
    tpu.vector_store %arg10[%c80, %c0_44], %128 {strides = array<i32>} : memref<192x128xbf16, #tpu.memory_space<vmem>>, vector<16x128xbf16>,
    %cst_45 = arith.constant 0.899999976 : f32
    %130 = vector.broadcast %cst_45 : f32 to vector<8x128xf32>
    %131 = arith.mulf %130, %124 : vector<8x128xf32>
    %132 = arith.addf %131, %2 : vector<8x128xf32>
    %cst_46 = arith.constant 1.000000e+00 : f32
    %133 = vector.broadcast %cst_46 : f32 to vector<8x128xf32>
    %134 = arith.cmpf ogt, %132, %133 : vector<8x128xf32>
    %cst_47 = arith.constant 0.000000e+00 : f32
    %135 = vector.broadcast %cst_47 : f32 to vector<8x128xf32>
    %136 = arith.select %134, %135, %132 : vector<8x128xi1>, vector<8x128xf32>
    %137 = arith.extui %134 : vector<8x128xi1> to vector<8x128xi32>
    %138 = arith.sitofp %137 : vector<8x128xi32> to vector<8x128xf32>
    %cst_48 = arith.constant 0.899999976 : f32
    %139 = vector.broadcast %cst_48 : f32 to vector<8x128xf32>
    %140 = arith.mulf %139, %136 : vector<8x128xf32>
    %141 = arith.addf %140, %2 : vector<8x128xf32>
    %cst_49 = arith.constant 1.000000e+00 : f32
    %142 = vector.broadcast %cst_49 : f32 to vector<8x128xf32>
    %143 = arith.cmpf ogt, %141, %142 : vector<8x128xf32>
    %cst_50 = arith.constant 0.000000e+00 : f32
    %144 = vector.broadcast %cst_50 : f32 to vector<8x128xf32>
    %145 = arith.select %143, %144, %141 : vector<8x128xi1>, vector<8x128xf32>
    %146 = arith.extui %143 : vector<8x128xi1> to vector<8x128xi32>
    %147 = arith.sitofp %146 : vector<8x128xi32> to vector<8x128xf32>
    %148 = tpu.concatenate %138, %147 in 0 : vector<8x128xf32>, vector<8x128xf32> -> vector<16x128xf32>
    %149 = arith.truncf %148 : vector<16x128xf32> to vector<16x128xbf16>
    %c96 = arith.constant 96 : index
    %c0_51 = arith.constant 0 : index
    %150 = vector.load %arg10[%c96, %c0_51] : memref<192x128xbf16, #tpu.memory_space<vmem>>, vector<16x128xbf16>
    tpu.vector_store %arg10[%c96, %c0_51], %149 {strides = array<i32>} : memref<192x128xbf16, #tpu.memory_space<vmem>>, vector<16x128xbf16>,
    %cst_52 = arith.constant 0.899999976 : f32
    %151 = vector.broadcast %cst_52 : f32 to vector<8x128xf32>
    %152 = arith.mulf %151, %145 : vector<8x128xf32>
    %153 = arith.addf %152, %2 : vector<8x128xf32>
    %cst_53 = arith.constant 1.000000e+00 : f32
    %154 = vector.broadcast %cst_53 : f32 to vector<8x128xf32>
    %155 = arith.cmpf ogt, %153, %154 : vector<8x128xf32>
    %cst_54 = arith.constant 0.000000e+00 : f32
    %156 = vector.broadcast %cst_54 : f32 to vector<8x128xf32>
    %157 = arith.select %155, %156, %153 : vector<8x128xi1>, vector<8x128xf32>
    %158 = arith.extui %155 : vector<8x128xi1> to vector<8x128xi32>
    %159 = arith.sitofp %158 : vector<8x128xi32> to vector<8x128xf32>
    %cst_55 = arith.constant 0.899999976 : f32
    %160 = vector.broadcast %cst_55 : f32 to vector<8x128xf32>
    %161 = arith.mulf %160, %157 : vector<8x128xf32>
    %162 = arith.addf %161, %2 : vector<8x128xf32>
    %cst_56 = arith.constant 1.000000e+00 : f32
    %163 = vector.broadcast %cst_56 : f32 to vector<8x128xf32>
    %164 = arith.cmpf ogt, %162, %163 : vector<8x128xf32>
    %cst_57 = arith.constant 0.000000e+00 : f32
    %165 = vector.broadcast %cst_57 : f32 to vector<8x128xf32>
    %166 = arith.select %164, %165, %162 : vector<8x128xi1>, vector<8x128xf32>
    %167 = arith.extui %164 : vector<8x128xi1> to vector<8x128xi32>
    %168 = arith.sitofp %167 : vector<8x128xi32> to vector<8x128xf32>
    %169 = tpu.concatenate %159, %168 in 0 : vector<8x128xf32>, vector<8x128xf32> -> vector<16x128xf32>
    %170 = arith.truncf %169 : vector<16x128xf32> to vector<16x128xbf16>
    %c112 = arith.constant 112 : index
    %c0_58 = arith.constant 0 : index
    %171 = vector.load %arg10[%c112, %c0_58] : memref<192x128xbf16, #tpu.memory_space<vmem>>, vector<16x128xbf16>
    tpu.vector_store %arg10[%c112, %c0_58], %170 {strides = array<i32>} : memref<192x128xbf16, #tpu.memory_space<vmem>>, vector<16x128xbf16>,
    %cst_59 = arith.constant 0.899999976 : f32
    %172 = vector.broadcast %cst_59 : f32 to vector<8x128xf32>
    %173 = arith.mulf %172, %166 : vector<8x128xf32>
    %174 = arith.addf %173, %2 : vector<8x128xf32>
    %cst_60 = arith.constant 1.000000e+00 : f32
    %175 = vector.broadcast %cst_60 : f32 to vector<8x128xf32>
    %176 = arith.cmpf ogt, %174, %175 : vector<8x128xf32>
    %cst_61 = arith.constant 0.000000e+00 : f32
    %177 = vector.broadcast %cst_61 : f32 to vector<8x128xf32>
    %178 = arith.select %176, %177, %174 : vector<8x128xi1>, vector<8x128xf32>
    %179 = arith.extui %176 : vector<8x128xi1> to vector<8x128xi32>
    %180 = arith.sitofp %179 : vector<8x128xi32> to vector<8x128xf32>
    %cst_62 = arith.constant 0.899999976 : f32
    %181 = vector.broadcast %cst_62 : f32 to vector<8x128xf32>
    %182 = arith.mulf %181, %178 : vector<8x128xf32>
    %183 = arith.addf %182, %2 : vector<8x128xf32>
    %cst_63 = arith.constant 1.000000e+00 : f32
    %184 = vector.broadcast %cst_63 : f32 to vector<8x128xf32>
    %185 = arith.cmpf ogt, %183, %184 : vector<8x128xf32>
    %cst_64 = arith.constant 0.000000e+00 : f32
    %186 = vector.broadcast %cst_64 : f32 to vector<8x128xf32>
    %187 = arith.select %185, %186, %183 : vector<8x128xi1>, vector<8x128xf32>
    %188 = arith.extui %185 : vector<8x128xi1> to vector<8x128xi32>
    %189 = arith.sitofp %188 : vector<8x128xi32> to vector<8x128xf32>
    %190 = tpu.concatenate %180, %189 in 0 : vector<8x128xf32>, vector<8x128xf32> -> vector<16x128xf32>
    %191 = arith.truncf %190 : vector<16x128xf32> to vector<16x128xbf16>
    %c128 = arith.constant 128 : index
    %c0_65 = arith.constant 0 : index
    %192 = vector.load %arg10[%c128, %c0_65] : memref<192x128xbf16, #tpu.memory_space<vmem>>, vector<16x128xbf16>
    tpu.vector_store %arg10[%c128, %c0_65], %191 {strides = array<i32>} : memref<192x128xbf16, #tpu.memory_space<vmem>>, vector<16x128xbf16>,
    %cst_66 = arith.constant 0.899999976 : f32
    %193 = vector.broadcast %cst_66 : f32 to vector<8x128xf32>
    %194 = arith.mulf %193, %187 : vector<8x128xf32>
    %195 = arith.addf %194, %2 : vector<8x128xf32>
    %cst_67 = arith.constant 1.000000e+00 : f32
    %196 = vector.broadcast %cst_67 : f32 to vector<8x128xf32>
    %197 = arith.cmpf ogt, %195, %196 : vector<8x128xf32>
    %cst_68 = arith.constant 0.000000e+00 : f32
    %198 = vector.broadcast %cst_68 : f32 to vector<8x128xf32>
    %199 = arith.select %197, %198, %195 : vector<8x128xi1>, vector<8x128xf32>
    %200 = arith.extui %197 : vector<8x128xi1> to vector<8x128xi32>
    %201 = arith.sitofp %200 : vector<8x128xi32> to vector<8x128xf32>
    %cst_69 = arith.constant 0.899999976 : f32
    %202 = vector.broadcast %cst_69 : f32 to vector<8x128xf32>
    %203 = arith.mulf %202, %199 : vector<8x128xf32>
    %204 = arith.addf %203, %2 : vector<8x128xf32>
    %cst_70 = arith.constant 1.000000e+00 : f32
    %205 = vector.broadcast %cst_70 : f32 to vector<8x128xf32>
    %206 = arith.cmpf ogt, %204, %205 : vector<8x128xf32>
    %cst_71 = arith.constant 0.000000e+00 : f32
    %207 = vector.broadcast %cst_71 : f32 to vector<8x128xf32>
    %208 = arith.select %206, %207, %204 : vector<8x128xi1>, vector<8x128xf32>
    %209 = arith.extui %206 : vector<8x128xi1> to vector<8x128xi32>
    %210 = arith.sitofp %209 : vector<8x128xi32> to vector<8x128xf32>
    %211 = tpu.concatenate %201, %210 in 0 : vector<8x128xf32>, vector<8x128xf32> -> vector<16x128xf32>
    %212 = arith.truncf %211 : vector<16x128xf32> to vector<16x128xbf16>
    %c144 = arith.constant 144 : index
    %c0_72 = arith.constant 0 : index
    %213 = vector.load %arg10[%c144, %c0_72] : memref<192x128xbf16, #tpu.memory_space<vmem>>, vector<16x128xbf16>
    tpu.vector_store %arg10[%c144, %c0_72], %212 {strides = array<i32>} : memref<192x128xbf16, #tpu.memory_space<vmem>>, vector<16x128xbf16>,
    %cst_73 = arith.constant 0.899999976 : f32
    %214 = vector.broadcast %cst_73 : f32 to vector<8x128xf32>
    %215 = arith.mulf %214, %208 : vector<8x128xf32>
    %216 = arith.addf %215, %2 : vector<8x128xf32>
    %cst_74 = arith.constant 1.000000e+00 : f32
    %217 = vector.broadcast %cst_74 : f32 to vector<8x128xf32>
    %218 = arith.cmpf ogt, %216, %217 : vector<8x128xf32>
    %cst_75 = arith.constant 0.000000e+00 : f32
    %219 = vector.broadcast %cst_75 : f32 to vector<8x128xf32>
    %220 = arith.select %218, %219, %216 : vector<8x128xi1>, vector<8x128xf32>
    %221 = arith.extui %218 : vector<8x128xi1> to vector<8x128xi32>
    %222 = arith.sitofp %221 : vector<8x128xi32> to vector<8x128xf32>
    %cst_76 = arith.constant 0.899999976 : f32
    %223 = vector.broadcast %cst_76 : f32 to vector<8x128xf32>
    %224 = arith.mulf %223, %220 : vector<8x128xf32>
    %225 = arith.addf %224, %2 : vector<8x128xf32>
    %cst_77 = arith.constant 1.000000e+00 : f32
    %226 = vector.broadcast %cst_77 : f32 to vector<8x128xf32>
    %227 = arith.cmpf ogt, %225, %226 : vector<8x128xf32>
    %cst_78 = arith.constant 0.000000e+00 : f32
    %228 = vector.broadcast %cst_78 : f32 to vector<8x128xf32>
    %229 = arith.select %227, %228, %225 : vector<8x128xi1>, vector<8x128xf32>
    %230 = arith.extui %227 : vector<8x128xi1> to vector<8x128xi32>
    %231 = arith.sitofp %230 : vector<8x128xi32> to vector<8x128xf32>
    %232 = tpu.concatenate %222, %231 in 0 : vector<8x128xf32>, vector<8x128xf32> -> vector<16x128xf32>
    %233 = arith.truncf %232 : vector<16x128xf32> to vector<16x128xbf16>
    %c160 = arith.constant 160 : index
    %c0_79 = arith.constant 0 : index
    %234 = vector.load %arg10[%c160, %c0_79] : memref<192x128xbf16, #tpu.memory_space<vmem>>, vector<16x128xbf16>
    tpu.vector_store %arg10[%c160, %c0_79], %233 {strides = array<i32>} : memref<192x128xbf16, #tpu.memory_space<vmem>>, vector<16x128xbf16>,
    %cst_80 = arith.constant 0.899999976 : f32
    %235 = vector.broadcast %cst_80 : f32 to vector<8x128xf32>
    %236 = arith.mulf %235, %229 : vector<8x128xf32>
    %237 = arith.addf %236, %2 : vector<8x128xf32>
    %cst_81 = arith.constant 1.000000e+00 : f32
    %238 = vector.broadcast %cst_81 : f32 to vector<8x128xf32>
    %239 = arith.cmpf ogt, %237, %238 : vector<8x128xf32>
    %cst_82 = arith.constant 0.000000e+00 : f32
    %240 = vector.broadcast %cst_82 : f32 to vector<8x128xf32>
    %241 = arith.select %239, %240, %237 : vector<8x128xi1>, vector<8x128xf32>
    %242 = arith.extui %239 : vector<8x128xi1> to vector<8x128xi32>
    %243 = arith.sitofp %242 : vector<8x128xi32> to vector<8x128xf32>
    %cst_83 = arith.constant 0.899999976 : f32
    %244 = vector.broadcast %cst_83 : f32 to vector<8x128xf32>
    %245 = arith.mulf %244, %241 : vector<8x128xf32>
    %246 = arith.addf %245, %2 : vector<8x128xf32>
    %cst_84 = arith.constant 1.000000e+00 : f32
    %247 = vector.broadcast %cst_84 : f32 to vector<8x128xf32>
    %248 = arith.cmpf ogt, %246, %247 : vector<8x128xf32>
    %249 = arith.extui %248 : vector<8x128xi1> to vector<8x128xi32>
    %250 = arith.sitofp %249 : vector<8x128xi32> to vector<8x128xf32>
    %251 = tpu.concatenate %243, %250 in 0 : vector<8x128xf32>, vector<8x128xf32> -> vector<16x128xf32>
    %252 = arith.truncf %251 : vector<16x128xf32> to vector<16x128xbf16>
    %c176 = arith.constant 176 : index
    %c0_85 = arith.constant 0 : index
    %253 = vector.load %arg10[%c176, %c0_85] : memref<192x128xbf16, #tpu.memory_space<vmem>>, vector<16x128xbf16>
    tpu.vector_store %arg10[%c176, %c0_85], %252 {strides = array<i32>} : memref<192x128xbf16, #tpu.memory_space<vmem>>, vector<16x128xbf16>,
    %c0_86 = arith.constant 0 : index
    %c0_87 = arith.constant 0 : index
    %254 = vector.load %arg10[%c0_86, %c0_87] : memref<192x128xbf16, #tpu.memory_space<vmem>>, vector<192x128xbf16>
    %c0_88 = arith.constant 0 : index
    %c0_89 = arith.constant 0 : index
    %255 = vector.load %arg2[%c0_88, %c0_89] : memref<128x256xbf16, #tpu.memory_space<vmem>>, vector<128x256xbf16>
    %cst_90 = arith.constant dense<0.000000e+00> : vector<192x256xf32>
    %256 = tpu.matmul %254, %255, %cst_90 {dimension_numbers = #tpu.dot_dimension_numbers<[1], [0], [0], [1], [0, 0, 1, 1], [], []>} : vector<192x128xbf16>, vector<128x256xbf16>, vector<192x256xf32> -> vector<192x256xf32>
    %c0_91 = arith.constant 0 : index
    %c0_92 = arith.constant 0 : index
    %257 = vector.load %arg3[%c0_91, %c0_92] : memref<1x256xf32, #tpu.memory_space<vmem>>, vector<1x256xf32>
    %258 = vector.broadcast %257 : vector<1x256xf32> to vector<192x256xf32>
    %259 = arith.addf %256, %258 : vector<192x256xf32>
    %c0_93 = arith.constant 0 : index
    %c0_94 = arith.constant 0 : index
    %260 = vector.load %arg11[%c0_93, %c0_94] : memref<192x256xf32, #tpu.memory_space<vmem>>, vector<192x256xf32>
    tpu.vector_store %arg11[%c0_93, %c0_94], %259 {strides = array<i32>} : memref<192x256xf32, #tpu.memory_space<vmem>>, vector<192x256xf32>,
    %cst_95 = arith.constant 0.000000e+00 : f32
    %261 = vector.broadcast %cst_95 : f32 to vector<8x256xf32>
    %cst_96 = arith.constant 0.000000e+00 : f32
    %262 = vector.broadcast %cst_96 : f32 to vector<8x256xf32>
    %c0_97 = arith.constant 0 : index
    %c0_98 = arith.constant 0 : index
    %263 = vector.load %arg11[%c0_97, %c0_98] : memref<192x256xf32, #tpu.memory_space<vmem>>, vector<8x256xf32>
    %cst_99 = arith.constant 0.899999976 : f32
    %264 = vector.broadcast %cst_99 : f32 to vector<8x256xf32>
    %265 = arith.mulf %264, %261 : vector<8x256xf32>
    %cst_100 = arith.constant 1.000000e-01 : f32
    %266 = vector.broadcast %cst_100 : f32 to vector<8x256xf32>
    %267 = arith.mulf %266, %262 : vector<8x256xf32>
    %268 = arith.addf %265, %267 : vector<8x256xf32>
    %cst_101 = arith.constant 2.300000e-01 : f32
    %269 = vector.broadcast %cst_101 : f32 to vector<8x256xf32>
    %270 = arith.cmpf ogt, %268, %269 : vector<8x256xf32>
    %cst_102 = arith.constant 0.000000e+00 : f32
    %271 = vector.broadcast %cst_102 : f32 to vector<8x256xf32>
    %272 = arith.select %270, %271, %268 : vector<8x256xi1>, vector<8x256xf32>
    %cst_103 = arith.constant 8.000000e-01 : f32
    %273 = vector.broadcast %cst_103 : f32 to vector<8x256xf32>
    %274 = arith.mulf %273, %262 : vector<8x256xf32>
    %275 = arith.addf %274, %263 : vector<8x256xf32>
    %276 = arith.extui %270 : vector<8x256xi1> to vector<8x256xi32>
    %277 = arith.sitofp %276 : vector<8x256xi32> to vector<8x256xf32>
    %c8 = arith.constant 8 : index
    %c0_104 = arith.constant 0 : index
    %278 = vector.load %arg11[%c8, %c0_104] : memref<192x256xf32, #tpu.memory_space<vmem>>, vector<8x256xf32>
    %cst_105 = arith.constant 0.899999976 : f32
    %279 = vector.broadcast %cst_105 : f32 to vector<8x256xf32>
    %280 = arith.mulf %279, %272 : vector<8x256xf32>
    %cst_106 = arith.constant 1.000000e-01 : f32
    %281 = vector.broadcast %cst_106 : f32 to vector<8x256xf32>
    %282 = arith.mulf %281, %275 : vector<8x256xf32>
    %283 = arith.addf %280, %282 : vector<8x256xf32>
    %cst_107 = arith.constant 2.300000e-01 : f32
    %284 = vector.broadcast %cst_107 : f32 to vector<8x256xf32>
    %285 = arith.cmpf ogt, %283, %284 : vector<8x256xf32>
    %cst_108 = arith.constant 0.000000e+00 : f32
    %286 = vector.broadcast %cst_108 : f32 to vector<8x256xf32>
    %287 = arith.select %285, %286, %283 : vector<8x256xi1>, vector<8x256xf32>
    %cst_109 = arith.constant 8.000000e-01 : f32
    %288 = vector.broadcast %cst_109 : f32 to vector<8x256xf32>
    %289 = arith.mulf %288, %275 : vector<8x256xf32>
    %290 = arith.addf %289, %278 : vector<8x256xf32>
    %291 = arith.extui %285 : vector<8x256xi1> to vector<8x256xi32>
    %292 = arith.sitofp %291 : vector<8x256xi32> to vector<8x256xf32>
    %293 = tpu.concatenate %277, %292 in 0 : vector<8x256xf32>, vector<8x256xf32> -> vector<16x256xf32>
    %294 = arith.truncf %293 : vector<16x256xf32> to vector<16x256xbf16>
    %c0_110 = arith.constant 0 : index
    %c0_111 = arith.constant 0 : index
    %295 = vector.load %arg12[%c0_110, %c0_111] : memref<192x256xbf16, #tpu.memory_space<vmem>>, vector<16x256xbf16>
    tpu.vector_store %arg12[%c0_110, %c0_111], %294 {strides = array<i32>} : memref<192x256xbf16, #tpu.memory_space<vmem>>, vector<16x256xbf16>,
    %c16_112 = arith.constant 16 : index
    %c0_113 = arith.constant 0 : index
    %296 = vector.load %arg11[%c16_112, %c0_113] : memref<192x256xf32, #tpu.memory_space<vmem>>, vector<8x256xf32>
    %cst_114 = arith.constant 0.899999976 : f32
    %297 = vector.broadcast %cst_114 : f32 to vector<8x256xf32>
    %298 = arith.mulf %297, %287 : vector<8x256xf32>
    %cst_115 = arith.constant 1.000000e-01 : f32
    %299 = vector.broadcast %cst_115 : f32 to vector<8x256xf32>
    %300 = arith.mulf %299, %290 : vector<8x256xf32>
    %301 = arith.addf %298, %300 : vector<8x256xf32>
    %cst_116 = arith.constant 2.300000e-01 : f32
    %302 = vector.broadcast %cst_116 : f32 to vector<8x256xf32>
    %303 = arith.cmpf ogt, %301, %302 : vector<8x256xf32>
    %cst_117 = arith.constant 0.000000e+00 : f32
    %304 = vector.broadcast %cst_117 : f32 to vector<8x256xf32>
    %305 = arith.select %303, %304, %301 : vector<8x256xi1>, vector<8x256xf32>
    %cst_118 = arith.constant 8.000000e-01 : f32
    %306 = vector.broadcast %cst_118 : f32 to vector<8x256xf32>
    %307 = arith.mulf %306, %290 : vector<8x256xf32>
    %308 = arith.addf %307, %296 : vector<8x256xf32>
    %309 = arith.extui %303 : vector<8x256xi1> to vector<8x256xi32>
    %310 = arith.sitofp %309 : vector<8x256xi32> to vector<8x256xf32>
    %c24 = arith.constant 24 : index
    %c0_119 = arith.constant 0 : index
    %311 = vector.load %arg11[%c24, %c0_119] : memref<192x256xf32, #tpu.memory_space<vmem>>, vector<8x256xf32>
    %cst_120 = arith.constant 0.899999976 : f32
    %312 = vector.broadcast %cst_120 : f32 to vector<8x256xf32>
    %313 = arith.mulf %312, %305 : vector<8x256xf32>
    %cst_121 = arith.constant 1.000000e-01 : f32
    %314 = vector.broadcast %cst_121 : f32 to vector<8x256xf32>
    %315 = arith.mulf %314, %308 : vector<8x256xf32>
    %316 = arith.addf %313, %315 : vector<8x256xf32>
    %cst_122 = arith.constant 2.300000e-01 : f32
    %317 = vector.broadcast %cst_122 : f32 to vector<8x256xf32>
    %318 = arith.cmpf ogt, %316, %317 : vector<8x256xf32>
    %cst_123 = arith.constant 0.000000e+00 : f32
    %319 = vector.broadcast %cst_123 : f32 to vector<8x256xf32>
    %320 = arith.select %318, %319, %316 : vector<8x256xi1>, vector<8x256xf32>
    %cst_124 = arith.constant 8.000000e-01 : f32
    %321 = vector.broadcast %cst_124 : f32 to vector<8x256xf32>
    %322 = arith.mulf %321, %308 : vector<8x256xf32>
    %323 = arith.addf %322, %311 : vector<8x256xf32>
    %324 = arith.extui %318 : vector<8x256xi1> to vector<8x256xi32>
    %325 = arith.sitofp %324 : vector<8x256xi32> to vector<8x256xf32>
    %326 = tpu.concatenate %310, %325 in 0 : vector<8x256xf32>, vector<8x256xf32> -> vector<16x256xf32>
    %327 = arith.truncf %326 : vector<16x256xf32> to vector<16x256xbf16>
    %c16_125 = arith.constant 16 : index
    %c0_126 = arith.constant 0 : index
    %328 = vector.load %arg12[%c16_125, %c0_126] : memref<192x256xbf16, #tpu.memory_space<vmem>>, vector<16x256xbf16>
    tpu.vector_store %arg12[%c16_125, %c0_126], %327 {strides = array<i32>} : memref<192x256xbf16, #tpu.memory_space<vmem>>, vector<16x256xbf16>,
    %c32_127 = arith.constant 32 : index
    %c0_128 = arith.constant 0 : index
    %329 = vector.load %arg11[%c32_127, %c0_128] : memref<192x256xf32, #tpu.memory_space<vmem>>, vector<8x256xf32>
    %cst_129 = arith.constant 0.899999976 : f32
    %330 = vector.broadcast %cst_129 : f32 to vector<8x256xf32>
    %331 = arith.mulf %330, %320 : vector<8x256xf32>
    %cst_130 = arith.constant 1.000000e-01 : f32
    %332 = vector.broadcast %cst_130 : f32 to vector<8x256xf32>
    %333 = arith.mulf %332, %323 : vector<8x256xf32>
    %334 = arith.addf %331, %333 : vector<8x256xf32>
    %cst_131 = arith.constant 2.300000e-01 : f32
    %335 = vector.broadcast %cst_131 : f32 to vector<8x256xf32>
    %336 = arith.cmpf ogt, %334, %335 : vector<8x256xf32>
    %cst_132 = arith.constant 0.000000e+00 : f32
    %337 = vector.broadcast %cst_132 : f32 to vector<8x256xf32>
    %338 = arith.select %336, %337, %334 : vector<8x256xi1>, vector<8x256xf32>
    %cst_133 = arith.constant 8.000000e-01 : f32
    %339 = vector.broadcast %cst_133 : f32 to vector<8x256xf32>
    %340 = arith.mulf %339, %323 : vector<8x256xf32>
    %341 = arith.addf %340, %329 : vector<8x256xf32>
    %342 = arith.extui %336 : vector<8x256xi1> to vector<8x256xi32>
    %343 = arith.sitofp %342 : vector<8x256xi32> to vector<8x256xf32>
    %c40 = arith.constant 40 : index
    %c0_134 = arith.constant 0 : index
    %344 = vector.load %arg11[%c40, %c0_134] : memref<192x256xf32, #tpu.memory_space<vmem>>, vector<8x256xf32>
    %cst_135 = arith.constant 0.899999976 : f32
    %345 = vector.broadcast %cst_135 : f32 to vector<8x256xf32>
    %346 = arith.mulf %345, %338 : vector<8x256xf32>
    %cst_136 = arith.constant 1.000000e-01 : f32
    %347 = vector.broadcast %cst_136 : f32 to vector<8x256xf32>
    %348 = arith.mulf %347, %341 : vector<8x256xf32>
    %349 = arith.addf %346, %348 : vector<8x256xf32>
    %cst_137 = arith.constant 2.300000e-01 : f32
    %350 = vector.broadcast %cst_137 : f32 to vector<8x256xf32>
    %351 = arith.cmpf ogt, %349, %350 : vector<8x256xf32>
    %cst_138 = arith.constant 0.000000e+00 : f32
    %352 = vector.broadcast %cst_138 : f32 to vector<8x256xf32>
    %353 = arith.select %351, %352, %349 : vector<8x256xi1>, vector<8x256xf32>
    %cst_139 = arith.constant 8.000000e-01 : f32
    %354 = vector.broadcast %cst_139 : f32 to vector<8x256xf32>
    %355 = arith.mulf %354, %341 : vector<8x256xf32>
    %356 = arith.addf %355, %344 : vector<8x256xf32>
    %357 = arith.extui %351 : vector<8x256xi1> to vector<8x256xi32>
    %358 = arith.sitofp %357 : vector<8x256xi32> to vector<8x256xf32>
    %359 = tpu.concatenate %343, %358 in 0 : vector<8x256xf32>, vector<8x256xf32> -> vector<16x256xf32>
    %360 = arith.truncf %359 : vector<16x256xf32> to vector<16x256xbf16>
    %c32_140 = arith.constant 32 : index
    %c0_141 = arith.constant 0 : index
    %361 = vector.load %arg12[%c32_140, %c0_141] : memref<192x256xbf16, #tpu.memory_space<vmem>>, vector<16x256xbf16>
    tpu.vector_store %arg12[%c32_140, %c0_141], %360 {strides = array<i32>} : memref<192x256xbf16, #tpu.memory_space<vmem>>, vector<16x256xbf16>,
    %c48_142 = arith.constant 48 : index
    %c0_143 = arith.constant 0 : index
    %362 = vector.load %arg11[%c48_142, %c0_143] : memref<192x256xf32, #tpu.memory_space<vmem>>, vector<8x256xf32>
    %cst_144 = arith.constant 0.899999976 : f32
    %363 = vector.broadcast %cst_144 : f32 to vector<8x256xf32>
    %364 = arith.mulf %363, %353 : vector<8x256xf32>
    %cst_145 = arith.constant 1.000000e-01 : f32
    %365 = vector.broadcast %cst_145 : f32 to vector<8x256xf32>
    %366 = arith.mulf %365, %356 : vector<8x256xf32>
    %367 = arith.addf %364, %366 : vector<8x256xf32>
    %cst_146 = arith.constant 2.300000e-01 : f32
    %368 = vector.broadcast %cst_146 : f32 to vector<8x256xf32>
    %369 = arith.cmpf ogt, %367, %368 : vector<8x256xf32>
    %cst_147 = arith.constant 0.000000e+00 : f32
    %370 = vector.broadcast %cst_147 : f32 to vector<8x256xf32>
    %371 = arith.select %369, %370, %367 : vector<8x256xi1>, vector<8x256xf32>
    %cst_148 = arith.constant 8.000000e-01 : f32
    %372 = vector.broadcast %cst_148 : f32 to vector<8x256xf32>
    %373 = arith.mulf %372, %356 : vector<8x256xf32>
    %374 = arith.addf %373, %362 : vector<8x256xf32>
    %375 = arith.extui %369 : vector<8x256xi1> to vector<8x256xi32>
    %376 = arith.sitofp %375 : vector<8x256xi32> to vector<8x256xf32>
    %c56 = arith.constant 56 : index
    %c0_149 = arith.constant 0 : index
    %377 = vector.load %arg11[%c56, %c0_149] : memref<192x256xf32, #tpu.memory_space<vmem>>, vector<8x256xf32>
    %cst_150 = arith.constant 0.899999976 : f32
    %378 = vector.broadcast %cst_150 : f32 to vector<8x256xf32>
    %379 = arith.mulf %378, %371 : vector<8x256xf32>
    %cst_151 = arith.constant 1.000000e-01 : f32
    %380 = vector.broadcast %cst_151 : f32 to vector<8x256xf32>
    %381 = arith.mulf %380, %374 : vector<8x256xf32>
    %382 = arith.addf %379, %381 : vector<8x256xf32>
    %cst_152 = arith.constant 2.300000e-01 : f32
    %383 = vector.broadcast %cst_152 : f32 to vector<8x256xf32>
    %384 = arith.cmpf ogt, %382, %383 : vector<8x256xf32>
    %cst_153 = arith.constant 0.000000e+00 : f32
    %385 = vector.broadcast %cst_153 : f32 to vector<8x256xf32>
    %386 = arith.select %384, %385, %382 : vector<8x256xi1>, vector<8x256xf32>
    %cst_154 = arith.constant 8.000000e-01 : f32
    %387 = vector.broadcast %cst_154 : f32 to vector<8x256xf32>
    %388 = arith.mulf %387, %374 : vector<8x256xf32>
    %389 = arith.addf %388, %377 : vector<8x256xf32>
    %390 = arith.extui %384 : vector<8x256xi1> to vector<8x256xi32>
    %391 = arith.sitofp %390 : vector<8x256xi32> to vector<8x256xf32>
    %392 = tpu.concatenate %376, %391 in 0 : vector<8x256xf32>, vector<8x256xf32> -> vector<16x256xf32>
    %393 = arith.truncf %392 : vector<16x256xf32> to vector<16x256xbf16>
    %c48_155 = arith.constant 48 : index
    %c0_156 = arith.constant 0 : index
    %394 = vector.load %arg12[%c48_155, %c0_156] : memref<192x256xbf16, #tpu.memory_space<vmem>>, vector<16x256xbf16>
    tpu.vector_store %arg12[%c48_155, %c0_156], %393 {strides = array<i32>} : memref<192x256xbf16, #tpu.memory_space<vmem>>, vector<16x256xbf16>,
    %c64_157 = arith.constant 64 : index
    %c0_158 = arith.constant 0 : index
    %395 = vector.load %arg11[%c64_157, %c0_158] : memref<192x256xf32, #tpu.memory_space<vmem>>, vector<8x256xf32>
    %cst_159 = arith.constant 0.899999976 : f32
    %396 = vector.broadcast %cst_159 : f32 to vector<8x256xf32>
    %397 = arith.mulf %396, %386 : vector<8x256xf32>
    %cst_160 = arith.constant 1.000000e-01 : f32
    %398 = vector.broadcast %cst_160 : f32 to vector<8x256xf32>
    %399 = arith.mulf %398, %389 : vector<8x256xf32>
    %400 = arith.addf %397, %399 : vector<8x256xf32>
    %cst_161 = arith.constant 2.300000e-01 : f32
    %401 = vector.broadcast %cst_161 : f32 to vector<8x256xf32>
    %402 = arith.cmpf ogt, %400, %401 : vector<8x256xf32>
    %cst_162 = arith.constant 0.000000e+00 : f32
    %403 = vector.broadcast %cst_162 : f32 to vector<8x256xf32>
    %404 = arith.select %402, %403, %400 : vector<8x256xi1>, vector<8x256xf32>
    %cst_163 = arith.constant 8.000000e-01 : f32
    %405 = vector.broadcast %cst_163 : f32 to vector<8x256xf32>
    %406 = arith.mulf %405, %389 : vector<8x256xf32>
    %407 = arith.addf %406, %395 : vector<8x256xf32>
    %408 = arith.extui %402 : vector<8x256xi1> to vector<8x256xi32>
    %409 = arith.sitofp %408 : vector<8x256xi32> to vector<8x256xf32>
    %c72 = arith.constant 72 : index
    %c0_164 = arith.constant 0 : index
    %410 = vector.load %arg11[%c72, %c0_164] : memref<192x256xf32, #tpu.memory_space<vmem>>, vector<8x256xf32>
    %cst_165 = arith.constant 0.899999976 : f32
    %411 = vector.broadcast %cst_165 : f32 to vector<8x256xf32>
    %412 = arith.mulf %411, %404 : vector<8x256xf32>
    %cst_166 = arith.constant 1.000000e-01 : f32
    %413 = vector.broadcast %cst_166 : f32 to vector<8x256xf32>
    %414 = arith.mulf %413, %407 : vector<8x256xf32>
    %415 = arith.addf %412, %414 : vector<8x256xf32>
    %cst_167 = arith.constant 2.300000e-01 : f32
    %416 = vector.broadcast %cst_167 : f32 to vector<8x256xf32>
    %417 = arith.cmpf ogt, %415, %416 : vector<8x256xf32>
    %cst_168 = arith.constant 0.000000e+00 : f32
    %418 = vector.broadcast %cst_168 : f32 to vector<8x256xf32>
    %419 = arith.select %417, %418, %415 : vector<8x256xi1>, vector<8x256xf32>
    %cst_169 = arith.constant 8.000000e-01 : f32
    %420 = vector.broadcast %cst_169 : f32 to vector<8x256xf32>
    %421 = arith.mulf %420, %407 : vector<8x256xf32>
    %422 = arith.addf %421, %410 : vector<8x256xf32>
    %423 = arith.extui %417 : vector<8x256xi1> to vector<8x256xi32>
    %424 = arith.sitofp %423 : vector<8x256xi32> to vector<8x256xf32>
    %425 = tpu.concatenate %409, %424 in 0 : vector<8x256xf32>, vector<8x256xf32> -> vector<16x256xf32>
    %426 = arith.truncf %425 : vector<16x256xf32> to vector<16x256xbf16>
    %c64_170 = arith.constant 64 : index
    %c0_171 = arith.constant 0 : index
    %427 = vector.load %arg12[%c64_170, %c0_171] : memref<192x256xbf16, #tpu.memory_space<vmem>>, vector<16x256xbf16>
    tpu.vector_store %arg12[%c64_170, %c0_171], %426 {strides = array<i32>} : memref<192x256xbf16, #tpu.memory_space<vmem>>, vector<16x256xbf16>,
    %c80_172 = arith.constant 80 : index
    %c0_173 = arith.constant 0 : index
    %428 = vector.load %arg11[%c80_172, %c0_173] : memref<192x256xf32, #tpu.memory_space<vmem>>, vector<8x256xf32>
    %cst_174 = arith.constant 0.899999976 : f32
    %429 = vector.broadcast %cst_174 : f32 to vector<8x256xf32>
    %430 = arith.mulf %429, %419 : vector<8x256xf32>
    %cst_175 = arith.constant 1.000000e-01 : f32
    %431 = vector.broadcast %cst_175 : f32 to vector<8x256xf32>
    %432 = arith.mulf %431, %422 : vector<8x256xf32>
    %433 = arith.addf %430, %432 : vector<8x256xf32>
    %cst_176 = arith.constant 2.300000e-01 : f32
    %434 = vector.broadcast %cst_176 : f32 to vector<8x256xf32>
    %435 = arith.cmpf ogt, %433, %434 : vector<8x256xf32>
    %cst_177 = arith.constant 0.000000e+00 : f32
    %436 = vector.broadcast %cst_177 : f32 to vector<8x256xf32>
    %437 = arith.select %435, %436, %433 : vector<8x256xi1>, vector<8x256xf32>
    %cst_178 = arith.constant 8.000000e-01 : f32
    %438 = vector.broadcast %cst_178 : f32 to vector<8x256xf32>
    %439 = arith.mulf %438, %422 : vector<8x256xf32>
    %440 = arith.addf %439, %428 : vector<8x256xf32>
    %441 = arith.extui %435 : vector<8x256xi1> to vector<8x256xi32>
    %442 = arith.sitofp %441 : vector<8x256xi32> to vector<8x256xf32>
    %c88 = arith.constant 88 : index
    %c0_179 = arith.constant 0 : index
    %443 = vector.load %arg11[%c88, %c0_179] : memref<192x256xf32, #tpu.memory_space<vmem>>, vector<8x256xf32>
    %cst_180 = arith.constant 0.899999976 : f32
    %444 = vector.broadcast %cst_180 : f32 to vector<8x256xf32>
    %445 = arith.mulf %444, %437 : vector<8x256xf32>
    %cst_181 = arith.constant 1.000000e-01 : f32
    %446 = vector.broadcast %cst_181 : f32 to vector<8x256xf32>
    %447 = arith.mulf %446, %440 : vector<8x256xf32>
    %448 = arith.addf %445, %447 : vector<8x256xf32>
    %cst_182 = arith.constant 2.300000e-01 : f32
    %449 = vector.broadcast %cst_182 : f32 to vector<8x256xf32>
    %450 = arith.cmpf ogt, %448, %449 : vector<8x256xf32>
    %cst_183 = arith.constant 0.000000e+00 : f32
    %451 = vector.broadcast %cst_183 : f32 to vector<8x256xf32>
    %452 = arith.select %450, %451, %448 : vector<8x256xi1>, vector<8x256xf32>
    %cst_184 = arith.constant 8.000000e-01 : f32
    %453 = vector.broadcast %cst_184 : f32 to vector<8x256xf32>
    %454 = arith.mulf %453, %440 : vector<8x256xf32>
    %455 = arith.addf %454, %443 : vector<8x256xf32>
    %456 = arith.extui %450 : vector<8x256xi1> to vector<8x256xi32>
    %457 = arith.sitofp %456 : vector<8x256xi32> to vector<8x256xf32>
    %458 = tpu.concatenate %442, %457 in 0 : vector<8x256xf32>, vector<8x256xf32> -> vector<16x256xf32>
    %459 = arith.truncf %458 : vector<16x256xf32> to vector<16x256xbf16>
    %c80_185 = arith.constant 80 : index
    %c0_186 = arith.constant 0 : index
    %460 = vector.load %arg12[%c80_185, %c0_186] : memref<192x256xbf16, #tpu.memory_space<vmem>>, vector<16x256xbf16>
    tpu.vector_store %arg12[%c80_185, %c0_186], %459 {strides = array<i32>} : memref<192x256xbf16, #tpu.memory_space<vmem>>, vector<16x256xbf16>,
    %c96_187 = arith.constant 96 : index
    %c0_188 = arith.constant 0 : index
    %461 = vector.load %arg11[%c96_187, %c0_188] : memref<192x256xf32, #tpu.memory_space<vmem>>, vector<8x256xf32>
    %cst_189 = arith.constant 0.899999976 : f32
    %462 = vector.broadcast %cst_189 : f32 to vector<8x256xf32>
    %463 = arith.mulf %462, %452 : vector<8x256xf32>
    %cst_190 = arith.constant 1.000000e-01 : f32
    %464 = vector.broadcast %cst_190 : f32 to vector<8x256xf32>
    %465 = arith.mulf %464, %455 : vector<8x256xf32>
    %466 = arith.addf %463, %465 : vector<8x256xf32>
    %cst_191 = arith.constant 2.300000e-01 : f32
    %467 = vector.broadcast %cst_191 : f32 to vector<8x256xf32>
    %468 = arith.cmpf ogt, %466, %467 : vector<8x256xf32>
    %cst_192 = arith.constant 0.000000e+00 : f32
    %469 = vector.broadcast %cst_192 : f32 to vector<8x256xf32>
    %470 = arith.select %468, %469, %466 : vector<8x256xi1>, vector<8x256xf32>
    %cst_193 = arith.constant 8.000000e-01 : f32
    %471 = vector.broadcast %cst_193 : f32 to vector<8x256xf32>
    %472 = arith.mulf %471, %455 : vector<8x256xf32>
    %473 = arith.addf %472, %461 : vector<8x256xf32>
    %474 = arith.extui %468 : vector<8x256xi1> to vector<8x256xi32>
    %475 = arith.sitofp %474 : vector<8x256xi32> to vector<8x256xf32>
    %c104 = arith.constant 104 : index
    %c0_194 = arith.constant 0 : index
    %476 = vector.load %arg11[%c104, %c0_194] : memref<192x256xf32, #tpu.memory_space<vmem>>, vector<8x256xf32>
    %cst_195 = arith.constant 0.899999976 : f32
    %477 = vector.broadcast %cst_195 : f32 to vector<8x256xf32>
    %478 = arith.mulf %477, %470 : vector<8x256xf32>
    %cst_196 = arith.constant 1.000000e-01 : f32
    %479 = vector.broadcast %cst_196 : f32 to vector<8x256xf32>
    %480 = arith.mulf %479, %473 : vector<8x256xf32>
    %481 = arith.addf %478, %480 : vector<8x256xf32>
    %cst_197 = arith.constant 2.300000e-01 : f32
    %482 = vector.broadcast %cst_197 : f32 to vector<8x256xf32>
    %483 = arith.cmpf ogt, %481, %482 : vector<8x256xf32>
    %cst_198 = arith.constant 0.000000e+00 : f32
    %484 = vector.broadcast %cst_198 : f32 to vector<8x256xf32>
    %485 = arith.select %483, %484, %481 : vector<8x256xi1>, vector<8x256xf32>
    %cst_199 = arith.constant 8.000000e-01 : f32
    %486 = vector.broadcast %cst_199 : f32 to vector<8x256xf32>
    %487 = arith.mulf %486, %473 : vector<8x256xf32>
    %488 = arith.addf %487, %476 : vector<8x256xf32>
    %489 = arith.extui %483 : vector<8x256xi1> to vector<8x256xi32>
    %490 = arith.sitofp %489 : vector<8x256xi32> to vector<8x256xf32>
    %491 = tpu.concatenate %475, %490 in 0 : vector<8x256xf32>, vector<8x256xf32> -> vector<16x256xf32>
    %492 = arith.truncf %491 : vector<16x256xf32> to vector<16x256xbf16>
    %c96_200 = arith.constant 96 : index
    %c0_201 = arith.constant 0 : index
    %493 = vector.load %arg12[%c96_200, %c0_201] : memref<192x256xbf16, #tpu.memory_space<vmem>>, vector<16x256xbf16>
    tpu.vector_store %arg12[%c96_200, %c0_201], %492 {strides = array<i32>} : memref<192x256xbf16, #tpu.memory_space<vmem>>, vector<16x256xbf16>,
    %c112_202 = arith.constant 112 : index
    %c0_203 = arith.constant 0 : index
    %494 = vector.load %arg11[%c112_202, %c0_203] : memref<192x256xf32, #tpu.memory_space<vmem>>, vector<8x256xf32>
    %cst_204 = arith.constant 0.899999976 : f32
    %495 = vector.broadcast %cst_204 : f32 to vector<8x256xf32>
    %496 = arith.mulf %495, %485 : vector<8x256xf32>
    %cst_205 = arith.constant 1.000000e-01 : f32
    %497 = vector.broadcast %cst_205 : f32 to vector<8x256xf32>
    %498 = arith.mulf %497, %488 : vector<8x256xf32>
    %499 = arith.addf %496, %498 : vector<8x256xf32>
    %cst_206 = arith.constant 2.300000e-01 : f32
    %500 = vector.broadcast %cst_206 : f32 to vector<8x256xf32>
    %501 = arith.cmpf ogt, %499, %500 : vector<8x256xf32>
    %cst_207 = arith.constant 0.000000e+00 : f32
    %502 = vector.broadcast %cst_207 : f32 to vector<8x256xf32>
    %503 = arith.select %501, %502, %499 : vector<8x256xi1>, vector<8x256xf32>
    %cst_208 = arith.constant 8.000000e-01 : f32
    %504 = vector.broadcast %cst_208 : f32 to vector<8x256xf32>
    %505 = arith.mulf %504, %488 : vector<8x256xf32>
    %506 = arith.addf %505, %494 : vector<8x256xf32>
    %507 = arith.extui %501 : vector<8x256xi1> to vector<8x256xi32>
    %508 = arith.sitofp %507 : vector<8x256xi32> to vector<8x256xf32>
    %c120 = arith.constant 120 : index
    %c0_209 = arith.constant 0 : index
    %509 = vector.load %arg11[%c120, %c0_209] : memref<192x256xf32, #tpu.memory_space<vmem>>, vector<8x256xf32>
    %cst_210 = arith.constant 0.899999976 : f32
    %510 = vector.broadcast %cst_210 : f32 to vector<8x256xf32>
    %511 = arith.mulf %510, %503 : vector<8x256xf32>
    %cst_211 = arith.constant 1.000000e-01 : f32
    %512 = vector.broadcast %cst_211 : f32 to vector<8x256xf32>
    %513 = arith.mulf %512, %506 : vector<8x256xf32>
    %514 = arith.addf %511, %513 : vector<8x256xf32>
    %cst_212 = arith.constant 2.300000e-01 : f32
    %515 = vector.broadcast %cst_212 : f32 to vector<8x256xf32>
    %516 = arith.cmpf ogt, %514, %515 : vector<8x256xf32>
    %cst_213 = arith.constant 0.000000e+00 : f32
    %517 = vector.broadcast %cst_213 : f32 to vector<8x256xf32>
    %518 = arith.select %516, %517, %514 : vector<8x256xi1>, vector<8x256xf32>
    %cst_214 = arith.constant 8.000000e-01 : f32
    %519 = vector.broadcast %cst_214 : f32 to vector<8x256xf32>
    %520 = arith.mulf %519, %506 : vector<8x256xf32>
    %521 = arith.addf %520, %509 : vector<8x256xf32>
    %522 = arith.extui %516 : vector<8x256xi1> to vector<8x256xi32>
    %523 = arith.sitofp %522 : vector<8x256xi32> to vector<8x256xf32>
    %524 = tpu.concatenate %508, %523 in 0 : vector<8x256xf32>, vector<8x256xf32> -> vector<16x256xf32>
    %525 = arith.truncf %524 : vector<16x256xf32> to vector<16x256xbf16>
    %c112_215 = arith.constant 112 : index
    %c0_216 = arith.constant 0 : index
    %526 = vector.load %arg12[%c112_215, %c0_216] : memref<192x256xbf16, #tpu.memory_space<vmem>>, vector<16x256xbf16>
    tpu.vector_store %arg12[%c112_215, %c0_216], %525 {strides = array<i32>} : memref<192x256xbf16, #tpu.memory_space<vmem>>, vector<16x256xbf16>,
    %c128_217 = arith.constant 128 : index
    %c0_218 = arith.constant 0 : index
    %527 = vector.load %arg11[%c128_217, %c0_218] : memref<192x256xf32, #tpu.memory_space<vmem>>, vector<8x256xf32>
    %cst_219 = arith.constant 0.899999976 : f32
    %528 = vector.broadcast %cst_219 : f32 to vector<8x256xf32>
    %529 = arith.mulf %528, %518 : vector<8x256xf32>
    %cst_220 = arith.constant 1.000000e-01 : f32
    %530 = vector.broadcast %cst_220 : f32 to vector<8x256xf32>
    %531 = arith.mulf %530, %521 : vector<8x256xf32>
    %532 = arith.addf %529, %531 : vector<8x256xf32>
    %cst_221 = arith.constant 2.300000e-01 : f32
    %533 = vector.broadcast %cst_221 : f32 to vector<8x256xf32>
    %534 = arith.cmpf ogt, %532, %533 : vector<8x256xf32>
    %cst_222 = arith.constant 0.000000e+00 : f32
    %535 = vector.broadcast %cst_222 : f32 to vector<8x256xf32>
    %536 = arith.select %534, %535, %532 : vector<8x256xi1>, vector<8x256xf32>
    %cst_223 = arith.constant 8.000000e-01 : f32
    %537 = vector.broadcast %cst_223 : f32 to vector<8x256xf32>
    %538 = arith.mulf %537, %521 : vector<8x256xf32>
    %539 = arith.addf %538, %527 : vector<8x256xf32>
    %540 = arith.extui %534 : vector<8x256xi1> to vector<8x256xi32>
    %541 = arith.sitofp %540 : vector<8x256xi32> to vector<8x256xf32>
    %c136 = arith.constant 136 : index
    %c0_224 = arith.constant 0 : index
    %542 = vector.load %arg11[%c136, %c0_224] : memref<192x256xf32, #tpu.memory_space<vmem>>, vector<8x256xf32>
    %cst_225 = arith.constant 0.899999976 : f32
    %543 = vector.broadcast %cst_225 : f32 to vector<8x256xf32>
    %544 = arith.mulf %543, %536 : vector<8x256xf32>
    %cst_226 = arith.constant 1.000000e-01 : f32
    %545 = vector.broadcast %cst_226 : f32 to vector<8x256xf32>
    %546 = arith.mulf %545, %539 : vector<8x256xf32>
    %547 = arith.addf %544, %546 : vector<8x256xf32>
    %cst_227 = arith.constant 2.300000e-01 : f32
    %548 = vector.broadcast %cst_227 : f32 to vector<8x256xf32>
    %549 = arith.cmpf ogt, %547, %548 : vector<8x256xf32>
    %cst_228 = arith.constant 0.000000e+00 : f32
    %550 = vector.broadcast %cst_228 : f32 to vector<8x256xf32>
    %551 = arith.select %549, %550, %547 : vector<8x256xi1>, vector<8x256xf32>
    %cst_229 = arith.constant 8.000000e-01 : f32
    %552 = vector.broadcast %cst_229 : f32 to vector<8x256xf32>
    %553 = arith.mulf %552, %539 : vector<8x256xf32>
    %554 = arith.addf %553, %542 : vector<8x256xf32>
    %555 = arith.extui %549 : vector<8x256xi1> to vector<8x256xi32>
    %556 = arith.sitofp %555 : vector<8x256xi32> to vector<8x256xf32>
    %557 = tpu.concatenate %541, %556 in 0 : vector<8x256xf32>, vector<8x256xf32> -> vector<16x256xf32>
    %558 = arith.truncf %557 : vector<16x256xf32> to vector<16x256xbf16>
    %c128_230 = arith.constant 128 : index
    %c0_231 = arith.constant 0 : index
    %559 = vector.load %arg12[%c128_230, %c0_231] : memref<192x256xbf16, #tpu.memory_space<vmem>>, vector<16x256xbf16>
    tpu.vector_store %arg12[%c128_230, %c0_231], %558 {strides = array<i32>} : memref<192x256xbf16, #tpu.memory_space<vmem>>, vector<16x256xbf16>,
    %c144_232 = arith.constant 144 : index
    %c0_233 = arith.constant 0 : index
    %560 = vector.load %arg11[%c144_232, %c0_233] : memref<192x256xf32, #tpu.memory_space<vmem>>, vector<8x256xf32>
    %cst_234 = arith.constant 0.899999976 : f32
    %561 = vector.broadcast %cst_234 : f32 to vector<8x256xf32>
    %562 = arith.mulf %561, %551 : vector<8x256xf32>
    %cst_235 = arith.constant 1.000000e-01 : f32
    %563 = vector.broadcast %cst_235 : f32 to vector<8x256xf32>
    %564 = arith.mulf %563, %554 : vector<8x256xf32>
    %565 = arith.addf %562, %564 : vector<8x256xf32>
    %cst_236 = arith.constant 2.300000e-01 : f32
    %566 = vector.broadcast %cst_236 : f32 to vector<8x256xf32>
    %567 = arith.cmpf ogt, %565, %566 : vector<8x256xf32>
    %cst_237 = arith.constant 0.000000e+00 : f32
    %568 = vector.broadcast %cst_237 : f32 to vector<8x256xf32>
    %569 = arith.select %567, %568, %565 : vector<8x256xi1>, vector<8x256xf32>
    %cst_238 = arith.constant 8.000000e-01 : f32
    %570 = vector.broadcast %cst_238 : f32 to vector<8x256xf32>
    %571 = arith.mulf %570, %554 : vector<8x256xf32>
    %572 = arith.addf %571, %560 : vector<8x256xf32>
    %573 = arith.extui %567 : vector<8x256xi1> to vector<8x256xi32>
    %574 = arith.sitofp %573 : vector<8x256xi32> to vector<8x256xf32>
    %c152 = arith.constant 152 : index
    %c0_239 = arith.constant 0 : index
    %575 = vector.load %arg11[%c152, %c0_239] : memref<192x256xf32, #tpu.memory_space<vmem>>, vector<8x256xf32>
    %cst_240 = arith.constant 0.899999976 : f32
    %576 = vector.broadcast %cst_240 : f32 to vector<8x256xf32>
    %577 = arith.mulf %576, %569 : vector<8x256xf32>
    %cst_241 = arith.constant 1.000000e-01 : f32
    %578 = vector.broadcast %cst_241 : f32 to vector<8x256xf32>
    %579 = arith.mulf %578, %572 : vector<8x256xf32>
    %580 = arith.addf %577, %579 : vector<8x256xf32>
    %cst_242 = arith.constant 2.300000e-01 : f32
    %581 = vector.broadcast %cst_242 : f32 to vector<8x256xf32>
    %582 = arith.cmpf ogt, %580, %581 : vector<8x256xf32>
    %cst_243 = arith.constant 0.000000e+00 : f32
    %583 = vector.broadcast %cst_243 : f32 to vector<8x256xf32>
    %584 = arith.select %582, %583, %580 : vector<8x256xi1>, vector<8x256xf32>
    %cst_244 = arith.constant 8.000000e-01 : f32
    %585 = vector.broadcast %cst_244 : f32 to vector<8x256xf32>
    %586 = arith.mulf %585, %572 : vector<8x256xf32>
    %587 = arith.addf %586, %575 : vector<8x256xf32>
    %588 = arith.extui %582 : vector<8x256xi1> to vector<8x256xi32>
    %589 = arith.sitofp %588 : vector<8x256xi32> to vector<8x256xf32>
    %590 = tpu.concatenate %574, %589 in 0 : vector<8x256xf32>, vector<8x256xf32> -> vector<16x256xf32>
    %591 = arith.truncf %590 : vector<16x256xf32> to vector<16x256xbf16>
    %c144_245 = arith.constant 144 : index
    %c0_246 = arith.constant 0 : index
    %592 = vector.load %arg12[%c144_245, %c0_246] : memref<192x256xbf16, #tpu.memory_space<vmem>>, vector<16x256xbf16>
    tpu.vector_store %arg12[%c144_245, %c0_246], %591 {strides = array<i32>} : memref<192x256xbf16, #tpu.memory_space<vmem>>, vector<16x256xbf16>,
    %c160_247 = arith.constant 160 : index
    %c0_248 = arith.constant 0 : index
    %593 = vector.load %arg11[%c160_247, %c0_248] : memref<192x256xf32, #tpu.memory_space<vmem>>, vector<8x256xf32>
    %cst_249 = arith.constant 0.899999976 : f32
    %594 = vector.broadcast %cst_249 : f32 to vector<8x256xf32>
    %595 = arith.mulf %594, %584 : vector<8x256xf32>
    %cst_250 = arith.constant 1.000000e-01 : f32
    %596 = vector.broadcast %cst_250 : f32 to vector<8x256xf32>
    %597 = arith.mulf %596, %587 : vector<8x256xf32>
    %598 = arith.addf %595, %597 : vector<8x256xf32>
    %cst_251 = arith.constant 2.300000e-01 : f32
    %599 = vector.broadcast %cst_251 : f32 to vector<8x256xf32>
    %600 = arith.cmpf ogt, %598, %599 : vector<8x256xf32>
    %cst_252 = arith.constant 0.000000e+00 : f32
    %601 = vector.broadcast %cst_252 : f32 to vector<8x256xf32>
    %602 = arith.select %600, %601, %598 : vector<8x256xi1>, vector<8x256xf32>
    %cst_253 = arith.constant 8.000000e-01 : f32
    %603 = vector.broadcast %cst_253 : f32 to vector<8x256xf32>
    %604 = arith.mulf %603, %587 : vector<8x256xf32>
    %605 = arith.addf %604, %593 : vector<8x256xf32>
    %606 = arith.extui %600 : vector<8x256xi1> to vector<8x256xi32>
    %607 = arith.sitofp %606 : vector<8x256xi32> to vector<8x256xf32>
    %c168 = arith.constant 168 : index
    %c0_254 = arith.constant 0 : index
    %608 = vector.load %arg11[%c168, %c0_254] : memref<192x256xf32, #tpu.memory_space<vmem>>, vector<8x256xf32>
    %cst_255 = arith.constant 0.899999976 : f32
    %609 = vector.broadcast %cst_255 : f32 to vector<8x256xf32>
    %610 = arith.mulf %609, %602 : vector<8x256xf32>
    %cst_256 = arith.constant 1.000000e-01 : f32
    %611 = vector.broadcast %cst_256 : f32 to vector<8x256xf32>
    %612 = arith.mulf %611, %605 : vector<8x256xf32>
    %613 = arith.addf %610, %612 : vector<8x256xf32>
    %cst_257 = arith.constant 2.300000e-01 : f32
    %614 = vector.broadcast %cst_257 : f32 to vector<8x256xf32>
    %615 = arith.cmpf ogt, %613, %614 : vector<8x256xf32>
    %cst_258 = arith.constant 0.000000e+00 : f32
    %616 = vector.broadcast %cst_258 : f32 to vector<8x256xf32>
    %617 = arith.select %615, %616, %613 : vector<8x256xi1>, vector<8x256xf32>
    %cst_259 = arith.constant 8.000000e-01 : f32
    %618 = vector.broadcast %cst_259 : f32 to vector<8x256xf32>
    %619 = arith.mulf %618, %605 : vector<8x256xf32>
    %620 = arith.addf %619, %608 : vector<8x256xf32>
    %621 = arith.extui %615 : vector<8x256xi1> to vector<8x256xi32>
    %622 = arith.sitofp %621 : vector<8x256xi32> to vector<8x256xf32>
    %623 = tpu.concatenate %607, %622 in 0 : vector<8x256xf32>, vector<8x256xf32> -> vector<16x256xf32>
    %624 = arith.truncf %623 : vector<16x256xf32> to vector<16x256xbf16>
    %c160_260 = arith.constant 160 : index
    %c0_261 = arith.constant 0 : index
    %625 = vector.load %arg12[%c160_260, %c0_261] : memref<192x256xbf16, #tpu.memory_space<vmem>>, vector<16x256xbf16>
    tpu.vector_store %arg12[%c160_260, %c0_261], %624 {strides = array<i32>} : memref<192x256xbf16, #tpu.memory_space<vmem>>, vector<16x256xbf16>,
    %c176_262 = arith.constant 176 : index
    %c0_263 = arith.constant 0 : index
    %626 = vector.load %arg11[%c176_262, %c0_263] : memref<192x256xf32, #tpu.memory_space<vmem>>, vector<8x256xf32>
    %cst_264 = arith.constant 0.899999976 : f32
    %627 = vector.broadcast %cst_264 : f32 to vector<8x256xf32>
    %628 = arith.mulf %627, %617 : vector<8x256xf32>
    %cst_265 = arith.constant 1.000000e-01 : f32
    %629 = vector.broadcast %cst_265 : f32 to vector<8x256xf32>
    %630 = arith.mulf %629, %620 : vector<8x256xf32>
    %631 = arith.addf %628, %630 : vector<8x256xf32>
    %cst_266 = arith.constant 2.300000e-01 : f32
    %632 = vector.broadcast %cst_266 : f32 to vector<8x256xf32>
    %633 = arith.cmpf ogt, %631, %632 : vector<8x256xf32>
    %cst_267 = arith.constant 0.000000e+00 : f32
    %634 = vector.broadcast %cst_267 : f32 to vector<8x256xf32>
    %635 = arith.select %633, %634, %631 : vector<8x256xi1>, vector<8x256xf32>
    %cst_268 = arith.constant 8.000000e-01 : f32
    %636 = vector.broadcast %cst_268 : f32 to vector<8x256xf32>
    %637 = arith.mulf %636, %620 : vector<8x256xf32>
    %638 = arith.addf %637, %626 : vector<8x256xf32>
    %639 = arith.extui %633 : vector<8x256xi1> to vector<8x256xi32>
    %640 = arith.sitofp %639 : vector<8x256xi32> to vector<8x256xf32>
    %cst_269 = arith.constant 0.899999976 : f32
    %641 = vector.broadcast %cst_269 : f32 to vector<8x256xf32>
    %642 = arith.mulf %641, %635 : vector<8x256xf32>
    %cst_270 = arith.constant 1.000000e-01 : f32
    %643 = vector.broadcast %cst_270 : f32 to vector<8x256xf32>
    %644 = arith.mulf %643, %638 : vector<8x256xf32>
    %645 = arith.addf %642, %644 : vector<8x256xf32>
    %cst_271 = arith.constant 2.300000e-01 : f32
    %646 = vector.broadcast %cst_271 : f32 to vector<8x256xf32>
    %647 = arith.cmpf ogt, %645, %646 : vector<8x256xf32>
    %648 = arith.extui %647 : vector<8x256xi1> to vector<8x256xi32>
    %649 = arith.sitofp %648 : vector<8x256xi32> to vector<8x256xf32>
    %650 = tpu.concatenate %640, %649 in 0 : vector<8x256xf32>, vector<8x256xf32> -> vector<16x256xf32>
    %651 = arith.truncf %650 : vector<16x256xf32> to vector<16x256xbf16>
    %c176_272 = arith.constant 176 : index
    %c0_273 = arith.constant 0 : index
    %652 = vector.load %arg12[%c176_272, %c0_273] : memref<192x256xbf16, #tpu.memory_space<vmem>>, vector<16x256xbf16>
    tpu.vector_store %arg12[%c176_272, %c0_273], %651 {strides = array<i32>} : memref<192x256xbf16, #tpu.memory_space<vmem>>, vector<16x256xbf16>,
    %c0_274 = arith.constant 0 : index
    %c0_275 = arith.constant 0 : index
    %653 = vector.load %arg12[%c0_274, %c0_275] : memref<192x256xbf16, #tpu.memory_space<vmem>>, vector<192x256xbf16>
    %c0_276 = arith.constant 0 : index
    %c0_277 = arith.constant 0 : index
    %654 = vector.load %arg4[%c0_276, %c0_277] : memref<256x256xbf16, #tpu.memory_space<vmem>>, vector<256x256xbf16>
    %cst_278 = arith.constant dense<0.000000e+00> : vector<192x256xf32>
    %655 = tpu.matmul %653, %654, %cst_278 {dimension_numbers = #tpu.dot_dimension_numbers<[1], [0], [0], [1], [0, 0, 1, 1], [], []>} : vector<192x256xbf16>, vector<256x256xbf16>, vector<192x256xf32> -> vector<192x256xf32>
    %c0_279 = arith.constant 0 : index
    %c0_280 = arith.constant 0 : index
    %656 = vector.load %arg5[%c0_279, %c0_280] : memref<1x256xf32, #tpu.memory_space<vmem>>, vector<1x256xf32>
    %657 = vector.broadcast %656 : vector<1x256xf32> to vector<192x256xf32>
    %658 = arith.addf %655, %657 : vector<192x256xf32>
    %c0_281 = arith.constant 0 : index
    %c0_282 = arith.constant 0 : index
    %659 = vector.load %arg13[%c0_281, %c0_282] : memref<192x256xf32, #tpu.memory_space<vmem>>, vector<192x256xf32>
    tpu.vector_store %arg13[%c0_281, %c0_282], %658 {strides = array<i32>} : memref<192x256xf32, #tpu.memory_space<vmem>>, vector<192x256xf32>,
    %cst_283 = arith.constant 0.000000e+00 : f32
    %660 = vector.broadcast %cst_283 : f32 to vector<8x256xf32>
    %cst_284 = arith.constant 0.000000e+00 : f32
    %661 = vector.broadcast %cst_284 : f32 to vector<8x256xf32>
    %c0_285 = arith.constant 0 : index
    %c0_286 = arith.constant 0 : index
    %662 = vector.load %arg13[%c0_285, %c0_286] : memref<192x256xf32, #tpu.memory_space<vmem>>, vector<8x256xf32>
    %cst_287 = arith.constant 0.899999976 : f32
    %663 = vector.broadcast %cst_287 : f32 to vector<8x256xf32>
    %664 = arith.mulf %663, %660 : vector<8x256xf32>
    %cst_288 = arith.constant 1.000000e-01 : f32
    %665 = vector.broadcast %cst_288 : f32 to vector<8x256xf32>
    %666 = arith.mulf %665, %661 : vector<8x256xf32>
    %667 = arith.addf %664, %666 : vector<8x256xf32>
    %cst_289 = arith.constant 2.300000e-01 : f32
    %668 = vector.broadcast %cst_289 : f32 to vector<8x256xf32>
    %669 = arith.cmpf ogt, %667, %668 : vector<8x256xf32>
    %cst_290 = arith.constant 0.000000e+00 : f32
    %670 = vector.broadcast %cst_290 : f32 to vector<8x256xf32>
    %671 = arith.select %669, %670, %667 : vector<8x256xi1>, vector<8x256xf32>
    %cst_291 = arith.constant 8.000000e-01 : f32
    %672 = vector.broadcast %cst_291 : f32 to vector<8x256xf32>
    %673 = arith.mulf %672, %661 : vector<8x256xf32>
    %674 = arith.addf %673, %662 : vector<8x256xf32>
    %675 = arith.extui %669 : vector<8x256xi1> to vector<8x256xi32>
    %676 = arith.sitofp %675 : vector<8x256xi32> to vector<8x256xf32>
    %c8_292 = arith.constant 8 : index
    %c0_293 = arith.constant 0 : index
    %677 = vector.load %arg13[%c8_292, %c0_293] : memref<192x256xf32, #tpu.memory_space<vmem>>, vector<8x256xf32>
    %cst_294 = arith.constant 0.899999976 : f32
    %678 = vector.broadcast %cst_294 : f32 to vector<8x256xf32>
    %679 = arith.mulf %678, %671 : vector<8x256xf32>
    %cst_295 = arith.constant 1.000000e-01 : f32
    %680 = vector.broadcast %cst_295 : f32 to vector<8x256xf32>
    %681 = arith.mulf %680, %674 : vector<8x256xf32>
    %682 = arith.addf %679, %681 : vector<8x256xf32>
    %cst_296 = arith.constant 2.300000e-01 : f32
    %683 = vector.broadcast %cst_296 : f32 to vector<8x256xf32>
    %684 = arith.cmpf ogt, %682, %683 : vector<8x256xf32>
    %cst_297 = arith.constant 0.000000e+00 : f32
    %685 = vector.broadcast %cst_297 : f32 to vector<8x256xf32>
    %686 = arith.select %684, %685, %682 : vector<8x256xi1>, vector<8x256xf32>
    %cst_298 = arith.constant 8.000000e-01 : f32
    %687 = vector.broadcast %cst_298 : f32 to vector<8x256xf32>
    %688 = arith.mulf %687, %674 : vector<8x256xf32>
    %689 = arith.addf %688, %677 : vector<8x256xf32>
    %690 = arith.extui %684 : vector<8x256xi1> to vector<8x256xi32>
    %691 = arith.sitofp %690 : vector<8x256xi32> to vector<8x256xf32>
    %692 = tpu.concatenate %676, %691 in 0 : vector<8x256xf32>, vector<8x256xf32> -> vector<16x256xf32>
    %693 = arith.truncf %692 : vector<16x256xf32> to vector<16x256xbf16>
    %c0_299 = arith.constant 0 : index
    %c0_300 = arith.constant 0 : index
    %694 = vector.load %arg14[%c0_299, %c0_300] : memref<192x256xbf16, #tpu.memory_space<vmem>>, vector<16x256xbf16>
    tpu.vector_store %arg14[%c0_299, %c0_300], %693 {strides = array<i32>} : memref<192x256xbf16, #tpu.memory_space<vmem>>, vector<16x256xbf16>,
    %c16_301 = arith.constant 16 : index
    %c0_302 = arith.constant 0 : index
    %695 = vector.load %arg13[%c16_301, %c0_302] : memref<192x256xf32, #tpu.memory_space<vmem>>, vector<8x256xf32>
    %cst_303 = arith.constant 0.899999976 : f32
    %696 = vector.broadcast %cst_303 : f32 to vector<8x256xf32>
    %697 = arith.mulf %696, %686 : vector<8x256xf32>
    %cst_304 = arith.constant 1.000000e-01 : f32
    %698 = vector.broadcast %cst_304 : f32 to vector<8x256xf32>
    %699 = arith.mulf %698, %689 : vector<8x256xf32>
    %700 = arith.addf %697, %699 : vector<8x256xf32>
    %cst_305 = arith.constant 2.300000e-01 : f32
    %701 = vector.broadcast %cst_305 : f32 to vector<8x256xf32>
    %702 = arith.cmpf ogt, %700, %701 : vector<8x256xf32>
    %cst_306 = arith.constant 0.000000e+00 : f32
    %703 = vector.broadcast %cst_306 : f32 to vector<8x256xf32>
    %704 = arith.select %702, %703, %700 : vector<8x256xi1>, vector<8x256xf32>
    %cst_307 = arith.constant 8.000000e-01 : f32
    %705 = vector.broadcast %cst_307 : f32 to vector<8x256xf32>
    %706 = arith.mulf %705, %689 : vector<8x256xf32>
    %707 = arith.addf %706, %695 : vector<8x256xf32>
    %708 = arith.extui %702 : vector<8x256xi1> to vector<8x256xi32>
    %709 = arith.sitofp %708 : vector<8x256xi32> to vector<8x256xf32>
    %c24_308 = arith.constant 24 : index
    %c0_309 = arith.constant 0 : index
    %710 = vector.load %arg13[%c24_308, %c0_309] : memref<192x256xf32, #tpu.memory_space<vmem>>, vector<8x256xf32>
    %cst_310 = arith.constant 0.899999976 : f32
    %711 = vector.broadcast %cst_310 : f32 to vector<8x256xf32>
    %712 = arith.mulf %711, %704 : vector<8x256xf32>
    %cst_311 = arith.constant 1.000000e-01 : f32
    %713 = vector.broadcast %cst_311 : f32 to vector<8x256xf32>
    %714 = arith.mulf %713, %707 : vector<8x256xf32>
    %715 = arith.addf %712, %714 : vector<8x256xf32>
    %cst_312 = arith.constant 2.300000e-01 : f32
    %716 = vector.broadcast %cst_312 : f32 to vector<8x256xf32>
    %717 = arith.cmpf ogt, %715, %716 : vector<8x256xf32>
    %cst_313 = arith.constant 0.000000e+00 : f32
    %718 = vector.broadcast %cst_313 : f32 to vector<8x256xf32>
    %719 = arith.select %717, %718, %715 : vector<8x256xi1>, vector<8x256xf32>
    %cst_314 = arith.constant 8.000000e-01 : f32
    %720 = vector.broadcast %cst_314 : f32 to vector<8x256xf32>
    %721 = arith.mulf %720, %707 : vector<8x256xf32>
    %722 = arith.addf %721, %710 : vector<8x256xf32>
    %723 = arith.extui %717 : vector<8x256xi1> to vector<8x256xi32>
    %724 = arith.sitofp %723 : vector<8x256xi32> to vector<8x256xf32>
    %725 = tpu.concatenate %709, %724 in 0 : vector<8x256xf32>, vector<8x256xf32> -> vector<16x256xf32>
    %726 = arith.truncf %725 : vector<16x256xf32> to vector<16x256xbf16>
    %c16_315 = arith.constant 16 : index
    %c0_316 = arith.constant 0 : index
    %727 = vector.load %arg14[%c16_315, %c0_316] : memref<192x256xbf16, #tpu.memory_space<vmem>>, vector<16x256xbf16>
    tpu.vector_store %arg14[%c16_315, %c0_316], %726 {strides = array<i32>} : memref<192x256xbf16, #tpu.memory_space<vmem>>, vector<16x256xbf16>,
    %c32_317 = arith.constant 32 : index
    %c0_318 = arith.constant 0 : index
    %728 = vector.load %arg13[%c32_317, %c0_318] : memref<192x256xf32, #tpu.memory_space<vmem>>, vector<8x256xf32>
    %cst_319 = arith.constant 0.899999976 : f32
    %729 = vector.broadcast %cst_319 : f32 to vector<8x256xf32>
    %730 = arith.mulf %729, %719 : vector<8x256xf32>
    %cst_320 = arith.constant 1.000000e-01 : f32
    %731 = vector.broadcast %cst_320 : f32 to vector<8x256xf32>
    %732 = arith.mulf %731, %722 : vector<8x256xf32>
    %733 = arith.addf %730, %732 : vector<8x256xf32>
    %cst_321 = arith.constant 2.300000e-01 : f32
    %734 = vector.broadcast %cst_321 : f32 to vector<8x256xf32>
    %735 = arith.cmpf ogt, %733, %734 : vector<8x256xf32>
    %cst_322 = arith.constant 0.000000e+00 : f32
    %736 = vector.broadcast %cst_322 : f32 to vector<8x256xf32>
    %737 = arith.select %735, %736, %733 : vector<8x256xi1>, vector<8x256xf32>
    %cst_323 = arith.constant 8.000000e-01 : f32
    %738 = vector.broadcast %cst_323 : f32 to vector<8x256xf32>
    %739 = arith.mulf %738, %722 : vector<8x256xf32>
    %740 = arith.addf %739, %728 : vector<8x256xf32>
    %741 = arith.extui %735 : vector<8x256xi1> to vector<8x256xi32>
    %742 = arith.sitofp %741 : vector<8x256xi32> to vector<8x256xf32>
    %c40_324 = arith.constant 40 : index
    %c0_325 = arith.constant 0 : index
    %743 = vector.load %arg13[%c40_324, %c0_325] : memref<192x256xf32, #tpu.memory_space<vmem>>, vector<8x256xf32>
    %cst_326 = arith.constant 0.899999976 : f32
    %744 = vector.broadcast %cst_326 : f32 to vector<8x256xf32>
    %745 = arith.mulf %744, %737 : vector<8x256xf32>
    %cst_327 = arith.constant 1.000000e-01 : f32
    %746 = vector.broadcast %cst_327 : f32 to vector<8x256xf32>
    %747 = arith.mulf %746, %740 : vector<8x256xf32>
    %748 = arith.addf %745, %747 : vector<8x256xf32>
    %cst_328 = arith.constant 2.300000e-01 : f32
    %749 = vector.broadcast %cst_328 : f32 to vector<8x256xf32>
    %750 = arith.cmpf ogt, %748, %749 : vector<8x256xf32>
    %cst_329 = arith.constant 0.000000e+00 : f32
    %751 = vector.broadcast %cst_329 : f32 to vector<8x256xf32>
    %752 = arith.select %750, %751, %748 : vector<8x256xi1>, vector<8x256xf32>
    %cst_330 = arith.constant 8.000000e-01 : f32
    %753 = vector.broadcast %cst_330 : f32 to vector<8x256xf32>
    %754 = arith.mulf %753, %740 : vector<8x256xf32>
    %755 = arith.addf %754, %743 : vector<8x256xf32>
    %756 = arith.extui %750 : vector<8x256xi1> to vector<8x256xi32>
    %757 = arith.sitofp %756 : vector<8x256xi32> to vector<8x256xf32>
    %758 = tpu.concatenate %742, %757 in 0 : vector<8x256xf32>, vector<8x256xf32> -> vector<16x256xf32>
    %759 = arith.truncf %758 : vector<16x256xf32> to vector<16x256xbf16>
    %c32_331 = arith.constant 32 : index
    %c0_332 = arith.constant 0 : index
    %760 = vector.load %arg14[%c32_331, %c0_332] : memref<192x256xbf16, #tpu.memory_space<vmem>>, vector<16x256xbf16>
    tpu.vector_store %arg14[%c32_331, %c0_332], %759 {strides = array<i32>} : memref<192x256xbf16, #tpu.memory_space<vmem>>, vector<16x256xbf16>,
    %c48_333 = arith.constant 48 : index
    %c0_334 = arith.constant 0 : index
    %761 = vector.load %arg13[%c48_333, %c0_334] : memref<192x256xf32, #tpu.memory_space<vmem>>, vector<8x256xf32>
    %cst_335 = arith.constant 0.899999976 : f32
    %762 = vector.broadcast %cst_335 : f32 to vector<8x256xf32>
    %763 = arith.mulf %762, %752 : vector<8x256xf32>
    %cst_336 = arith.constant 1.000000e-01 : f32
    %764 = vector.broadcast %cst_336 : f32 to vector<8x256xf32>
    %765 = arith.mulf %764, %755 : vector<8x256xf32>
    %766 = arith.addf %763, %765 : vector<8x256xf32>
    %cst_337 = arith.constant 2.300000e-01 : f32
    %767 = vector.broadcast %cst_337 : f32 to vector<8x256xf32>
    %768 = arith.cmpf ogt, %766, %767 : vector<8x256xf32>
    %cst_338 = arith.constant 0.000000e+00 : f32
    %769 = vector.broadcast %cst_338 : f32 to vector<8x256xf32>
    %770 = arith.select %768, %769, %766 : vector<8x256xi1>, vector<8x256xf32>
    %cst_339 = arith.constant 8.000000e-01 : f32
    %771 = vector.broadcast %cst_339 : f32 to vector<8x256xf32>
    %772 = arith.mulf %771, %755 : vector<8x256xf32>
    %773 = arith.addf %772, %761 : vector<8x256xf32>
    %774 = arith.extui %768 : vector<8x256xi1> to vector<8x256xi32>
    %775 = arith.sitofp %774 : vector<8x256xi32> to vector<8x256xf32>
    %c56_340 = arith.constant 56 : index
    %c0_341 = arith.constant 0 : index
    %776 = vector.load %arg13[%c56_340, %c0_341] : memref<192x256xf32, #tpu.memory_space<vmem>>, vector<8x256xf32>
    %cst_342 = arith.constant 0.899999976 : f32
    %777 = vector.broadcast %cst_342 : f32 to vector<8x256xf32>
    %778 = arith.mulf %777, %770 : vector<8x256xf32>
    %cst_343 = arith.constant 1.000000e-01 : f32
    %779 = vector.broadcast %cst_343 : f32 to vector<8x256xf32>
    %780 = arith.mulf %779, %773 : vector<8x256xf32>
    %781 = arith.addf %778, %780 : vector<8x256xf32>
    %cst_344 = arith.constant 2.300000e-01 : f32
    %782 = vector.broadcast %cst_344 : f32 to vector<8x256xf32>
    %783 = arith.cmpf ogt, %781, %782 : vector<8x256xf32>
    %cst_345 = arith.constant 0.000000e+00 : f32
    %784 = vector.broadcast %cst_345 : f32 to vector<8x256xf32>
    %785 = arith.select %783, %784, %781 : vector<8x256xi1>, vector<8x256xf32>
    %cst_346 = arith.constant 8.000000e-01 : f32
    %786 = vector.broadcast %cst_346 : f32 to vector<8x256xf32>
    %787 = arith.mulf %786, %773 : vector<8x256xf32>
    %788 = arith.addf %787, %776 : vector<8x256xf32>
    %789 = arith.extui %783 : vector<8x256xi1> to vector<8x256xi32>
    %790 = arith.sitofp %789 : vector<8x256xi32> to vector<8x256xf32>
    %791 = tpu.concatenate %775, %790 in 0 : vector<8x256xf32>, vector<8x256xf32> -> vector<16x256xf32>
    %792 = arith.truncf %791 : vector<16x256xf32> to vector<16x256xbf16>
    %c48_347 = arith.constant 48 : index
    %c0_348 = arith.constant 0 : index
    %793 = vector.load %arg14[%c48_347, %c0_348] : memref<192x256xbf16, #tpu.memory_space<vmem>>, vector<16x256xbf16>
    tpu.vector_store %arg14[%c48_347, %c0_348], %792 {strides = array<i32>} : memref<192x256xbf16, #tpu.memory_space<vmem>>, vector<16x256xbf16>,
    %c64_349 = arith.constant 64 : index
    %c0_350 = arith.constant 0 : index
    %794 = vector.load %arg13[%c64_349, %c0_350] : memref<192x256xf32, #tpu.memory_space<vmem>>, vector<8x256xf32>
    %cst_351 = arith.constant 0.899999976 : f32
    %795 = vector.broadcast %cst_351 : f32 to vector<8x256xf32>
    %796 = arith.mulf %795, %785 : vector<8x256xf32>
    %cst_352 = arith.constant 1.000000e-01 : f32
    %797 = vector.broadcast %cst_352 : f32 to vector<8x256xf32>
    %798 = arith.mulf %797, %788 : vector<8x256xf32>
    %799 = arith.addf %796, %798 : vector<8x256xf32>
    %cst_353 = arith.constant 2.300000e-01 : f32
    %800 = vector.broadcast %cst_353 : f32 to vector<8x256xf32>
    %801 = arith.cmpf ogt, %799, %800 : vector<8x256xf32>
    %cst_354 = arith.constant 0.000000e+00 : f32
    %802 = vector.broadcast %cst_354 : f32 to vector<8x256xf32>
    %803 = arith.select %801, %802, %799 : vector<8x256xi1>, vector<8x256xf32>
    %cst_355 = arith.constant 8.000000e-01 : f32
    %804 = vector.broadcast %cst_355 : f32 to vector<8x256xf32>
    %805 = arith.mulf %804, %788 : vector<8x256xf32>
    %806 = arith.addf %805, %794 : vector<8x256xf32>
    %807 = arith.extui %801 : vector<8x256xi1> to vector<8x256xi32>
    %808 = arith.sitofp %807 : vector<8x256xi32> to vector<8x256xf32>
    %c72_356 = arith.constant 72 : index
    %c0_357 = arith.constant 0 : index
    %809 = vector.load %arg13[%c72_356, %c0_357] : memref<192x256xf32, #tpu.memory_space<vmem>>, vector<8x256xf32>
    %cst_358 = arith.constant 0.899999976 : f32
    %810 = vector.broadcast %cst_358 : f32 to vector<8x256xf32>
    %811 = arith.mulf %810, %803 : vector<8x256xf32>
    %cst_359 = arith.constant 1.000000e-01 : f32
    %812 = vector.broadcast %cst_359 : f32 to vector<8x256xf32>
    %813 = arith.mulf %812, %806 : vector<8x256xf32>
    %814 = arith.addf %811, %813 : vector<8x256xf32>
    %cst_360 = arith.constant 2.300000e-01 : f32
    %815 = vector.broadcast %cst_360 : f32 to vector<8x256xf32>
    %816 = arith.cmpf ogt, %814, %815 : vector<8x256xf32>
    %cst_361 = arith.constant 0.000000e+00 : f32
    %817 = vector.broadcast %cst_361 : f32 to vector<8x256xf32>
    %818 = arith.select %816, %817, %814 : vector<8x256xi1>, vector<8x256xf32>
    %cst_362 = arith.constant 8.000000e-01 : f32
    %819 = vector.broadcast %cst_362 : f32 to vector<8x256xf32>
    %820 = arith.mulf %819, %806 : vector<8x256xf32>
    %821 = arith.addf %820, %809 : vector<8x256xf32>
    %822 = arith.extui %816 : vector<8x256xi1> to vector<8x256xi32>
    %823 = arith.sitofp %822 : vector<8x256xi32> to vector<8x256xf32>
    %824 = tpu.concatenate %808, %823 in 0 : vector<8x256xf32>, vector<8x256xf32> -> vector<16x256xf32>
    %825 = arith.truncf %824 : vector<16x256xf32> to vector<16x256xbf16>
    %c64_363 = arith.constant 64 : index
    %c0_364 = arith.constant 0 : index
    %826 = vector.load %arg14[%c64_363, %c0_364] : memref<192x256xbf16, #tpu.memory_space<vmem>>, vector<16x256xbf16>
    tpu.vector_store %arg14[%c64_363, %c0_364], %825 {strides = array<i32>} : memref<192x256xbf16, #tpu.memory_space<vmem>>, vector<16x256xbf16>,
    %c80_365 = arith.constant 80 : index
    %c0_366 = arith.constant 0 : index
    %827 = vector.load %arg13[%c80_365, %c0_366] : memref<192x256xf32, #tpu.memory_space<vmem>>, vector<8x256xf32>
    %cst_367 = arith.constant 0.899999976 : f32
    %828 = vector.broadcast %cst_367 : f32 to vector<8x256xf32>
    %829 = arith.mulf %828, %818 : vector<8x256xf32>
    %cst_368 = arith.constant 1.000000e-01 : f32
    %830 = vector.broadcast %cst_368 : f32 to vector<8x256xf32>
    %831 = arith.mulf %830, %821 : vector<8x256xf32>
    %832 = arith.addf %829, %831 : vector<8x256xf32>
    %cst_369 = arith.constant 2.300000e-01 : f32
    %833 = vector.broadcast %cst_369 : f32 to vector<8x256xf32>
    %834 = arith.cmpf ogt, %832, %833 : vector<8x256xf32>
    %cst_370 = arith.constant 0.000000e+00 : f32
    %835 = vector.broadcast %cst_370 : f32 to vector<8x256xf32>
    %836 = arith.select %834, %835, %832 : vector<8x256xi1>, vector<8x256xf32>
    %cst_371 = arith.constant 8.000000e-01 : f32
    %837 = vector.broadcast %cst_371 : f32 to vector<8x256xf32>
    %838 = arith.mulf %837, %821 : vector<8x256xf32>
    %839 = arith.addf %838, %827 : vector<8x256xf32>
    %840 = arith.extui %834 : vector<8x256xi1> to vector<8x256xi32>
    %841 = arith.sitofp %840 : vector<8x256xi32> to vector<8x256xf32>
    %c88_372 = arith.constant 88 : index
    %c0_373 = arith.constant 0 : index
    %842 = vector.load %arg13[%c88_372, %c0_373] : memref<192x256xf32, #tpu.memory_space<vmem>>, vector<8x256xf32>
    %cst_374 = arith.constant 0.899999976 : f32
    %843 = vector.broadcast %cst_374 : f32 to vector<8x256xf32>
    %844 = arith.mulf %843, %836 : vector<8x256xf32>
    %cst_375 = arith.constant 1.000000e-01 : f32
    %845 = vector.broadcast %cst_375 : f32 to vector<8x256xf32>
    %846 = arith.mulf %845, %839 : vector<8x256xf32>
    %847 = arith.addf %844, %846 : vector<8x256xf32>
    %cst_376 = arith.constant 2.300000e-01 : f32
    %848 = vector.broadcast %cst_376 : f32 to vector<8x256xf32>
    %849 = arith.cmpf ogt, %847, %848 : vector<8x256xf32>
    %cst_377 = arith.constant 0.000000e+00 : f32
    %850 = vector.broadcast %cst_377 : f32 to vector<8x256xf32>
    %851 = arith.select %849, %850, %847 : vector<8x256xi1>, vector<8x256xf32>
    %cst_378 = arith.constant 8.000000e-01 : f32
    %852 = vector.broadcast %cst_378 : f32 to vector<8x256xf32>
    %853 = arith.mulf %852, %839 : vector<8x256xf32>
    %854 = arith.addf %853, %842 : vector<8x256xf32>
    %855 = arith.extui %849 : vector<8x256xi1> to vector<8x256xi32>
    %856 = arith.sitofp %855 : vector<8x256xi32> to vector<8x256xf32>
    %857 = tpu.concatenate %841, %856 in 0 : vector<8x256xf32>, vector<8x256xf32> -> vector<16x256xf32>
    %858 = arith.truncf %857 : vector<16x256xf32> to vector<16x256xbf16>
    %c80_379 = arith.constant 80 : index
    %c0_380 = arith.constant 0 : index
    %859 = vector.load %arg14[%c80_379, %c0_380] : memref<192x256xbf16, #tpu.memory_space<vmem>>, vector<16x256xbf16>
    tpu.vector_store %arg14[%c80_379, %c0_380], %858 {strides = array<i32>} : memref<192x256xbf16, #tpu.memory_space<vmem>>, vector<16x256xbf16>,
    %c96_381 = arith.constant 96 : index
    %c0_382 = arith.constant 0 : index
    %860 = vector.load %arg13[%c96_381, %c0_382] : memref<192x256xf32, #tpu.memory_space<vmem>>, vector<8x256xf32>
    %cst_383 = arith.constant 0.899999976 : f32
    %861 = vector.broadcast %cst_383 : f32 to vector<8x256xf32>
    %862 = arith.mulf %861, %851 : vector<8x256xf32>
    %cst_384 = arith.constant 1.000000e-01 : f32
    %863 = vector.broadcast %cst_384 : f32 to vector<8x256xf32>
    %864 = arith.mulf %863, %854 : vector<8x256xf32>
    %865 = arith.addf %862, %864 : vector<8x256xf32>
    %cst_385 = arith.constant 2.300000e-01 : f32
    %866 = vector.broadcast %cst_385 : f32 to vector<8x256xf32>
    %867 = arith.cmpf ogt, %865, %866 : vector<8x256xf32>
    %cst_386 = arith.constant 0.000000e+00 : f32
    %868 = vector.broadcast %cst_386 : f32 to vector<8x256xf32>
    %869 = arith.select %867, %868, %865 : vector<8x256xi1>, vector<8x256xf32>
    %cst_387 = arith.constant 8.000000e-01 : f32
    %870 = vector.broadcast %cst_387 : f32 to vector<8x256xf32>
    %871 = arith.mulf %870, %854 : vector<8x256xf32>
    %872 = arith.addf %871, %860 : vector<8x256xf32>
    %873 = arith.extui %867 : vector<8x256xi1> to vector<8x256xi32>
    %874 = arith.sitofp %873 : vector<8x256xi32> to vector<8x256xf32>
    %c104_388 = arith.constant 104 : index
    %c0_389 = arith.constant 0 : index
    %875 = vector.load %arg13[%c104_388, %c0_389] : memref<192x256xf32, #tpu.memory_space<vmem>>, vector<8x256xf32>
    %cst_390 = arith.constant 0.899999976 : f32
    %876 = vector.broadcast %cst_390 : f32 to vector<8x256xf32>
    %877 = arith.mulf %876, %869 : vector<8x256xf32>
    %cst_391 = arith.constant 1.000000e-01 : f32
    %878 = vector.broadcast %cst_391 : f32 to vector<8x256xf32>
    %879 = arith.mulf %878, %872 : vector<8x256xf32>
    %880 = arith.addf %877, %879 : vector<8x256xf32>
    %cst_392 = arith.constant 2.300000e-01 : f32
    %881 = vector.broadcast %cst_392 : f32 to vector<8x256xf32>
    %882 = arith.cmpf ogt, %880, %881 : vector<8x256xf32>
    %cst_393 = arith.constant 0.000000e+00 : f32
    %883 = vector.broadcast %cst_393 : f32 to vector<8x256xf32>
    %884 = arith.select %882, %883, %880 : vector<8x256xi1>, vector<8x256xf32>
    %cst_394 = arith.constant 8.000000e-01 : f32
    %885 = vector.broadcast %cst_394 : f32 to vector<8x256xf32>
    %886 = arith.mulf %885, %872 : vector<8x256xf32>
    %887 = arith.addf %886, %875 : vector<8x256xf32>
    %888 = arith.extui %882 : vector<8x256xi1> to vector<8x256xi32>
    %889 = arith.sitofp %888 : vector<8x256xi32> to vector<8x256xf32>
    %890 = tpu.concatenate %874, %889 in 0 : vector<8x256xf32>, vector<8x256xf32> -> vector<16x256xf32>
    %891 = arith.truncf %890 : vector<16x256xf32> to vector<16x256xbf16>
    %c96_395 = arith.constant 96 : index
    %c0_396 = arith.constant 0 : index
    %892 = vector.load %arg14[%c96_395, %c0_396] : memref<192x256xbf16, #tpu.memory_space<vmem>>, vector<16x256xbf16>
    tpu.vector_store %arg14[%c96_395, %c0_396], %891 {strides = array<i32>} : memref<192x256xbf16, #tpu.memory_space<vmem>>, vector<16x256xbf16>,
    %c112_397 = arith.constant 112 : index
    %c0_398 = arith.constant 0 : index
    %893 = vector.load %arg13[%c112_397, %c0_398] : memref<192x256xf32, #tpu.memory_space<vmem>>, vector<8x256xf32>
    %cst_399 = arith.constant 0.899999976 : f32
    %894 = vector.broadcast %cst_399 : f32 to vector<8x256xf32>
    %895 = arith.mulf %894, %884 : vector<8x256xf32>
    %cst_400 = arith.constant 1.000000e-01 : f32
    %896 = vector.broadcast %cst_400 : f32 to vector<8x256xf32>
    %897 = arith.mulf %896, %887 : vector<8x256xf32>
    %898 = arith.addf %895, %897 : vector<8x256xf32>
    %cst_401 = arith.constant 2.300000e-01 : f32
    %899 = vector.broadcast %cst_401 : f32 to vector<8x256xf32>
    %900 = arith.cmpf ogt, %898, %899 : vector<8x256xf32>
    %cst_402 = arith.constant 0.000000e+00 : f32
    %901 = vector.broadcast %cst_402 : f32 to vector<8x256xf32>
    %902 = arith.select %900, %901, %898 : vector<8x256xi1>, vector<8x256xf32>
    %cst_403 = arith.constant 8.000000e-01 : f32
    %903 = vector.broadcast %cst_403 : f32 to vector<8x256xf32>
    %904 = arith.mulf %903, %887 : vector<8x256xf32>
    %905 = arith.addf %904, %893 : vector<8x256xf32>
    %906 = arith.extui %900 : vector<8x256xi1> to vector<8x256xi32>
    %907 = arith.sitofp %906 : vector<8x256xi32> to vector<8x256xf32>
    %c120_404 = arith.constant 120 : index
    %c0_405 = arith.constant 0 : index
    %908 = vector.load %arg13[%c120_404, %c0_405] : memref<192x256xf32, #tpu.memory_space<vmem>>, vector<8x256xf32>
    %cst_406 = arith.constant 0.899999976 : f32
    %909 = vector.broadcast %cst_406 : f32 to vector<8x256xf32>
    %910 = arith.mulf %909, %902 : vector<8x256xf32>
    %cst_407 = arith.constant 1.000000e-01 : f32
    %911 = vector.broadcast %cst_407 : f32 to vector<8x256xf32>
    %912 = arith.mulf %911, %905 : vector<8x256xf32>
    %913 = arith.addf %910, %912 : vector<8x256xf32>
    %cst_408 = arith.constant 2.300000e-01 : f32
    %914 = vector.broadcast %cst_408 : f32 to vector<8x256xf32>
    %915 = arith.cmpf ogt, %913, %914 : vector<8x256xf32>
    %cst_409 = arith.constant 0.000000e+00 : f32
    %916 = vector.broadcast %cst_409 : f32 to vector<8x256xf32>
    %917 = arith.select %915, %916, %913 : vector<8x256xi1>, vector<8x256xf32>
    %cst_410 = arith.constant 8.000000e-01 : f32
    %918 = vector.broadcast %cst_410 : f32 to vector<8x256xf32>
    %919 = arith.mulf %918, %905 : vector<8x256xf32>
    %920 = arith.addf %919, %908 : vector<8x256xf32>
    %921 = arith.extui %915 : vector<8x256xi1> to vector<8x256xi32>
    %922 = arith.sitofp %921 : vector<8x256xi32> to vector<8x256xf32>
    %923 = tpu.concatenate %907, %922 in 0 : vector<8x256xf32>, vector<8x256xf32> -> vector<16x256xf32>
    %924 = arith.truncf %923 : vector<16x256xf32> to vector<16x256xbf16>
    %c112_411 = arith.constant 112 : index
    %c0_412 = arith.constant 0 : index
    %925 = vector.load %arg14[%c112_411, %c0_412] : memref<192x256xbf16, #tpu.memory_space<vmem>>, vector<16x256xbf16>
    tpu.vector_store %arg14[%c112_411, %c0_412], %924 {strides = array<i32>} : memref<192x256xbf16, #tpu.memory_space<vmem>>, vector<16x256xbf16>,
    %c128_413 = arith.constant 128 : index
    %c0_414 = arith.constant 0 : index
    %926 = vector.load %arg13[%c128_413, %c0_414] : memref<192x256xf32, #tpu.memory_space<vmem>>, vector<8x256xf32>
    %cst_415 = arith.constant 0.899999976 : f32
    %927 = vector.broadcast %cst_415 : f32 to vector<8x256xf32>
    %928 = arith.mulf %927, %917 : vector<8x256xf32>
    %cst_416 = arith.constant 1.000000e-01 : f32
    %929 = vector.broadcast %cst_416 : f32 to vector<8x256xf32>
    %930 = arith.mulf %929, %920 : vector<8x256xf32>
    %931 = arith.addf %928, %930 : vector<8x256xf32>
    %cst_417 = arith.constant 2.300000e-01 : f32
    %932 = vector.broadcast %cst_417 : f32 to vector<8x256xf32>
    %933 = arith.cmpf ogt, %931, %932 : vector<8x256xf32>
    %cst_418 = arith.constant 0.000000e+00 : f32
    %934 = vector.broadcast %cst_418 : f32 to vector<8x256xf32>
    %935 = arith.select %933, %934, %931 : vector<8x256xi1>, vector<8x256xf32>
    %cst_419 = arith.constant 8.000000e-01 : f32
    %936 = vector.broadcast %cst_419 : f32 to vector<8x256xf32>
    %937 = arith.mulf %936, %920 : vector<8x256xf32>
    %938 = arith.addf %937, %926 : vector<8x256xf32>
    %939 = arith.extui %933 : vector<8x256xi1> to vector<8x256xi32>
    %940 = arith.sitofp %939 : vector<8x256xi32> to vector<8x256xf32>
    %c136_420 = arith.constant 136 : index
    %c0_421 = arith.constant 0 : index
    %941 = vector.load %arg13[%c136_420, %c0_421] : memref<192x256xf32, #tpu.memory_space<vmem>>, vector<8x256xf32>
    %cst_422 = arith.constant 0.899999976 : f32
    %942 = vector.broadcast %cst_422 : f32 to vector<8x256xf32>
    %943 = arith.mulf %942, %935 : vector<8x256xf32>
    %cst_423 = arith.constant 1.000000e-01 : f32
    %944 = vector.broadcast %cst_423 : f32 to vector<8x256xf32>
    %945 = arith.mulf %944, %938 : vector<8x256xf32>
    %946 = arith.addf %943, %945 : vector<8x256xf32>
    %cst_424 = arith.constant 2.300000e-01 : f32
    %947 = vector.broadcast %cst_424 : f32 to vector<8x256xf32>
    %948 = arith.cmpf ogt, %946, %947 : vector<8x256xf32>
    %cst_425 = arith.constant 0.000000e+00 : f32
    %949 = vector.broadcast %cst_425 : f32 to vector<8x256xf32>
    %950 = arith.select %948, %949, %946 : vector<8x256xi1>, vector<8x256xf32>
    %cst_426 = arith.constant 8.000000e-01 : f32
    %951 = vector.broadcast %cst_426 : f32 to vector<8x256xf32>
    %952 = arith.mulf %951, %938 : vector<8x256xf32>
    %953 = arith.addf %952, %941 : vector<8x256xf32>
    %954 = arith.extui %948 : vector<8x256xi1> to vector<8x256xi32>
    %955 = arith.sitofp %954 : vector<8x256xi32> to vector<8x256xf32>
    %956 = tpu.concatenate %940, %955 in 0 : vector<8x256xf32>, vector<8x256xf32> -> vector<16x256xf32>
    %957 = arith.truncf %956 : vector<16x256xf32> to vector<16x256xbf16>
    %c128_427 = arith.constant 128 : index
    %c0_428 = arith.constant 0 : index
    %958 = vector.load %arg14[%c128_427, %c0_428] : memref<192x256xbf16, #tpu.memory_space<vmem>>, vector<16x256xbf16>
    tpu.vector_store %arg14[%c128_427, %c0_428], %957 {strides = array<i32>} : memref<192x256xbf16, #tpu.memory_space<vmem>>, vector<16x256xbf16>,
    %c144_429 = arith.constant 144 : index
    %c0_430 = arith.constant 0 : index
    %959 = vector.load %arg13[%c144_429, %c0_430] : memref<192x256xf32, #tpu.memory_space<vmem>>, vector<8x256xf32>
    %cst_431 = arith.constant 0.899999976 : f32
    %960 = vector.broadcast %cst_431 : f32 to vector<8x256xf32>
    %961 = arith.mulf %960, %950 : vector<8x256xf32>
    %cst_432 = arith.constant 1.000000e-01 : f32
    %962 = vector.broadcast %cst_432 : f32 to vector<8x256xf32>
    %963 = arith.mulf %962, %953 : vector<8x256xf32>
    %964 = arith.addf %961, %963 : vector<8x256xf32>
    %cst_433 = arith.constant 2.300000e-01 : f32
    %965 = vector.broadcast %cst_433 : f32 to vector<8x256xf32>
    %966 = arith.cmpf ogt, %964, %965 : vector<8x256xf32>
    %cst_434 = arith.constant 0.000000e+00 : f32
    %967 = vector.broadcast %cst_434 : f32 to vector<8x256xf32>
    %968 = arith.select %966, %967, %964 : vector<8x256xi1>, vector<8x256xf32>
    %cst_435 = arith.constant 8.000000e-01 : f32
    %969 = vector.broadcast %cst_435 : f32 to vector<8x256xf32>
    %970 = arith.mulf %969, %953 : vector<8x256xf32>
    %971 = arith.addf %970, %959 : vector<8x256xf32>
    %972 = arith.extui %966 : vector<8x256xi1> to vector<8x256xi32>
    %973 = arith.sitofp %972 : vector<8x256xi32> to vector<8x256xf32>
    %c152_436 = arith.constant 152 : index
    %c0_437 = arith.constant 0 : index
    %974 = vector.load %arg13[%c152_436, %c0_437] : memref<192x256xf32, #tpu.memory_space<vmem>>, vector<8x256xf32>
    %cst_438 = arith.constant 0.899999976 : f32
    %975 = vector.broadcast %cst_438 : f32 to vector<8x256xf32>
    %976 = arith.mulf %975, %968 : vector<8x256xf32>
    %cst_439 = arith.constant 1.000000e-01 : f32
    %977 = vector.broadcast %cst_439 : f32 to vector<8x256xf32>
    %978 = arith.mulf %977, %971 : vector<8x256xf32>
    %979 = arith.addf %976, %978 : vector<8x256xf32>
    %cst_440 = arith.constant 2.300000e-01 : f32
    %980 = vector.broadcast %cst_440 : f32 to vector<8x256xf32>
    %981 = arith.cmpf ogt, %979, %980 : vector<8x256xf32>
    %cst_441 = arith.constant 0.000000e+00 : f32
    %982 = vector.broadcast %cst_441 : f32 to vector<8x256xf32>
    %983 = arith.select %981, %982, %979 : vector<8x256xi1>, vector<8x256xf32>
    %cst_442 = arith.constant 8.000000e-01 : f32
    %984 = vector.broadcast %cst_442 : f32 to vector<8x256xf32>
    %985 = arith.mulf %984, %971 : vector<8x256xf32>
    %986 = arith.addf %985, %974 : vector<8x256xf32>
    %987 = arith.extui %981 : vector<8x256xi1> to vector<8x256xi32>
    %988 = arith.sitofp %987 : vector<8x256xi32> to vector<8x256xf32>
    %989 = tpu.concatenate %973, %988 in 0 : vector<8x256xf32>, vector<8x256xf32> -> vector<16x256xf32>
    %990 = arith.truncf %989 : vector<16x256xf32> to vector<16x256xbf16>
    %c144_443 = arith.constant 144 : index
    %c0_444 = arith.constant 0 : index
    %991 = vector.load %arg14[%c144_443, %c0_444] : memref<192x256xbf16, #tpu.memory_space<vmem>>, vector<16x256xbf16>
    tpu.vector_store %arg14[%c144_443, %c0_444], %990 {strides = array<i32>} : memref<192x256xbf16, #tpu.memory_space<vmem>>, vector<16x256xbf16>,
    %c160_445 = arith.constant 160 : index
    %c0_446 = arith.constant 0 : index
    %992 = vector.load %arg13[%c160_445, %c0_446] : memref<192x256xf32, #tpu.memory_space<vmem>>, vector<8x256xf32>
    %cst_447 = arith.constant 0.899999976 : f32
    %993 = vector.broadcast %cst_447 : f32 to vector<8x256xf32>
    %994 = arith.mulf %993, %983 : vector<8x256xf32>
    %cst_448 = arith.constant 1.000000e-01 : f32
    %995 = vector.broadcast %cst_448 : f32 to vector<8x256xf32>
    %996 = arith.mulf %995, %986 : vector<8x256xf32>
    %997 = arith.addf %994, %996 : vector<8x256xf32>
    %cst_449 = arith.constant 2.300000e-01 : f32
    %998 = vector.broadcast %cst_449 : f32 to vector<8x256xf32>
    %999 = arith.cmpf ogt, %997, %998 : vector<8x256xf32>
    %cst_450 = arith.constant 0.000000e+00 : f32
    %1000 = vector.broadcast %cst_450 : f32 to vector<8x256xf32>
    %1001 = arith.select %999, %1000, %997 : vector<8x256xi1>, vector<8x256xf32>
    %cst_451 = arith.constant 8.000000e-01 : f32
    %1002 = vector.broadcast %cst_451 : f32 to vector<8x256xf32>
    %1003 = arith.mulf %1002, %986 : vector<8x256xf32>
    %1004 = arith.addf %1003, %992 : vector<8x256xf32>
    %1005 = arith.extui %999 : vector<8x256xi1> to vector<8x256xi32>
    %1006 = arith.sitofp %1005 : vector<8x256xi32> to vector<8x256xf32>
    %c168_452 = arith.constant 168 : index
    %c0_453 = arith.constant 0 : index
    %1007 = vector.load %arg13[%c168_452, %c0_453] : memref<192x256xf32, #tpu.memory_space<vmem>>, vector<8x256xf32>
    %cst_454 = arith.constant 0.899999976 : f32
    %1008 = vector.broadcast %cst_454 : f32 to vector<8x256xf32>
    %1009 = arith.mulf %1008, %1001 : vector<8x256xf32>
    %cst_455 = arith.constant 1.000000e-01 : f32
    %1010 = vector.broadcast %cst_455 : f32 to vector<8x256xf32>
    %1011 = arith.mulf %1010, %1004 : vector<8x256xf32>
    %1012 = arith.addf %1009, %1011 : vector<8x256xf32>
    %cst_456 = arith.constant 2.300000e-01 : f32
    %1013 = vector.broadcast %cst_456 : f32 to vector<8x256xf32>
    %1014 = arith.cmpf ogt, %1012, %1013 : vector<8x256xf32>
    %cst_457 = arith.constant 0.000000e+00 : f32
    %1015 = vector.broadcast %cst_457 : f32 to vector<8x256xf32>
    %1016 = arith.select %1014, %1015, %1012 : vector<8x256xi1>, vector<8x256xf32>
    %cst_458 = arith.constant 8.000000e-01 : f32
    %1017 = vector.broadcast %cst_458 : f32 to vector<8x256xf32>
    %1018 = arith.mulf %1017, %1004 : vector<8x256xf32>
    %1019 = arith.addf %1018, %1007 : vector<8x256xf32>
    %1020 = arith.extui %1014 : vector<8x256xi1> to vector<8x256xi32>
    %1021 = arith.sitofp %1020 : vector<8x256xi32> to vector<8x256xf32>
    %1022 = tpu.concatenate %1006, %1021 in 0 : vector<8x256xf32>, vector<8x256xf32> -> vector<16x256xf32>
    %1023 = arith.truncf %1022 : vector<16x256xf32> to vector<16x256xbf16>
    %c160_459 = arith.constant 160 : index
    %c0_460 = arith.constant 0 : index
    %1024 = vector.load %arg14[%c160_459, %c0_460] : memref<192x256xbf16, #tpu.memory_space<vmem>>, vector<16x256xbf16>
    tpu.vector_store %arg14[%c160_459, %c0_460], %1023 {strides = array<i32>} : memref<192x256xbf16, #tpu.memory_space<vmem>>, vector<16x256xbf16>,
    %c176_461 = arith.constant 176 : index
    %c0_462 = arith.constant 0 : index
    %1025 = vector.load %arg13[%c176_461, %c0_462] : memref<192x256xf32, #tpu.memory_space<vmem>>, vector<8x256xf32>
    %cst_463 = arith.constant 0.899999976 : f32
    %1026 = vector.broadcast %cst_463 : f32 to vector<8x256xf32>
    %1027 = arith.mulf %1026, %1016 : vector<8x256xf32>
    %cst_464 = arith.constant 1.000000e-01 : f32
    %1028 = vector.broadcast %cst_464 : f32 to vector<8x256xf32>
    %1029 = arith.mulf %1028, %1019 : vector<8x256xf32>
    %1030 = arith.addf %1027, %1029 : vector<8x256xf32>
    %cst_465 = arith.constant 2.300000e-01 : f32
    %1031 = vector.broadcast %cst_465 : f32 to vector<8x256xf32>
    %1032 = arith.cmpf ogt, %1030, %1031 : vector<8x256xf32>
    %cst_466 = arith.constant 0.000000e+00 : f32
    %1033 = vector.broadcast %cst_466 : f32 to vector<8x256xf32>
    %1034 = arith.select %1032, %1033, %1030 : vector<8x256xi1>, vector<8x256xf32>
    %cst_467 = arith.constant 8.000000e-01 : f32
    %1035 = vector.broadcast %cst_467 : f32 to vector<8x256xf32>
    %1036 = arith.mulf %1035, %1019 : vector<8x256xf32>
    %1037 = arith.addf %1036, %1025 : vector<8x256xf32>
    %1038 = arith.extui %1032 : vector<8x256xi1> to vector<8x256xi32>
    %1039 = arith.sitofp %1038 : vector<8x256xi32> to vector<8x256xf32>
    %cst_468 = arith.constant 0.899999976 : f32
    %1040 = vector.broadcast %cst_468 : f32 to vector<8x256xf32>
    %1041 = arith.mulf %1040, %1034 : vector<8x256xf32>
    %cst_469 = arith.constant 1.000000e-01 : f32
    %1042 = vector.broadcast %cst_469 : f32 to vector<8x256xf32>
    %1043 = arith.mulf %1042, %1037 : vector<8x256xf32>
    %1044 = arith.addf %1041, %1043 : vector<8x256xf32>
    %cst_470 = arith.constant 2.300000e-01 : f32
    %1045 = vector.broadcast %cst_470 : f32 to vector<8x256xf32>
    %1046 = arith.cmpf ogt, %1044, %1045 : vector<8x256xf32>
    %1047 = arith.extui %1046 : vector<8x256xi1> to vector<8x256xi32>
    %1048 = arith.sitofp %1047 : vector<8x256xi32> to vector<8x256xf32>
    %1049 = tpu.concatenate %1039, %1048 in 0 : vector<8x256xf32>, vector<8x256xf32> -> vector<16x256xf32>
    %1050 = arith.truncf %1049 : vector<16x256xf32> to vector<16x256xbf16>
    %c176_471 = arith.constant 176 : index
    %c0_472 = arith.constant 0 : index
    %1051 = vector.load %arg14[%c176_471, %c0_472] : memref<192x256xbf16, #tpu.memory_space<vmem>>, vector<16x256xbf16>
    tpu.vector_store %arg14[%c176_471, %c0_472], %1050 {strides = array<i32>} : memref<192x256xbf16, #tpu.memory_space<vmem>>, vector<16x256xbf16>,
    %c0_473 = arith.constant 0 : index
    %c0_474 = arith.constant 0 : index
    %1052 = vector.load %arg14[%c0_473, %c0_474] : memref<192x256xbf16, #tpu.memory_space<vmem>>, vector<192x256xbf16>
    %1053 = arith.extf %1052 : vector<192x256xbf16> to vector<192x256xf32>
    %c0_475 = arith.constant 0 : index
    %c0_476 = arith.constant 0 : index
    %1054 = vector.load %arg12[%c0_475, %c0_476] : memref<192x256xbf16, #tpu.memory_space<vmem>>, vector<192x256xbf16>
    %1055 = arith.extf %1054 : vector<192x256xbf16> to vector<192x256xf32>
    %1056 = arith.addf %1053, %1055 : vector<192x256xf32>
    %1057 = arith.truncf %1056 : vector<192x256xf32> to vector<192x256xbf16>
    %c0_477 = arith.constant 0 : index
    %c0_478 = arith.constant 0 : index
    %1058 = vector.load %arg14[%c0_477, %c0_478] : memref<192x256xbf16, #tpu.memory_space<vmem>>, vector<192x256xbf16>
    tpu.vector_store %arg14[%c0_477, %c0_478], %1057 {strides = array<i32>} : memref<192x256xbf16, #tpu.memory_space<vmem>>, vector<192x256xbf16>,
    %c0_479 = arith.constant 0 : index
    %c0_480 = arith.constant 0 : index
    %1059 = vector.load %arg14[%c0_479, %c0_480] : memref<192x256xbf16, #tpu.memory_space<vmem>>, vector<192x256xbf16>
    %c0_481 = arith.constant 0 : index
    %c0_482 = arith.constant 0 : index
    %1060 = vector.load %arg6[%c0_481, %c0_482] : memref<256x256xbf16, #tpu.memory_space<vmem>>, vector<256x256xbf16>
    %cst_483 = arith.constant dense<0.000000e+00> : vector<192x256xf32>
    %1061 = tpu.matmul %1059, %1060, %cst_483 {dimension_numbers = #tpu.dot_dimension_numbers<[1], [0], [0], [1], [0, 0, 1, 1], [], []>} : vector<192x256xbf16>, vector<256x256xbf16>, vector<192x256xf32> -> vector<192x256xf32>
    %c0_484 = arith.constant 0 : index
    %c0_485 = arith.constant 0 : index
    %1062 = vector.load %arg7[%c0_484, %c0_485] : memref<1x256xf32, #tpu.memory_space<vmem>>, vector<1x256xf32>
    %1063 = vector.broadcast %1062 : vector<1x256xf32> to vector<192x256xf32>
    %1064 = arith.addf %1061, %1063 : vector<192x256xf32>
    %c0_486 = arith.constant 0 : index
    %c0_487 = arith.constant 0 : index
    %1065 = vector.load %arg15[%c0_486, %c0_487] : memref<192x256xf32, #tpu.memory_space<vmem>>, vector<192x256xf32>
    tpu.vector_store %arg15[%c0_486, %c0_487], %1064 {strides = array<i32>} : memref<192x256xf32, #tpu.memory_space<vmem>>, vector<192x256xf32>,
    %cst_488 = arith.constant 0.000000e+00 : f32
    %1066 = vector.broadcast %cst_488 : f32 to vector<8x256xf32>
    %cst_489 = arith.constant 0.000000e+00 : f32
    %1067 = vector.broadcast %cst_489 : f32 to vector<8x256xf32>
    %c0_490 = arith.constant 0 : index
    %c0_491 = arith.constant 0 : index
    %1068 = vector.load %arg15[%c0_490, %c0_491] : memref<192x256xf32, #tpu.memory_space<vmem>>, vector<8x256xf32>
    %cst_492 = arith.constant 0.899999976 : f32
    %1069 = vector.broadcast %cst_492 : f32 to vector<8x256xf32>
    %1070 = arith.mulf %1069, %1066 : vector<8x256xf32>
    %cst_493 = arith.constant 1.000000e-01 : f32
    %1071 = vector.broadcast %cst_493 : f32 to vector<8x256xf32>
    %1072 = arith.mulf %1071, %1067 : vector<8x256xf32>
    %1073 = arith.addf %1070, %1072 : vector<8x256xf32>
    %cst_494 = arith.constant 2.300000e-01 : f32
    %1074 = vector.broadcast %cst_494 : f32 to vector<8x256xf32>
    %1075 = arith.cmpf ogt, %1073, %1074 : vector<8x256xf32>
    %cst_495 = arith.constant 0.000000e+00 : f32
    %1076 = vector.broadcast %cst_495 : f32 to vector<8x256xf32>
    %1077 = arith.select %1075, %1076, %1073 : vector<8x256xi1>, vector<8x256xf32>
    %cst_496 = arith.constant 8.000000e-01 : f32
    %1078 = vector.broadcast %cst_496 : f32 to vector<8x256xf32>
    %1079 = arith.mulf %1078, %1067 : vector<8x256xf32>
    %1080 = arith.addf %1079, %1068 : vector<8x256xf32>
    %1081 = arith.extui %1075 : vector<8x256xi1> to vector<8x256xi32>
    %1082 = arith.sitofp %1081 : vector<8x256xi32> to vector<8x256xf32>
    %c8_497 = arith.constant 8 : index
    %c0_498 = arith.constant 0 : index
    %1083 = vector.load %arg15[%c8_497, %c0_498] : memref<192x256xf32, #tpu.memory_space<vmem>>, vector<8x256xf32>
    %cst_499 = arith.constant 0.899999976 : f32
    %1084 = vector.broadcast %cst_499 : f32 to vector<8x256xf32>
    %1085 = arith.mulf %1084, %1077 : vector<8x256xf32>
    %cst_500 = arith.constant 1.000000e-01 : f32
    %1086 = vector.broadcast %cst_500 : f32 to vector<8x256xf32>
    %1087 = arith.mulf %1086, %1080 : vector<8x256xf32>
    %1088 = arith.addf %1085, %1087 : vector<8x256xf32>
    %cst_501 = arith.constant 2.300000e-01 : f32
    %1089 = vector.broadcast %cst_501 : f32 to vector<8x256xf32>
    %1090 = arith.cmpf ogt, %1088, %1089 : vector<8x256xf32>
    %cst_502 = arith.constant 0.000000e+00 : f32
    %1091 = vector.broadcast %cst_502 : f32 to vector<8x256xf32>
    %1092 = arith.select %1090, %1091, %1088 : vector<8x256xi1>, vector<8x256xf32>
    %cst_503 = arith.constant 8.000000e-01 : f32
    %1093 = vector.broadcast %cst_503 : f32 to vector<8x256xf32>
    %1094 = arith.mulf %1093, %1080 : vector<8x256xf32>
    %1095 = arith.addf %1094, %1083 : vector<8x256xf32>
    %1096 = arith.extui %1090 : vector<8x256xi1> to vector<8x256xi32>
    %1097 = arith.sitofp %1096 : vector<8x256xi32> to vector<8x256xf32>
    %1098 = tpu.concatenate %1082, %1097 in 0 : vector<8x256xf32>, vector<8x256xf32> -> vector<16x256xf32>
    %1099 = arith.truncf %1098 : vector<16x256xf32> to vector<16x256xbf16>
    %c0_504 = arith.constant 0 : index
    %c0_505 = arith.constant 0 : index
    %1100 = vector.load %arg16[%c0_504, %c0_505] : memref<192x256xbf16, #tpu.memory_space<vmem>>, vector<16x256xbf16>
    tpu.vector_store %arg16[%c0_504, %c0_505], %1099 {strides = array<i32>} : memref<192x256xbf16, #tpu.memory_space<vmem>>, vector<16x256xbf16>,
    %c16_506 = arith.constant 16 : index
    %c0_507 = arith.constant 0 : index
    %1101 = vector.load %arg15[%c16_506, %c0_507] : memref<192x256xf32, #tpu.memory_space<vmem>>, vector<8x256xf32>
    %cst_508 = arith.constant 0.899999976 : f32
    %1102 = vector.broadcast %cst_508 : f32 to vector<8x256xf32>
    %1103 = arith.mulf %1102, %1092 : vector<8x256xf32>
    %cst_509 = arith.constant 1.000000e-01 : f32
    %1104 = vector.broadcast %cst_509 : f32 to vector<8x256xf32>
    %1105 = arith.mulf %1104, %1095 : vector<8x256xf32>
    %1106 = arith.addf %1103, %1105 : vector<8x256xf32>
    %cst_510 = arith.constant 2.300000e-01 : f32
    %1107 = vector.broadcast %cst_510 : f32 to vector<8x256xf32>
    %1108 = arith.cmpf ogt, %1106, %1107 : vector<8x256xf32>
    %cst_511 = arith.constant 0.000000e+00 : f32
    %1109 = vector.broadcast %cst_511 : f32 to vector<8x256xf32>
    %1110 = arith.select %1108, %1109, %1106 : vector<8x256xi1>, vector<8x256xf32>
    %cst_512 = arith.constant 8.000000e-01 : f32
    %1111 = vector.broadcast %cst_512 : f32 to vector<8x256xf32>
    %1112 = arith.mulf %1111, %1095 : vector<8x256xf32>
    %1113 = arith.addf %1112, %1101 : vector<8x256xf32>
    %1114 = arith.extui %1108 : vector<8x256xi1> to vector<8x256xi32>
    %1115 = arith.sitofp %1114 : vector<8x256xi32> to vector<8x256xf32>
    %c24_513 = arith.constant 24 : index
    %c0_514 = arith.constant 0 : index
    %1116 = vector.load %arg15[%c24_513, %c0_514] : memref<192x256xf32, #tpu.memory_space<vmem>>, vector<8x256xf32>
    %cst_515 = arith.constant 0.899999976 : f32
    %1117 = vector.broadcast %cst_515 : f32 to vector<8x256xf32>
    %1118 = arith.mulf %1117, %1110 : vector<8x256xf32>
    %cst_516 = arith.constant 1.000000e-01 : f32
    %1119 = vector.broadcast %cst_516 : f32 to vector<8x256xf32>
    %1120 = arith.mulf %1119, %1113 : vector<8x256xf32>
    %1121 = arith.addf %1118, %1120 : vector<8x256xf32>
    %cst_517 = arith.constant 2.300000e-01 : f32
    %1122 = vector.broadcast %cst_517 : f32 to vector<8x256xf32>
    %1123 = arith.cmpf ogt, %1121, %1122 : vector<8x256xf32>
    %cst_518 = arith.constant 0.000000e+00 : f32
    %1124 = vector.broadcast %cst_518 : f32 to vector<8x256xf32>
    %1125 = arith.select %1123, %1124, %1121 : vector<8x256xi1>, vector<8x256xf32>
    %cst_519 = arith.constant 8.000000e-01 : f32
    %1126 = vector.broadcast %cst_519 : f32 to vector<8x256xf32>
    %1127 = arith.mulf %1126, %1113 : vector<8x256xf32>
    %1128 = arith.addf %1127, %1116 : vector<8x256xf32>
    %1129 = arith.extui %1123 : vector<8x256xi1> to vector<8x256xi32>
    %1130 = arith.sitofp %1129 : vector<8x256xi32> to vector<8x256xf32>
    %1131 = tpu.concatenate %1115, %1130 in 0 : vector<8x256xf32>, vector<8x256xf32> -> vector<16x256xf32>
    %1132 = arith.truncf %1131 : vector<16x256xf32> to vector<16x256xbf16>
    %c16_520 = arith.constant 16 : index
    %c0_521 = arith.constant 0 : index
    %1133 = vector.load %arg16[%c16_520, %c0_521] : memref<192x256xbf16, #tpu.memory_space<vmem>>, vector<16x256xbf16>
    tpu.vector_store %arg16[%c16_520, %c0_521], %1132 {strides = array<i32>} : memref<192x256xbf16, #tpu.memory_space<vmem>>, vector<16x256xbf16>,
    %c32_522 = arith.constant 32 : index
    %c0_523 = arith.constant 0 : index
    %1134 = vector.load %arg15[%c32_522, %c0_523] : memref<192x256xf32, #tpu.memory_space<vmem>>, vector<8x256xf32>
    %cst_524 = arith.constant 0.899999976 : f32
    %1135 = vector.broadcast %cst_524 : f32 to vector<8x256xf32>
    %1136 = arith.mulf %1135, %1125 : vector<8x256xf32>
    %cst_525 = arith.constant 1.000000e-01 : f32
    %1137 = vector.broadcast %cst_525 : f32 to vector<8x256xf32>
    %1138 = arith.mulf %1137, %1128 : vector<8x256xf32>
    %1139 = arith.addf %1136, %1138 : vector<8x256xf32>
    %cst_526 = arith.constant 2.300000e-01 : f32
    %1140 = vector.broadcast %cst_526 : f32 to vector<8x256xf32>
    %1141 = arith.cmpf ogt, %1139, %1140 : vector<8x256xf32>
    %cst_527 = arith.constant 0.000000e+00 : f32
    %1142 = vector.broadcast %cst_527 : f32 to vector<8x256xf32>
    %1143 = arith.select %1141, %1142, %1139 : vector<8x256xi1>, vector<8x256xf32>
    %cst_528 = arith.constant 8.000000e-01 : f32
    %1144 = vector.broadcast %cst_528 : f32 to vector<8x256xf32>
    %1145 = arith.mulf %1144, %1128 : vector<8x256xf32>
    %1146 = arith.addf %1145, %1134 : vector<8x256xf32>
    %1147 = arith.extui %1141 : vector<8x256xi1> to vector<8x256xi32>
    %1148 = arith.sitofp %1147 : vector<8x256xi32> to vector<8x256xf32>
    %c40_529 = arith.constant 40 : index
    %c0_530 = arith.constant 0 : index
    %1149 = vector.load %arg15[%c40_529, %c0_530] : memref<192x256xf32, #tpu.memory_space<vmem>>, vector<8x256xf32>
    %cst_531 = arith.constant 0.899999976 : f32
    %1150 = vector.broadcast %cst_531 : f32 to vector<8x256xf32>
    %1151 = arith.mulf %1150, %1143 : vector<8x256xf32>
    %cst_532 = arith.constant 1.000000e-01 : f32
    %1152 = vector.broadcast %cst_532 : f32 to vector<8x256xf32>
    %1153 = arith.mulf %1152, %1146 : vector<8x256xf32>
    %1154 = arith.addf %1151, %1153 : vector<8x256xf32>
    %cst_533 = arith.constant 2.300000e-01 : f32
    %1155 = vector.broadcast %cst_533 : f32 to vector<8x256xf32>
    %1156 = arith.cmpf ogt, %1154, %1155 : vector<8x256xf32>
    %cst_534 = arith.constant 0.000000e+00 : f32
    %1157 = vector.broadcast %cst_534 : f32 to vector<8x256xf32>
    %1158 = arith.select %1156, %1157, %1154 : vector<8x256xi1>, vector<8x256xf32>
    %cst_535 = arith.constant 8.000000e-01 : f32
    %1159 = vector.broadcast %cst_535 : f32 to vector<8x256xf32>
    %1160 = arith.mulf %1159, %1146 : vector<8x256xf32>
    %1161 = arith.addf %1160, %1149 : vector<8x256xf32>
    %1162 = arith.extui %1156 : vector<8x256xi1> to vector<8x256xi32>
    %1163 = arith.sitofp %1162 : vector<8x256xi32> to vector<8x256xf32>
    %1164 = tpu.concatenate %1148, %1163 in 0 : vector<8x256xf32>, vector<8x256xf32> -> vector<16x256xf32>
    %1165 = arith.truncf %1164 : vector<16x256xf32> to vector<16x256xbf16>
    %c32_536 = arith.constant 32 : index
    %c0_537 = arith.constant 0 : index
    %1166 = vector.load %arg16[%c32_536, %c0_537] : memref<192x256xbf16, #tpu.memory_space<vmem>>, vector<16x256xbf16>
    tpu.vector_store %arg16[%c32_536, %c0_537], %1165 {strides = array<i32>} : memref<192x256xbf16, #tpu.memory_space<vmem>>, vector<16x256xbf16>,
    %c48_538 = arith.constant 48 : index
    %c0_539 = arith.constant 0 : index
    %1167 = vector.load %arg15[%c48_538, %c0_539] : memref<192x256xf32, #tpu.memory_space<vmem>>, vector<8x256xf32>
    %cst_540 = arith.constant 0.899999976 : f32
    %1168 = vector.broadcast %cst_540 : f32 to vector<8x256xf32>
    %1169 = arith.mulf %1168, %1158 : vector<8x256xf32>
    %cst_541 = arith.constant 1.000000e-01 : f32
    %1170 = vector.broadcast %cst_541 : f32 to vector<8x256xf32>
    %1171 = arith.mulf %1170, %1161 : vector<8x256xf32>
    %1172 = arith.addf %1169, %1171 : vector<8x256xf32>
    %cst_542 = arith.constant 2.300000e-01 : f32
    %1173 = vector.broadcast %cst_542 : f32 to vector<8x256xf32>
    %1174 = arith.cmpf ogt, %1172, %1173 : vector<8x256xf32>
    %cst_543 = arith.constant 0.000000e+00 : f32
    %1175 = vector.broadcast %cst_543 : f32 to vector<8x256xf32>
    %1176 = arith.select %1174, %1175, %1172 : vector<8x256xi1>, vector<8x256xf32>
    %cst_544 = arith.constant 8.000000e-01 : f32
    %1177 = vector.broadcast %cst_544 : f32 to vector<8x256xf32>
    %1178 = arith.mulf %1177, %1161 : vector<8x256xf32>
    %1179 = arith.addf %1178, %1167 : vector<8x256xf32>
    %1180 = arith.extui %1174 : vector<8x256xi1> to vector<8x256xi32>
    %1181 = arith.sitofp %1180 : vector<8x256xi32> to vector<8x256xf32>
    %c56_545 = arith.constant 56 : index
    %c0_546 = arith.constant 0 : index
    %1182 = vector.load %arg15[%c56_545, %c0_546] : memref<192x256xf32, #tpu.memory_space<vmem>>, vector<8x256xf32>
    %cst_547 = arith.constant 0.899999976 : f32
    %1183 = vector.broadcast %cst_547 : f32 to vector<8x256xf32>
    %1184 = arith.mulf %1183, %1176 : vector<8x256xf32>
    %cst_548 = arith.constant 1.000000e-01 : f32
    %1185 = vector.broadcast %cst_548 : f32 to vector<8x256xf32>
    %1186 = arith.mulf %1185, %1179 : vector<8x256xf32>
    %1187 = arith.addf %1184, %1186 : vector<8x256xf32>
    %cst_549 = arith.constant 2.300000e-01 : f32
    %1188 = vector.broadcast %cst_549 : f32 to vector<8x256xf32>
    %1189 = arith.cmpf ogt, %1187, %1188 : vector<8x256xf32>
    %cst_550 = arith.constant 0.000000e+00 : f32
    %1190 = vector.broadcast %cst_550 : f32 to vector<8x256xf32>
    %1191 = arith.select %1189, %1190, %1187 : vector<8x256xi1>, vector<8x256xf32>
    %cst_551 = arith.constant 8.000000e-01 : f32
    %1192 = vector.broadcast %cst_551 : f32 to vector<8x256xf32>
    %1193 = arith.mulf %1192, %1179 : vector<8x256xf32>
    %1194 = arith.addf %1193, %1182 : vector<8x256xf32>
    %1195 = arith.extui %1189 : vector<8x256xi1> to vector<8x256xi32>
    %1196 = arith.sitofp %1195 : vector<8x256xi32> to vector<8x256xf32>
    %1197 = tpu.concatenate %1181, %1196 in 0 : vector<8x256xf32>, vector<8x256xf32> -> vector<16x256xf32>
    %1198 = arith.truncf %1197 : vector<16x256xf32> to vector<16x256xbf16>
    %c48_552 = arith.constant 48 : index
    %c0_553 = arith.constant 0 : index
    %1199 = vector.load %arg16[%c48_552, %c0_553] : memref<192x256xbf16, #tpu.memory_space<vmem>>, vector<16x256xbf16>
    tpu.vector_store %arg16[%c48_552, %c0_553], %1198 {strides = array<i32>} : memref<192x256xbf16, #tpu.memory_space<vmem>>, vector<16x256xbf16>,
    %c64_554 = arith.constant 64 : index
    %c0_555 = arith.constant 0 : index
    %1200 = vector.load %arg15[%c64_554, %c0_555] : memref<192x256xf32, #tpu.memory_space<vmem>>, vector<8x256xf32>
    %cst_556 = arith.constant 0.899999976 : f32
    %1201 = vector.broadcast %cst_556 : f32 to vector<8x256xf32>
    %1202 = arith.mulf %1201, %1191 : vector<8x256xf32>
    %cst_557 = arith.constant 1.000000e-01 : f32
    %1203 = vector.broadcast %cst_557 : f32 to vector<8x256xf32>
    %1204 = arith.mulf %1203, %1194 : vector<8x256xf32>
    %1205 = arith.addf %1202, %1204 : vector<8x256xf32>
    %cst_558 = arith.constant 2.300000e-01 : f32
    %1206 = vector.broadcast %cst_558 : f32 to vector<8x256xf32>
    %1207 = arith.cmpf ogt, %1205, %1206 : vector<8x256xf32>
    %cst_559 = arith.constant 0.000000e+00 : f32
    %1208 = vector.broadcast %cst_559 : f32 to vector<8x256xf32>
    %1209 = arith.select %1207, %1208, %1205 : vector<8x256xi1>, vector<8x256xf32>
    %cst_560 = arith.constant 8.000000e-01 : f32
    %1210 = vector.broadcast %cst_560 : f32 to vector<8x256xf32>
    %1211 = arith.mulf %1210, %1194 : vector<8x256xf32>
    %1212 = arith.addf %1211, %1200 : vector<8x256xf32>
    %1213 = arith.extui %1207 : vector<8x256xi1> to vector<8x256xi32>
    %1214 = arith.sitofp %1213 : vector<8x256xi32> to vector<8x256xf32>
    %c72_561 = arith.constant 72 : index
    %c0_562 = arith.constant 0 : index
    %1215 = vector.load %arg15[%c72_561, %c0_562] : memref<192x256xf32, #tpu.memory_space<vmem>>, vector<8x256xf32>
    %cst_563 = arith.constant 0.899999976 : f32
    %1216 = vector.broadcast %cst_563 : f32 to vector<8x256xf32>
    %1217 = arith.mulf %1216, %1209 : vector<8x256xf32>
    %cst_564 = arith.constant 1.000000e-01 : f32
    %1218 = vector.broadcast %cst_564 : f32 to vector<8x256xf32>
    %1219 = arith.mulf %1218, %1212 : vector<8x256xf32>
    %1220 = arith.addf %1217, %1219 : vector<8x256xf32>
    %cst_565 = arith.constant 2.300000e-01 : f32
    %1221 = vector.broadcast %cst_565 : f32 to vector<8x256xf32>
    %1222 = arith.cmpf ogt, %1220, %1221 : vector<8x256xf32>
    %cst_566 = arith.constant 0.000000e+00 : f32
    %1223 = vector.broadcast %cst_566 : f32 to vector<8x256xf32>
    %1224 = arith.select %1222, %1223, %1220 : vector<8x256xi1>, vector<8x256xf32>
    %cst_567 = arith.constant 8.000000e-01 : f32
    %1225 = vector.broadcast %cst_567 : f32 to vector<8x256xf32>
    %1226 = arith.mulf %1225, %1212 : vector<8x256xf32>
    %1227 = arith.addf %1226, %1215 : vector<8x256xf32>
    %1228 = arith.extui %1222 : vector<8x256xi1> to vector<8x256xi32>
    %1229 = arith.sitofp %1228 : vector<8x256xi32> to vector<8x256xf32>
    %1230 = tpu.concatenate %1214, %1229 in 0 : vector<8x256xf32>, vector<8x256xf32> -> vector<16x256xf32>
    %1231 = arith.truncf %1230 : vector<16x256xf32> to vector<16x256xbf16>
    %c64_568 = arith.constant 64 : index
    %c0_569 = arith.constant 0 : index
    %1232 = vector.load %arg16[%c64_568, %c0_569] : memref<192x256xbf16, #tpu.memory_space<vmem>>, vector<16x256xbf16>
    tpu.vector_store %arg16[%c64_568, %c0_569], %1231 {strides = array<i32>} : memref<192x256xbf16, #tpu.memory_space<vmem>>, vector<16x256xbf16>,
    %c80_570 = arith.constant 80 : index
    %c0_571 = arith.constant 0 : index
    %1233 = vector.load %arg15[%c80_570, %c0_571] : memref<192x256xf32, #tpu.memory_space<vmem>>, vector<8x256xf32>
    %cst_572 = arith.constant 0.899999976 : f32
    %1234 = vector.broadcast %cst_572 : f32 to vector<8x256xf32>
    %1235 = arith.mulf %1234, %1224 : vector<8x256xf32>
    %cst_573 = arith.constant 1.000000e-01 : f32
    %1236 = vector.broadcast %cst_573 : f32 to vector<8x256xf32>
    %1237 = arith.mulf %1236, %1227 : vector<8x256xf32>
    %1238 = arith.addf %1235, %1237 : vector<8x256xf32>
    %cst_574 = arith.constant 2.300000e-01 : f32
    %1239 = vector.broadcast %cst_574 : f32 to vector<8x256xf32>
    %1240 = arith.cmpf ogt, %1238, %1239 : vector<8x256xf32>
    %cst_575 = arith.constant 0.000000e+00 : f32
    %1241 = vector.broadcast %cst_575 : f32 to vector<8x256xf32>
    %1242 = arith.select %1240, %1241, %1238 : vector<8x256xi1>, vector<8x256xf32>
    %cst_576 = arith.constant 8.000000e-01 : f32
    %1243 = vector.broadcast %cst_576 : f32 to vector<8x256xf32>
    %1244 = arith.mulf %1243, %1227 : vector<8x256xf32>
    %1245 = arith.addf %1244, %1233 : vector<8x256xf32>
    %1246 = arith.extui %1240 : vector<8x256xi1> to vector<8x256xi32>
    %1247 = arith.sitofp %1246 : vector<8x256xi32> to vector<8x256xf32>
    %c88_577 = arith.constant 88 : index
    %c0_578 = arith.constant 0 : index
    %1248 = vector.load %arg15[%c88_577, %c0_578] : memref<192x256xf32, #tpu.memory_space<vmem>>, vector<8x256xf32>
    %cst_579 = arith.constant 0.899999976 : f32
    %1249 = vector.broadcast %cst_579 : f32 to vector<8x256xf32>
    %1250 = arith.mulf %1249, %1242 : vector<8x256xf32>
    %cst_580 = arith.constant 1.000000e-01 : f32
    %1251 = vector.broadcast %cst_580 : f32 to vector<8x256xf32>
    %1252 = arith.mulf %1251, %1245 : vector<8x256xf32>
    %1253 = arith.addf %1250, %1252 : vector<8x256xf32>
    %cst_581 = arith.constant 2.300000e-01 : f32
    %1254 = vector.broadcast %cst_581 : f32 to vector<8x256xf32>
    %1255 = arith.cmpf ogt, %1253, %1254 : vector<8x256xf32>
    %cst_582 = arith.constant 0.000000e+00 : f32
    %1256 = vector.broadcast %cst_582 : f32 to vector<8x256xf32>
    %1257 = arith.select %1255, %1256, %1253 : vector<8x256xi1>, vector<8x256xf32>
    %cst_583 = arith.constant 8.000000e-01 : f32
    %1258 = vector.broadcast %cst_583 : f32 to vector<8x256xf32>
    %1259 = arith.mulf %1258, %1245 : vector<8x256xf32>
    %1260 = arith.addf %1259, %1248 : vector<8x256xf32>
    %1261 = arith.extui %1255 : vector<8x256xi1> to vector<8x256xi32>
    %1262 = arith.sitofp %1261 : vector<8x256xi32> to vector<8x256xf32>
    %1263 = tpu.concatenate %1247, %1262 in 0 : vector<8x256xf32>, vector<8x256xf32> -> vector<16x256xf32>
    %1264 = arith.truncf %1263 : vector<16x256xf32> to vector<16x256xbf16>
    %c80_584 = arith.constant 80 : index
    %c0_585 = arith.constant 0 : index
    %1265 = vector.load %arg16[%c80_584, %c0_585] : memref<192x256xbf16, #tpu.memory_space<vmem>>, vector<16x256xbf16>
    tpu.vector_store %arg16[%c80_584, %c0_585], %1264 {strides = array<i32>} : memref<192x256xbf16, #tpu.memory_space<vmem>>, vector<16x256xbf16>,
    %c96_586 = arith.constant 96 : index
    %c0_587 = arith.constant 0 : index
    %1266 = vector.load %arg15[%c96_586, %c0_587] : memref<192x256xf32, #tpu.memory_space<vmem>>, vector<8x256xf32>
    %cst_588 = arith.constant 0.899999976 : f32
    %1267 = vector.broadcast %cst_588 : f32 to vector<8x256xf32>
    %1268 = arith.mulf %1267, %1257 : vector<8x256xf32>
    %cst_589 = arith.constant 1.000000e-01 : f32
    %1269 = vector.broadcast %cst_589 : f32 to vector<8x256xf32>
    %1270 = arith.mulf %1269, %1260 : vector<8x256xf32>
    %1271 = arith.addf %1268, %1270 : vector<8x256xf32>
    %cst_590 = arith.constant 2.300000e-01 : f32
    %1272 = vector.broadcast %cst_590 : f32 to vector<8x256xf32>
    %1273 = arith.cmpf ogt, %1271, %1272 : vector<8x256xf32>
    %cst_591 = arith.constant 0.000000e+00 : f32
    %1274 = vector.broadcast %cst_591 : f32 to vector<8x256xf32>
    %1275 = arith.select %1273, %1274, %1271 : vector<8x256xi1>, vector<8x256xf32>
    %cst_592 = arith.constant 8.000000e-01 : f32
    %1276 = vector.broadcast %cst_592 : f32 to vector<8x256xf32>
    %1277 = arith.mulf %1276, %1260 : vector<8x256xf32>
    %1278 = arith.addf %1277, %1266 : vector<8x256xf32>
    %1279 = arith.extui %1273 : vector<8x256xi1> to vector<8x256xi32>
    %1280 = arith.sitofp %1279 : vector<8x256xi32> to vector<8x256xf32>
    %c104_593 = arith.constant 104 : index
    %c0_594 = arith.constant 0 : index
    %1281 = vector.load %arg15[%c104_593, %c0_594] : memref<192x256xf32, #tpu.memory_space<vmem>>, vector<8x256xf32>
    %cst_595 = arith.constant 0.899999976 : f32
    %1282 = vector.broadcast %cst_595 : f32 to vector<8x256xf32>
    %1283 = arith.mulf %1282, %1275 : vector<8x256xf32>
    %cst_596 = arith.constant 1.000000e-01 : f32
    %1284 = vector.broadcast %cst_596 : f32 to vector<8x256xf32>
    %1285 = arith.mulf %1284, %1278 : vector<8x256xf32>
    %1286 = arith.addf %1283, %1285 : vector<8x256xf32>
    %cst_597 = arith.constant 2.300000e-01 : f32
    %1287 = vector.broadcast %cst_597 : f32 to vector<8x256xf32>
    %1288 = arith.cmpf ogt, %1286, %1287 : vector<8x256xf32>
    %cst_598 = arith.constant 0.000000e+00 : f32
    %1289 = vector.broadcast %cst_598 : f32 to vector<8x256xf32>
    %1290 = arith.select %1288, %1289, %1286 : vector<8x256xi1>, vector<8x256xf32>
    %cst_599 = arith.constant 8.000000e-01 : f32
    %1291 = vector.broadcast %cst_599 : f32 to vector<8x256xf32>
    %1292 = arith.mulf %1291, %1278 : vector<8x256xf32>
    %1293 = arith.addf %1292, %1281 : vector<8x256xf32>
    %1294 = arith.extui %1288 : vector<8x256xi1> to vector<8x256xi32>
    %1295 = arith.sitofp %1294 : vector<8x256xi32> to vector<8x256xf32>
    %1296 = tpu.concatenate %1280, %1295 in 0 : vector<8x256xf32>, vector<8x256xf32> -> vector<16x256xf32>
    %1297 = arith.truncf %1296 : vector<16x256xf32> to vector<16x256xbf16>
    %c96_600 = arith.constant 96 : index
    %c0_601 = arith.constant 0 : index
    %1298 = vector.load %arg16[%c96_600, %c0_601] : memref<192x256xbf16, #tpu.memory_space<vmem>>, vector<16x256xbf16>
    tpu.vector_store %arg16[%c96_600, %c0_601], %1297 {strides = array<i32>} : memref<192x256xbf16, #tpu.memory_space<vmem>>, vector<16x256xbf16>,
    %c112_602 = arith.constant 112 : index
    %c0_603 = arith.constant 0 : index
    %1299 = vector.load %arg15[%c112_602, %c0_603] : memref<192x256xf32, #tpu.memory_space<vmem>>, vector<8x256xf32>
    %cst_604 = arith.constant 0.899999976 : f32
    %1300 = vector.broadcast %cst_604 : f32 to vector<8x256xf32>
    %1301 = arith.mulf %1300, %1290 : vector<8x256xf32>
    %cst_605 = arith.constant 1.000000e-01 : f32
    %1302 = vector.broadcast %cst_605 : f32 to vector<8x256xf32>
    %1303 = arith.mulf %1302, %1293 : vector<8x256xf32>
    %1304 = arith.addf %1301, %1303 : vector<8x256xf32>
    %cst_606 = arith.constant 2.300000e-01 : f32
    %1305 = vector.broadcast %cst_606 : f32 to vector<8x256xf32>
    %1306 = arith.cmpf ogt, %1304, %1305 : vector<8x256xf32>
    %cst_607 = arith.constant 0.000000e+00 : f32
    %1307 = vector.broadcast %cst_607 : f32 to vector<8x256xf32>
    %1308 = arith.select %1306, %1307, %1304 : vector<8x256xi1>, vector<8x256xf32>
    %cst_608 = arith.constant 8.000000e-01 : f32
    %1309 = vector.broadcast %cst_608 : f32 to vector<8x256xf32>
    %1310 = arith.mulf %1309, %1293 : vector<8x256xf32>
    %1311 = arith.addf %1310, %1299 : vector<8x256xf32>
    %1312 = arith.extui %1306 : vector<8x256xi1> to vector<8x256xi32>
    %1313 = arith.sitofp %1312 : vector<8x256xi32> to vector<8x256xf32>
    %c120_609 = arith.constant 120 : index
    %c0_610 = arith.constant 0 : index
    %1314 = vector.load %arg15[%c120_609, %c0_610] : memref<192x256xf32, #tpu.memory_space<vmem>>, vector<8x256xf32>
    %cst_611 = arith.constant 0.899999976 : f32
    %1315 = vector.broadcast %cst_611 : f32 to vector<8x256xf32>
    %1316 = arith.mulf %1315, %1308 : vector<8x256xf32>
    %cst_612 = arith.constant 1.000000e-01 : f32
    %1317 = vector.broadcast %cst_612 : f32 to vector<8x256xf32>
    %1318 = arith.mulf %1317, %1311 : vector<8x256xf32>
    %1319 = arith.addf %1316, %1318 : vector<8x256xf32>
    %cst_613 = arith.constant 2.300000e-01 : f32
    %1320 = vector.broadcast %cst_613 : f32 to vector<8x256xf32>
    %1321 = arith.cmpf ogt, %1319, %1320 : vector<8x256xf32>
    %cst_614 = arith.constant 0.000000e+00 : f32
    %1322 = vector.broadcast %cst_614 : f32 to vector<8x256xf32>
    %1323 = arith.select %1321, %1322, %1319 : vector<8x256xi1>, vector<8x256xf32>
    %cst_615 = arith.constant 8.000000e-01 : f32
    %1324 = vector.broadcast %cst_615 : f32 to vector<8x256xf32>
    %1325 = arith.mulf %1324, %1311 : vector<8x256xf32>
    %1326 = arith.addf %1325, %1314 : vector<8x256xf32>
    %1327 = arith.extui %1321 : vector<8x256xi1> to vector<8x256xi32>
    %1328 = arith.sitofp %1327 : vector<8x256xi32> to vector<8x256xf32>
    %1329 = tpu.concatenate %1313, %1328 in 0 : vector<8x256xf32>, vector<8x256xf32> -> vector<16x256xf32>
    %1330 = arith.truncf %1329 : vector<16x256xf32> to vector<16x256xbf16>
    %c112_616 = arith.constant 112 : index
    %c0_617 = arith.constant 0 : index
    %1331 = vector.load %arg16[%c112_616, %c0_617] : memref<192x256xbf16, #tpu.memory_space<vmem>>, vector<16x256xbf16>
    tpu.vector_store %arg16[%c112_616, %c0_617], %1330 {strides = array<i32>} : memref<192x256xbf16, #tpu.memory_space<vmem>>, vector<16x256xbf16>,
    %c128_618 = arith.constant 128 : index
    %c0_619 = arith.constant 0 : index
    %1332 = vector.load %arg15[%c128_618, %c0_619] : memref<192x256xf32, #tpu.memory_space<vmem>>, vector<8x256xf32>
    %cst_620 = arith.constant 0.899999976 : f32
    %1333 = vector.broadcast %cst_620 : f32 to vector<8x256xf32>
    %1334 = arith.mulf %1333, %1323 : vector<8x256xf32>
    %cst_621 = arith.constant 1.000000e-01 : f32
    %1335 = vector.broadcast %cst_621 : f32 to vector<8x256xf32>
    %1336 = arith.mulf %1335, %1326 : vector<8x256xf32>
    %1337 = arith.addf %1334, %1336 : vector<8x256xf32>
    %cst_622 = arith.constant 2.300000e-01 : f32
    %1338 = vector.broadcast %cst_622 : f32 to vector<8x256xf32>
    %1339 = arith.cmpf ogt, %1337, %1338 : vector<8x256xf32>
    %cst_623 = arith.constant 0.000000e+00 : f32
    %1340 = vector.broadcast %cst_623 : f32 to vector<8x256xf32>
    %1341 = arith.select %1339, %1340, %1337 : vector<8x256xi1>, vector<8x256xf32>
    %cst_624 = arith.constant 8.000000e-01 : f32
    %1342 = vector.broadcast %cst_624 : f32 to vector<8x256xf32>
    %1343 = arith.mulf %1342, %1326 : vector<8x256xf32>
    %1344 = arith.addf %1343, %1332 : vector<8x256xf32>
    %1345 = arith.extui %1339 : vector<8x256xi1> to vector<8x256xi32>
    %1346 = arith.sitofp %1345 : vector<8x256xi32> to vector<8x256xf32>
    %c136_625 = arith.constant 136 : index
    %c0_626 = arith.constant 0 : index
    %1347 = vector.load %arg15[%c136_625, %c0_626] : memref<192x256xf32, #tpu.memory_space<vmem>>, vector<8x256xf32>
    %cst_627 = arith.constant 0.899999976 : f32
    %1348 = vector.broadcast %cst_627 : f32 to vector<8x256xf32>
    %1349 = arith.mulf %1348, %1341 : vector<8x256xf32>
    %cst_628 = arith.constant 1.000000e-01 : f32
    %1350 = vector.broadcast %cst_628 : f32 to vector<8x256xf32>
    %1351 = arith.mulf %1350, %1344 : vector<8x256xf32>
    %1352 = arith.addf %1349, %1351 : vector<8x256xf32>
    %cst_629 = arith.constant 2.300000e-01 : f32
    %1353 = vector.broadcast %cst_629 : f32 to vector<8x256xf32>
    %1354 = arith.cmpf ogt, %1352, %1353 : vector<8x256xf32>
    %cst_630 = arith.constant 0.000000e+00 : f32
    %1355 = vector.broadcast %cst_630 : f32 to vector<8x256xf32>
    %1356 = arith.select %1354, %1355, %1352 : vector<8x256xi1>, vector<8x256xf32>
    %cst_631 = arith.constant 8.000000e-01 : f32
    %1357 = vector.broadcast %cst_631 : f32 to vector<8x256xf32>
    %1358 = arith.mulf %1357, %1344 : vector<8x256xf32>
    %1359 = arith.addf %1358, %1347 : vector<8x256xf32>
    %1360 = arith.extui %1354 : vector<8x256xi1> to vector<8x256xi32>
    %1361 = arith.sitofp %1360 : vector<8x256xi32> to vector<8x256xf32>
    %1362 = tpu.concatenate %1346, %1361 in 0 : vector<8x256xf32>, vector<8x256xf32> -> vector<16x256xf32>
    %1363 = arith.truncf %1362 : vector<16x256xf32> to vector<16x256xbf16>
    %c128_632 = arith.constant 128 : index
    %c0_633 = arith.constant 0 : index
    %1364 = vector.load %arg16[%c128_632, %c0_633] : memref<192x256xbf16, #tpu.memory_space<vmem>>, vector<16x256xbf16>
    tpu.vector_store %arg16[%c128_632, %c0_633], %1363 {strides = array<i32>} : memref<192x256xbf16, #tpu.memory_space<vmem>>, vector<16x256xbf16>,
    %c144_634 = arith.constant 144 : index
    %c0_635 = arith.constant 0 : index
    %1365 = vector.load %arg15[%c144_634, %c0_635] : memref<192x256xf32, #tpu.memory_space<vmem>>, vector<8x256xf32>
    %cst_636 = arith.constant 0.899999976 : f32
    %1366 = vector.broadcast %cst_636 : f32 to vector<8x256xf32>
    %1367 = arith.mulf %1366, %1356 : vector<8x256xf32>
    %cst_637 = arith.constant 1.000000e-01 : f32
    %1368 = vector.broadcast %cst_637 : f32 to vector<8x256xf32>
    %1369 = arith.mulf %1368, %1359 : vector<8x256xf32>
    %1370 = arith.addf %1367, %1369 : vector<8x256xf32>
    %cst_638 = arith.constant 2.300000e-01 : f32
    %1371 = vector.broadcast %cst_638 : f32 to vector<8x256xf32>
    %1372 = arith.cmpf ogt, %1370, %1371 : vector<8x256xf32>
    %cst_639 = arith.constant 0.000000e+00 : f32
    %1373 = vector.broadcast %cst_639 : f32 to vector<8x256xf32>
    %1374 = arith.select %1372, %1373, %1370 : vector<8x256xi1>, vector<8x256xf32>
    %cst_640 = arith.constant 8.000000e-01 : f32
    %1375 = vector.broadcast %cst_640 : f32 to vector<8x256xf32>
    %1376 = arith.mulf %1375, %1359 : vector<8x256xf32>
    %1377 = arith.addf %1376, %1365 : vector<8x256xf32>
    %1378 = arith.extui %1372 : vector<8x256xi1> to vector<8x256xi32>
    %1379 = arith.sitofp %1378 : vector<8x256xi32> to vector<8x256xf32>
    %c152_641 = arith.constant 152 : index
    %c0_642 = arith.constant 0 : index
    %1380 = vector.load %arg15[%c152_641, %c0_642] : memref<192x256xf32, #tpu.memory_space<vmem>>, vector<8x256xf32>
    %cst_643 = arith.constant 0.899999976 : f32
    %1381 = vector.broadcast %cst_643 : f32 to vector<8x256xf32>
    %1382 = arith.mulf %1381, %1374 : vector<8x256xf32>
    %cst_644 = arith.constant 1.000000e-01 : f32
    %1383 = vector.broadcast %cst_644 : f32 to vector<8x256xf32>
    %1384 = arith.mulf %1383, %1377 : vector<8x256xf32>
    %1385 = arith.addf %1382, %1384 : vector<8x256xf32>
    %cst_645 = arith.constant 2.300000e-01 : f32
    %1386 = vector.broadcast %cst_645 : f32 to vector<8x256xf32>
    %1387 = arith.cmpf ogt, %1385, %1386 : vector<8x256xf32>
    %cst_646 = arith.constant 0.000000e+00 : f32
    %1388 = vector.broadcast %cst_646 : f32 to vector<8x256xf32>
    %1389 = arith.select %1387, %1388, %1385 : vector<8x256xi1>, vector<8x256xf32>
    %cst_647 = arith.constant 8.000000e-01 : f32
    %1390 = vector.broadcast %cst_647 : f32 to vector<8x256xf32>
    %1391 = arith.mulf %1390, %1377 : vector<8x256xf32>
    %1392 = arith.addf %1391, %1380 : vector<8x256xf32>
    %1393 = arith.extui %1387 : vector<8x256xi1> to vector<8x256xi32>
    %1394 = arith.sitofp %1393 : vector<8x256xi32> to vector<8x256xf32>
    %1395 = tpu.concatenate %1379, %1394 in 0 : vector<8x256xf32>, vector<8x256xf32> -> vector<16x256xf32>
    %1396 = arith.truncf %1395 : vector<16x256xf32> to vector<16x256xbf16>
    %c144_648 = arith.constant 144 : index
    %c0_649 = arith.constant 0 : index
    %1397 = vector.load %arg16[%c144_648, %c0_649] : memref<192x256xbf16, #tpu.memory_space<vmem>>, vector<16x256xbf16>
    tpu.vector_store %arg16[%c144_648, %c0_649], %1396 {strides = array<i32>} : memref<192x256xbf16, #tpu.memory_space<vmem>>, vector<16x256xbf16>,
    %c160_650 = arith.constant 160 : index
    %c0_651 = arith.constant 0 : index
    %1398 = vector.load %arg15[%c160_650, %c0_651] : memref<192x256xf32, #tpu.memory_space<vmem>>, vector<8x256xf32>
    %cst_652 = arith.constant 0.899999976 : f32
    %1399 = vector.broadcast %cst_652 : f32 to vector<8x256xf32>
    %1400 = arith.mulf %1399, %1389 : vector<8x256xf32>
    %cst_653 = arith.constant 1.000000e-01 : f32
    %1401 = vector.broadcast %cst_653 : f32 to vector<8x256xf32>
    %1402 = arith.mulf %1401, %1392 : vector<8x256xf32>
    %1403 = arith.addf %1400, %1402 : vector<8x256xf32>
    %cst_654 = arith.constant 2.300000e-01 : f32
    %1404 = vector.broadcast %cst_654 : f32 to vector<8x256xf32>
    %1405 = arith.cmpf ogt, %1403, %1404 : vector<8x256xf32>
    %cst_655 = arith.constant 0.000000e+00 : f32
    %1406 = vector.broadcast %cst_655 : f32 to vector<8x256xf32>
    %1407 = arith.select %1405, %1406, %1403 : vector<8x256xi1>, vector<8x256xf32>
    %cst_656 = arith.constant 8.000000e-01 : f32
    %1408 = vector.broadcast %cst_656 : f32 to vector<8x256xf32>
    %1409 = arith.mulf %1408, %1392 : vector<8x256xf32>
    %1410 = arith.addf %1409, %1398 : vector<8x256xf32>
    %1411 = arith.extui %1405 : vector<8x256xi1> to vector<8x256xi32>
    %1412 = arith.sitofp %1411 : vector<8x256xi32> to vector<8x256xf32>
    %c168_657 = arith.constant 168 : index
    %c0_658 = arith.constant 0 : index
    %1413 = vector.load %arg15[%c168_657, %c0_658] : memref<192x256xf32, #tpu.memory_space<vmem>>, vector<8x256xf32>
    %cst_659 = arith.constant 0.899999976 : f32
    %1414 = vector.broadcast %cst_659 : f32 to vector<8x256xf32>
    %1415 = arith.mulf %1414, %1407 : vector<8x256xf32>
    %cst_660 = arith.constant 1.000000e-01 : f32
    %1416 = vector.broadcast %cst_660 : f32 to vector<8x256xf32>
    %1417 = arith.mulf %1416, %1410 : vector<8x256xf32>
    %1418 = arith.addf %1415, %1417 : vector<8x256xf32>
    %cst_661 = arith.constant 2.300000e-01 : f32
    %1419 = vector.broadcast %cst_661 : f32 to vector<8x256xf32>
    %1420 = arith.cmpf ogt, %1418, %1419 : vector<8x256xf32>
    %cst_662 = arith.constant 0.000000e+00 : f32
    %1421 = vector.broadcast %cst_662 : f32 to vector<8x256xf32>
    %1422 = arith.select %1420, %1421, %1418 : vector<8x256xi1>, vector<8x256xf32>
    %cst_663 = arith.constant 8.000000e-01 : f32
    %1423 = vector.broadcast %cst_663 : f32 to vector<8x256xf32>
    %1424 = arith.mulf %1423, %1410 : vector<8x256xf32>
    %1425 = arith.addf %1424, %1413 : vector<8x256xf32>
    %1426 = arith.extui %1420 : vector<8x256xi1> to vector<8x256xi32>
    %1427 = arith.sitofp %1426 : vector<8x256xi32> to vector<8x256xf32>
    %1428 = tpu.concatenate %1412, %1427 in 0 : vector<8x256xf32>, vector<8x256xf32> -> vector<16x256xf32>
    %1429 = arith.truncf %1428 : vector<16x256xf32> to vector<16x256xbf16>
    %c160_664 = arith.constant 160 : index
    %c0_665 = arith.constant 0 : index
    %1430 = vector.load %arg16[%c160_664, %c0_665] : memref<192x256xbf16, #tpu.memory_space<vmem>>, vector<16x256xbf16>
    tpu.vector_store %arg16[%c160_664, %c0_665], %1429 {strides = array<i32>} : memref<192x256xbf16, #tpu.memory_space<vmem>>, vector<16x256xbf16>,
    %c176_666 = arith.constant 176 : index
    %c0_667 = arith.constant 0 : index
    %1431 = vector.load %arg15[%c176_666, %c0_667] : memref<192x256xf32, #tpu.memory_space<vmem>>, vector<8x256xf32>
    %cst_668 = arith.constant 0.899999976 : f32
    %1432 = vector.broadcast %cst_668 : f32 to vector<8x256xf32>
    %1433 = arith.mulf %1432, %1422 : vector<8x256xf32>
    %cst_669 = arith.constant 1.000000e-01 : f32
    %1434 = vector.broadcast %cst_669 : f32 to vector<8x256xf32>
    %1435 = arith.mulf %1434, %1425 : vector<8x256xf32>
    %1436 = arith.addf %1433, %1435 : vector<8x256xf32>
    %cst_670 = arith.constant 2.300000e-01 : f32
    %1437 = vector.broadcast %cst_670 : f32 to vector<8x256xf32>
    %1438 = arith.cmpf ogt, %1436, %1437 : vector<8x256xf32>
    %cst_671 = arith.constant 0.000000e+00 : f32
    %1439 = vector.broadcast %cst_671 : f32 to vector<8x256xf32>
    %1440 = arith.select %1438, %1439, %1436 : vector<8x256xi1>, vector<8x256xf32>
    %cst_672 = arith.constant 8.000000e-01 : f32
    %1441 = vector.broadcast %cst_672 : f32 to vector<8x256xf32>
    %1442 = arith.mulf %1441, %1425 : vector<8x256xf32>
    %1443 = arith.addf %1442, %1431 : vector<8x256xf32>
    %1444 = arith.extui %1438 : vector<8x256xi1> to vector<8x256xi32>
    %1445 = arith.sitofp %1444 : vector<8x256xi32> to vector<8x256xf32>
    %cst_673 = arith.constant 0.899999976 : f32
    %1446 = vector.broadcast %cst_673 : f32 to vector<8x256xf32>
    %1447 = arith.mulf %1446, %1440 : vector<8x256xf32>
    %cst_674 = arith.constant 1.000000e-01 : f32
    %1448 = vector.broadcast %cst_674 : f32 to vector<8x256xf32>
    %1449 = arith.mulf %1448, %1443 : vector<8x256xf32>
    %1450 = arith.addf %1447, %1449 : vector<8x256xf32>
    %cst_675 = arith.constant 2.300000e-01 : f32
    %1451 = vector.broadcast %cst_675 : f32 to vector<8x256xf32>
    %1452 = arith.cmpf ogt, %1450, %1451 : vector<8x256xf32>
    %1453 = arith.extui %1452 : vector<8x256xi1> to vector<8x256xi32>
    %1454 = arith.sitofp %1453 : vector<8x256xi32> to vector<8x256xf32>
    %1455 = tpu.concatenate %1445, %1454 in 0 : vector<8x256xf32>, vector<8x256xf32> -> vector<16x256xf32>
    %1456 = arith.truncf %1455 : vector<16x256xf32> to vector<16x256xbf16>
    %c176_676 = arith.constant 176 : index
    %c0_677 = arith.constant 0 : index
    %1457 = vector.load %arg16[%c176_676, %c0_677] : memref<192x256xbf16, #tpu.memory_space<vmem>>, vector<16x256xbf16>
    tpu.vector_store %arg16[%c176_676, %c0_677], %1456 {strides = array<i32>} : memref<192x256xbf16, #tpu.memory_space<vmem>>, vector<16x256xbf16>,
    %c0_678 = arith.constant 0 : index
    %c0_679 = arith.constant 0 : index
    %1458 = vector.load %arg16[%c0_678, %c0_679] : memref<192x256xbf16, #tpu.memory_space<vmem>>, vector<192x256xbf16>
    %1459 = arith.extf %1458 : vector<192x256xbf16> to vector<192x256xf32>
    %c0_680 = arith.constant 0 : index
    %c0_681 = arith.constant 0 : index
    %1460 = vector.load %arg14[%c0_680, %c0_681] : memref<192x256xbf16, #tpu.memory_space<vmem>>, vector<192x256xbf16>
    %1461 = arith.extf %1460 : vector<192x256xbf16> to vector<192x256xf32>
    %1462 = arith.addf %1459, %1461 : vector<192x256xf32>
    %1463 = arith.truncf %1462 : vector<192x256xf32> to vector<192x256xbf16>
    %c0_682 = arith.constant 0 : index
    %c0_683 = arith.constant 0 : index
    %1464 = vector.load %arg16[%c0_682, %c0_683] : memref<192x256xbf16, #tpu.memory_space<vmem>>, vector<192x256xbf16>
    tpu.vector_store %arg16[%c0_682, %c0_683], %1463 {strides = array<i32>} : memref<192x256xbf16, #tpu.memory_space<vmem>>, vector<192x256xbf16>,
    %c0_684 = arith.constant 0 : index
    %c0_685 = arith.constant 0 : index
    %1465 = vector.load %arg16[%c0_684, %c0_685] : memref<192x256xbf16, #tpu.memory_space<vmem>>, vector<192x256xbf16>
    %c0_686 = arith.constant 0 : index
    %c0_687 = arith.constant 0 : index
    %1466 = vector.load %arg8[%c0_686, %c0_687] : memref<256x128xbf16, #tpu.memory_space<vmem>>, vector<256x128xbf16>
    %cst_688 = arith.constant dense<0.000000e+00> : vector<192x128xf32>
    %1467 = tpu.matmul %1465, %1466, %cst_688 {dimension_numbers = #tpu.dot_dimension_numbers<[1], [0], [0], [1], [0, 0, 1, 1], [], []>} : vector<192x256xbf16>, vector<256x128xbf16>, vector<192x128xf32> -> vector<192x128xf32>
    %c0_689 = arith.constant 0 : index
    %c0_690 = arith.constant 0 : index
    %1468 = vector.load %arg17[%c0_689, %c0_690] : memref<192x128xf32, #tpu.memory_space<vmem>>, vector<192x128xf32>
    tpu.vector_store %arg17[%c0_689, %c0_690], %1467 {strides = array<i32>} : memref<192x128xf32, #tpu.memory_space<vmem>>, vector<192x128xf32>,
    %cst_691 = arith.constant 0.000000e+00 : f32
    %1469 = vector.broadcast %cst_691 : f32 to vector<8x128xf32>
    %cst_692 = arith.constant 0.000000e+00 : f32
    %1470 = vector.broadcast %cst_692 : f32 to vector<8x128xf32>
    %c0_693 = arith.constant 0 : index
    %c0_694 = arith.constant 0 : index
    %1471 = vector.load %arg17[%c0_693, %c0_694] : memref<192x128xf32, #tpu.memory_space<vmem>>, vector<8x128xf32>
    %1472 = arith.addf %1470, %1471 : vector<8x128xf32>
    %cst_695 = arith.constant 0.899999976 : f32
    %1473 = vector.broadcast %cst_695 : f32 to vector<8x128xf32>
    %1474 = arith.mulf %1473, %1469 : vector<8x128xf32>
    %cst_696 = arith.constant 1.000000e-01 : f32
    %1475 = vector.broadcast %cst_696 : f32 to vector<8x128xf32>
    %1476 = arith.mulf %1475, %1472 : vector<8x128xf32>
    %1477 = arith.addf %1474, %1476 : vector<8x128xf32>
    %cst_697 = arith.constant 8.000000e-01 : f32
    %1478 = vector.broadcast %cst_697 : f32 to vector<8x128xf32>
    %1479 = arith.mulf %1478, %1472 : vector<8x128xf32>
    %c8_698 = arith.constant 8 : index
    %c0_699 = arith.constant 0 : index
    %1480 = vector.load %arg17[%c8_698, %c0_699] : memref<192x128xf32, #tpu.memory_space<vmem>>, vector<8x128xf32>
    %1481 = arith.addf %1479, %1480 : vector<8x128xf32>
    %cst_700 = arith.constant 0.899999976 : f32
    %1482 = vector.broadcast %cst_700 : f32 to vector<8x128xf32>
    %1483 = arith.mulf %1482, %1477 : vector<8x128xf32>
    %cst_701 = arith.constant 1.000000e-01 : f32
    %1484 = vector.broadcast %cst_701 : f32 to vector<8x128xf32>
    %1485 = arith.mulf %1484, %1481 : vector<8x128xf32>
    %1486 = arith.addf %1483, %1485 : vector<8x128xf32>
    %cst_702 = arith.constant 8.000000e-01 : f32
    %1487 = vector.broadcast %cst_702 : f32 to vector<8x128xf32>
    %1488 = arith.mulf %1487, %1481 : vector<8x128xf32>
    %c16_703 = arith.constant 16 : index
    %c0_704 = arith.constant 0 : index
    %1489 = vector.load %arg17[%c16_703, %c0_704] : memref<192x128xf32, #tpu.memory_space<vmem>>, vector<8x128xf32>
    %1490 = arith.addf %1488, %1489 : vector<8x128xf32>
    %cst_705 = arith.constant 0.899999976 : f32
    %1491 = vector.broadcast %cst_705 : f32 to vector<8x128xf32>
    %1492 = arith.mulf %1491, %1486 : vector<8x128xf32>
    %cst_706 = arith.constant 1.000000e-01 : f32
    %1493 = vector.broadcast %cst_706 : f32 to vector<8x128xf32>
    %1494 = arith.mulf %1493, %1490 : vector<8x128xf32>
    %1495 = arith.addf %1492, %1494 : vector<8x128xf32>
    %cst_707 = arith.constant 8.000000e-01 : f32
    %1496 = vector.broadcast %cst_707 : f32 to vector<8x128xf32>
    %1497 = arith.mulf %1496, %1490 : vector<8x128xf32>
    %c24_708 = arith.constant 24 : index
    %c0_709 = arith.constant 0 : index
    %1498 = vector.load %arg17[%c24_708, %c0_709] : memref<192x128xf32, #tpu.memory_space<vmem>>, vector<8x128xf32>
    %1499 = arith.addf %1497, %1498 : vector<8x128xf32>
    %cst_710 = arith.constant 0.899999976 : f32
    %1500 = vector.broadcast %cst_710 : f32 to vector<8x128xf32>
    %1501 = arith.mulf %1500, %1495 : vector<8x128xf32>
    %cst_711 = arith.constant 1.000000e-01 : f32
    %1502 = vector.broadcast %cst_711 : f32 to vector<8x128xf32>
    %1503 = arith.mulf %1502, %1499 : vector<8x128xf32>
    %1504 = arith.addf %1501, %1503 : vector<8x128xf32>
    %cst_712 = arith.constant 8.000000e-01 : f32
    %1505 = vector.broadcast %cst_712 : f32 to vector<8x128xf32>
    %1506 = arith.mulf %1505, %1499 : vector<8x128xf32>
    %c32_713 = arith.constant 32 : index
    %c0_714 = arith.constant 0 : index
    %1507 = vector.load %arg17[%c32_713, %c0_714] : memref<192x128xf32, #tpu.memory_space<vmem>>, vector<8x128xf32>
    %1508 = arith.addf %1506, %1507 : vector<8x128xf32>
    %cst_715 = arith.constant 0.899999976 : f32
    %1509 = vector.broadcast %cst_715 : f32 to vector<8x128xf32>
    %1510 = arith.mulf %1509, %1504 : vector<8x128xf32>
    %cst_716 = arith.constant 1.000000e-01 : f32
    %1511 = vector.broadcast %cst_716 : f32 to vector<8x128xf32>
    %1512 = arith.mulf %1511, %1508 : vector<8x128xf32>
    %1513 = arith.addf %1510, %1512 : vector<8x128xf32>
    %cst_717 = arith.constant 8.000000e-01 : f32
    %1514 = vector.broadcast %cst_717 : f32 to vector<8x128xf32>
    %1515 = arith.mulf %1514, %1508 : vector<8x128xf32>
    %c40_718 = arith.constant 40 : index
    %c0_719 = arith.constant 0 : index
    %1516 = vector.load %arg17[%c40_718, %c0_719] : memref<192x128xf32, #tpu.memory_space<vmem>>, vector<8x128xf32>
    %1517 = arith.addf %1515, %1516 : vector<8x128xf32>
    %cst_720 = arith.constant 0.899999976 : f32
    %1518 = vector.broadcast %cst_720 : f32 to vector<8x128xf32>
    %1519 = arith.mulf %1518, %1513 : vector<8x128xf32>
    %cst_721 = arith.constant 1.000000e-01 : f32
    %1520 = vector.broadcast %cst_721 : f32 to vector<8x128xf32>
    %1521 = arith.mulf %1520, %1517 : vector<8x128xf32>
    %1522 = arith.addf %1519, %1521 : vector<8x128xf32>
    %cst_722 = arith.constant 8.000000e-01 : f32
    %1523 = vector.broadcast %cst_722 : f32 to vector<8x128xf32>
    %1524 = arith.mulf %1523, %1517 : vector<8x128xf32>
    %c48_723 = arith.constant 48 : index
    %c0_724 = arith.constant 0 : index
    %1525 = vector.load %arg17[%c48_723, %c0_724] : memref<192x128xf32, #tpu.memory_space<vmem>>, vector<8x128xf32>
    %1526 = arith.addf %1524, %1525 : vector<8x128xf32>
    %cst_725 = arith.constant 0.899999976 : f32
    %1527 = vector.broadcast %cst_725 : f32 to vector<8x128xf32>
    %1528 = arith.mulf %1527, %1522 : vector<8x128xf32>
    %cst_726 = arith.constant 1.000000e-01 : f32
    %1529 = vector.broadcast %cst_726 : f32 to vector<8x128xf32>
    %1530 = arith.mulf %1529, %1526 : vector<8x128xf32>
    %1531 = arith.addf %1528, %1530 : vector<8x128xf32>
    %cst_727 = arith.constant 8.000000e-01 : f32
    %1532 = vector.broadcast %cst_727 : f32 to vector<8x128xf32>
    %1533 = arith.mulf %1532, %1526 : vector<8x128xf32>
    %c56_728 = arith.constant 56 : index
    %c0_729 = arith.constant 0 : index
    %1534 = vector.load %arg17[%c56_728, %c0_729] : memref<192x128xf32, #tpu.memory_space<vmem>>, vector<8x128xf32>
    %1535 = arith.addf %1533, %1534 : vector<8x128xf32>
    %cst_730 = arith.constant 0.899999976 : f32
    %1536 = vector.broadcast %cst_730 : f32 to vector<8x128xf32>
    %1537 = arith.mulf %1536, %1531 : vector<8x128xf32>
    %cst_731 = arith.constant 1.000000e-01 : f32
    %1538 = vector.broadcast %cst_731 : f32 to vector<8x128xf32>
    %1539 = arith.mulf %1538, %1535 : vector<8x128xf32>
    %1540 = arith.addf %1537, %1539 : vector<8x128xf32>
    %cst_732 = arith.constant 8.000000e-01 : f32
    %1541 = vector.broadcast %cst_732 : f32 to vector<8x128xf32>
    %1542 = arith.mulf %1541, %1535 : vector<8x128xf32>
    %c64_733 = arith.constant 64 : index
    %c0_734 = arith.constant 0 : index
    %1543 = vector.load %arg17[%c64_733, %c0_734] : memref<192x128xf32, #tpu.memory_space<vmem>>, vector<8x128xf32>
    %1544 = arith.addf %1542, %1543 : vector<8x128xf32>
    %cst_735 = arith.constant 0.899999976 : f32
    %1545 = vector.broadcast %cst_735 : f32 to vector<8x128xf32>
    %1546 = arith.mulf %1545, %1540 : vector<8x128xf32>
    %cst_736 = arith.constant 1.000000e-01 : f32
    %1547 = vector.broadcast %cst_736 : f32 to vector<8x128xf32>
    %1548 = arith.mulf %1547, %1544 : vector<8x128xf32>
    %1549 = arith.addf %1546, %1548 : vector<8x128xf32>
    %cst_737 = arith.constant 8.000000e-01 : f32
    %1550 = vector.broadcast %cst_737 : f32 to vector<8x128xf32>
    %1551 = arith.mulf %1550, %1544 : vector<8x128xf32>
    %c72_738 = arith.constant 72 : index
    %c0_739 = arith.constant 0 : index
    %1552 = vector.load %arg17[%c72_738, %c0_739] : memref<192x128xf32, #tpu.memory_space<vmem>>, vector<8x128xf32>
    %1553 = arith.addf %1551, %1552 : vector<8x128xf32>
    %cst_740 = arith.constant 0.899999976 : f32
    %1554 = vector.broadcast %cst_740 : f32 to vector<8x128xf32>
    %1555 = arith.mulf %1554, %1549 : vector<8x128xf32>
    %cst_741 = arith.constant 1.000000e-01 : f32
    %1556 = vector.broadcast %cst_741 : f32 to vector<8x128xf32>
    %1557 = arith.mulf %1556, %1553 : vector<8x128xf32>
    %1558 = arith.addf %1555, %1557 : vector<8x128xf32>
    %cst_742 = arith.constant 8.000000e-01 : f32
    %1559 = vector.broadcast %cst_742 : f32 to vector<8x128xf32>
    %1560 = arith.mulf %1559, %1553 : vector<8x128xf32>
    %c80_743 = arith.constant 80 : index
    %c0_744 = arith.constant 0 : index
    %1561 = vector.load %arg17[%c80_743, %c0_744] : memref<192x128xf32, #tpu.memory_space<vmem>>, vector<8x128xf32>
    %1562 = arith.addf %1560, %1561 : vector<8x128xf32>
    %cst_745 = arith.constant 0.899999976 : f32
    %1563 = vector.broadcast %cst_745 : f32 to vector<8x128xf32>
    %1564 = arith.mulf %1563, %1558 : vector<8x128xf32>
    %cst_746 = arith.constant 1.000000e-01 : f32
    %1565 = vector.broadcast %cst_746 : f32 to vector<8x128xf32>
    %1566 = arith.mulf %1565, %1562 : vector<8x128xf32>
    %1567 = arith.addf %1564, %1566 : vector<8x128xf32>
    %cst_747 = arith.constant 8.000000e-01 : f32
    %1568 = vector.broadcast %cst_747 : f32 to vector<8x128xf32>
    %1569 = arith.mulf %1568, %1562 : vector<8x128xf32>
    %c88_748 = arith.constant 88 : index
    %c0_749 = arith.constant 0 : index
    %1570 = vector.load %arg17[%c88_748, %c0_749] : memref<192x128xf32, #tpu.memory_space<vmem>>, vector<8x128xf32>
    %1571 = arith.addf %1569, %1570 : vector<8x128xf32>
    %cst_750 = arith.constant 0.899999976 : f32
    %1572 = vector.broadcast %cst_750 : f32 to vector<8x128xf32>
    %1573 = arith.mulf %1572, %1567 : vector<8x128xf32>
    %cst_751 = arith.constant 1.000000e-01 : f32
    %1574 = vector.broadcast %cst_751 : f32 to vector<8x128xf32>
    %1575 = arith.mulf %1574, %1571 : vector<8x128xf32>
    %1576 = arith.addf %1573, %1575 : vector<8x128xf32>
    %cst_752 = arith.constant 8.000000e-01 : f32
    %1577 = vector.broadcast %cst_752 : f32 to vector<8x128xf32>
    %1578 = arith.mulf %1577, %1571 : vector<8x128xf32>
    %c96_753 = arith.constant 96 : index
    %c0_754 = arith.constant 0 : index
    %1579 = vector.load %arg17[%c96_753, %c0_754] : memref<192x128xf32, #tpu.memory_space<vmem>>, vector<8x128xf32>
    %1580 = arith.addf %1578, %1579 : vector<8x128xf32>
    %cst_755 = arith.constant 0.899999976 : f32
    %1581 = vector.broadcast %cst_755 : f32 to vector<8x128xf32>
    %1582 = arith.mulf %1581, %1576 : vector<8x128xf32>
    %cst_756 = arith.constant 1.000000e-01 : f32
    %1583 = vector.broadcast %cst_756 : f32 to vector<8x128xf32>
    %1584 = arith.mulf %1583, %1580 : vector<8x128xf32>
    %1585 = arith.addf %1582, %1584 : vector<8x128xf32>
    %cst_757 = arith.constant 8.000000e-01 : f32
    %1586 = vector.broadcast %cst_757 : f32 to vector<8x128xf32>
    %1587 = arith.mulf %1586, %1580 : vector<8x128xf32>
    %c104_758 = arith.constant 104 : index
    %c0_759 = arith.constant 0 : index
    %1588 = vector.load %arg17[%c104_758, %c0_759] : memref<192x128xf32, #tpu.memory_space<vmem>>, vector<8x128xf32>
    %1589 = arith.addf %1587, %1588 : vector<8x128xf32>
    %cst_760 = arith.constant 0.899999976 : f32
    %1590 = vector.broadcast %cst_760 : f32 to vector<8x128xf32>
    %1591 = arith.mulf %1590, %1585 : vector<8x128xf32>
    %cst_761 = arith.constant 1.000000e-01 : f32
    %1592 = vector.broadcast %cst_761 : f32 to vector<8x128xf32>
    %1593 = arith.mulf %1592, %1589 : vector<8x128xf32>
    %1594 = arith.addf %1591, %1593 : vector<8x128xf32>
    %cst_762 = arith.constant 8.000000e-01 : f32
    %1595 = vector.broadcast %cst_762 : f32 to vector<8x128xf32>
    %1596 = arith.mulf %1595, %1589 : vector<8x128xf32>
    %c112_763 = arith.constant 112 : index
    %c0_764 = arith.constant 0 : index
    %1597 = vector.load %arg17[%c112_763, %c0_764] : memref<192x128xf32, #tpu.memory_space<vmem>>, vector<8x128xf32>
    %1598 = arith.addf %1596, %1597 : vector<8x128xf32>
    %cst_765 = arith.constant 0.899999976 : f32
    %1599 = vector.broadcast %cst_765 : f32 to vector<8x128xf32>
    %1600 = arith.mulf %1599, %1594 : vector<8x128xf32>
    %cst_766 = arith.constant 1.000000e-01 : f32
    %1601 = vector.broadcast %cst_766 : f32 to vector<8x128xf32>
    %1602 = arith.mulf %1601, %1598 : vector<8x128xf32>
    %1603 = arith.addf %1600, %1602 : vector<8x128xf32>
    %cst_767 = arith.constant 8.000000e-01 : f32
    %1604 = vector.broadcast %cst_767 : f32 to vector<8x128xf32>
    %1605 = arith.mulf %1604, %1598 : vector<8x128xf32>
    %c120_768 = arith.constant 120 : index
    %c0_769 = arith.constant 0 : index
    %1606 = vector.load %arg17[%c120_768, %c0_769] : memref<192x128xf32, #tpu.memory_space<vmem>>, vector<8x128xf32>
    %1607 = arith.addf %1605, %1606 : vector<8x128xf32>
    %cst_770 = arith.constant 0.899999976 : f32
    %1608 = vector.broadcast %cst_770 : f32 to vector<8x128xf32>
    %1609 = arith.mulf %1608, %1603 : vector<8x128xf32>
    %cst_771 = arith.constant 1.000000e-01 : f32
    %1610 = vector.broadcast %cst_771 : f32 to vector<8x128xf32>
    %1611 = arith.mulf %1610, %1607 : vector<8x128xf32>
    %1612 = arith.addf %1609, %1611 : vector<8x128xf32>
    %cst_772 = arith.constant 8.000000e-01 : f32
    %1613 = vector.broadcast %cst_772 : f32 to vector<8x128xf32>
    %1614 = arith.mulf %1613, %1607 : vector<8x128xf32>
    %c128_773 = arith.constant 128 : index
    %c0_774 = arith.constant 0 : index
    %1615 = vector.load %arg17[%c128_773, %c0_774] : memref<192x128xf32, #tpu.memory_space<vmem>>, vector<8x128xf32>
    %1616 = arith.addf %1614, %1615 : vector<8x128xf32>
    %cst_775 = arith.constant 0.899999976 : f32
    %1617 = vector.broadcast %cst_775 : f32 to vector<8x128xf32>
    %1618 = arith.mulf %1617, %1612 : vector<8x128xf32>
    %cst_776 = arith.constant 1.000000e-01 : f32
    %1619 = vector.broadcast %cst_776 : f32 to vector<8x128xf32>
    %1620 = arith.mulf %1619, %1616 : vector<8x128xf32>
    %1621 = arith.addf %1618, %1620 : vector<8x128xf32>
    %cst_777 = arith.constant 8.000000e-01 : f32
    %1622 = vector.broadcast %cst_777 : f32 to vector<8x128xf32>
    %1623 = arith.mulf %1622, %1616 : vector<8x128xf32>
    %c136_778 = arith.constant 136 : index
    %c0_779 = arith.constant 0 : index
    %1624 = vector.load %arg17[%c136_778, %c0_779] : memref<192x128xf32, #tpu.memory_space<vmem>>, vector<8x128xf32>
    %1625 = arith.addf %1623, %1624 : vector<8x128xf32>
    %cst_780 = arith.constant 0.899999976 : f32
    %1626 = vector.broadcast %cst_780 : f32 to vector<8x128xf32>
    %1627 = arith.mulf %1626, %1621 : vector<8x128xf32>
    %cst_781 = arith.constant 1.000000e-01 : f32
    %1628 = vector.broadcast %cst_781 : f32 to vector<8x128xf32>
    %1629 = arith.mulf %1628, %1625 : vector<8x128xf32>
    %1630 = arith.addf %1627, %1629 : vector<8x128xf32>
    %cst_782 = arith.constant 8.000000e-01 : f32
    %1631 = vector.broadcast %cst_782 : f32 to vector<8x128xf32>
    %1632 = arith.mulf %1631, %1625 : vector<8x128xf32>
    %c144_783 = arith.constant 144 : index
    %c0_784 = arith.constant 0 : index
    %1633 = vector.load %arg17[%c144_783, %c0_784] : memref<192x128xf32, #tpu.memory_space<vmem>>, vector<8x128xf32>
    %1634 = arith.addf %1632, %1633 : vector<8x128xf32>
    %cst_785 = arith.constant 0.899999976 : f32
    %1635 = vector.broadcast %cst_785 : f32 to vector<8x128xf32>
    %1636 = arith.mulf %1635, %1630 : vector<8x128xf32>
    %cst_786 = arith.constant 1.000000e-01 : f32
    %1637 = vector.broadcast %cst_786 : f32 to vector<8x128xf32>
    %1638 = arith.mulf %1637, %1634 : vector<8x128xf32>
    %1639 = arith.addf %1636, %1638 : vector<8x128xf32>
    %cst_787 = arith.constant 8.000000e-01 : f32
    %1640 = vector.broadcast %cst_787 : f32 to vector<8x128xf32>
    %1641 = arith.mulf %1640, %1634 : vector<8x128xf32>
    %c152_788 = arith.constant 152 : index
    %c0_789 = arith.constant 0 : index
    %1642 = vector.load %arg17[%c152_788, %c0_789] : memref<192x128xf32, #tpu.memory_space<vmem>>, vector<8x128xf32>
    %1643 = arith.addf %1641, %1642 : vector<8x128xf32>
    %cst_790 = arith.constant 0.899999976 : f32
    %1644 = vector.broadcast %cst_790 : f32 to vector<8x128xf32>
    %1645 = arith.mulf %1644, %1639 : vector<8x128xf32>
    %cst_791 = arith.constant 1.000000e-01 : f32
    %1646 = vector.broadcast %cst_791 : f32 to vector<8x128xf32>
    %1647 = arith.mulf %1646, %1643 : vector<8x128xf32>
    %1648 = arith.addf %1645, %1647 : vector<8x128xf32>
    %cst_792 = arith.constant 8.000000e-01 : f32
    %1649 = vector.broadcast %cst_792 : f32 to vector<8x128xf32>
    %1650 = arith.mulf %1649, %1643 : vector<8x128xf32>
    %c160_793 = arith.constant 160 : index
    %c0_794 = arith.constant 0 : index
    %1651 = vector.load %arg17[%c160_793, %c0_794] : memref<192x128xf32, #tpu.memory_space<vmem>>, vector<8x128xf32>
    %1652 = arith.addf %1650, %1651 : vector<8x128xf32>
    %cst_795 = arith.constant 0.899999976 : f32
    %1653 = vector.broadcast %cst_795 : f32 to vector<8x128xf32>
    %1654 = arith.mulf %1653, %1648 : vector<8x128xf32>
    %cst_796 = arith.constant 1.000000e-01 : f32
    %1655 = vector.broadcast %cst_796 : f32 to vector<8x128xf32>
    %1656 = arith.mulf %1655, %1652 : vector<8x128xf32>
    %1657 = arith.addf %1654, %1656 : vector<8x128xf32>
    %cst_797 = arith.constant 8.000000e-01 : f32
    %1658 = vector.broadcast %cst_797 : f32 to vector<8x128xf32>
    %1659 = arith.mulf %1658, %1652 : vector<8x128xf32>
    %c168_798 = arith.constant 168 : index
    %c0_799 = arith.constant 0 : index
    %1660 = vector.load %arg17[%c168_798, %c0_799] : memref<192x128xf32, #tpu.memory_space<vmem>>, vector<8x128xf32>
    %1661 = arith.addf %1659, %1660 : vector<8x128xf32>
    %cst_800 = arith.constant 0.899999976 : f32
    %1662 = vector.broadcast %cst_800 : f32 to vector<8x128xf32>
    %1663 = arith.mulf %1662, %1657 : vector<8x128xf32>
    %cst_801 = arith.constant 1.000000e-01 : f32
    %1664 = vector.broadcast %cst_801 : f32 to vector<8x128xf32>
    %1665 = arith.mulf %1664, %1661 : vector<8x128xf32>
    %1666 = arith.addf %1663, %1665 : vector<8x128xf32>
    %cst_802 = arith.constant 8.000000e-01 : f32
    %1667 = vector.broadcast %cst_802 : f32 to vector<8x128xf32>
    %1668 = arith.mulf %1667, %1661 : vector<8x128xf32>
    %c176_803 = arith.constant 176 : index
    %c0_804 = arith.constant 0 : index
    %1669 = vector.load %arg17[%c176_803, %c0_804] : memref<192x128xf32, #tpu.memory_space<vmem>>, vector<8x128xf32>
    %1670 = arith.addf %1668, %1669 : vector<8x128xf32>
    %cst_805 = arith.constant 0.899999976 : f32
    %1671 = vector.broadcast %cst_805 : f32 to vector<8x128xf32>
    %1672 = arith.mulf %1671, %1666 : vector<8x128xf32>
    %cst_806 = arith.constant 1.000000e-01 : f32
    %1673 = vector.broadcast %cst_806 : f32 to vector<8x128xf32>
    %1674 = arith.mulf %1673, %1670 : vector<8x128xf32>
    %1675 = arith.addf %1672, %1674 : vector<8x128xf32>
    %cst_807 = arith.constant 8.000000e-01 : f32
    %1676 = vector.broadcast %cst_807 : f32 to vector<8x128xf32>
    %1677 = arith.mulf %1676, %1670 : vector<8x128xf32>
    %c184 = arith.constant 184 : index
    %c0_808 = arith.constant 0 : index
    %1678 = vector.load %arg17[%c184, %c0_808] : memref<192x128xf32, #tpu.memory_space<vmem>>, vector<8x128xf32>
    %1679 = arith.addf %1677, %1678 : vector<8x128xf32>
    %cst_809 = arith.constant 0.899999976 : f32
    %1680 = vector.broadcast %cst_809 : f32 to vector<8x128xf32>
    %1681 = arith.mulf %1680, %1675 : vector<8x128xf32>
    %cst_810 = arith.constant 1.000000e-01 : f32
    %1682 = vector.broadcast %cst_810 : f32 to vector<8x128xf32>
    %1683 = arith.mulf %1682, %1679 : vector<8x128xf32>
    %1684 = arith.addf %1681, %1683 : vector<8x128xf32>
    %c0_811 = arith.constant 0 : index
    %c0_812 = arith.constant 0 : index
    %1685 = vector.load %arg9[%c0_811, %c0_812] : memref<8x128xf32, #tpu.memory_space<vmem>>, vector<8x128xf32>
    tpu.vector_store %arg9[%c0_811, %c0_812], %1684 {strides = array<i32>} : memref<8x128xf32, #tpu.memory_space<vmem>>, vector<8x128xf32>,
    return
  }
  func.func @transform_0(%arg0: i32) -> (i32, i32) {
    %c0_i32 = arith.constant 0 : i32
    %c0_i32_0 = arith.constant 0 : i32
    return %arg0, %c0_i32 : i32, i32
  }
  func.func @transform_1(%arg0: i32) -> (i32, i32) {
    %c0_i32 = arith.constant 0 : i32
    %c0_i32_0 = arith.constant 0 : i32
    %c0_i32_1 = arith.constant 0 : i32
    return %c0_i32, %c0_i32_0 : i32, i32
  }
  func.func @transform_2(%arg0: i32) -> (i32, i32) {
    %c0_i32 = arith.constant 0 : i32
    %c0_i32_0 = arith.constant 0 : i32
    %c0_i32_1 = arith.constant 0 : i32
    return %c0_i32, %c0_i32_0 : i32, i32
  }
  func.func @transform_3(%arg0: i32) -> (i32, i32) {
    %c0_i32 = arith.constant 0 : i32
    %c0_i32_0 = arith.constant 0 : i32
    %c0_i32_1 = arith.constant 0 : i32
    return %c0_i32, %c0_i32_0 : i32, i32
  }
  func.func @transform_4(%arg0: i32) -> (i32, i32) {
    %c0_i32 = arith.constant 0 : i32
    %c0_i32_0 = arith.constant 0 : i32
    %c0_i32_1 = arith.constant 0 : i32
    return %c0_i32, %c0_i32_0 : i32, i32
  }
  func.func @transform_5(%arg0: i32) -> (i32, i32) {
    %c0_i32 = arith.constant 0 : i32
    %c0_i32_0 = arith.constant 0 : i32
    %c0_i32_1 = arith.constant 0 : i32
    return %c0_i32, %c0_i32_0 : i32, i32
  }
  func.func @transform_6(%arg0: i32) -> (i32, i32) {
    %c0_i32 = arith.constant 0 : i32
    %c0_i32_0 = arith.constant 0 : i32
    %c0_i32_1 = arith.constant 0 : i32
    return %c0_i32, %c0_i32_0 : i32, i32
  }
  func.func @transform_7(%arg0: i32) -> (i32, i32) {
    %c0_i32 = arith.constant 0 : i32
    %c0_i32_0 = arith.constant 0 : i32
    %c0_i32_1 = arith.constant 0 : i32
    return %c0_i32, %c0_i32_0 : i32, i32
  }
  func.func @transform_8(%arg0: i32) -> (i32, i32) {
    %c0_i32 = arith.constant 0 : i32
    %c0_i32_0 = arith.constant 0 : i32
    return %arg0, %c0_i32 : i32, i32
  }
}

</mosaic_0001>

<bundles_post_ra>
// kernel: tpu_custom_call.1
= control target key start
LH: loop header
LB: loop body
LE: loop exit
PB: predicated region body
PF: predicated region fallthrough
CT: control target
= control target key end

     0   :  { %13 = vsyncpa [#allocation11], 0  ;;  %s6910_s0 = inlined_call_operand.hbm [shape: f32[8,128], index: 0, kind: input, shape index: {}]   ;;  %s6911_s1 = inlined_call_operand.hbm [shape: bf16[128,256], index: 1, kind: input, shape index: {}]   ;;  %s6912_s2 = inlined_call_operand.hbm [shape: f32[1,256], index: 2, kind: input, shape index: {}]   ;;  %s6913_s3 = inlined_call_operand.hbm [shape: bf16[256,256], index: 3, kind: input, shape index: {}]   ;;  %s6914_s4 = inlined_call_operand.vmem [shape: f32[1,256], index: 4, kind: input, shape index: {}]   ;;  %s6915_s5 = inlined_call_operand.hbm [shape: bf16[256,256], index: 5, kind: input, shape index: {}]   ;;  %s6916_s6 = inlined_call_operand.vmem [shape: f32[1,256], index: 6, kind: input, shape index: {}]   ;;  %s6917_s7 = inlined_call_operand.hbm [shape: bf16[256,128], index: 7, kind: input, shape index: {}]   ;;  %s6918_s8 = inlined_call_operand.hbm [shape: f32[8,128], index: 8, kind: output, shape index: {}]  }
   0x1   :  { %14 = vsyncpa [#allocation14], 0 }
   0x2   :  { %15 = vsyncpa [#allocation17], 0 }
   0x3   :  { %16 = vsyncpa [#allocation20], 0  ;;  %s33_s29 = sshll.u32 %s6911_s1, 4  ;;  %s34_s29 = int_to_ptr.hbm [resolvable:$true] %s33_s29 }
   0x4   :  { %17 = vsyncpa [#allocation12], 0  ;;  %s5914_s30 = smov [#allocation13]   ;;  %s57_s12 = sshll.u32 %s6913_s3, 4  ;;  %s58_s12 = int_to_ptr.hbm [resolvable:$true] %s57_s12 }
   0x5   :  { %s35_s9 = sshll.u32 %s5914_s30, 4  ;;  %s5915_s13 = smov 128   ;;  %s36_s9 = int_to_ptr.vmem [resolvable:$true] %s35_s9 }
   0x6   :  { %s5916_s14 = smov 8   ;;  %s5917_s15 = smov [#allocation16]  }
   0x7   :  { %41 = dma.hbm_to_vmem [thread:$0]  %s34_s29, 2048, %s36_s9, [#allocation14], %s5915_s13, %s5915_s13, %s5916_s14  }
   0x8   :  { %s59_s16 = sshll.u32 %s5917_s15, 4  ;;  %s23_s18 = sshll.u32 %s6910_s0, 4  ;;  %s60_s16 = int_to_ptr.vmem [resolvable:$true] %s59_s16  ;;  %s24_s18 = int_to_ptr.hbm [resolvable:$true] %s23_s18 }
   0x9   :  { %65 = dma.hbm_to_vmem [thread:$0]  %s58_s12, 4096, %s60_s16, [#allocation17], %s5915_s13, %s5915_s13, %s5916_s14  }
   0xa   :  { %s47_s20 = sshll.u32 %s6912_s2, 4  ;;  %s5918_s21 = smov [#allocation10]   ;;  %s48_s20 = int_to_ptr.hbm [resolvable:$true] %s47_s20 }
   0xb   :  { %s25_s22 = sshll.u32 %s5918_s21, 4  ;;  %s5919_s23 = smov [#allocation15]   ;;  %s26_s22 = int_to_ptr.vmem [resolvable:$true] %s25_s22 }
   0xc   :  { %28 = dma.hbm_to_vmem [thread:$0]  %s24_s18, 128, %s26_s22, [#allocation11]  }
   0xd   :  { %s49_s24 = sshll.u32 %s5919_s23, 4  ;;  %s72_s0 = sshll.u32 %s6915_s5, 4  ;;  %s50_s24 = int_to_ptr.vmem [resolvable:$true] %s49_s24  ;;  %s73_s0 = int_to_ptr.hbm [resolvable:$true] %s72_s0 }
   0xe   :  { %52 = dma.hbm_to_vmem [thread:$0]  %s48_s20, 32, %s50_s24, [#allocation14]  }
   0xf   :  { %s87_s29 = sshll.u32 %s6917_s7, 4  ;;  %s5920_s30 = smov [#allocation18]   ;;  %s88_s29 = int_to_ptr.hbm [resolvable:$true] %s87_s29 }
  0x10   :  { %s74_s2 = sshll.u32 %s5920_s30, 4  ;;  %s5921_s9 = smov [#allocation19]   ;;  %s75_s2 = int_to_ptr.vmem [resolvable:$true] %s74_s2 }
  0x11   :  { %80 = dma.hbm_to_vmem [thread:$0]  %s73_s0, 4096, %s75_s2, [#allocation17], %s5915_s13, %s5915_s13, %s5916_s14  }
  0x12   :  { %s89_s10 = sshll.u32 %s5921_s9, 4  ;;  %s5922_s11 = smov 64   ;;  %s90_s10 = int_to_ptr.vmem [resolvable:$true] %s89_s10 }
  0x13   :  { %s5923_s5 = smov 4  }
  0x14   :  { %95 = dma.hbm_to_vmem [thread:$0]  %s88_s29, 2048, %s90_s10, [#allocation20], %s5922_s11, %s5922_s11, %s5923_s5  }
  0x15   :  { %5904 = dma.done.wait [#allocation11], 128  }
  0x16   :  { %5905 = vsyncadd [#allocation11], 4294967168 }
  0x17   :  { %5906 = dma.done.wait [#allocation14], 2080  }
  0x18   :  { %5907 = vsyncadd [#allocation14], 4294965216 }
  0x19   :  { %5908 = dma.done.wait [#allocation17], 8192  }
  0x1a   :  { %5909 = vsyncadd [#allocation17], 4294959104 }
  0x1b   :  { %5910 = dma.done.wait [#allocation20], 2048  }
  0x1c   :  { %5911 = vsyncadd [#allocation20], 4294965248  ;;  %v4742_v0 = vld [vmem:[#allocation13 + $0x70] sm:$0xf]  ;;  %v5521_v1 = vld [vmem:[#allocation13 + $0x74] sm:$0xf0] }
  0x1d   :  { %v5520_v2 = vld [vmem:[#allocation13 + $0x74] sm:$0xf]  ;;  %v4743_v3 = vor.u32 %v5521_v1, %v4742_v0  ;;  %v4744_v4 = vld [vmem:[#allocation13 + $0x78] sm:$0xf0]  ;;  %v4734_v5 = vld [vmem:[#allocation13 + $0x60] sm:$0xf] }
  0x1e   :  { %v5519_v6 = vld [vmem:[#allocation13 + $0x64] sm:$0xf0]  ;;  %v4747_v7 = vor.u32 %v5520_v2, %v4744_v4  ;;  %v5518_v8 = vld [vmem:[#allocation13 + $0x64] sm:$0xf]  ;;  %v4736_v9 = vld [vmem:[#allocation13 + $0x68] sm:$0xf0] }
  0x1f   :  { %510 = vmatpush.bf16.msra.mxu0 %v4743_v3  ;;  %v4735_v10 = vor.u32 %v5519_v6, %v4734_v5  ;;  %v4739_v11 = vor.u32 %v5518_v8, %v4736_v9  ;;  %v4726_v12 = vld [vmem:[#allocation13 + $0x50] sm:$0xf]  ;;  %v5517_v13 = vld [vmem:[#allocation13 + $0x54] sm:$0xf0]  ;;  %v5516_v14 = vld [vmem:[#allocation13 + $0x54] sm:$0xf] }
  0x20   :  { %579 = vmatpush.bf16.msra.mxu1 %v4747_v7  ;;  %v4728_v15 = vld [vmem:[#allocation13 + $0x58] sm:$0xf0]  ;;  %v4727_v16 = vor.u32 %v5517_v13, %v4726_v12  ;;  %v4718_v18 = vld [vmem:[#allocation13 + $0x40] sm:$0xf]  ;;  %v5515_v19 = vld [vmem:[#allocation13 + $0x44] sm:$0xf0] }
  0x21   :  { %v4731_v17 = vor.u32 %v5516_v14, %v4728_v15  ;;  %v5514_v20 = vld [vmem:[#allocation13 + $0x44] sm:$0xf]  ;;  %v4720_v21 = vld [vmem:[#allocation13 + $0x48] sm:$0xf0]  ;;  %v120_v22 = vld [vmem:[#allocation10] sm:$0xff]  ;;  %v4719_v23 = vor.u32 %v5515_v19, %v4718_v18  ;;  %v5924_v39 = vmov 0.0  }
  0x22   :  { %v5999_v24 = vmul.f32 0.1, %v120_v22  ;;  %v4723_v25 = vor.u32 %v5514_v20, %v4720_v21  ;;  %v4710_v26 = vld [vmem:[#allocation13 + $0x30] sm:$0xf]  ;;  %v5513_v27 = vld [vmem:[#allocation13 + $0x34] sm:$0xf0] }
  0x23   :  { %511 = vmatpush.bf16.msra.mxu0 %v4735_v10  ;;  %v5512_v28 = vld [vmem:[#allocation13 + $0x34] sm:$0xf]  ;;  %v4712_v29 = vld [vmem:[#allocation13 + $0x38] sm:$0xf0]  ;;  %v4711_v31 = vor.u32 %v5513_v27, %v4710_v26  ;;  %v4702_v34 = vld [vmem:[#allocation13 + $0x20] sm:$0xf] }
  0x24   :  { %580 = vmatpush.bf16.msra.mxu1 %v4739_v11  ;;  %vm123_vm0 = vcmp.gt.f32.partialorder %v5999_v24, 1.0  ;;  %v4715_v33 = vor.u32 %v5512_v28, %v4712_v29  ;;  %v5511_v35 = vld [vmem:[#allocation13 + $0x24] sm:$0xf0]  ;;  %v5510_v36 = vld [vmem:[#allocation13 + $0x24] sm:$0xf]  ;;  %s4599_s17 = sshll.u32 %s6918_s8, 4  ;;  %s4600_s17 = int_to_ptr.hbm [resolvable:$true] %s4599_s17 }
  0x25   :  { %v124_v30 = vsel %vm123_vm0, 0.0, %v5999_v24  ;;  %v4704_v37 = vld [vmem:[#allocation13 + $0x28] sm:$0xf0]  ;;  %v4612_v40 = vsel %vm123_vm0, 1.0, %v5924_v39  ;;  %v4703_v41 = vor.u32 %v5511_v35, %v4702_v34  ;;  %v4694_v43 = vld [vmem:[#allocation13 + $0x10] sm:$0xf] }
  0x26   :  { %v127_v32 = vmul.f32 0.9, %v124_v30  ;;  %v4707_v42 = vor.u32 %v5510_v36, %v4704_v37  ;;  %v5509_v44 = vld [vmem:[#allocation13 + $0x14] sm:$0xf0]  ;;  %v5508_v47 = vld [vmem:[#allocation13 + $0x14] sm:$0xf] }
  0x27   :  { %512 = vmatpush.bf16.msra.mxu0 %v4727_v16  ;;  %v4696_v48 = vld [vmem:[#allocation13 + $0x18] sm:$0xf0]  ;;  %v4695_v51 = vor.u32 %v5509_v44, %v4694_v43  ;;  %v4686_v52 = vld [vmem:[#allocation13] sm:$0xf]  ;;  %v5507_v55 = vld [vmem:[#allocation13 + $0x4] sm:$0xf0] }
  0x28   :  { %581 = vmatpush.bf16.msra.mxu1 %v4731_v17  ;;  %v128_v38 = vadd.f32 %v127_v32, %v5999_v24  ;;  %v4699_v54 = vor.u32 %v5508_v47, %v4696_v48  ;;  %v5506_v56 = vld [vmem:[#allocation13 + $0x4] sm:$0xf]  ;;  %v4688_v57 = vld [vmem:[#allocation13 + $0x8] sm:$0xf0]  ;;  %v5560_v58 = vld [vmem:[#allocation16 + $0x74] sm:$0xf]  ;;  %v4687_v63 = vor.u32 %v5507_v55, %v4686_v52 }
  0x29   :  { %v4950_v59 = vld [vmem:[#allocation16 + $0x78] sm:$0xf0]  ;;  %v5576_v60 = vld [vmem:[#allocation16 + $0xf4] sm:$0xf]  ;;  %v4691_v1 = vor.u32 %v5506_v56, %v4688_v57  ;;  %v5558_v5 = vld [vmem:[#allocation16 + $0x64] sm:$0xf] }
  0x2a   :  { %vm129_vm1 = vcmp.gt.f32.partialorder %v128_v38, 1.0  ;;  %v5014_v61 = vld [vmem:[#allocation16 + $0xf8] sm:$0xf0]  ;;  %v4953_v2 = vor.u32 %v5560_v58, %v4950_v59  ;;  %v4942_v6 = vld [vmem:[#allocation16 + $0x68] sm:$0xf0] }
  0x2b   :  { %513 = vmatpush.bf16.msra.mxu0 %v4719_v23  ;;  %v130_v45 = vsel %vm129_vm1, 0.0, %v128_v38  ;;  %v4613_v46 = vsel %vm129_vm1, 1.0, %v5924_v39  ;;  %v5017_v3 = vor.u32 %v5576_v60, %v5014_v61  ;;  %v5574_v9 = vld [vmem:[#allocation16 + $0xe4] sm:$0xf]  ;;  %v5006_v10 = vld [vmem:[#allocation16 + $0xe8] sm:$0xf0]  ;;  %v4945_v13 = vor.u32 %v5558_v5, %v4942_v6 }
  0x2c   :  { %582 = vmatpush.bf16.msra.mxu1 %v4723_v25  ;;  %v5675_v49 = vpack.c.bf16 %v4613_v46, %v4612_v40  ;;  %v137_v50 = vmul.f32 0.9, %v130_v45  ;;  %v5009_v16 = vor.u32 %v5574_v9, %v5006_v10  ;;  %v4934_v32 = vld [vmem:[#allocation16 + $0x58] sm:$0xf0]  ;;  %v5572_v34 = vld [vmem:[#allocation16 + $0xd4] sm:$0xf] }
  0x2d   :  { %v4998_v35 = vld [vmem:[#allocation16 + $0xd8] sm:$0xf0]  ;;  %v5570_v55 = vld [vmem:[#allocation16 + $0xc4] sm:$0xf]  ;;  %v4990_v56 = vld [vmem:[#allocation16 + $0xc8] sm:$0xf0] }
  0x2e   :  { %5676 = vst [vmem:[#allocation2 + $0x30] sm:$0xff] %v5675_v49   ;;  %v138_v53 = vadd.f32 %v137_v50, %v5999_v24  ;;  %v5001_v37 = vor.u32 %v5572_v34, %v4998_v35  ;;  %v5554_v50 = vld [vmem:[#allocation16 + $0x44] sm:$0xf]  ;;  %v4993_v59 = vor.u32 %v5570_v55, %v4990_v56  ;;  %v4948_v34 = vld [vmem:[#allocation16 + $0x70] sm:$0xf] }
  0x2f   :  { %514 = vmatpush.bf16.msra.mxu0 %v4711_v31  ;;  %v5556_v31 = vld [vmem:[#allocation16 + $0x54] sm:$0xf]  ;;  %v5561_v35 = vld [vmem:[#allocation16 + $0x74] sm:$0xf0]  ;;  %v5566_v55 = vld [vmem:[#allocation16 + $0xa4] sm:$0xf] }
  0x30   :  { %583 = vmatpush.bf16.msra.mxu1 %v4715_v33  ;;  %vm139_vm2 = vcmp.gt.f32.partialorder %v138_v53, 1.0  ;;  %v4937_v33 = vor.u32 %v5556_v31, %v4934_v32  ;;  %v4974_v56 = vld [vmem:[#allocation16 + $0xa8] sm:$0xf0] }
  0x31   :  { %v140_v62 = vsel %vm139_vm2, 0.0, %v138_v53  ;;  %v4614_v8 = vsel %vm139_vm2, 1.0, %v5924_v39 }
  0x32   :  { %v143_v0 = vmul.f32 0.9, %v140_v62 }
  0x33   :  { %515 = vmatpush.bf16.msra.mxu0 %v4703_v41 }
  0x34   :  { %584 = vmatpush.bf16.msra.mxu1 %v4707_v42  ;;  %v144_v4 = vadd.f32 %v143_v0, %v5999_v24 }
  0x35   :  { %v5494_v7 = vld [vmem:[#allocation2 + $0x30] sm:$0xff] }
  0x36   :  { %vm145_vm3 = vcmp.gt.f32.partialorder %v144_v4, 1.0 }
  0x37   :  { %516 = vmatpush.bf16.msra.mxu0 %v4695_v51  ;;  %v146_v11 = vsel %vm145_vm3, 0.0, %v144_v4  ;;  %v4615_v12 = vsel %vm145_vm3, 1.0, %v5924_v39  ;;  %v4926_v51 = vld [vmem:[#allocation16 + $0x48] sm:$0xf0] }
  0x38   :  { %585 = vmatpush.bf16.msra.mxu1 %v4699_v54  ;;  %v5678_v14 = vpack.c.bf16 %v4615_v12, %v4614_v8  ;;  %v153_v15 = vmul.f32 0.9, %v146_v11  ;;  %v4929_v54 = vor.u32 %v5554_v50, %v4926_v51  ;;  %v4932_v50 = vld [vmem:[#allocation16 + $0x50] sm:$0xf]  ;;  %v5557_v51 = vld [vmem:[#allocation16 + $0x54] sm:$0xf0] }
  0x3a   :  { %5710 = vst [vmem:[#allocation2] sm:$0xff] %v5678_v14   ;;  %v154_v17 = vadd.f32 %v153_v15, %v5999_v24 }
  0x3b   :  { %517 = vmatpush.bf16.msra.mxu0 %v4687_v63 }
  0x3c   :  { %586 = vmatpush.bf16.msra.mxu1 %v4691_v1  ;;  %vm155_vm4 = vcmp.gt.f32.partialorder %v154_v17, 1.0 }
  0x3d   :  { %v156_v18 = vsel %vm155_vm4, 0.0, %v154_v17  ;;  %v4616_v21 = vsel %vm155_vm4, 1.0, %v5924_v39 }
  0x3e   :  { %518 = vmatmul.bf16.vlgmr.msra.gmra.mxu0 %v5494_v7  ;;  %v159_v19 = vmul.f32 0.9, %v156_v18  ;;  %v5552_v18 = vld [vmem:[#allocation16 + $0x34] sm:$0xf] }
  0x3f   :  { %1681 = vmatpush.bf16.msrb.mxu0 %v4953_v2  ;;  %587 = vmatmul.bf16.vlgmr.msra.gmra.mxu1 %v5494_v7 }
  0x40   :  { %1750 = vmatpush.bf16.msrb.mxu1 %v5017_v3  ;;  %v160_v20 = vadd.f32 %v159_v19, %v5999_v24  ;;  %v4918_v19 = vld [vmem:[#allocation16 + $0x38] sm:$0xf0] }
  0x41   :  { %v5495_v27 = vld [vmem:[#allocation2] sm:$0xff] }
  0x42   :  { %vm161_vm5 = vcmp.gt.f32.partialorder %v160_v20, 1.0 }
  0x43   :  { %1682 = vmatpush.bf16.msrb.mxu0 %v4945_v13  ;;  %v162_v22 = vsel %vm161_vm5, 0.0, %v160_v20  ;;  %v4617_v23 = vsel %vm161_vm5, 1.0, %v5924_v39  ;;  %v5568_v20 = vld [vmem:[#allocation16 + $0xb4] sm:$0xf] }
  0x44   :  { %1751 = vmatpush.bf16.msrb.mxu1 %v5009_v16  ;;  %v5681_v25 = vpack.c.bf16 %v4617_v23, %v4616_v21  ;;  %v169_v26 = vmul.f32 0.9, %v162_v22  ;;  %v4921_v21 = vor.u32 %v5552_v18, %v4918_v19  ;;  %v4982_v22 = vld [vmem:[#allocation16 + $0xb8] sm:$0xf0]  ;;  %v4908_v18 = vld [vmem:[#allocation16 + $0x20] sm:$0xf] }
  0x45   :  { %v5551_v19 = vld [vmem:[#allocation16 + $0x24] sm:$0xf0] }
  0x46   :  { %5711 = vst [vmem:[#allocation2 + $0x58] sm:$0xff] %v5681_v25   ;;  %v170_v28 = vadd.f32 %v169_v26, %v5999_v24  ;;  %v4985_v25 = vor.u32 %v5568_v20, %v4982_v22  ;;  %v4972_v20 = vld [vmem:[#allocation16 + $0xa0] sm:$0xf]  ;;  %v5567_v22 = vld [vmem:[#allocation16 + $0xa4] sm:$0xf0] }
  0x47   :  { %1683 = vmatpush.bf16.msrb.mxu0 %v4937_v33 }
  0x48   :  { %vm171_vm6 = vcmp.gt.f32.partialorder %v170_v28, 1.0  ;;  %1752 = vmatpush.bf16.msrb.mxu1 %v5001_v37  ;;  %v4949_v37 = vor.u32 %v5561_v35, %v4948_v34 }
  0x49   :  { %v172_v29 = vsel %vm171_vm6, 0.0, %v170_v28  ;;  %v4618_v38 = vsel %vm171_vm6, 1.0, %v5924_v39 }
  0x4a   :  { %v175_v30 = vmul.f32 0.9, %v172_v29  ;;  %1543 = vmatpush.bf16.msra.mxu2 %v4949_v37 }
  0x4b   :  { %1684 = vmatpush.bf16.msrb.mxu0 %v4929_v54  ;;  %v5573_v54 = vld [vmem:[#allocation16 + $0xd4] sm:$0xf0] }
  0x4c   :  { %v176_v36 = vadd.f32 %v175_v30, %v5999_v24  ;;  %1753 = vmatpush.bf16.msrb.mxu1 %v4993_v59 }
  0x4d   :  { %v5496_v45 = vld [vmem:[#allocation2 + $0x58] sm:$0xff] }
  0x4e   :  { %523 = vmatmul.bf16.gmra.mxu0 %v5495_v27  ;;  %vm177_vm7 = vcmp.gt.f32.partialorder %v176_v36, 1.0 }
  0x4f   :  { %592 = vmatmul.bf16.gmra.mxu1 %v5495_v27  ;;  %v178_v40 = vsel %vm177_vm7, 0.0, %v176_v36  ;;  %v4619_v41 = vsel %vm177_vm7, 1.0, %v5924_v39  ;;  %1685 = vmatpush.bf16.msrb.mxu0 %v4921_v21  ;;  %v5012_v36 = vld [vmem:[#allocation16 + $0xf0] sm:$0xf]  ;;  %v4909_v21 = vor.u32 %v5551_v19, %v4908_v18 }
  0x50   :  { %v5684_v42 = vpack.c.bf16 %v4619_v41, %v4618_v38  ;;  %v185_v43 = vmul.f32 0.9, %v178_v40  ;;  %1754 = vmatpush.bf16.msrb.mxu1 %v4985_v25  ;;  %v5577_v38 = vld [vmem:[#allocation16 + $0xf4] sm:$0xf0]  ;;  %v4940_v41 = vld [vmem:[#allocation16 + $0x60] sm:$0xf]  ;;  %v4973_v25 = vor.u32 %v5567_v22, %v4972_v20 }
  0x51   :  { %v5013_v40 = vor.u32 %v5577_v38, %v5012_v36 }
  0x52   :  { %5712 = vst [vmem:[#allocation2 + $0x18] sm:$0xff] %v5684_v42   ;;  %v186_v44 = vadd.f32 %v185_v43, %v5999_v24  ;;  %v5559_v42 = vld [vmem:[#allocation16 + $0x64] sm:$0xf0] }
  0x53   :  { %1612 = vmatpush.bf16.msra.mxu3 %v5013_v40  ;;  %v4892_v40 = vld [vmem:[#allocation16] sm:$0xf] }
  0x54   :  { %vm187_vm8 = vcmp.gt.f32.partialorder %v186_v44, 1.0 }
  0x55   :  { %v188_v46 = vsel %vm187_vm8, 0.0, %v186_v44  ;;  %v4620_v49 = vsel %vm187_vm8, 1.0, %v5924_v39  ;;  %v4941_v44 = vor.u32 %v5559_v42, %v4940_v41  ;;  %v5547_v41 = vld [vmem:[#allocation16 + $0x4] sm:$0xf0]  ;;  %v4956_v42 = vld [vmem:[#allocation16 + $0x80] sm:$0xf] }
  0x56   :  { %v191_v47 = vmul.f32 0.9, %v188_v46  ;;  %v5575_v46 = vld [vmem:[#allocation16 + $0xe4] sm:$0xf0] }
  0x57   :  { %1544 = vmatpush.bf16.msra.mxu2 %v4941_v44  ;;  %v4893_v44 = vor.u32 %v5547_v41, %v4892_v40  ;;  %v5633_v40 = vld [vmem:[#allocation18 + $0xf4] sm:$0xf0] }
  0x58   :  { %v192_v48 = vadd.f32 %v191_v47, %v5999_v24  ;;  %v5550_v47 = vld [vmem:[#allocation16 + $0x24] sm:$0xf] }
  0x59   :  { %v5497_v0 = vld [vmem:[#allocation2 + $0x18] sm:$0xff] }
  0x5a   :  { %vm193_vm9 = vcmp.gt.f32.partialorder %v192_v48, 1.0 }
  0x5b   :  { %v194_v52 = vsel %vm193_vm9, 0.0, %v192_v48  ;;  %v4621_v53 = vsel %vm193_vm9, 1.0, %v5924_v39 }
  0x5c   :  { %v5687_v57 = vpack.c.bf16 %v4621_v53, %v4620_v49  ;;  %v201_v58 = vmul.f32 0.9, %v194_v52  ;;  %v4910_v49 = vld [vmem:[#allocation16 + $0x28] sm:$0xf0]  ;;  %v4996_v53 = vld [vmem:[#allocation16 + $0xd0] sm:$0xf] }
  0x5d   :  { %v4913_v52 = vor.u32 %v5550_v47, %v4910_v49 }
  0x5e   :  { %528 = vmatmul.bf16.gmra.mxu0 %v5496_v45  ;;  %5713 = vst [vmem:[#allocation2 + $0x50] sm:$0xff] %v5687_v57   ;;  %v202_v60 = vadd.f32 %v201_v58, %v5999_v24  ;;  %v4933_v57 = vor.u32 %v5557_v51, %v4932_v50  ;;  %v4977_v58 = vor.u32 %v5566_v55, %v4974_v56  ;;  %v352_v51 = vld [vmem:[#allocation15] sm:$0x3] }
  0x5f   :  { %597 = vmatmul.bf16.gmra.mxu1 %v5496_v45  ;;  %v5004_v45 = vld [vmem:[#allocation16 + $0xe0] sm:$0xf]  ;;  %1686 = vmatpush.bf16.msrb.mxu0 %v4913_v52  ;;  %v6048_v55 = vperm.slane %v352_v51, 0  ;;  %v6050_v56 = vperm.slane %v352_v51, 1 }
  0x60   :  { %vm203_vm10 = vcmp.gt.f32.partialorder %v202_v60, 1.0  ;;  %v5005_v48 = vor.u32 %v5575_v46, %v5004_v45  ;;  %1755 = vmatpush.bf16.msrb.mxu1 %v4977_v58  ;;  %1545 = vmatpush.bf16.msra.mxu2 %v4933_v57  ;;  %v5563_v45 = vld [vmem:[#allocation16 + $0x84] sm:$0xf0]  ;;  %v5548_v57 = vld [vmem:[#allocation16 + $0x14] sm:$0xf] }
  0x61   :  { %v204_v61 = vsel %vm203_vm10, 0.0, %v202_v60  ;;  %v4622_v1 = vsel %vm203_vm10, 1.0, %v5924_v39  ;;  %v4997_v60 = vor.u32 %v5573_v54, %v4996_v53  ;;  %v4957_v46 = vor.u32 %v5563_v45, %v4956_v42  ;;  %v4902_v58 = vld [vmem:[#allocation16 + $0x18] sm:$0xf0] }
  0x62   :  { %v207_v62 = vmul.f32 0.9, %v204_v61  ;;  %1613 = vmatpush.bf16.msra.mxu3 %v5005_v48 }
  0x64   :  { %v208_v63 = vadd.f32 %v207_v62, %v5999_v24 }
  0x65   :  { %v5498_v15 = vld [vmem:[#allocation2 + $0x50] sm:$0xff] }
  0x66   :  { %vm209_vm11 = vcmp.gt.f32.partialorder %v208_v63, 1.0  ;;  %1614 = vmatpush.bf16.msra.mxu3 %v4997_v60 }
  0x67   :  { %v210_v2 = vsel %vm209_vm11, 0.0, %v208_v63  ;;  %v4623_v3 = vsel %vm209_vm11, 1.0, %v5924_v39  ;;  %v4924_v63 = vld [vmem:[#allocation16 + $0x40] sm:$0xf] }
  0x68   :  { %v5690_v4 = vpack.c.bf16 %v4623_v3, %v4622_v1  ;;  %v217_v5 = vmul.f32 0.9, %v210_v2  ;;  %v4988_v1 = vld [vmem:[#allocation16 + $0xc0] sm:$0xf] }
  0x6a   :  { %5714 = vst [vmem:[#allocation2 + $0x20] sm:$0xff] %v5690_v4   ;;  %v218_v6 = vadd.f32 %v217_v5, %v5999_v24  ;;  %v5571_v4 = vld [vmem:[#allocation16 + $0xc4] sm:$0xf0] }
  0x6c   :  { %vm219_vm12 = vcmp.gt.f32.partialorder %v218_v6, 1.0 }
  0x6d   :  { %v220_v7 = vsel %vm219_vm12, 0.0, %v218_v6  ;;  %v4624_v10 = vsel %vm219_vm12, 1.0, %v5924_v39 }
  0x6e   :  { %533 = vmatmul.bf16.gmra.mxu0 %v5497_v0  ;;  %v223_v8 = vmul.f32 0.9, %v220_v7  ;;  %v4989_v7 = vor.u32 %v5571_v4, %v4988_v1 }
  0x6f   :  { %602 = vmatmul.bf16.gmra.mxu1 %v5497_v0  ;;  %v5555_v0 = vld [vmem:[#allocation16 + $0x44] sm:$0xf0] }
  0x70   :  { %v224_v9 = vadd.f32 %v223_v8, %v5999_v24  ;;  %v4925_v3 = vor.u32 %v5555_v0, %v4924_v63  ;;  %1615 = vmatpush.bf16.msra.mxu3 %v4989_v7 }
  0x71   :  { %v5499_v32 = vld [vmem:[#allocation2 + $0x20] sm:$0xff] }
  0x72   :  { %vm225_vm13 = vcmp.gt.f32.partialorder %v224_v9, 1.0  ;;  %1546 = vmatpush.bf16.msra.mxu2 %v4925_v3 }
  0x73   :  { %v226_v11 = vsel %vm225_vm13, 0.0, %v224_v9  ;;  %v4625_v12 = vsel %vm225_vm13, 1.0, %v5924_v39 }
  0x74   :  { %v5693_v13 = vpack.c.bf16 %v4625_v12, %v4624_v10  ;;  %v233_v14 = vmul.f32 0.9, %v226_v11  ;;  %v4916_v10 = vld [vmem:[#allocation16 + $0x30] sm:$0xf]  ;;  %v5553_v11 = vld [vmem:[#allocation16 + $0x34] sm:$0xf0] }
  0x76   :  { %5715 = vst [vmem:[#allocation2 + $0x8] sm:$0xff] %v5693_v13   ;;  %v234_v16 = vadd.f32 %v233_v14, %v5999_v24  ;;  %v4917_v13 = vor.u32 %v5553_v11, %v4916_v10  ;;  %v4980_v14 = vld [vmem:[#allocation16 + $0xb0] sm:$0xf] }
  0x78   :  { %vm235_vm14 = vcmp.gt.f32.partialorder %v234_v16, 1.0  ;;  %1547 = vmatpush.bf16.msra.mxu2 %v4917_v13 }
  0x79   :  { %v236_v17 = vsel %vm235_vm14, 0.0, %v234_v16  ;;  %v4626_v27 = vsel %vm235_vm14, 1.0, %v5924_v39 }
  0x7a   :  { %v239_v23 = vmul.f32 0.9, %v236_v17 }
  0x7c   :  { %v240_v26 = vadd.f32 %v239_v23, %v5999_v24  ;;  %1548 = vmatpush.bf16.msra.mxu2 %v4909_v21 }
  0x7d   :  { %v5500_v2 = vld [vmem:[#allocation2 + $0x8] sm:$0xff] }
  0x7e   :  { %538 = vmatmul.bf16.gmra.mxu0 %v5498_v15  ;;  %vm241_vm15 = vcmp.gt.f32.partialorder %v240_v26, 1.0 }
  0x7f   :  { %607 = vmatmul.bf16.gmra.mxu1 %v5498_v15  ;;  %v242_v28 = vsel %vm241_vm15, 0.0, %v240_v26  ;;  %v4627_v29 = vsel %vm241_vm15, 1.0, %v5924_v39  ;;  %v5569_v15 = vld [vmem:[#allocation16 + $0xb4] sm:$0xf0] }
  0x80   :  { %v5696_v30 = vpack.c.bf16 %v4627_v29, %v4626_v27  ;;  %v249_v31 = vmul.f32 0.9, %v242_v28  ;;  %v4981_v16 = vor.u32 %v5569_v15, %v4980_v14  ;;  %v4900_v28 = vld [vmem:[#allocation16 + $0x10] sm:$0xf]  ;;  %v5549_v29 = vld [vmem:[#allocation16 + $0x14] sm:$0xf0] }
  0x82   :  { %5716 = vst [vmem:[#allocation2 + $0x38] sm:$0xff] %v5696_v30   ;;  %v250_v33 = vadd.f32 %v249_v31, %v5999_v24  ;;  %1616 = vmatpush.bf16.msra.mxu3 %v4981_v16  ;;  %v4964_v30 = vld [vmem:[#allocation16 + $0x90] sm:$0xf]  ;;  %v4901_v31 = vor.u32 %v5549_v29, %v4900_v28 }
  0x84   :  { %vm251_vm0 = vcmp.gt.f32.partialorder %v250_v33, 1.0  ;;  %1549 = vmatpush.bf16.msra.mxu2 %v4901_v31 }
  0x85   :  { %v252_v43 = vsel %vm251_vm0, 0.0, %v250_v33  ;;  %v4628_v62 = vsel %vm251_vm0, 1.0, %v5924_v39  ;;  %v5925_v33 = vmov 0.0|0.0  }
  0x86   :  { %v255_v59 = vmul.f32 0.9, %v252_v43  ;;  %1617 = vmatpush.bf16.msra.mxu3 %v4973_v25  ;;  %723 = vst [vmem:[#allocation4] sm:$0xff] %v5925_v33 }
  0x88   :  { %v256_v61 = vadd.f32 %v255_v59, %v5999_v24  ;;  %1550 = vmatpush.bf16.msra.mxu2 %v4893_v44  ;;  %v5564_v59 = vld [vmem:[#allocation16 + $0x94] sm:$0xf] }
  0x89   :  { %v5501_v43 = vld [vmem:[#allocation2 + $0x38] sm:$0xff] }
  0x8a   :  { %vm257_vm1 = vcmp.gt.f32.partialorder %v256_v61, 1.0 }
  0x8b   :  { %v258_v5 = vsel %vm257_vm1, 0.0, %v256_v61  ;;  %v4629_v6 = vsel %vm257_vm1, 1.0, %v5924_v39  ;;  %v4905_v61 = vor.u32 %v5548_v57, %v4902_v58 }
  0x8c   :  { %v5699_v8 = vpack.c.bf16 %v4629_v6, %v4628_v62  ;;  %v265_v9 = vmul.f32 0.9, %v258_v5  ;;  %v4966_v62 = vld [vmem:[#allocation16 + $0x98] sm:$0xf0] }
  0x8d   :  { %v4969_v1 = vor.u32 %v5564_v59, %v4966_v62  ;;  %1687 = vmatpush.bf16.msrb.mxu0 %v4905_v61  ;;  %v5522_v44 = vld [vmem:[#allocation4 + $0x4] sm:$0xf] }
  0x8e   :  { %543 = vmatmul.bf16.gmra.mxu0 %v5499_v32  ;;  %5717 = vst [vmem:[#allocation2 + $0x28] sm:$0xff] %v5699_v8   ;;  %v266_v12 = vadd.f32 %v265_v9, %v5999_v24 }
  0x8f   :  { %612 = vmatmul.bf16.gmra.mxu1 %v5499_v32  ;;  %v5565_v32 = vld [vmem:[#allocation16 + $0x94] sm:$0xf0] }
  0x90   :  { %vm267_vm2 = vcmp.gt.f32.partialorder %v266_v12, 1.0  ;;  %v4965_v34 = vor.u32 %v5565_v32, %v4964_v30  ;;  %1756 = vmatpush.bf16.msrb.mxu1 %v4969_v1 }
  0x91   :  { %v268_v17 = vsel %vm267_vm2, 0.0, %v266_v12  ;;  %v4630_v26 = vsel %vm267_vm2, 1.0, %v5924_v39 }
  0x92   :  { %v271_v23 = vmul.f32 0.9, %v268_v17  ;;  %1618 = vmatpush.bf16.msra.mxu3 %v4965_v34  ;;  %v5218_v34 = vld [vmem:[#allocation18 + $0x70] sm:$0xf] }
  0x94   :  { %v272_v27 = vadd.f32 %v271_v23, %v5999_v24 }
  0x95   :  { %v5502_v60 = vld [vmem:[#allocation2 + $0x28] sm:$0xff] }
  0x96   :  { %vm273_vm3 = vcmp.gt.f32.partialorder %v272_v27, 1.0  ;;  %1619 = vmatpush.bf16.msra.mxu3 %v4957_v46 }
  0x97   :  { %v274_v35 = vsel %vm273_vm3, 0.0, %v272_v27  ;;  %v4631_v36 = vsel %vm273_vm3, 1.0, %v5924_v39 }
  0x98   :  { %v5702_v37 = vpack.c.bf16 %v4631_v36, %v4630_v26  ;;  %v281_v38 = vmul.f32 0.9, %v274_v35  ;;  %v4796_v36 = vld [vmem:[#allocation4] sm:$0xf] }
  0x9a   :  { %5718 = vst [vmem:[#allocation2 + $0x48] sm:$0xff] %v5702_v37   ;;  %v282_v47 = vadd.f32 %v281_v38, %v5999_v24  ;;  %v5617_v37 = vld [vmem:[#allocation18 + $0x74] sm:$0xf0]  ;;  %v5282_v38 = vld [vmem:[#allocation18 + $0xf0] sm:$0xf] }
  0x9b   :  { %v5219_v45 = vor.u32 %v5617_v37, %v5218_v34  ;;  %v5283_v46 = vor.u32 %v5633_v40, %v5282_v38  ;;  %v5210_v34 = vld [vmem:[#allocation18 + $0x60] sm:$0xf] }
  0x9c   :  { %vm283_vm4 = vcmp.gt.f32.partialorder %v282_v47, 1.0  ;;  %v5274_v40 = vld [vmem:[#allocation18 + $0xe0] sm:$0xf] }
  0x9d   :  { %v284_v48 = vsel %vm283_vm4, 0.0, %v282_v47  ;;  %v4632_v52 = vsel %vm283_vm4, 1.0, %v5924_v39  ;;  %v5546_v47 = vld [vmem:[#allocation16 + $0x4] sm:$0xf]  ;;  %2950 = vmatpush.bf16.msrb.mxu2 %v5219_v45  ;;  %3019 = vmatpush.bf16.msrb.mxu3 %v5283_v46 }
  0x9e   :  { %548 = vmatmul.bf16.gmra.mxu0 %v5500_v2  ;;  %v287_v49 = vmul.f32 0.9, %v284_v48  ;;  %v4894_v48 = vld [vmem:[#allocation16 + $0x8] sm:$0xf0] }
  0x9f   :  { %617 = vmatmul.bf16.gmra.mxu1 %v5500_v2 }
  0xa0   :  { %v288_v50 = vadd.f32 %v287_v49, %v5999_v24  ;;  %v5562_v49 = vld [vmem:[#allocation16 + $0x84] sm:$0xf] }
  0xa1   :  { %v5503_v32 = vld [vmem:[#allocation2 + $0x48] sm:$0xff] }
  0xa2   :  { %vm289_vm5 = vcmp.gt.f32.partialorder %v288_v50, 1.0 }
  0xa3   :  { %v4633_v53 = vsel %vm289_vm5, 1.0, %v5924_v39  ;;  %v290_v63 = vsel %vm289_vm5, 0.0, %v288_v50 }
  0xa4   :  { %v5705_v54 = vpack.c.bf16 %v4633_v53, %v4632_v52  ;;  %v297_v2 = vmul.f32 0.9, %v290_v63 }
  0xa6   :  { %5719 = vst [vmem:[#allocation2 + $0x10] sm:$0xff] %v5705_v54   ;;  %v298_v6 = vadd.f32 %v297_v2, %v5999_v24  ;;  %v4897_v54 = vor.u32 %v5546_v47, %v4894_v48 }
  0xa8   :  { %vm299_vm6 = vcmp.gt.f32.partialorder %v298_v6, 1.0  ;;  %1688 = vmatpush.bf16.msrb.mxu0 %v4897_v54 }
  0xa9   :  { %v300_v9 = vsel %vm299_vm6, 0.0, %v298_v6  ;;  %v4634_v27 = vsel %vm299_vm6, 1.0, %v5924_v39 }
  0xaa   :  { %v303_v12 = vmul.f32 0.9, %v300_v9 }
  0xac   :  { %v304_v19 = vadd.f32 %v303_v12, %v5999_v24 }
  0xae   :  { %553 = vmatmul.bf16.gmra.mxu0 %v5501_v43  ;;  %vm305_vm9 = vcmp.gt.f32.partialorder %v304_v19, 1.0 }
  0xaf   :  { %622 = vmatmul.bf16.gmra.mxu1 %v5501_v43  ;;  %v4635_v28 = vsel %vm305_vm9, 1.0, %v5924_v39 }
  0xb0   :  { %v5708_v41 = vpack.c.bf16 %v4635_v28, %v4634_v27 }
  0xb2   :  { %5720 = vst [vmem:[#allocation2 + $0x40] sm:$0xff] %v5708_v41   ;;  %v5631_v41 = vld [vmem:[#allocation18 + $0xe4] sm:$0xf0] }
  0xbb   :  { %v519_v0 = vpop.f32.mrf.mxu0 }
  0xbc   :  { %v520_v3 = vadd.f32 %v519_v0, %v6048_v55  ;;  %v588_v4 = vpop.f32.mrf.mxu1 }
  0xbd   :  { %v589_v5 = vadd.f32 %v588_v4, %v6050_v56 }
  0xbe   :  { %v705_v7 = vmul.f32 0.1, %v520_v3  ;;  %558 = vmatmul.bf16.gmra.mxu0 %v5502_v60  ;;  %v713_v16 = vmul.f32 0.8, %v520_v3 }
  0xbf   :  { %v706_v8 = vmul.f32 0.1, %v589_v5  ;;  %627 = vmatmul.bf16.gmra.mxu1 %v5502_v60  ;;  %v714_v21 = vmul.f32 0.8, %v589_v5  ;;  %v4958_v60 = vld [vmem:[#allocation16 + $0x88] sm:$0xf0] }
  0xc0   :  { %vm709_vm7 = vcmp.gt.f32.partialorder %v705_v7, 0.23  ;;  %v4961_v6 = vor.u32 %v5562_v49, %v4958_v60 }
  0xc1   :  { %v4748_v10 = vsel %vm709_vm7, 1.0, %v5924_v39  ;;  %vm710_vm8 = vcmp.gt.f32.partialorder %v706_v8, 0.23  ;;  %v711_v15 = vsel %vm709_vm7, 0.0, %v705_v7 }
  0xc2   :  { %v4749_v11 = vsel %vm710_vm8, 1.0, %v5924_v39  ;;  %v712_v20 = vsel %vm710_vm8, 0.0, %v706_v8  ;;  %v727_v25 = vmul.f32 0.9, %v711_v15  ;;  %1757 = vmatpush.bf16.msrb.mxu1 %v4961_v6 }
  0xc3   :  { %v722_v13 = vpack.c.bf16 %v4749_v11, %v4748_v10  ;;  %v521_v14 = vpop.f32.mrf.mxu0  ;;  %v728_v29 = vmul.f32 0.9, %v712_v20 }
  0xc4   :  { %v522_v17 = vadd.f32 %v521_v14, %v6048_v55  ;;  %v590_v18 = vpop.f32.mrf.mxu1 }
  0xc5   :  { %724 = vst [vmem:[#allocation4 + $0x8] sm:$0xff] %v722_v13  ;;  %v591_v22 = vadd.f32 %v590_v18, %v6050_v56 }
  0xc6   :  { %v715_v23 = vadd.f32 %v713_v16, %v522_v17 }
  0xc7   :  { %v716_v26 = vadd.f32 %v714_v21, %v591_v22 }
  0xc8   :  { %v729_v30 = vmul.f32 0.1, %v715_v23  ;;  %v737_v31 = vmul.f32 0.8, %v715_v23 }
  0xc9   :  { %v730_v33 = vmul.f32 0.1, %v716_v26  ;;  %v738_v24 = vmul.f32 0.8, %v716_v26 }
  0xca   :  { %v731_v35 = vadd.f32 %v729_v30, %v727_v25 }
  0xcb   :  { %v732_v42 = vadd.f32 %v730_v33, %v728_v29  ;;  %v524_v43 = vpop.f32.mrf.mxu0 }
  0xcc   :  { %v525_v50 = vadd.f32 %v524_v43, %v6048_v55  ;;  %vm733_vm10 = vcmp.gt.f32.partialorder %v731_v35, 0.23  ;;  %v593_v51 = vpop.f32.mrf.mxu1  ;;  %v5523_v52 = vld [vmem:[#allocation4 + $0x4] sm:$0xf0]  ;;  %v4798_v53 = vld [vmem:[#allocation4 + $0x8] sm:$0xf0] }
  0xcd   :  { %v735_v57 = vsel %vm733_vm10, 0.0, %v731_v35  ;;  %v4750_v58 = vsel %vm733_vm10, 1.0, %v5924_v39  ;;  %v594_v59 = vadd.f32 %v593_v51, %v6050_v56  ;;  %vm734_vm11 = vcmp.gt.f32.partialorder %v732_v42, 0.23  ;;  %v5615_v35 = vld [vmem:[#allocation18 + $0x64] sm:$0xf0] }
  0xce   :  { %v739_v61 = vadd.f32 %v737_v31, %v525_v50  ;;  %v736_v62 = vsel %vm734_vm11, 0.0, %v732_v42  ;;  %v4751_v63 = vsel %vm734_vm11, 1.0, %v5924_v39  ;;  %563 = vmatmul.bf16.gmra.mxu0 %v5503_v32  ;;  %v6068_v2 = vor.u32 %v5523_v52, %v4796_v36  ;;  %v5504_v31 = vld [vmem:[#allocation2 + $0x10] sm:$0xff] }
  0xcf   :  { %v740_v0 = vadd.f32 %v738_v24, %v594_v59  ;;  %v765_v1 = vpack.c.bf16 %v4751_v63, %v4750_v58  ;;  %632 = vmatmul.bf16.gmra.mxu1 %v5503_v32  ;;  %v747_v3 = vmul.f32 0.9, %v735_v57  ;;  %v6070_v5 = vor.u32 %v5522_v44, %v4798_v53 }
  0xd0   :  { %v749_v4 = vmul.f32 0.1, %v739_v61  ;;  %v748_v7 = vmul.f32 0.9, %v736_v62  ;;  %1551 = vmatmul.bf16.vlgmr.msra.gmra.mxu2 %v6068_v2  ;;  %v757_v12 = vmul.f32 0.8, %v739_v61  ;;  %v5211_v38 = vor.u32 %v5615_v35, %v5210_v34 }
  0xd1   :  { %v750_v8 = vmul.f32 0.1, %v740_v0  ;;  %767 = vst [vmem:[#allocation4 + $0x10] sm:$0xff] %v765_v1  ;;  %1620 = vmatmul.bf16.vlgmr.msra.gmra.mxu3 %v6070_v5  ;;  %v758_v13 = vmul.f32 0.8, %v740_v0  ;;  %v5275_v51 = vor.u32 %v5631_v41, %v5274_v40 }
  0xd2   :  { %v751_v9 = vadd.f32 %v749_v4, %v747_v3  ;;  %2951 = vmatpush.bf16.msrb.mxu2 %v5211_v38 }
  0xd3   :  { %v752_v10 = vadd.f32 %v750_v8, %v748_v7  ;;  %v526_v11 = vpop.f32.mrf.mxu0  ;;  %3020 = vmatpush.bf16.msrb.mxu3 %v5275_v51 }
  0xd4   :  { %vm753_vm12 = vcmp.gt.f32.partialorder %v751_v9, 0.23  ;;  %v527_v14 = vadd.f32 %v526_v11, %v6048_v55  ;;  %v595_v15 = vpop.f32.mrf.mxu1 }
  0xd5   :  { %v755_v16 = vsel %vm753_vm12, 0.0, %v751_v9  ;;  %v4752_v17 = vsel %vm753_vm12, 1.0, %v5924_v39  ;;  %vm754_vm13 = vcmp.gt.f32.partialorder %v752_v10, 0.23  ;;  %v596_v18 = vadd.f32 %v595_v15, %v6050_v56 }
  0xd6   :  { %v756_v19 = vsel %vm754_vm13, 0.0, %v752_v10  ;;  %v4753_v20 = vsel %vm754_vm13, 1.0, %v5924_v39  ;;  %v759_v21 = vadd.f32 %v757_v12, %v527_v14  ;;  %v771_v25 = vmul.f32 0.9, %v755_v16 }
  0xd7   :  { %v766_v22 = vpack.c.bf16 %v4753_v20, %v4752_v17  ;;  %v760_v23 = vadd.f32 %v758_v13, %v596_v18  ;;  %v772_v27 = vmul.f32 0.9, %v756_v19 }
  0xd8   :  { %v773_v26 = vmul.f32 0.1, %v759_v21  ;;  %v781_v30 = vmul.f32 0.8, %v759_v21  ;;  %v4804_v50 = vld [vmem:[#allocation4 + $0x10] sm:$0xf] }
  0xd9   :  { %768 = vst [vmem:[#allocation4 + $0x18] sm:$0xff] %v766_v22  ;;  %v774_v28 = vmul.f32 0.1, %v760_v23  ;;  %v782_v24 = vmul.f32 0.8, %v760_v23  ;;  %v5505_v21 = vld [vmem:[#allocation2 + $0x40] sm:$0xff] }
  0xda   :  { %v775_v29 = vadd.f32 %v773_v26, %v771_v25  ;;  %v5524_v61 = vld [vmem:[#allocation4 + $0x14] sm:$0xf]  ;;  %v5616_v22 = vld [vmem:[#allocation18 + $0x74] sm:$0xf]  ;;  %v5220_v23 = vld [vmem:[#allocation18 + $0x78] sm:$0xf0] }
  0xdb   :  { %v776_v32 = vadd.f32 %v774_v28, %v772_v27  ;;  %v529_v33 = vpop.f32.mrf.mxu0  ;;  %v5223_v28 = vor.u32 %v5616_v22, %v5220_v23  ;;  %v5266_v22 = vld [vmem:[#allocation18 + $0xd0] sm:$0xf]  ;;  %v5629_v23 = vld [vmem:[#allocation18 + $0xd4] sm:$0xf0] }
  0xdc   :  { %v530_v36 = vadd.f32 %v529_v33, %v6048_v55  ;;  %vm777_vm14 = vcmp.gt.f32.partialorder %v775_v29, 0.23  ;;  %v598_v37 = vpop.f32.mrf.mxu1 }
  0xdd   :  { %v779_v42 = vsel %vm777_vm14, 0.0, %v775_v29  ;;  %v4754_v43 = vsel %vm777_vm14, 1.0, %v5924_v39  ;;  %v599_v44 = vadd.f32 %v598_v37, %v6050_v56  ;;  %vm778_vm15 = vcmp.gt.f32.partialorder %v776_v32, 0.23  ;;  %v5632_v29 = vld [vmem:[#allocation18 + $0xf4] sm:$0xf]  ;;  %3088 = vmatpush.bf16.msra.mxu0 %v5223_v28 }
  0xde   :  { %v783_v45 = vadd.f32 %v781_v30, %v530_v36  ;;  %v780_v46 = vsel %vm778_vm15, 0.0, %v776_v32  ;;  %v4755_v47 = vsel %vm778_vm15, 1.0, %v5924_v39  ;;  %568 = vmatmul.bf16.gmra.mxu0 %v5504_v31  ;;  %v791_v52 = vmul.f32 0.9, %v779_v42  ;;  %v5284_v30 = vld [vmem:[#allocation18 + $0xf8] sm:$0xf0] }
  0xdf   :  { %v784_v48 = vadd.f32 %v782_v24, %v599_v44  ;;  %v809_v49 = vpack.c.bf16 %v4755_v47, %v4754_v43  ;;  %637 = vmatmul.bf16.gmra.mxu1 %v5504_v31  ;;  %v792_v57 = vmul.f32 0.9, %v780_v46  ;;  %v5287_v24 = vor.u32 %v5632_v29, %v5284_v30  ;;  %v5212_v29 = vld [vmem:[#allocation18 + $0x68] sm:$0xf0]  ;;  %v5630_v30 = vld [vmem:[#allocation18 + $0xe4] sm:$0xf] }
  0xe0   :  { %v793_v53 = vmul.f32 0.1, %v783_v45  ;;  %v5525_v54 = vld [vmem:[#allocation4 + $0x14] sm:$0xf0]  ;;  %v4806_v62 = vld [vmem:[#allocation4 + $0x18] sm:$0xf0]  ;;  %v5267_v28 = vor.u32 %v5629_v23, %v5266_v22 }
  0xe1   :  { %v794_v58 = vmul.f32 0.1, %v784_v48  ;;  %811 = vst [vmem:[#allocation4 + $0x20] sm:$0xff] %v809_v49  ;;  %v6082_v59 = vor.u32 %v5525_v54, %v4804_v50  ;;  %v6085_v0 = vor.u32 %v5524_v61, %v4806_v62  ;;  %v801_v3 = vmul.f32 0.8, %v783_v45  ;;  %3157 = vmatpush.bf16.msra.mxu1 %v5287_v24 }
  0xe2   :  { %v795_v60 = vadd.f32 %v793_v53, %v791_v52  ;;  %v802_v4 = vmul.f32 0.8, %v784_v48  ;;  %v5276_v24 = vld [vmem:[#allocation18 + $0xe8] sm:$0xf0]  ;;  %3021 = vmatpush.bf16.msrb.mxu3 %v5267_v28  ;;  %v5258_v23 = vld [vmem:[#allocation18 + $0xc0] sm:$0xf] }
  0xe3   :  { %v796_v63 = vadd.f32 %v794_v58, %v792_v57  ;;  %1556 = vmatmul.bf16.gmra.mxu2 %v6082_v59  ;;  %v531_v1 = vpop.f32.mrf.mxu0  ;;  %1625 = vmatmul.bf16.gmra.mxu3 %v6085_v0 }
  0xe4   :  { %vm797_vm0 = vcmp.gt.f32.partialorder %v795_v60, 0.23  ;;  %v532_v6 = vadd.f32 %v531_v1, %v6048_v55  ;;  %v600_v7 = vpop.f32.mrf.mxu1 }
  0xe5   :  { %v799_v8 = vsel %vm797_vm0, 0.0, %v795_v60  ;;  %v4756_v9 = vsel %vm797_vm0, 1.0, %v5924_v39  ;;  %vm798_vm1 = vcmp.gt.f32.partialorder %v796_v63, 0.23  ;;  %v601_v10 = vadd.f32 %v600_v7, %v6050_v56 }
  0xe6   :  { %v800_v11 = vsel %vm798_vm1, 0.0, %v796_v63  ;;  %v4757_v12 = vsel %vm798_vm1, 1.0, %v5924_v39  ;;  %v803_v13 = vadd.f32 %v801_v3, %v532_v6  ;;  %v815_v16 = vmul.f32 0.9, %v799_v8 }
  0xe7   :  { %v810_v14 = vpack.c.bf16 %v4757_v12, %v4756_v9  ;;  %v804_v15 = vadd.f32 %v802_v4, %v601_v10  ;;  %v816_v18 = vmul.f32 0.9, %v800_v11 }
  0xe8   :  { %v817_v17 = vmul.f32 0.1, %v803_v13  ;;  %v825_v27 = vmul.f32 0.8, %v803_v13  ;;  %v4812_v43 = vld [vmem:[#allocation4 + $0x20] sm:$0xf] }
  0xe9   :  { %812 = vst [vmem:[#allocation4 + $0x28] sm:$0xff] %v810_v14  ;;  %v818_v19 = vmul.f32 0.1, %v804_v15  ;;  %v826_v33 = vmul.f32 0.8, %v804_v15 }
  0xea   :  { %v819_v20 = vadd.f32 %v817_v17, %v815_v16  ;;  %v5526_v51 = vld [vmem:[#allocation4 + $0x24] sm:$0xf]  ;;  %v5202_v17 = vld [vmem:[#allocation18 + $0x50] sm:$0xf] }
  0xeb   :  { %v820_v25 = vadd.f32 %v818_v19, %v816_v18  ;;  %v534_v26 = vpop.f32.mrf.mxu0  ;;  %v5613_v18 = vld [vmem:[#allocation18 + $0x54] sm:$0xf0] }
  0xec   :  { %v535_v31 = vadd.f32 %v534_v26, %v6048_v55  ;;  %vm821_vm2 = vcmp.gt.f32.partialorder %v819_v20, 0.23  ;;  %v603_v32 = vpop.f32.mrf.mxu1 }
  0xed   :  { %v823_v34 = vsel %vm821_vm2, 0.0, %v819_v20  ;;  %v4758_v35 = vsel %vm821_vm2, 1.0, %v5924_v39  ;;  %v604_v36 = vadd.f32 %v603_v32, %v6050_v56  ;;  %vm822_vm3 = vcmp.gt.f32.partialorder %v820_v25, 0.23 }
  0xee   :  { %v827_v37 = vadd.f32 %v825_v27, %v535_v31  ;;  %v824_v38 = vsel %vm822_vm3, 0.0, %v820_v25  ;;  %v4759_v40 = vsel %vm822_vm3, 1.0, %v5924_v39  ;;  %573 = vmatmul.bf16.gmra.mxu0 %v5505_v21  ;;  %v835_v44 = vmul.f32 0.9, %v823_v34  ;;  %v5614_v25 = vld [vmem:[#allocation18 + $0x64] sm:$0xf] }
  0xef   :  { %v828_v41 = vadd.f32 %v826_v33, %v604_v36  ;;  %v853_v42 = vpack.c.bf16 %v4759_v40, %v4758_v35  ;;  %642 = vmatmul.bf16.gmra.mxu1 %v5505_v21  ;;  %v836_v47 = vmul.f32 0.9, %v824_v38  ;;  %v5203_v21 = vor.u32 %v5613_v18, %v5202_v17  ;;  %v5194_v18 = vld [vmem:[#allocation18 + $0x40] sm:$0xf] }
  0xf0   :  { %v837_v45 = vmul.f32 0.1, %v827_v37  ;;  %v5527_v46 = vld [vmem:[#allocation4 + $0x24] sm:$0xf0]  ;;  %v4814_v52 = vld [vmem:[#allocation4 + $0x28] sm:$0xf0] }
  0xf1   :  { %v838_v48 = vmul.f32 0.1, %v828_v41  ;;  %855 = vst [vmem:[#allocation4 + $0x30] sm:$0xff] %v853_v42  ;;  %v6096_v49 = vor.u32 %v5527_v46, %v4812_v43  ;;  %v6099_v54 = vor.u32 %v5526_v51, %v4814_v52  ;;  %v845_v58 = vmul.f32 0.8, %v827_v37  ;;  %2952 = vmatpush.bf16.msrb.mxu2 %v5203_v21 }
  0xf2   :  { %v839_v50 = vadd.f32 %v837_v45, %v835_v44  ;;  %v846_v60 = vmul.f32 0.8, %v828_v41  ;;  %v5215_v41 = vor.u32 %v5614_v25, %v5212_v29  ;;  %v5279_v45 = vor.u32 %v5630_v30, %v5276_v24  ;;  %v5627_v25 = vld [vmem:[#allocation18 + $0xc4] sm:$0xf0] }
  0xf3   :  { %v840_v53 = vadd.f32 %v838_v48, %v836_v47  ;;  %1561 = vmatmul.bf16.gmra.mxu2 %v6096_v49  ;;  %v536_v57 = vpop.f32.mrf.mxu0  ;;  %1630 = vmatmul.bf16.gmra.mxu3 %v6099_v54 }
  0xf4   :  { %vm841_vm4 = vcmp.gt.f32.partialorder %v839_v50, 0.23  ;;  %v537_v61 = vadd.f32 %v536_v57, %v6048_v55  ;;  %v605_v62 = vpop.f32.mrf.mxu1  ;;  %3089 = vmatpush.bf16.msra.mxu0 %v5215_v41  ;;  %3158 = vmatpush.bf16.msra.mxu1 %v5279_v45 }
  0xf5   :  { %v843_v63 = vsel %vm841_vm4, 0.0, %v839_v50  ;;  %v4760_v1 = vsel %vm841_vm4, 1.0, %v5924_v39  ;;  %vm842_vm5 = vcmp.gt.f32.partialorder %v840_v53, 0.23  ;;  %v606_v3 = vadd.f32 %v605_v62, %v6050_v56 }
  0xf6   :  { %v844_v4 = vsel %vm842_vm5, 0.0, %v840_v53  ;;  %v4761_v6 = vsel %vm842_vm5, 1.0, %v5924_v39  ;;  %v847_v7 = vadd.f32 %v845_v58, %v537_v61  ;;  %v859_v10 = vmul.f32 0.9, %v843_v63 }
  0xf7   :  { %v854_v8 = vpack.c.bf16 %v4761_v6, %v4760_v1  ;;  %v848_v9 = vadd.f32 %v846_v60, %v606_v3  ;;  %v860_v11 = vmul.f32 0.9, %v844_v4 }
  0xf8   :  { %v861_v12 = vmul.f32 0.1, %v847_v7  ;;  %v869_v14 = vmul.f32 0.8, %v847_v7  ;;  %v4820_v40 = vld [vmem:[#allocation4 + $0x30] sm:$0xf] }
  0xf9   :  { %856 = vst [vmem:[#allocation4 + $0x38] sm:$0xff] %v854_v8  ;;  %v862_v13 = vmul.f32 0.1, %v848_v9  ;;  %v870_v16 = vmul.f32 0.8, %v848_v9 }
  0xfa   :  { %v863_v15 = vadd.f32 %v861_v12, %v859_v10  ;;  %v5528_v51 = vld [vmem:[#allocation4 + $0x34] sm:$0xf] }
  0xfb   :  { %v864_v19 = vadd.f32 %v862_v13, %v860_v11  ;;  %v539_v20 = vpop.f32.mrf.mxu0 }
  0xfc   :  { %v540_v26 = vadd.f32 %v539_v20, %v6048_v55  ;;  %vm865_vm6 = vcmp.gt.f32.partialorder %v863_v15, 0.23  ;;  %v608_v27 = vpop.f32.mrf.mxu1 }
  0xfd   :  { %v867_v31 = vsel %vm865_vm6, 0.0, %v863_v15  ;;  %v4762_v32 = vsel %vm865_vm6, 1.0, %v5924_v39  ;;  %v609_v33 = vadd.f32 %v608_v27, %v6050_v56  ;;  %vm866_vm7 = vcmp.gt.f32.partialorder %v864_v19, 0.23 }
  0xfe   :  { %v871_v34 = vadd.f32 %v869_v14, %v540_v26  ;;  %v868_v35 = vsel %vm866_vm7, 0.0, %v864_v19  ;;  %v4763_v36 = vsel %vm866_vm7, 1.0, %v5924_v39  ;;  %1689 = vmatmul.bf16.vlgmr.msrb.gmra.mxu0 %v6068_v2  ;;  %v879_v42 = vmul.f32 0.9, %v867_v31  ;;  %v5611_v19 = vld [vmem:[#allocation18 + $0x44] sm:$0xf0] }
  0xff   :  { %v872_v37 = vadd.f32 %v870_v16, %v609_v33  ;;  %v897_v38 = vpack.c.bf16 %v4763_v36, %v4762_v32  ;;  %1758 = vmatmul.bf16.vlgmr.msrb.gmra.mxu1 %v6070_v5  ;;  %v880_v46 = vmul.f32 0.9, %v868_v35  ;;  %v5195_v22 = vor.u32 %v5611_v19, %v5194_v18 }
 0x100   :  { %v881_v43 = vmul.f32 0.1, %v871_v34  ;;  %v5529_v44 = vld [vmem:[#allocation4 + $0x34] sm:$0xf0]  ;;  %v4822_v2 = vld [vmem:[#allocation4 + $0x38] sm:$0xf0] }
 0x101   :  { %v882_v47 = vmul.f32 0.1, %v872_v37  ;;  %899 = vst [vmem:[#allocation4 + $0x40] sm:$0xff] %v897_v38  ;;  %v6112_v48 = vor.u32 %v5529_v44, %v4820_v40  ;;  %v6115_v5 = vor.u32 %v5528_v51, %v4822_v2  ;;  %v889_v57 = vmul.f32 0.8, %v871_v34  ;;  %2953 = vmatpush.bf16.msrb.mxu2 %v5195_v22 }
 0x102   :  { %v883_v50 = vadd.f32 %v881_v43, %v879_v42  ;;  %v890_v58 = vmul.f32 0.8, %v872_v37  ;;  %v5259_v34 = vor.u32 %v5627_v25, %v5258_v23 }
 0x103   :  { %v884_v52 = vadd.f32 %v882_v47, %v880_v46  ;;  %1566 = vmatmul.bf16.gmra.mxu2 %v6112_v48  ;;  %v541_v53 = vpop.f32.mrf.mxu0  ;;  %1635 = vmatmul.bf16.gmra.mxu3 %v6115_v5 }
 0x104   :  { %vm885_vm8 = vcmp.gt.f32.partialorder %v883_v50, 0.23  ;;  %v542_v60 = vadd.f32 %v541_v53, %v6048_v55  ;;  %v610_v61 = vpop.f32.mrf.mxu1  ;;  %3022 = vmatpush.bf16.msrb.mxu3 %v5259_v34 }
 0x105   :  { %v887_v62 = vsel %vm885_vm8, 0.0, %v883_v50  ;;  %v4764_v63 = vsel %vm885_vm8, 1.0, %v5924_v39  ;;  %vm886_vm9 = vcmp.gt.f32.partialorder %v884_v52, 0.23  ;;  %v611_v1 = vadd.f32 %v610_v61, %v6050_v56 }
 0x106   :  { %v888_v3 = vsel %vm886_vm9, 0.0, %v884_v52  ;;  %v4765_v4 = vsel %vm886_vm9, 1.0, %v5924_v39  ;;  %v891_v6 = vadd.f32 %v889_v57, %v542_v60  ;;  %v903_v9 = vmul.f32 0.9, %v887_v62 }
 0x107   :  { %v898_v7 = vpack.c.bf16 %v4765_v4, %v4764_v63  ;;  %v892_v8 = vadd.f32 %v890_v58, %v611_v1  ;;  %v904_v11 = vmul.f32 0.9, %v888_v3 }
 0x108   :  { %v905_v10 = vmul.f32 0.1, %v891_v6  ;;  %v913_v14 = vmul.f32 0.8, %v891_v6  ;;  %v4828_v24 = vld [vmem:[#allocation4 + $0x40] sm:$0xf] }
 0x109   :  { %900 = vst [vmem:[#allocation4 + $0x48] sm:$0xff] %v898_v7  ;;  %v906_v12 = vmul.f32 0.1, %v892_v8  ;;  %v914_v17 = vmul.f32 0.8, %v892_v8 }
 0x10a   :  { %v907_v13 = vadd.f32 %v905_v10, %v903_v9  ;;  %v5530_v43 = vld [vmem:[#allocation4 + $0x44] sm:$0xf]  ;;  %v5612_v7 = vld [vmem:[#allocation18 + $0x54] sm:$0xf] }
 0x10b   :  { %v908_v15 = vadd.f32 %v906_v12, %v904_v11  ;;  %v544_v16 = vpop.f32.mrf.mxu0  ;;  %v5204_v8 = vld [vmem:[#allocation18 + $0x58] sm:$0xf0] }
 0x10c   :  { %v545_v20 = vadd.f32 %v544_v16, %v6048_v55  ;;  %vm909_vm10 = vcmp.gt.f32.partialorder %v907_v13, 0.23  ;;  %v613_v21 = vpop.f32.mrf.mxu1  ;;  %v5207_v12 = vor.u32 %v5612_v7, %v5204_v8  ;;  %v5250_v7 = vld [vmem:[#allocation18 + $0xb0] sm:$0xf]  ;;  %v5625_v8 = vld [vmem:[#allocation18 + $0xb4] sm:$0xf0] }
 0x10d   :  { %v911_v26 = vsel %vm909_vm10, 0.0, %v907_v13  ;;  %v4766_v27 = vsel %vm909_vm10, 1.0, %v5924_v39  ;;  %v614_v28 = vadd.f32 %v613_v21, %v6050_v56  ;;  %vm910_vm11 = vcmp.gt.f32.partialorder %v908_v15, 0.23  ;;  %v5628_v13 = vld [vmem:[#allocation18 + $0xd4] sm:$0xf] }
 0x10e   :  { %v915_v29 = vadd.f32 %v913_v14, %v545_v20  ;;  %v912_v30 = vsel %vm910_vm11, 0.0, %v908_v15  ;;  %v4767_v31 = vsel %vm910_vm11, 1.0, %v5924_v39  ;;  %1694 = vmatmul.bf16.gmra.mxu0 %v6082_v59  ;;  %v923_v35 = vmul.f32 0.9, %v911_v26  ;;  %v5268_v14 = vld [vmem:[#allocation18 + $0xd8] sm:$0xf0] }
 0x10f   :  { %v916_v32 = vadd.f32 %v914_v17, %v614_v28  ;;  %v941_v33 = vpack.c.bf16 %v4767_v31, %v4766_v27  ;;  %1763 = vmatmul.bf16.gmra.mxu1 %v6085_v0  ;;  %v924_v38 = vmul.f32 0.9, %v912_v30  ;;  %v5271_v18 = vor.u32 %v5628_v13, %v5268_v14  ;;  %3090 = vmatpush.bf16.msra.mxu0 %v5207_v12  ;;  %v5196_v13 = vld [vmem:[#allocation18 + $0x48] sm:$0xf0]  ;;  %v5626_v14 = vld [vmem:[#allocation18 + $0xc4] sm:$0xf] }
 0x110   :  { %v925_v36 = vmul.f32 0.1, %v915_v29  ;;  %v5531_v37 = vld [vmem:[#allocation4 + $0x44] sm:$0xf0]  ;;  %v4830_v44 = vld [vmem:[#allocation4 + $0x48] sm:$0xf0]  ;;  %v5251_v12 = vor.u32 %v5625_v8, %v5250_v7 }
 0x111   :  { %v926_v40 = vmul.f32 0.1, %v916_v32  ;;  %943 = vst [vmem:[#allocation4 + $0x50] sm:$0xff] %v941_v33  ;;  %v6128_v41 = vor.u32 %v5531_v37, %v4828_v24  ;;  %v6131_v45 = vor.u32 %v5530_v43, %v4830_v44  ;;  %v933_v46 = vmul.f32 0.8, %v915_v29  ;;  %3159 = vmatpush.bf16.msra.mxu1 %v5271_v18 }
 0x112   :  { %v927_v42 = vadd.f32 %v925_v36, %v923_v35  ;;  %v934_v47 = vmul.f32 0.8, %v916_v32  ;;  %v5260_v18 = vld [vmem:[#allocation18 + $0xc8] sm:$0xf0]  ;;  %3023 = vmatpush.bf16.msrb.mxu3 %v5251_v12 }
 0x113   :  { %v928_v59 = vadd.f32 %v926_v40, %v924_v38  ;;  %1571 = vmatmul.bf16.gmra.mxu2 %v6128_v41  ;;  %v546_v0 = vpop.f32.mrf.mxu0  ;;  %1640 = vmatmul.bf16.gmra.mxu3 %v6131_v45 }
 0x114   :  { %vm929_vm12 = vcmp.gt.f32.partialorder %v927_v42, 0.23  ;;  %v547_v50 = vadd.f32 %v546_v0, %v6048_v55  ;;  %v615_v51 = vpop.f32.mrf.mxu1 }
 0x115   :  { %v931_v2 = vsel %vm929_vm12, 0.0, %v927_v42  ;;  %v4768_v52 = vsel %vm929_vm12, 1.0, %v5924_v39  ;;  %vm930_vm13 = vcmp.gt.f32.partialorder %v928_v59, 0.23  ;;  %v616_v53 = vadd.f32 %v615_v51, %v6050_v56 }
 0x116   :  { %v932_v57 = vsel %vm930_vm13, 0.0, %v928_v59  ;;  %v4769_v58 = vsel %vm930_vm13, 1.0, %v5924_v39  ;;  %v935_v60 = vadd.f32 %v933_v46, %v547_v50  ;;  %v947_v63 = vmul.f32 0.9, %v931_v2 }
 0x117   :  { %v942_v61 = vpack.c.bf16 %v4769_v58, %v4768_v52  ;;  %v936_v62 = vadd.f32 %v934_v47, %v616_v53  ;;  %v948_v3 = vmul.f32 0.9, %v932_v57 }
 0x118   :  { %v949_v1 = vmul.f32 0.1, %v935_v60  ;;  %v957_v11 = vmul.f32 0.8, %v935_v60  ;;  %v4836_v28 = vld [vmem:[#allocation4 + $0x50] sm:$0xf] }
 0x119   :  { %944 = vst [vmem:[#allocation4 + $0x58] sm:$0xff] %v942_v61  ;;  %v950_v4 = vmul.f32 0.1, %v936_v62  ;;  %v958_v17 = vmul.f32 0.8, %v936_v62 }
 0x11a   :  { %v951_v6 = vadd.f32 %v949_v1, %v947_v63  ;;  %v5532_v35 = vld [vmem:[#allocation4 + $0x54] sm:$0xf]  ;;  %v5186_v63 = vld [vmem:[#allocation18 + $0x30] sm:$0xf]  ;;  %v5609_v1 = vld [vmem:[#allocation18 + $0x34] sm:$0xf0] }
 0x11b   :  { %v952_v9 = vadd.f32 %v950_v4, %v948_v3  ;;  %v549_v10 = vpop.f32.mrf.mxu0 }
 0x11c   :  { %v550_v15 = vadd.f32 %v549_v10, %v6048_v55  ;;  %vm953_vm14 = vcmp.gt.f32.partialorder %v951_v6, 0.23  ;;  %v618_v16 = vpop.f32.mrf.mxu1 }
 0x11d   :  { %v955_v19 = vsel %vm953_vm14, 0.0, %v951_v6  ;;  %v4770_v20 = vsel %vm953_vm14, 1.0, %v5924_v39  ;;  %v619_v21 = vadd.f32 %v618_v16, %v6050_v56  ;;  %vm954_vm15 = vcmp.gt.f32.partialorder %v952_v9, 0.23 }
 0x11e   :  { %v959_v22 = vadd.f32 %v957_v11, %v550_v15  ;;  %v956_v23 = vsel %vm954_vm15, 0.0, %v952_v9  ;;  %v4771_v25 = vsel %vm954_vm15, 1.0, %v5924_v39  ;;  %1699 = vmatmul.bf16.gmra.mxu0 %v6096_v49  ;;  %v967_v29 = vmul.f32 0.9, %v955_v19  ;;  %v5610_v9 = vld [vmem:[#allocation18 + $0x44] sm:$0xf] }
 0x11f   :  { %v960_v26 = vadd.f32 %v958_v17, %v619_v21  ;;  %v985_v27 = vpack.c.bf16 %v4771_v25, %v4770_v20  ;;  %1768 = vmatmul.bf16.gmra.mxu1 %v6099_v54  ;;  %v968_v32 = vmul.f32 0.9, %v956_v23  ;;  %v5187_v6 = vor.u32 %v5609_v1, %v5186_v63 }
 0x120   :  { %v969_v30 = vmul.f32 0.1, %v959_v22  ;;  %v5533_v31 = vld [vmem:[#allocation4 + $0x54] sm:$0xf0]  ;;  %v4838_v36 = vld [vmem:[#allocation4 + $0x58] sm:$0xf0] }
 0x121   :  { %v970_v33 = vmul.f32 0.1, %v960_v26  ;;  %987 = vst [vmem:[#allocation4 + $0x60] sm:$0xff] %v985_v27  ;;  %v6144_v24 = vor.u32 %v5533_v31, %v4836_v28  ;;  %v6147_v49 = vor.u32 %v5532_v35, %v4838_v36  ;;  %v977_v54 = vmul.f32 0.8, %v959_v22  ;;  %2954 = vmatpush.bf16.msrb.mxu2 %v5187_v6 }
 0x122   :  { %v971_v34 = vadd.f32 %v969_v30, %v967_v29  ;;  %v978_v40 = vmul.f32 0.8, %v960_v26  ;;  %v5199_v26 = vor.u32 %v5610_v9, %v5196_v13  ;;  %v5263_v30 = vor.u32 %v5626_v14, %v5260_v18 }
 0x123   :  { %v972_v37 = vadd.f32 %v970_v33, %v968_v32  ;;  %1576 = vmatmul.bf16.gmra.mxu2 %v6144_v24  ;;  %v551_v38 = vpop.f32.mrf.mxu0  ;;  %1645 = vmatmul.bf16.gmra.mxu3 %v6147_v49 }
 0x124   :  { %vm973_vm0 = vcmp.gt.f32.partialorder %v971_v34, 0.23  ;;  %v552_v42 = vadd.f32 %v551_v38, %v6048_v55  ;;  %v620_v43 = vpop.f32.mrf.mxu1  ;;  %3091 = vmatpush.bf16.msra.mxu0 %v5199_v26  ;;  %3160 = vmatpush.bf16.msra.mxu1 %v5263_v30 }
 0x125   :  { %v975_v44 = vsel %vm973_vm0, 0.0, %v971_v34  ;;  %v4772_v59 = vsel %vm973_vm0, 1.0, %v5924_v39  ;;  %vm974_vm1 = vcmp.gt.f32.partialorder %v972_v37, 0.23  ;;  %v621_v0 = vadd.f32 %v620_v43, %v6050_v56 }
 0x126   :  { %v976_v46 = vsel %vm974_vm1, 0.0, %v972_v37  ;;  %v4773_v47 = vsel %vm974_vm1, 1.0, %v5924_v39  ;;  %v979_v50 = vadd.f32 %v977_v54, %v552_v42  ;;  %v991_v52 = vmul.f32 0.9, %v975_v44 }
 0x127   :  { %v986_v51 = vpack.c.bf16 %v4773_v47, %v4772_v59  ;;  %v980_v2 = vadd.f32 %v978_v40, %v621_v0  ;;  %v992_v53 = vmul.f32 0.9, %v976_v46 }
 0x128   :  { %v993_v57 = vmul.f32 0.1, %v979_v50  ;;  %v1001_v60 = vmul.f32 0.8, %v979_v50  ;;  %v4844_v25 = vld [vmem:[#allocation4 + $0x60] sm:$0xf] }
 0x129   :  { %988 = vst [vmem:[#allocation4 + $0x68] sm:$0xff] %v986_v51  ;;  %v994_v58 = vmul.f32 0.1, %v980_v2  ;;  %v1002_v62 = vmul.f32 0.8, %v980_v2 }
 0x12a   :  { %v995_v61 = vadd.f32 %v993_v57, %v991_v52  ;;  %v5534_v35 = vld [vmem:[#allocation4 + $0x64] sm:$0xf] }
 0x12b   :  { %v996_v3 = vadd.f32 %v994_v58, %v992_v53  ;;  %v554_v4 = vpop.f32.mrf.mxu0 }
 0x12c   :  { %v555_v10 = vadd.f32 %v554_v4, %v6048_v55  ;;  %vm997_vm2 = vcmp.gt.f32.partialorder %v995_v61, 0.23  ;;  %v623_v11 = vpop.f32.mrf.mxu1 }
 0x12d   :  { %v999_v15 = vsel %vm997_vm2, 0.0, %v995_v61  ;;  %v4774_v16 = vsel %vm997_vm2, 1.0, %v5924_v39  ;;  %v624_v17 = vadd.f32 %v623_v11, %v6050_v56  ;;  %vm998_vm3 = vcmp.gt.f32.partialorder %v996_v3, 0.23 }
 0x12e   :  { %v1003_v19 = vadd.f32 %v1001_v60, %v555_v10  ;;  %v1000_v20 = vsel %vm998_vm3, 0.0, %v996_v3  ;;  %v4775_v21 = vsel %vm998_vm3, 1.0, %v5924_v39  ;;  %1704 = vmatmul.bf16.gmra.mxu0 %v6112_v48  ;;  %v1011_v27 = vmul.f32 0.9, %v999_v15 }
 0x12f   :  { %v1004_v22 = vadd.f32 %v1002_v62, %v624_v17  ;;  %v1029_v23 = vpack.c.bf16 %v4775_v21, %v4774_v16  ;;  %1773 = vmatmul.bf16.gmra.mxu1 %v6115_v5  ;;  %v1012_v31 = vmul.f32 0.9, %v1000_v20 }
 0x130   :  { %v1013_v28 = vmul.f32 0.1, %v1003_v19  ;;  %v5535_v29 = vld [vmem:[#allocation4 + $0x64] sm:$0xf0]  ;;  %v4846_v48 = vld [vmem:[#allocation4 + $0x68] sm:$0xf0] }
 0x131   :  { %v1014_v32 = vmul.f32 0.1, %v1004_v22  ;;  %1031 = vst [vmem:[#allocation4 + $0x70] sm:$0xff] %v1029_v23  ;;  %v6160_v33 = vor.u32 %v5535_v29, %v4844_v25  ;;  %v6163_v5 = vor.u32 %v5534_v35, %v4846_v48  ;;  %v1021_v38 = vmul.f32 0.8, %v1003_v19 }
 0x132   :  { %v1015_v34 = vadd.f32 %v1013_v28, %v1011_v27  ;;  %v1022_v54 = vmul.f32 0.8, %v1004_v22 }
 0x133   :  { %v1016_v36 = vadd.f32 %v1014_v32, %v1012_v31  ;;  %1581 = vmatmul.bf16.gmra.mxu2 %v6160_v33  ;;  %v556_v37 = vpop.f32.mrf.mxu0  ;;  %1650 = vmatmul.bf16.gmra.mxu3 %v6163_v5  ;;  %v5178_v32 = vld [vmem:[#allocation18 + $0x20] sm:$0xf] }
 0x134   :  { %vm1017_vm4 = vcmp.gt.f32.partialorder %v1015_v34, 0.23  ;;  %v557_v40 = vadd.f32 %v556_v37, %v6048_v55  ;;  %v625_v42 = vpop.f32.mrf.mxu1 }
 0x135   :  { %v1019_v43 = vsel %vm1017_vm4, 0.0, %v1015_v34  ;;  %v4776_v44 = vsel %vm1017_vm4, 1.0, %v5924_v39  ;;  %vm1018_vm5 = vcmp.gt.f32.partialorder %v1016_v36, 0.23  ;;  %v626_v59 = vadd.f32 %v625_v42, %v6050_v56  ;;  %v5623_v42 = vld [vmem:[#allocation18 + $0xa4] sm:$0xf0] }
 0x136   :  { %v1020_v0 = vsel %vm1018_vm5, 0.0, %v1016_v36  ;;  %v4777_v46 = vsel %vm1018_vm5, 1.0, %v5924_v39  ;;  %v1023_v47 = vadd.f32 %v1021_v38, %v557_v40  ;;  %v1035_v2 = vmul.f32 0.9, %v1019_v43  ;;  %v5607_v36 = vld [vmem:[#allocation18 + $0x24] sm:$0xf0] }
 0x137   :  { %v1030_v50 = vpack.c.bf16 %v4777_v46, %v4776_v44  ;;  %v1024_v51 = vadd.f32 %v1022_v54, %v626_v59  ;;  %v1036_v53 = vmul.f32 0.9, %v1020_v0  ;;  %v5179_v54 = vor.u32 %v5607_v36, %v5178_v32  ;;  %v5242_v40 = vld [vmem:[#allocation18 + $0xa0] sm:$0xf] }
 0x138   :  { %v1037_v52 = vmul.f32 0.1, %v1023_v47  ;;  %v1045_v63 = vmul.f32 0.8, %v1023_v47  ;;  %v4852_v13 = vld [vmem:[#allocation4 + $0x70] sm:$0xf]  ;;  %v5243_v59 = vor.u32 %v5623_v42, %v5242_v40 }
 0x139   :  { %1032 = vst [vmem:[#allocation4 + $0x78] sm:$0xff] %v1030_v50  ;;  %v1038_v57 = vmul.f32 0.1, %v1024_v51  ;;  %v1046_v3 = vmul.f32 0.8, %v1024_v51  ;;  %2955 = vmatpush.bf16.msrb.mxu2 %v5179_v54 }
 0x13a   :  { %v1039_v58 = vadd.f32 %v1037_v52, %v1035_v2  ;;  %v5536_v21 = vld [vmem:[#allocation4 + $0x74] sm:$0xf]  ;;  %3024 = vmatpush.bf16.msrb.mxu3 %v5243_v59  ;;  %v5608_v50 = vld [vmem:[#allocation18 + $0x34] sm:$0xf]  ;;  %v5188_v51 = vld [vmem:[#allocation18 + $0x38] sm:$0xf0] }
 0x13b   :  { %v1040_v60 = vadd.f32 %v1038_v57, %v1036_v53  ;;  %v559_v61 = vpop.f32.mrf.mxu0  ;;  %v5191_v57 = vor.u32 %v5608_v50, %v5188_v51  ;;  %v5605_v50 = vld [vmem:[#allocation18 + $0x14] sm:$0xf0] }
 0x13c   :  { %v560_v62 = vadd.f32 %v559_v61, %v6048_v55  ;;  %vm1041_vm6 = vcmp.gt.f32.partialorder %v1039_v58, 0.23  ;;  %v628_v1 = vpop.f32.mrf.mxu1 }
 0x13d   :  { %v1043_v4 = vsel %vm1041_vm6, 0.0, %v1039_v58  ;;  %v4778_v6 = vsel %vm1041_vm6, 1.0, %v5924_v39  ;;  %v629_v7 = vadd.f32 %v628_v1, %v6050_v56  ;;  %vm1042_vm7 = vcmp.gt.f32.partialorder %v1040_v60, 0.23  ;;  %v5624_v58 = vld [vmem:[#allocation18 + $0xb4] sm:$0xf]  ;;  %3092 = vmatpush.bf16.msra.mxu0 %v5191_v57 }
 0x13e   :  { %v1047_v8 = vadd.f32 %v1045_v63, %v560_v62  ;;  %v1044_v9 = vsel %vm1042_vm7, 0.0, %v1040_v60  ;;  %v4779_v10 = vsel %vm1042_vm7, 1.0, %v5924_v39  ;;  %1709 = vmatmul.bf16.gmra.mxu0 %v6128_v41  ;;  %v1055_v14 = vmul.f32 0.9, %v1043_v4  ;;  %v5252_v60 = vld [vmem:[#allocation18 + $0xb8] sm:$0xf0] }
 0x13f   :  { %v1048_v11 = vadd.f32 %v1046_v3, %v629_v7  ;;  %v1073_v12 = vpack.c.bf16 %v4779_v10, %v4778_v6  ;;  %1778 = vmatmul.bf16.gmra.mxu1 %v6131_v45  ;;  %v1056_v17 = vmul.f32 0.9, %v1044_v9  ;;  %v5255_v1 = vor.u32 %v5624_v58, %v5252_v60  ;;  %v6194_v10 = vld [vmem:[%s6914_s4] sm:$0x3] }
 0x140   :  { %v1057_v15 = vmul.f32 0.1, %v1047_v8  ;;  %v5537_v16 = vld [vmem:[#allocation4 + $0x74] sm:$0xf0]  ;;  %v4854_v22 = vld [vmem:[#allocation4 + $0x78] sm:$0xf0] }
 0x141   :  { %v1058_v18 = vmul.f32 0.1, %v1048_v11  ;;  %1075 = vst [vmem:[#allocation4 + $0x80] sm:$0xff] %v1073_v12  ;;  %v6176_v19 = vor.u32 %v5537_v16, %v4852_v13  ;;  %v6179_v41 = vor.u32 %v5536_v21, %v4854_v22  ;;  %v1065_v45 = vmul.f32 0.8, %v1047_v8  ;;  %3161 = vmatpush.bf16.msra.mxu1 %v5255_v1 }
 0x142   :  { %v1059_v20 = vadd.f32 %v1057_v15, %v1055_v14  ;;  %v1066_v26 = vmul.f32 0.8, %v1048_v11 }
 0x143   :  { %v1060_v23 = vadd.f32 %v1058_v18, %v1056_v17  ;;  %1586 = vmatmul.bf16.gmra.mxu2 %v6176_v19  ;;  %v561_v25 = vpop.f32.mrf.mxu0  ;;  %1655 = vmatmul.bf16.gmra.mxu3 %v6179_v41 }
 0x144   :  { %vm1061_vm8 = vcmp.gt.f32.partialorder %v1059_v20, 0.23  ;;  %v562_v27 = vadd.f32 %v561_v25, %v6048_v55  ;;  %v630_v28 = vpop.f32.mrf.mxu1 }
 0x145   :  { %v1063_v29 = vsel %vm1061_vm8, 0.0, %v1059_v20  ;;  %v4780_v30 = vsel %vm1061_vm8, 1.0, %v5924_v39  ;;  %vm1062_vm9 = vcmp.gt.f32.partialorder %v1060_v23, 0.23  ;;  %v631_v31 = vadd.f32 %v630_v28, %v6050_v56 }
 0x146   :  { %v1064_v34 = vsel %vm1062_vm9, 0.0, %v1060_v23  ;;  %v4781_v35 = vsel %vm1062_vm9, 1.0, %v5924_v39  ;;  %v1067_v48 = vadd.f32 %v1065_v45, %v562_v27  ;;  %v1079_v43 = vmul.f32 0.9, %v1063_v29 }
 0x147   :  { %v1074_v37 = vpack.c.bf16 %v4781_v35, %v4780_v30  ;;  %v1068_v38 = vadd.f32 %v1066_v26, %v631_v31  ;;  %v1080_v0 = vmul.f32 0.9, %v1064_v34  ;;  %v6198_v20 = vperm.slane %v6194_v10, 0 }
 0x148   :  { %v1081_v44 = vmul.f32 0.1, %v1067_v48  ;;  %v1089_v53 = vmul.f32 0.8, %v1067_v48  ;;  %v4860_v13 = vld [vmem:[#allocation4 + $0x80] sm:$0xf] }
 0x149   :  { %1076 = vst [vmem:[#allocation4 + $0x88] sm:$0xff] %v1074_v37  ;;  %v1082_v46 = vmul.f32 0.1, %v1068_v38  ;;  %v1090_v63 = vmul.f32 0.8, %v1068_v38 }
 0x14a   :  { %v1083_v47 = vadd.f32 %v1081_v44, %v1079_v43  ;;  %v5538_v22 = vld [vmem:[#allocation4 + $0x84] sm:$0xf] }
 0x14b   :  { %v1084_v2 = vadd.f32 %v1082_v46, %v1080_v0  ;;  %v564_v52 = vpop.f32.mrf.mxu0 }
 0x14c   :  { %v565_v61 = vadd.f32 %v564_v52, %v6048_v55  ;;  %vm1085_vm10 = vcmp.gt.f32.partialorder %v1083_v47, 0.23  ;;  %v633_v62 = vpop.f32.mrf.mxu1 }
 0x14d   :  { %v1087_v3 = vsel %vm1085_vm10, 0.0, %v1083_v47  ;;  %v4782_v4 = vsel %vm1085_vm10, 1.0, %v5924_v39  ;;  %v634_v6 = vadd.f32 %v633_v62, %v6050_v56  ;;  %vm1086_vm11 = vcmp.gt.f32.partialorder %v1084_v2, 0.23  ;;  %v5170_v47 = vld [vmem:[#allocation18 + $0x10] sm:$0xf] }
 0x14e   :  { %v1091_v7 = vadd.f32 %v1089_v53, %v565_v61  ;;  %v1088_v8 = vsel %vm1086_vm11, 0.0, %v1084_v2  ;;  %v4783_v9 = vsel %vm1086_vm11, 1.0, %v5924_v39  ;;  %1714 = vmatmul.bf16.gmra.mxu0 %v6144_v24  ;;  %v1099_v14 = vmul.f32 0.9, %v1087_v3  ;;  %v5234_v62 = vld [vmem:[#allocation18 + $0x90] sm:$0xf] }
 0x14f   :  { %v1092_v11 = vadd.f32 %v1090_v63, %v634_v6  ;;  %v1117_v12 = vpack.c.bf16 %v4783_v9, %v4782_v4  ;;  %1783 = vmatmul.bf16.gmra.mxu1 %v6147_v49  ;;  %v1100_v17 = vmul.f32 0.9, %v1088_v8  ;;  %v5171_v53 = vor.u32 %v5605_v50, %v5170_v47  ;;  %v5621_v6 = vld [vmem:[#allocation18 + $0x94] sm:$0xf0] }
 0x150   :  { %v1101_v15 = vmul.f32 0.1, %v1091_v7  ;;  %v5539_v16 = vld [vmem:[#allocation4 + $0x84] sm:$0xf0]  ;;  %v4862_v23 = vld [vmem:[#allocation4 + $0x88] sm:$0xf0] }
 0x151   :  { %v1102_v18 = vmul.f32 0.1, %v1092_v11  ;;  %1119 = vst [vmem:[#allocation4 + $0x90] sm:$0xff] %v1117_v12  ;;  %v6200_v24 = vor.u32 %v5539_v16, %v4860_v13  ;;  %v6203_v45 = vor.u32 %v5538_v22, %v4862_v23  ;;  %v1109_v26 = vmul.f32 0.8, %v1091_v7  ;;  %2956 = vmatpush.bf16.msrb.mxu2 %v5171_v53 }
 0x152   :  { %v1103_v21 = vadd.f32 %v1101_v15, %v1099_v14  ;;  %v1110_v35 = vmul.f32 0.8, %v1092_v11  ;;  %v5235_v15 = vor.u32 %v5621_v6, %v5234_v62 }
 0x153   :  { %v1104_v25 = vadd.f32 %v1102_v18, %v1100_v17  ;;  %1591 = vmatmul.bf16.gmra.mxu2 %v6200_v24  ;;  %v566_v49 = vpop.f32.mrf.mxu0  ;;  %v1552_v27 = vpop.f32.mrf.mxu2  ;;  %1660 = vmatmul.bf16.gmra.mxu3 %v6203_v45 }
 0x154   :  { %vm1105_vm12 = vcmp.gt.f32.partialorder %v1103_v21, 0.23  ;;  %v567_v28 = vadd.f32 %v566_v49, %v6048_v55  ;;  %v635_v29 = vpop.f32.mrf.mxu1  ;;  %v1553_v32 = vadd.f32 %v1552_v27, %v6198_v20  ;;  %v1621_v34 = vpop.f32.mrf.mxu3  ;;  %3025 = vmatpush.bf16.msrb.mxu3 %v5235_v15 }
 0x155   :  { %v1107_v30 = vsel %vm1105_vm12, 0.0, %v1103_v21  ;;  %v4784_v31 = vsel %vm1105_vm12, 1.0, %v5924_v39  ;;  %vm1106_vm13 = vcmp.gt.f32.partialorder %v1104_v25, 0.23  ;;  %v636_v40 = vadd.f32 %v635_v29, %v6050_v56 }
 0x156   :  { %v4785_v48 = vsel %vm1106_vm13, 1.0, %v5924_v39  ;;  %v1111_v36 = vadd.f32 %v1109_v26, %v567_v28  ;;  %v1108_v37 = vsel %vm1106_vm13, 0.0, %v1104_v25  ;;  %v1622_v54 = vadd.f32 %v1621_v34, %v1553_v32 }
 0x157   :  { %v1118_v38 = vpack.c.bf16 %v4785_v48, %v4784_v31  ;;  %v1123_v42 = vmul.f32 0.9, %v1107_v30  ;;  %v1112_v59 = vadd.f32 %v1110_v35, %v636_v40  ;;  %v1124_v0 = vmul.f32 0.9, %v1108_v37  ;;  %v5180_v40 = vld [vmem:[#allocation18 + $0x28] sm:$0xf0] }
 0x158   :  { %v1125_v43 = vmul.f32 0.1, %v1111_v36  ;;  %v6211_v44 = vmul.f32 0.1, %v1622_v54  ;;  %v1133_v52 = vmul.f32 0.8, %v1111_v36 }
 0x159   :  { %1120 = vst [vmem:[#allocation4 + $0x98] sm:$0xff] %v1118_v38  ;;  %v1126_v51 = vmul.f32 0.1, %v1112_v59  ;;  %v1881_v63 = vmul.f32 0.8, %v1622_v54 }
 0x15a   :  { %v1127_v46 = vadd.f32 %v1125_v43, %v1123_v42  ;;  %vm1877_vm14 = vcmp.gt.f32.partialorder %v6211_v44, 0.23  ;;  %v1134_v12 = vmul.f32 0.8, %v1112_v59  ;;  %v4868_v22 = vld [vmem:[#allocation4 + $0x90] sm:$0xf] }
 0x15b   :  { %v569_v2 = vpop.f32.mrf.mxu0  ;;  %v1879_v57 = vsel %vm1877_vm14, 0.0, %v6211_v44  ;;  %v1554_v58 = vpop.f32.mrf.mxu2  ;;  %v1128_v1 = vadd.f32 %v1126_v51, %v1124_v0  ;;  %v5540_v23 = vld [vmem:[#allocation4 + $0x94] sm:$0xf]  ;;  %v5606_v36 = vld [vmem:[#allocation18 + $0x24] sm:$0xf] }
 0x15c   :  { %v570_v60 = vadd.f32 %v569_v2, %v6048_v55  ;;  %vm1129_vm15 = vcmp.gt.f32.partialorder %v1127_v46, 0.23  ;;  %v638_v61 = vpop.f32.mrf.mxu1  ;;  %v1555_v3 = vadd.f32 %v1554_v58, %v6198_v20  ;;  %v1894_v7 = vmul.f32 0.9, %v1879_v57  ;;  %v1623_v8 = vpop.f32.mrf.mxu3  ;;  %v5622_v58 = vld [vmem:[#allocation18 + $0xa4] sm:$0xf] }
 0x15d   :  { %v1131_v4 = vsel %vm1129_vm15, 0.0, %v1127_v46  ;;  %v639_v11 = vadd.f32 %v638_v61, %v6050_v56  ;;  %v4786_v14 = vsel %vm1129_vm15, 1.0, %v5924_v39  ;;  %vm1130_vm0 = vcmp.gt.f32.partialorder %v1128_v1, 0.23 }
 0x15e   :  { %v1135_v9 = vadd.f32 %v1133_v52, %v570_v60  ;;  %1719 = vmatmul.bf16.gmra.mxu0 %v6160_v33  ;;  %v1624_v13 = vadd.f32 %v1623_v8, %v1555_v3  ;;  %v1143_v16 = vmul.f32 0.9, %v1131_v4  ;;  %v1132_v18 = vsel %vm1130_vm0, 0.0, %v1128_v1  ;;  %v5244_v60 = vld [vmem:[#allocation18 + $0xa8] sm:$0xf0] }
 0x15f   :  { %1788 = vmatmul.bf16.gmra.mxu1 %v6163_v5  ;;  %v1136_v21 = vadd.f32 %v1134_v12, %v639_v11  ;;  %v4787_v26 = vsel %vm1130_vm0, 1.0, %v5924_v39  ;;  %v1144_v28 = vmul.f32 0.9, %v1132_v18  ;;  %v5183_v51 = vor.u32 %v5606_v36, %v5180_v40 }
 0x160   :  { %v1145_v17 = vmul.f32 0.1, %v1135_v9  ;;  %v1883_v25 = vadd.f32 %v1881_v63, %v1624_v13  ;;  %v1153_v49 = vmul.f32 0.8, %v1135_v9  ;;  %v5541_v27 = vld [vmem:[#allocation4 + $0x94] sm:$0xf0]  ;;  %v1161_v30 = vpack.c.bf16 %v4787_v26, %v4786_v14 }
 0x161   :  { %v1146_v29 = vmul.f32 0.1, %v1136_v21  ;;  %v4870_v31 = vld [vmem:[#allocation4 + $0x98] sm:$0xf0]  ;;  %v1154_v5 = vmul.f32 0.8, %v1136_v21  ;;  %v6226_v34 = vor.u32 %v5541_v27, %v4868_v22  ;;  %3093 = vmatpush.bf16.msra.mxu0 %v5183_v51  ;;  %v5247_v9 = vor.u32 %v5622_v58, %v5244_v60 }
 0x162   :  { %v1147_v33 = vadd.f32 %v1145_v17, %v1143_v16  ;;  %v1896_v32 = vmul.f32 0.1, %v1883_v25  ;;  %v6228_v35 = vor.u32 %v5540_v23, %v4870_v31  ;;  %1163 = vst [vmem:[#allocation4 + $0xa0] sm:$0xff] %v1161_v30  ;;  %v1904_v50 = vmul.f32 0.8, %v1883_v25  ;;  %v5734_v21 = vld [vmem:[#allocation4] sm:$0xff] }
 0x163   :  { %v571_v48 = vpop.f32.mrf.mxu0  ;;  %v1148_v37 = vadd.f32 %v1146_v29, %v1144_v28  ;;  %1596 = vmatmul.bf16.gmra.mxu2 %v6226_v34  ;;  %3162 = vmatpush.bf16.msra.mxu1 %v5247_v9  ;;  %v2392_v22 = vunpack.c.l.bf16 %v5734_v21  ;;  %v2393_v26 = vunpack.c.h.bf16 %v5734_v21  ;;  %v5603_v58 = vld [vmem:[#allocation18 + $0x4] sm:$0xf0] }
 0x164   :  { %vm1149_vm1 = vcmp.gt.f32.partialorder %v1147_v33, 0.23  ;;  %v572_v38 = vadd.f32 %v571_v48, %v6048_v55  ;;  %v640_v54 = vpop.f32.mrf.mxu1  ;;  %v6231_v42 = vadd.f32 %v1896_v32, %v1894_v7  ;;  %1665 = vmatmul.bf16.gmra.mxu3 %v6228_v35 }
 0x165   :  { %v1151_v43 = vsel %vm1149_vm1, 0.0, %v1147_v33  ;;  %v4788_v59 = vsel %vm1149_vm1, 1.0, %v5924_v39  ;;  %v641_v0 = vadd.f32 %v640_v54, %v6050_v56  ;;  %vm1150_vm2 = vcmp.gt.f32.partialorder %v1148_v37, 0.23 }
 0x166   :  { %v1155_v46 = vadd.f32 %v1153_v49, %v572_v38  ;;  %v1557_v47 = vpop.f32.mrf.mxu2  ;;  %v1152_v2 = vsel %vm1150_vm2, 0.0, %v1148_v37  ;;  %v4789_v52 = vsel %vm1150_vm2, 1.0, %v5924_v39  ;;  %v1167_v61 = vmul.f32 0.9, %v1151_v43  ;;  %v1626_v1 = vpop.f32.mrf.mxu3 }
 0x167   :  { %v1156_v53 = vadd.f32 %v1154_v5, %v641_v0  ;;  %v1558_v57 = vadd.f32 %v1557_v47, %v6198_v20  ;;  %v1162_v62 = vpack.c.bf16 %v4789_v52, %v4788_v59  ;;  %vm1900_vm3 = vcmp.gt.f32.partialorder %v6231_v42, 0.23 }
 0x168   :  { %v1169_v63 = vmul.f32 0.1, %v1155_v46  ;;  %v1168_v3 = vmul.f32 0.9, %v1152_v2  ;;  %v1902_v7 = vsel %vm1900_vm3, 0.0, %v6231_v42  ;;  %v2512_v59 = vadd.f32 %v2392_v22, %v2392_v22 }
 0x169   :  { %v1170_v4 = vmul.f32 0.1, %v1156_v53  ;;  %v1627_v6 = vadd.f32 %v1626_v1, %v1558_v57  ;;  %1164 = vst [vmem:[#allocation4 + $0xa8] sm:$0xff] %v1162_v62  ;;  %v1914_v13 = vmul.f32 0.9, %v1902_v7  ;;  %v2513_v0 = vadd.f32 %v2393_v26, %v2393_v26 }
 0x16a   :  { %v1171_v8 = vadd.f32 %v1169_v63, %v1167_v61  ;;  %v1177_v15 = vmul.f32 0.8, %v1155_v46  ;;  %v1178_v18 = vmul.f32 0.8, %v1156_v53  ;;  %v4876_v54 = vld [vmem:[#allocation4 + $0xa0] sm:$0xf] }
 0x16b   :  { %v1172_v11 = vadd.f32 %v1170_v4, %v1168_v3  ;;  %v1906_v12 = vadd.f32 %v1904_v50, %v1627_v6  ;;  %v574_v14 = vpop.f32.mrf.mxu0  ;;  %v5162_v57 = vld [vmem:[#allocation18] sm:$0xf]  ;;  %v5619_v1 = vld [vmem:[#allocation18 + $0x84] sm:$0xf0]  ;;  %v2560_v3 = vpack.c.bf16 %v2513_v0, %v2512_v59 }
 0x16c   :  { %v575_v16 = vadd.f32 %v574_v14, %v6048_v55  ;;  %vm1173_vm4 = vcmp.gt.f32.partialorder %v1171_v8, 0.23  ;;  %v643_v17 = vpop.f32.mrf.mxu1  ;;  %v5163_v62 = vor.u32 %v5603_v58, %v5162_v57  ;;  %v5226_v63 = vld [vmem:[#allocation18 + $0x80] sm:$0xf]  ;;  %v5236_v57 = vld [vmem:[#allocation18 + $0x98] sm:$0xf0] }
 0x16d   :  { %v1916_v23 = vmul.f32 0.1, %v1906_v12  ;;  %v1175_v25 = vsel %vm1173_vm4, 0.0, %v1171_v8  ;;  %v4790_v49 = vsel %vm1173_vm4, 1.0, %v5924_v39  ;;  %v1924_v27 = vmul.f32 0.8, %v1906_v12 }
 0x16e   :  { %v1179_v33 = vadd.f32 %v1177_v15, %v575_v16  ;;  %v644_v28 = vadd.f32 %v643_v17, %v6050_v56  ;;  %vm1174_vm5 = vcmp.gt.f32.partialorder %v1172_v11, 0.23  ;;  %v1559_v29 = vpop.f32.mrf.mxu2  ;;  %1724 = vmatmul.bf16.gmra.mxu0 %v6176_v19  ;;  %v1185_v5 = vmul.f32 0.9, %v1175_v25  ;;  %v1628_v38 = vpop.f32.mrf.mxu3  ;;  %v5542_v56 = vld [vmem:[#allocation4 + $0xa4] sm:$0xf]  ;;  %2957 = vmatpush.bf16.msrb.mxu2 %v5163_v62 }
 0x16f   :  { %v6247_v55 = vadd.f32 %v1916_v23, %v1914_v13  ;;  %v1176_v30 = vsel %vm1174_vm5, 0.0, %v1172_v11  ;;  %v4791_v31 = vsel %vm1174_vm5, 1.0, %v5924_v39  ;;  %v1560_v32 = vadd.f32 %v1559_v29, %v6198_v20  ;;  %1793 = vmatmul.bf16.gmra.mxu1 %v6179_v41  ;;  %2584 = vst [vmem:[#allocation6] sm:$0xff] %v2560_v3  ;;  %v2441_v29 = vld [vmem:[#allocation4 + $0x8] sm:$0xff] }
 0x170   :  { %v1187_v48 = vmul.f32 0.1, %v1179_v33  ;;  %v1180_v36 = vadd.f32 %v1178_v18, %v644_v28  ;;  %v1197_v37 = vpack.c.bf16 %v4791_v31, %v4790_v49  ;;  %v5543_v19 = vld [vmem:[#allocation4 + $0xa4] sm:$0xf0]  ;;  %v4878_v43 = vld [vmem:[#allocation4 + $0xa8] sm:$0xf0]  ;;  %v5227_v8 = vor.u32 %v5619_v1, %v5226_v63 }
 0x171   :  { %vm1920_vm6 = vcmp.gt.f32.partialorder %v6247_v55, 0.23  ;;  %v1629_v40 = vadd.f32 %v1628_v38, %v1560_v32  ;;  %v1186_v41 = vmul.f32 0.9, %v1176_v30  ;;  %v6256_v2 = vor.u32 %v5543_v19, %v4876_v54 }
 0x172   :  { %v1922_v46 = vsel %vm1920_vm6, 0.0, %v6247_v55  ;;  %v1189_v47 = vadd.f32 %v1187_v48, %v1185_v5  ;;  %v1188_v50 = vmul.f32 0.1, %v1180_v36  ;;  %1199 = vst [vmem:[#allocation4 + $0xb0] sm:$0xff] %v1197_v37  ;;  %v6258_v52 = vor.u32 %v5542_v56, %v4878_v43  ;;  %3026 = vmatpush.bf16.msrb.mxu3 %v5227_v8  ;;  %v5604_v36 = vld [vmem:[#allocation18 + $0x14] sm:$0xf] }
 0x173   :  { %v1926_v51 = vadd.f32 %v1924_v27, %v1629_v40  ;;  %v576_v53 = vpop.f32.mrf.mxu0  ;;  %v1938_v4 = vmul.f32 0.9, %v1922_v46  ;;  %1601 = vmatmul.bf16.gmra.mxu2 %v6256_v2  ;;  %v6268_v16 = vperm.slane %v6194_v10, 1  ;;  %v5172_v40 = vld [vmem:[#allocation18 + $0x18] sm:$0xf0]  ;;  %v2466_v43 = vunpack.c.l.bf16 %v2441_v29 }
 0x174   :  { %vm1191_vm7 = vcmp.gt.f32.partialorder %v1189_v47, 0.23  ;;  %v1190_v60 = vadd.f32 %v1188_v50, %v1186_v41  ;;  %v645_v61 = vpop.f32.mrf.mxu1  ;;  %1670 = vmatmul.bf16.gmra.mxu3 %v6258_v52  ;;  %v5620_v47 = vld [vmem:[#allocation18 + $0x94] sm:$0xf]  ;;  %v2467_v41 = vunpack.c.h.bf16 %v2441_v29  ;;  %v5175_v44 = vor.u32 %v5604_v36, %v5172_v40 }
 0x175   :  { %v4792_v6 = vsel %vm1191_vm7, 1.0, %v5924_v39  ;;  %v1940_v7 = vmul.f32 0.1, %v1926_v51  ;;  %v1948_v18 = vmul.f32 0.8, %v1926_v51  ;;  %v5239_v61 = vor.u32 %v5620_v47, %v5236_v57 }
 0x176   :  { %vm1192_vm8 = vcmp.gt.f32.partialorder %v1190_v60, 0.23  ;;  %v1562_v9 = vpop.f32.mrf.mxu2  ;;  %v1631_v15 = vpop.f32.mrf.mxu3  ;;  %3094 = vmatpush.bf16.msra.mxu0 %v5175_v44  ;;  %v5020_v29 = vsel %vm1900_vm3, 1.0, %v5924_v39  ;;  %v5066_v42 = vld [vmem:[#allocation6] sm:$0xf] }
 0x177   :  { %v4793_v11 = vsel %vm1192_vm8, 1.0, %v5924_v39  ;;  %v6264_v12 = vadd.f32 %v1940_v7, %v1938_v4  ;;  %v1563_v13 = vadd.f32 %v1562_v9, %v6198_v20  ;;  %3163 = vmatpush.bf16.msra.mxu1 %v5239_v61  ;;  %v5578_v40 = vld [vmem:[#allocation6 + $0x4] sm:$0xf] }
 0x178   :  { %v1198_v14 = vpack.c.bf16 %v4793_v11, %v4792_v6 }
 0x179   :  { %v1632_v17 = vadd.f32 %v1631_v15, %v1563_v13  ;;  %vm1944_vm9 = vcmp.gt.f32.partialorder %v6264_v12, 0.23  ;;  %v4884_v31 = vld [vmem:[#allocation4 + $0xb0] sm:$0xf]  ;;  %v5544_v0 = vld [vmem:[#allocation4 + $0xb4] sm:$0xf] }
 0x17a   :  { %1200 = vst [vmem:[#allocation4 + $0xb8] sm:$0xff] %v1198_v14  ;;  %v1946_v21 = vsel %vm1944_vm9, 0.0, %v6264_v12 }
 0x17b   :  { %v1950_v22 = vadd.f32 %v1948_v18, %v1632_v17  ;;  %v1690_v23 = vpop.f32.mrf.mxu0  ;;  %v1958_v26 = vmul.f32 0.9, %v1946_v21 }
 0x17c   :  { %v1691_v25 = vadd.f32 %v1690_v23, %v6268_v16  ;;  %v1759_v49 = vpop.f32.mrf.mxu1 }
 0x17d   :  { %v1960_v27 = vmul.f32 0.1, %v1950_v22  ;;  %v1968_v32 = vmul.f32 0.8, %v1950_v22 }
 0x17e   :  { %v1760_v33 = vadd.f32 %v1759_v49, %v1691_v25  ;;  %v1564_v28 = vpop.f32.mrf.mxu2  ;;  %1729 = vmatmul.bf16.gmra.mxu0 %v6200_v24  ;;  %v1633_v48 = vpop.f32.mrf.mxu3 }
 0x17f   :  { %v6276_v10 = vadd.f32 %v1960_v27, %v1958_v26  ;;  %v1565_v30 = vadd.f32 %v1564_v28, %v6198_v20  ;;  %1798 = vmatmul.bf16.gmra.mxu1 %v6203_v45  ;;  %v5018_v45 = vsel %vm1877_vm14, 1.0, %v5924_v39  ;;  %v2442_v28 = vld [vmem:[#allocation4 + $0x10] sm:$0xff] }
 0x180   :  { %v1874_v5 = vmul.f32 0.1, %v1760_v33  ;;  %v1882_v62 = vmul.f32 0.8, %v1760_v33  ;;  %v2514_v7 = vadd.f32 %v5018_v45, %v2466_v43 }
 0x181   :  { %vm1964_vm10 = vcmp.gt.f32.partialorder %v6276_v10, 0.23  ;;  %v1634_v37 = vadd.f32 %v1633_v48, %v1565_v30  ;;  %v5545_v38 = vld [vmem:[#allocation4 + $0xb4] sm:$0xf0]  ;;  %v4886_v54 = vld [vmem:[#allocation4 + $0xb8] sm:$0xf0] }
 0x182   :  { %v1966_v24 = vsel %vm1964_vm10, 0.0, %v6276_v10  ;;  %vm1878_vm11 = vcmp.gt.f32.partialorder %v1874_v5, 0.23  ;;  %v6284_v56 = vor.u32 %v5545_v38, %v4884_v31  ;;  %v6291_v50 = vor.u32 %v5544_v0, %v4886_v54 }
 0x183   :  { %v5019_v19 = vsel %vm1878_vm11, 1.0, %v5924_v39  ;;  %v1970_v59 = vadd.f32 %v1968_v32, %v1634_v37  ;;  %v1692_v46 = vpop.f32.mrf.mxu0  ;;  %v1982_v58 = vmul.f32 0.9, %v1966_v24  ;;  %v1880_v3 = vsel %vm1878_vm11, 0.0, %v1874_v5 }
 0x184   :  { %v1693_v51 = vadd.f32 %v1692_v46, %v6268_v16  ;;  %v1761_v53 = vpop.f32.mrf.mxu1  ;;  %1606 = vmatmul.bf16.gmra.mxu2 %v6284_v56  ;;  %1675 = vmatmul.bf16.gmra.mxu3 %v6291_v50  ;;  %v2515_v8 = vadd.f32 %v5019_v19, %v2467_v41  ;;  %v1895_v15 = vmul.f32 0.9, %v1880_v3  ;;  %v2468_v54 = vunpack.c.l.bf16 %v2442_v28  ;;  %v5618_v3 = vld [vmem:[#allocation18 + $0x84] sm:$0xf] }
 0x185   :  { %v1984_v60 = vmul.f32 0.1, %v1970_v59  ;;  %v1992_v14 = vmul.f32 0.8, %v1970_v59  ;;  %v2469_v19 = vunpack.c.h.bf16 %v2442_v28  ;;  %v5673_v59 = vld [vmem:[#allocation19 + $0x78] sm:$0xff]  ;;  %v5022_v0 = vsel %vm1920_vm6, 1.0, %v5924_v39 }
 0x186   :  { %v1762_v63 = vadd.f32 %v1761_v53, %v1693_v51  ;;  %v1567_v1 = vpop.f32.mrf.mxu2  ;;  %v1636_v11 = vpop.f32.mrf.mxu3  ;;  %v2561_v17 = vpack.c.bf16 %v2515_v8, %v2514_v7  ;;  %4356 = vmatpush.bf16.msra.mxu3 %v5673_v59  ;;  %v2516_v7 = vadd.f32 %v5020_v29, %v2468_v54 }
 0x187   :  { %v6297_v4 = vadd.f32 %v1984_v60, %v1982_v58  ;;  %v1568_v6 = vadd.f32 %v1567_v1, %v6198_v20  ;;  %v5164_v1 = vld [vmem:[#allocation18 + $0x8] sm:$0xf0] }
 0x188   :  { %v1884_v9 = vadd.f32 %v1882_v62, %v1762_v63  ;;  %2585 = vst [vmem:[#allocation6 + $0x8] sm:$0xff] %v2561_v17  ;;  %v5602_v63 = vld [vmem:[#allocation18 + $0x4] sm:$0xf] }
 0x189   :  { %v1637_v13 = vadd.f32 %v1636_v11, %v1568_v6  ;;  %vm1988_vm12 = vcmp.gt.f32.partialorder %v6297_v4, 0.23  ;;  %v5228_v11 = vld [vmem:[#allocation18 + $0x88] sm:$0xf0]  ;;  %v5167_v17 = vor.u32 %v5602_v63, %v5164_v1 }
 0x18a   :  { %v1897_v18 = vmul.f32 0.1, %v1884_v9  ;;  %v1990_v21 = vsel %vm1988_vm12, 0.0, %v6297_v4  ;;  %v1905_v31 = vmul.f32 0.8, %v1884_v9 }
 0x18b   :  { %v1994_v22 = vadd.f32 %v1992_v14, %v1637_v13  ;;  %v1695_v23 = vpop.f32.mrf.mxu0  ;;  %v2002_v27 = vmul.f32 0.9, %v1990_v21  ;;  %v2443_v13 = vld [vmem:[#allocation4 + $0x18] sm:$0xff]  ;;  %3095 = vmatpush.bf16.msra.mxu0 %v5167_v17 }
 0x18c   :  { %v1899_v25 = vadd.f32 %v1897_v18, %v1895_v15  ;;  %v1696_v49 = vadd.f32 %v1695_v23, %v6268_v16  ;;  %v1764_v26 = vpop.f32.mrf.mxu1  ;;  %v5231_v18 = vor.u32 %v5618_v3, %v5228_v11  ;;  %v2470_v29 = vunpack.c.l.bf16 %v2443_v13  ;;  %v5664_v11 = vld [vmem:[#allocation19 + $0x30] sm:$0xff] }
 0x18d   :  { %v2004_v33 = vmul.f32 0.1, %v1994_v22  ;;  %v2012_v45 = vmul.f32 0.8, %v1994_v22 }
 0x18e   :  { %v1765_v30 = vadd.f32 %v1764_v26, %v1696_v49  ;;  %vm1901_vm13 = vcmp.gt.f32.partialorder %v1899_v25, 0.23  ;;  %v1569_v32 = vpop.f32.mrf.mxu2  ;;  %1734 = vmatmul.bf16.gmra.mxu0 %v6226_v34  ;;  %v1638_v24 = vpop.f32.mrf.mxu3  ;;  %v5665_v34 = vld [vmem:[#allocation19 + $0x38] sm:$0xff]  ;;  %3164 = vmatpush.bf16.msra.mxu1 %v5231_v18 }
 0x18f   :  { %v6309_v5 = vadd.f32 %v2004_v33, %v2002_v27  ;;  %v1903_v48 = vsel %vm1901_vm13, 0.0, %v1899_v25  ;;  %v5021_v36 = vsel %vm1901_vm13, 1.0, %v5924_v39  ;;  %v1570_v37 = vadd.f32 %v1569_v32, %v6198_v20  ;;  %1803 = vmatmul.bf16.gmra.mxu1 %v6228_v35  ;;  %v5579_v57 = vld [vmem:[#allocation6 + $0x4] sm:$0xf0]  ;;  %v5068_v58 = vld [vmem:[#allocation6 + $0x8] sm:$0xf0]  ;;  %4287 = vmatpush.bf16.msra.mxu2 %v5665_v34 }
 0x190   :  { %v1907_v38 = vadd.f32 %v1905_v31, %v1765_v30  ;;  %v1915_v46 = vmul.f32 0.9, %v1903_v48  ;;  %v6322_v62 = vor.u32 %v5579_v57, %v5066_v42  ;;  %v6324_v55 = vor.u32 %v5578_v40, %v5068_v58 }
 0x191   :  { %vm2008_vm14 = vcmp.gt.f32.partialorder %v6309_v5, 0.23  ;;  %v1639_v43 = vadd.f32 %v1638_v24, %v1570_v37  ;;  %v2517_v8 = vadd.f32 %v5021_v36, %v2469_v19  ;;  %v2471_v30 = vunpack.c.h.bf16 %v2443_v13  ;;  %v2444_v19 = vld [vmem:[#allocation4 + $0x20] sm:$0xff] }
 0x192   :  { %v2010_v35 = vsel %vm2008_vm14, 0.0, %v6309_v5  ;;  %v1917_v47 = vmul.f32 0.1, %v1907_v38  ;;  %v1925_v41 = vmul.f32 0.8, %v1907_v38  ;;  %v2518_v37 = vadd.f32 %v5022_v0, %v2470_v29  ;;  %v5672_v13 = vld [vmem:[#allocation19 + $0x70] sm:$0xff] }
 0x193   :  { %v2014_v51 = vadd.f32 %v2012_v45, %v1639_v43  ;;  %v1697_v53 = vpop.f32.mrf.mxu0  ;;  %v2026_v6 = vmul.f32 0.9, %v2010_v35  ;;  %v2562_v23 = vpack.c.bf16 %v2517_v8, %v2516_v7  ;;  %v5024_v40 = vsel %vm1944_vm9, 1.0, %v5924_v39  ;;  %4288 = vmatpush.bf16.msra.mxu2 %v5664_v11  ;;  %4357 = vmatpush.bf16.msra.mxu3 %v5672_v13 }
 0x194   :  { %v1919_v60 = vadd.f32 %v1917_v47, %v1915_v46  ;;  %v1698_v44 = vadd.f32 %v1697_v53, %v6268_v16  ;;  %v1766_v61 = vpop.f32.mrf.mxu1  ;;  %2958 = vmatmul.bf16.vlgmr.msrb.gmra.mxu2 %v6322_v62  ;;  %3027 = vmatmul.bf16.vlgmr.msrb.gmra.mxu3 %v6324_v55  ;;  %v2472_v58 = vunpack.c.l.bf16 %v2444_v19 }
 0x195   :  { %v2028_v9 = vmul.f32 0.1, %v2014_v51  ;;  %v2036_v33 = vmul.f32 0.8, %v2014_v51  ;;  %2586 = vst [vmem:[#allocation6 + $0x10] sm:$0xff] %v2562_v23 }
 0x196   :  { %vm1921_vm15 = vcmp.gt.f32.partialorder %v1919_v60, 0.23  ;;  %v1767_v14 = vadd.f32 %v1766_v61, %v1698_v44  ;;  %v1572_v15 = vpop.f32.mrf.mxu2  ;;  %v1641_v27 = vpop.f32.mrf.mxu3 }
 0x197   :  { %v1923_v21 = vsel %vm1921_vm15, 0.0, %v1919_v60  ;;  %v5023_v22 = vsel %vm1921_vm15, 1.0, %v5924_v39  ;;  %v6329_v25 = vadd.f32 %v2028_v9, %v2026_v6  ;;  %v1573_v26 = vadd.f32 %v1572_v15, %v6198_v20 }
 0x198   :  { %v1927_v49 = vadd.f32 %v1925_v41, %v1767_v14  ;;  %v1939_v28 = vmul.f32 0.9, %v1923_v21  ;;  %v2519_v38 = vadd.f32 %v5023_v22, %v2471_v30  ;;  %v2473_v60 = vunpack.c.h.bf16 %v2444_v19 }
 0x199   :  { %vm2032_vm0 = vcmp.gt.f32.partialorder %v6329_v25, 0.23  ;;  %v1642_v32 = vadd.f32 %v1641_v27, %v1573_v26  ;;  %v2520_v6 = vadd.f32 %v5024_v40, %v2472_v58  ;;  %v5026_v14 = vsel %vm1964_vm10, 1.0, %v5924_v39 }
 0x19a   :  { %v1941_v31 = vmul.f32 0.1, %v1927_v49  ;;  %v2034_v48 = vsel %vm2032_vm0, 0.0, %v6329_v25  ;;  %v2563_v43 = vpack.c.bf16 %v2519_v38, %v2518_v37  ;;  %v1949_v0 = vmul.f32 0.8, %v1927_v49 }
 0x19b   :  { %v1700_v36 = vpop.f32.mrf.mxu0  ;;  %v2038_v24 = vadd.f32 %v2036_v33, %v1642_v32  ;;  %v2046_v34 = vmul.f32 0.9, %v2034_v48 }
 0x19c   :  { %v1943_v54 = vadd.f32 %v1941_v31, %v1939_v28  ;;  %v1769_v42 = vpop.f32.mrf.mxu1  ;;  %v1701_v45 = vadd.f32 %v1700_v36, %v6268_v16  ;;  %2587 = vst [vmem:[#allocation6 + $0x18] sm:$0xff] %v2563_v43  ;;  %v5074_v18 = vld [vmem:[#allocation6 + $0x10] sm:$0xf] }
 0x19d   :  { %v2048_v59 = vmul.f32 0.1, %v2038_v24 }
 0x19e   :  { %vm1945_vm1 = vcmp.gt.f32.partialorder %v1943_v54, 0.23  ;;  %v1574_v35 = vpop.f32.mrf.mxu2  ;;  %1739 = vmatmul.bf16.gmra.mxu0 %v6256_v2  ;;  %v1770_v46 = vadd.f32 %v1769_v42, %v1701_v45  ;;  %v1643_v53 = vpop.f32.mrf.mxu3  ;;  %v2056_v2 = vmul.f32 0.8, %v2038_v24  ;;  %v5580_v24 = vld [vmem:[#allocation6 + $0x14] sm:$0xf] }
 0x19f   :  { %v5025_v47 = vsel %vm1945_vm1, 1.0, %v5924_v39  ;;  %v1575_v41 = vadd.f32 %v1574_v35, %v6198_v20  ;;  %1808 = vmatmul.bf16.gmra.mxu1 %v6258_v52  ;;  %v6344_v12 = vadd.f32 %v2048_v59, %v2046_v34  ;;  %v1947_v51 = vsel %vm1945_vm1, 0.0, %v1943_v54  ;;  %v2445_v52 = vld [vmem:[#allocation4 + $0x28] sm:$0xff] }
 0x1a0   :  { %v1951_v57 = vadd.f32 %v1949_v0, %v1770_v46  ;;  %v1959_v63 = vmul.f32 0.9, %v1947_v51  ;;  %v2521_v7 = vadd.f32 %v5025_v47, %v2473_v60  ;;  %v2474_v27 = vunpack.c.l.bf16 %v2445_v52  ;;  %v2446_v51 = vld [vmem:[#allocation4 + $0x30] sm:$0xff] }
 0x1a1   :  { %v1644_v44 = vadd.f32 %v1643_v53, %v1575_v41  ;;  %vm2052_vm2 = vcmp.gt.f32.partialorder %v6344_v12, 0.23  ;;  %v2475_v37 = vunpack.c.h.bf16 %v2445_v52 }
 0x1a2   :  { %v2054_v61 = vsel %vm2052_vm2, 0.0, %v6344_v12  ;;  %v1961_v1 = vmul.f32 0.1, %v1951_v57  ;;  %v1969_v22 = vmul.f32 0.8, %v1951_v57  ;;  %v2564_v23 = vpack.c.bf16 %v2521_v7, %v2520_v6  ;;  %v2447_v7 = vld [vmem:[#allocation4 + $0x38] sm:$0xff] }
 0x1a3   :  { %v1702_v3 = vpop.f32.mrf.mxu0  ;;  %v2058_v8 = vadd.f32 %v2056_v2, %v1644_v44  ;;  %v2070_v21 = vmul.f32 0.9, %v2054_v61  ;;  %v5581_v29 = vld [vmem:[#allocation6 + $0x14] sm:$0xf0]  ;;  %v5076_v30 = vld [vmem:[#allocation6 + $0x18] sm:$0xf0]  ;;  %v2522_v0 = vadd.f32 %v5026_v14, %v2474_v27  ;;  %v2477_v14 = vunpack.c.h.bf16 %v2446_v51 }
 0x1a4   :  { %v1771_v9 = vpop.f32.mrf.mxu1  ;;  %v1963_v15 = vadd.f32 %v1961_v1, %v1959_v63  ;;  %v1703_v17 = vadd.f32 %v1702_v3, %v6268_v16  ;;  %2588 = vst [vmem:[#allocation6 + $0x20] sm:$0xff] %v2564_v23  ;;  %v6358_v36 = vor.u32 %v5581_v29, %v5074_v18  ;;  %v6362_v45 = vor.u32 %v5580_v24, %v5076_v30 }
 0x1a5   :  { %v2072_v49 = vmul.f32 0.1, %v2058_v8  ;;  %v2080_v40 = vmul.f32 0.8, %v2058_v8  ;;  %v5028_v2 = vsel %vm1988_vm12, 1.0, %v5924_v39 }
 0x1a6   :  { %v1577_v26 = vpop.f32.mrf.mxu2  ;;  %vm1965_vm3 = vcmp.gt.f32.partialorder %v1963_v15, 0.23  ;;  %v1772_v33 = vadd.f32 %v1771_v9, %v1703_v17  ;;  %v1646_v48 = vpop.f32.mrf.mxu3  ;;  %2963 = vmatmul.bf16.gmra.mxu2 %v6358_v36  ;;  %3032 = vmatmul.bf16.gmra.mxu3 %v6362_v45  ;;  %v2476_v9 = vunpack.c.l.bf16 %v2446_v51 }
 0x1a7   :  { %v1578_v28 = vadd.f32 %v1577_v26, %v6198_v20  ;;  %v1967_v10 = vsel %vm1965_vm3, 0.0, %v1963_v15  ;;  %v5027_v31 = vsel %vm1965_vm3, 1.0, %v5924_v39  ;;  %v6356_v32 = vadd.f32 %v2072_v49, %v2070_v21 }
 0x1a8   :  { %v1971_v38 = vadd.f32 %v1969_v22, %v1772_v33  ;;  %v1983_v42 = vmul.f32 0.9, %v1967_v10  ;;  %v2523_v47 = vadd.f32 %v5027_v31, %v2475_v37  ;;  %v2478_v15 = vunpack.c.l.bf16 %v2447_v7 }
 0x1a9   :  { %v1647_v54 = vadd.f32 %v1646_v48, %v1578_v28  ;;  %vm2076_vm4 = vcmp.gt.f32.partialorder %v6356_v32, 0.23  ;;  %v2479_v21 = vunpack.c.h.bf16 %v2447_v7  ;;  %v5030_v26 = vsel %vm2008_vm14, 1.0, %v5924_v39 }
 0x1aa   :  { %v1985_v19 = vmul.f32 0.1, %v1971_v38  ;;  %v2078_v43 = vsel %vm2076_vm4, 0.0, %v6356_v32  ;;  %v1993_v60 = vmul.f32 0.8, %v1971_v38  ;;  %v2565_v61 = vpack.c.bf16 %v2523_v47, %v2522_v0 }
 0x1ab   :  { %v1705_v34 = vpop.f32.mrf.mxu0  ;;  %v2082_v59 = vadd.f32 %v2080_v40, %v1647_v54  ;;  %v2090_v53 = vmul.f32 0.9, %v2078_v43  ;;  %v2524_v33 = vadd.f32 %v5028_v2, %v2476_v9  ;;  %v5082_v24 = vld [vmem:[#allocation6 + $0x20] sm:$0xf] }
 0x1ac   :  { %v1706_v35 = vadd.f32 %v1705_v34, %v6268_v16  ;;  %v1774_v46 = vpop.f32.mrf.mxu1  ;;  %v1987_v41 = vadd.f32 %v1985_v19, %v1983_v42  ;;  %2589 = vst [vmem:[#allocation6 + $0x28] sm:$0xff] %v2565_v61  ;;  %v5582_v42 = vld [vmem:[#allocation6 + $0x24] sm:$0xf] }
 0x1ad   :  { %v2092_v57 = vmul.f32 0.1, %v2082_v59 }
 0x1ae   :  { %v1775_v58 = vadd.f32 %v1774_v46, %v1706_v35  ;;  %v1579_v44 = vpop.f32.mrf.mxu2  ;;  %1744 = vmatmul.bf16.gmra.mxu0 %v6284_v56  ;;  %vm1989_vm5 = vcmp.gt.f32.partialorder %v1987_v41, 0.23  ;;  %v1648_v8 = vpop.f32.mrf.mxu3  ;;  %v2100_v56 = vmul.f32 0.8, %v2082_v59 }
 0x1af   :  { %v1580_v63 = vadd.f32 %v1579_v44, %v6198_v20  ;;  %1813 = vmatmul.bf16.gmra.mxu1 %v6291_v50  ;;  %v6375_v1 = vadd.f32 %v2092_v57, %v2090_v53  ;;  %v1991_v3 = vsel %vm1989_vm5, 0.0, %v1987_v41  ;;  %v5029_v6 = vsel %vm1989_vm5, 1.0, %v5924_v39 }
 0x1b0   :  { %v1995_v52 = vadd.f32 %v1993_v60, %v1775_v58  ;;  %v2003_v4 = vmul.f32 0.9, %v1991_v3  ;;  %v2525_v28 = vadd.f32 %v5029_v6, %v2477_v14  ;;  %v2526_v58 = vadd.f32 %v5030_v26, %v2478_v15 }
 0x1b1   :  { %v1649_v11 = vadd.f32 %v1648_v8, %v1580_v63  ;;  %vm2096_vm6 = vcmp.gt.f32.partialorder %v6375_v1, 0.23 }
 0x1b2   :  { %v2005_v13 = vmul.f32 0.1, %v1995_v52  ;;  %v2098_v50 = vsel %vm2096_vm6, 0.0, %v6375_v1  ;;  %v2013_v27 = vmul.f32 0.8, %v1995_v52  ;;  %v2566_v38 = vpack.c.bf16 %v2525_v28, %v2524_v33 }
 0x1b3   :  { %v1707_v17 = vpop.f32.mrf.mxu0  ;;  %v2102_v22 = vadd.f32 %v2100_v56, %v1649_v11  ;;  %v2114_v29 = vmul.f32 0.9, %v2098_v50  ;;  %v5583_v34 = vld [vmem:[#allocation6 + $0x24] sm:$0xf0]  ;;  %v5084_v59 = vld [vmem:[#allocation6 + $0x28] sm:$0xf0] }
 0x1b4   :  { %v2007_v18 = vadd.f32 %v2005_v13, %v2003_v4  ;;  %v1708_v23 = vadd.f32 %v1707_v17, %v6268_v16  ;;  %v1776_v49 = vpop.f32.mrf.mxu1  ;;  %2590 = vst [vmem:[#allocation6 + $0x30] sm:$0xff] %v2566_v38  ;;  %v6390_v0 = vor.u32 %v5583_v34, %v5082_v24  ;;  %v6392_v47 = vor.u32 %v5582_v42, %v5084_v59  ;;  %v2448_v4 = vld [vmem:[#allocation4 + $0x40] sm:$0xff]  ;;  %v5663_v50 = vld [vmem:[#allocation19 + $0x28] sm:$0xff] }
 0x1b5   :  { %v2116_v30 = vmul.f32 0.1, %v2102_v22  ;;  %v2124_v43 = vmul.f32 0.8, %v2102_v22  ;;  %v5032_v52 = vsel %vm2032_vm0, 1.0, %v5924_v39  ;;  %v5671_v17 = vld [vmem:[#allocation19 + $0x68] sm:$0xff]  ;;  %4289 = vmatpush.bf16.msra.mxu2 %v5663_v50 }
 0x1b6   :  { %vm2009_vm7 = vcmp.gt.f32.partialorder %v2007_v18, 0.23  ;;  %v1777_v10 = vadd.f32 %v1776_v49, %v1708_v23  ;;  %v1582_v31 = vpop.f32.mrf.mxu2  ;;  %v1651_v19 = vpop.f32.mrf.mxu3  ;;  %2968 = vmatmul.bf16.gmra.mxu2 %v6390_v0  ;;  %3037 = vmatmul.bf16.gmra.mxu3 %v6392_v47  ;;  %v5034_v59 = vsel %vm2052_vm2, 1.0, %v5924_v39  ;;  %v5036_v50 = vsel %vm2076_vm4, 1.0, %v5924_v39 }
 0x1b7   :  { %v2011_v48 = vsel %vm2009_vm7, 0.0, %v2007_v18  ;;  %v5031_v37 = vsel %vm2009_vm7, 1.0, %v5924_v39  ;;  %v1583_v54 = vadd.f32 %v1582_v31, %v6198_v20  ;;  %v6388_v40 = vadd.f32 %v2116_v30, %v2114_v29  ;;  %4358 = vmatpush.bf16.msra.mxu3 %v5671_v17 }
 0x1b8   :  { %v2015_v5 = vadd.f32 %v2013_v27, %v1777_v10  ;;  %v2027_v35 = vmul.f32 0.9, %v2011_v48  ;;  %v2527_v60 = vadd.f32 %v5031_v37, %v2479_v21  ;;  %v2480_v18 = vunpack.c.l.bf16 %v2448_v4 }
 0x1b9   :  { %v1652_v46 = vadd.f32 %v1651_v19, %v1583_v54  ;;  %vm2120_vm8 = vcmp.gt.f32.partialorder %v6388_v40, 0.23  ;;  %v2481_v21 = vunpack.c.h.bf16 %v2448_v4 }
 0x1ba   :  { %v2029_v41 = vmul.f32 0.1, %v2015_v5  ;;  %v2122_v51 = vsel %vm2120_vm8, 0.0, %v6388_v40  ;;  %v2567_v6 = vpack.c.bf16 %v2527_v60, %v2526_v58  ;;  %v2037_v9 = vmul.f32 0.8, %v2015_v5 }
 0x1bb   :  { %v2126_v53 = vadd.f32 %v2124_v43, %v1652_v46  ;;  %v1710_v57 = vpop.f32.mrf.mxu0  ;;  %v2134_v61 = vmul.f32 0.9, %v2122_v51  ;;  %v2528_v33 = vadd.f32 %v5032_v52, %v2480_v18  ;;  %v5090_v34 = vld [vmem:[#allocation6 + $0x30] sm:$0xf] }
 0x1bc   :  { %v2031_v44 = vadd.f32 %v2029_v41, %v2027_v35  ;;  %v1779_v2 = vpop.f32.mrf.mxu1  ;;  %v1711_v3 = vadd.f32 %v1710_v57, %v6268_v16  ;;  %2591 = vst [vmem:[#allocation6 + $0x38] sm:$0xff] %v2567_v6 }
 0x1bd   :  { %v2136_v63 = vmul.f32 0.1, %v2126_v53  ;;  %v2144_v22 = vmul.f32 0.8, %v2126_v53 }
 0x1be   :  { %vm2033_vm9 = vcmp.gt.f32.partialorder %v2031_v44, 0.23  ;;  %v1584_v7 = vpop.f32.mrf.mxu2  ;;  %3096 = vmatmul.bf16.vlgmr.msra.gmra.mxu0 %v6322_v62  ;;  %v1780_v56 = vadd.f32 %v1779_v2, %v1711_v3  ;;  %v1653_v25 = vpop.f32.mrf.mxu3  ;;  %v2449_v62 = vld [vmem:[#allocation4 + $0x48] sm:$0xff] }
 0x1bf   :  { %v6405_v8 = vadd.f32 %v2136_v63, %v2134_v61  ;;  %v5033_v11 = vsel %vm2033_vm9, 1.0, %v5924_v39  ;;  %3165 = vmatmul.bf16.vlgmr.msra.gmra.mxu1 %v6324_v55  ;;  %v2035_v13 = vsel %vm2033_vm9, 0.0, %v2031_v44  ;;  %v1585_v14 = vadd.f32 %v1584_v7, %v6198_v20  ;;  %v5584_v44 = vld [vmem:[#allocation6 + $0x34] sm:$0xf] }
 0x1c0   :  { %v2039_v15 = vadd.f32 %v2037_v9, %v1780_v56  ;;  %v2047_v23 = vmul.f32 0.9, %v2035_v13  ;;  %v2529_v28 = vadd.f32 %v5033_v11, %v2481_v21  ;;  %v2482_v31 = vunpack.c.l.bf16 %v2449_v62 }
 0x1c1   :  { %vm2140_vm10 = vcmp.gt.f32.partialorder %v6405_v8, 0.23  ;;  %v1654_v26 = vadd.f32 %v1653_v25, %v1585_v14  ;;  %v2483_v38 = vunpack.c.h.bf16 %v2449_v62  ;;  %v2450_v62 = vld [vmem:[#allocation4 + $0x50] sm:$0xff] }
 0x1c2   :  { %v2049_v49 = vmul.f32 0.1, %v2039_v15  ;;  %v2142_v55 = vsel %vm2140_vm10, 0.0, %v6405_v8  ;;  %v2057_v37 = vmul.f32 0.8, %v2039_v15  ;;  %v2568_v54 = vpack.c.bf16 %v2529_v28, %v2528_v33 }
 0x1c3   :  { %v1712_v27 = vpop.f32.mrf.mxu0  ;;  %v2146_v48 = vadd.f32 %v2144_v22, %v1654_v26  ;;  %v2158_v5 = vmul.f32 0.9, %v2142_v55  ;;  %v5585_v53 = vld [vmem:[#allocation6 + $0x34] sm:$0xf0]  ;;  %v5092_v2 = vld [vmem:[#allocation6 + $0x38] sm:$0xf0]  ;;  %v2530_v4 = vadd.f32 %v5034_v59, %v2482_v31  ;;  %v2484_v33 = vunpack.c.l.bf16 %v2450_v62 }
 0x1c4   :  { %v1713_v29 = vadd.f32 %v1712_v27, %v6268_v16  ;;  %v1781_v30 = vpop.f32.mrf.mxu1  ;;  %v2051_v10 = vadd.f32 %v2049_v49, %v2047_v23  ;;  %2592 = vst [vmem:[#allocation6 + $0x40] sm:$0xff] %v2568_v54  ;;  %v6422_v3 = vor.u32 %v5585_v53, %v5090_v34  ;;  %v6424_v52 = vor.u32 %v5584_v44, %v5092_v2  ;;  %v2451_v55 = vld [vmem:[#allocation4 + $0x58] sm:$0xff]  ;;  %v5670_v34 = vld [vmem:[#allocation19 + $0x60] sm:$0xff] }
 0x1c5   :  { %v2160_v19 = vmul.f32 0.1, %v2146_v48  ;;  %v2168_v60 = vmul.f32 0.8, %v2146_v48  ;;  %4359 = vmatpush.bf16.msra.mxu3 %v5670_v34  ;;  %v2487_v1 = vunpack.c.h.bf16 %v2451_v55 }
 0x1c6   :  { %v1782_v24 = vadd.f32 %v1781_v30, %v1713_v29  ;;  %v1587_v42 = vpop.f32.mrf.mxu2  ;;  %vm2053_vm11 = vcmp.gt.f32.partialorder %v2051_v10, 0.23  ;;  %v1656_v51 = vpop.f32.mrf.mxu3  ;;  %2973 = vmatmul.bf16.gmra.mxu2 %v6422_v3  ;;  %3042 = vmatmul.bf16.gmra.mxu3 %v6424_v52  ;;  %v2485_v30 = vunpack.c.h.bf16 %v2450_v62 }
 0x1c7   :  { %v1588_v43 = vadd.f32 %v1587_v42, %v6198_v20  ;;  %v2055_v35 = vsel %vm2053_vm11, 0.0, %v2051_v10  ;;  %v5035_v46 = vsel %vm2053_vm11, 1.0, %v5924_v39  ;;  %v6420_v57 = vadd.f32 %v2160_v19, %v2158_v5 }
 0x1c8   :  { %v2059_v41 = vadd.f32 %v2057_v37, %v1782_v24  ;;  %v2071_v61 = vmul.f32 0.9, %v2055_v35  ;;  %v2531_v13 = vadd.f32 %v5035_v46, %v2483_v38  ;;  %v2486_v37 = vunpack.c.l.bf16 %v2451_v55 }
 0x1c9   :  { %v1657_v58 = vadd.f32 %v1656_v51, %v1588_v43  ;;  %vm2164_vm12 = vcmp.gt.f32.partialorder %v6420_v57, 0.23  ;;  %v5038_v24 = vsel %vm2096_vm6, 1.0, %v5924_v39  ;;  %v2532_v42 = vadd.f32 %v5036_v50, %v2484_v33  ;;  %v5662_v43 = vld [vmem:[#allocation19 + $0x20] sm:$0xff] }
 0x1ca   :  { %v2073_v63 = vmul.f32 0.1, %v2059_v41  ;;  %v2166_v56 = vsel %vm2164_vm12, 0.0, %v6420_v57  ;;  %v2081_v17 = vmul.f32 0.8, %v2059_v41  ;;  %v2569_v21 = vpack.c.bf16 %v2531_v13, %v2530_v4  ;;  %4290 = vmatpush.bf16.msra.mxu2 %v5662_v43 }
 0x1cb   :  { %v2170_v12 = vadd.f32 %v2168_v60, %v1657_v58  ;;  %v1715_v6 = vpop.f32.mrf.mxu0  ;;  %v2178_v14 = vmul.f32 0.9, %v2166_v56  ;;  %v5098_v44 = vld [vmem:[#allocation6 + $0x40] sm:$0xf] }
 0x1cc   :  { %v2075_v7 = vadd.f32 %v2073_v63, %v2071_v61  ;;  %v1716_v9 = vadd.f32 %v1715_v6, %v6268_v16  ;;  %v1784_v11 = vpop.f32.mrf.mxu1  ;;  %2593 = vst [vmem:[#allocation6 + $0x48] sm:$0xff] %v2569_v21  ;;  %v5586_v6 = vld [vmem:[#allocation6 + $0x44] sm:$0xf] }
 0x1cd   :  { %v2180_v25 = vmul.f32 0.1, %v2170_v12  ;;  %v2188_v28 = vmul.f32 0.8, %v2170_v12 }
 0x1ce   :  { %v1785_v15 = vadd.f32 %v1784_v11, %v1716_v9  ;;  %vm2077_vm13 = vcmp.gt.f32.partialorder %v2075_v7, 0.23  ;;  %v1589_v18 = vpop.f32.mrf.mxu2  ;;  %3101 = vmatmul.bf16.gmra.mxu0 %v6358_v36  ;;  %v1658_v32 = vpop.f32.mrf.mxu3 }
 0x1cf   :  { %v6437_v22 = vadd.f32 %v2180_v25, %v2178_v14  ;;  %v2079_v23 = vsel %vm2077_vm13, 0.0, %v2075_v7  ;;  %v5037_v49 = vsel %vm2077_vm13, 1.0, %v5924_v39  ;;  %3170 = vmatmul.bf16.gmra.mxu1 %v6362_v45  ;;  %v1590_v27 = vadd.f32 %v1589_v18, %v6198_v20 }
 0x1d0   :  { %v2083_v26 = vadd.f32 %v2081_v17, %v1785_v15  ;;  %v2091_v29 = vmul.f32 0.9, %v2079_v23  ;;  %v2533_v5 = vadd.f32 %v5037_v49, %v2485_v30  ;;  %v2534_v15 = vadd.f32 %v5038_v24, %v2486_v37 }
 0x1d1   :  { %vm2184_vm14 = vcmp.gt.f32.partialorder %v6437_v22, 0.23  ;;  %v1659_v31 = vadd.f32 %v1658_v32, %v1590_v27  ;;  %v2452_v27 = vld [vmem:[#allocation4 + $0x60] sm:$0xff] }
 0x1d2   :  { %v2093_v36 = vmul.f32 0.1, %v2083_v26  ;;  %v2186_v10 = vsel %vm2184_vm14, 0.0, %v6437_v22  ;;  %v2101_v35 = vmul.f32 0.8, %v2083_v26  ;;  %v2570_v58 = vpack.c.bf16 %v2533_v5, %v2532_v42  ;;  %v2453_v5 = vld [vmem:[#allocation4 + $0x68] sm:$0xff] }
 0x1d3   :  { %v1717_v48 = vpop.f32.mrf.mxu0  ;;  %v2190_v19 = vadd.f32 %v2188_v28, %v1659_v31  ;;  %v2202_v59 = vmul.f32 0.9, %v2186_v10  ;;  %v5587_v12 = vld [vmem:[#allocation6 + $0x44] sm:$0xf0]  ;;  %v5100_v7 = vld [vmem:[#allocation6 + $0x48] sm:$0xf0] }
 0x1d4   :  { %v2095_v45 = vadd.f32 %v2093_v36, %v2091_v29  ;;  %v1718_v38 = vadd.f32 %v1717_v48, %v6268_v16  ;;  %v1786_v54 = vpop.f32.mrf.mxu1  ;;  %2594 = vst [vmem:[#allocation6 + $0x50] sm:$0xff] %v2570_v58  ;;  %v6454_v11 = vor.u32 %v5587_v12, %v5098_v44  ;;  %v6456_v4 = vor.u32 %v5586_v6, %v5100_v7 }
 0x1d5   :  { %v2204_v60 = vmul.f32 0.1, %v2190_v19  ;;  %v2212_v25 = vmul.f32 0.8, %v2190_v19  ;;  %v5040_v36 = vsel %vm2120_vm8, 1.0, %v5924_v39  ;;  %v2489_v19 = vunpack.c.h.bf16 %v2452_v27 }
 0x1d6   :  { %vm2097_vm15 = vcmp.gt.f32.partialorder %v2095_v45, 0.23  ;;  %v1787_v46 = vadd.f32 %v1786_v54, %v1718_v38  ;;  %v1592_v41 = vpop.f32.mrf.mxu2  ;;  %v1661_v63 = vpop.f32.mrf.mxu3  ;;  %2978 = vmatmul.bf16.gmra.mxu2 %v6454_v11  ;;  %3047 = vmatmul.bf16.gmra.mxu3 %v6456_v4  ;;  %v2488_v38 = vunpack.c.l.bf16 %v2452_v27  ;;  %v2490_v44 = vunpack.c.l.bf16 %v2453_v5 }
 0x1d7   :  { %v2099_v51 = vsel %vm2097_vm15, 0.0, %v2095_v45  ;;  %v5039_v53 = vsel %vm2097_vm15, 1.0, %v5924_v39  ;;  %v1593_v61 = vadd.f32 %v1592_v41, %v6198_v20  ;;  %v6452_v9 = vadd.f32 %v2204_v60, %v2202_v59 }
 0x1d8   :  { %v2103_v2 = vadd.f32 %v2101_v35, %v1787_v46  ;;  %v2115_v56 = vmul.f32 0.9, %v2099_v51  ;;  %v2535_v17 = vadd.f32 %v5039_v53, %v2487_v1  ;;  %v5042_v59 = vsel %vm2140_vm10, 1.0, %v5924_v39 }
 0x1d9   :  { %v1662_v14 = vadd.f32 %v1661_v63, %v1593_v61  ;;  %vm2208_vm0 = vcmp.gt.f32.partialorder %v6452_v9, 0.23  ;;  %v2536_v46 = vadd.f32 %v5040_v36, %v2488_v38  ;;  %v2491_v1 = vunpack.c.h.bf16 %v2453_v5 }
 0x1da   :  { %v2117_v13 = vmul.f32 0.1, %v2103_v2  ;;  %v2210_v18 = vsel %vm2208_vm0, 0.0, %v6452_v9  ;;  %v2571_v26 = vpack.c.bf16 %v2535_v17, %v2534_v15  ;;  %v2125_v29 = vmul.f32 0.8, %v2103_v2 }
 0x1db   :  { %v1720_v50 = vpop.f32.mrf.mxu0  ;;  %v2214_v23 = vadd.f32 %v2212_v25, %v1662_v14  ;;  %v2222_v55 = vmul.f32 0.9, %v2210_v18  ;;  %v5106_v15 = vld [vmem:[#allocation6 + $0x50] sm:$0xf]  ;;  %v5588_v17 = vld [vmem:[#allocation6 + $0x54] sm:$0xf] }
 0x1dc   :  { %v2119_v62 = vadd.f32 %v2117_v13, %v2115_v56  ;;  %v1789_v21 = vpop.f32.mrf.mxu1  ;;  %v1721_v49 = vadd.f32 %v1720_v50, %v6268_v16  ;;  %2595 = vst [vmem:[#allocation6 + $0x58] sm:$0xff] %v2571_v26 }
 0x1dd   :  { %v2224_v33 = vmul.f32 0.1, %v2214_v23  ;;  %v2232_v37 = vmul.f32 0.8, %v2214_v23 }
 0x1de   :  { %vm2121_vm1 = vcmp.gt.f32.partialorder %v2119_v62, 0.23  ;;  %v1594_v32 = vpop.f32.mrf.mxu2  ;;  %3106 = vmatmul.bf16.gmra.mxu0 %v6390_v0  ;;  %v1790_v28 = vadd.f32 %v1789_v21, %v1721_v49  ;;  %v1663_v48 = vpop.f32.mrf.mxu3 }
 0x1df   :  { %3175 = vmatmul.bf16.gmra.mxu1 %v6392_v47  ;;  %v2123_v30 = vsel %vm2121_vm1, 0.0, %v2119_v62  ;;  %v5041_v10 = vsel %vm2121_vm1, 1.0, %v5924_v39  ;;  %v1595_v31 = vadd.f32 %v1594_v32, %v6198_v20  ;;  %v6472_v45 = vadd.f32 %v2224_v33, %v2222_v55 }
 0x1e0   :  { %v2127_v0 = vadd.f32 %v2125_v29, %v1790_v28  ;;  %v2135_v47 = vmul.f32 0.9, %v2123_v30  ;;  %v2537_v58 = vadd.f32 %v5041_v10, %v2489_v19  ;;  %v2538_v33 = vadd.f32 %v5042_v59, %v2490_v44  ;;  %v5661_v19 = vld [vmem:[#allocation19 + $0x18] sm:$0xff] }
 0x1e1   :  { %v1664_v54 = vadd.f32 %v1663_v48, %v1595_v31  ;;  %vm2228_vm2 = vcmp.gt.f32.partialorder %v6472_v45, 0.23  ;;  %v2454_v31 = vld [vmem:[#allocation4 + $0x70] sm:$0xff]  ;;  %v5044_v48 = vsel %vm2164_vm12, 1.0, %v5924_v39  ;;  %4291 = vmatpush.bf16.msra.mxu2 %v5661_v19 }
 0x1e2   :  { %v2137_v24 = vmul.f32 0.1, %v2127_v0  ;;  %v2230_v40 = vsel %vm2228_vm2, 0.0, %v6472_v45  ;;  %v2145_v53 = vmul.f32 0.8, %v2127_v0  ;;  %v2572_v7 = vpack.c.bf16 %v2537_v58, %v2536_v46 }
 0x1e3   :  { %v1722_v42 = vpop.f32.mrf.mxu0  ;;  %v2234_v43 = vadd.f32 %v2232_v37, %v1664_v54  ;;  %v2246_v51 = vmul.f32 0.9, %v2230_v40  ;;  %v5589_v61 = vld [vmem:[#allocation6 + $0x54] sm:$0xf0]  ;;  %v5108_v63 = vld [vmem:[#allocation6 + $0x58] sm:$0xf0]  ;;  %v2492_v5 = vunpack.c.l.bf16 %v2454_v31  ;;  %v2493_v59 = vunpack.c.h.bf16 %v2454_v31 }
 0x1e4   :  { %v1791_v34 = vpop.f32.mrf.mxu1  ;;  %v2139_v35 = vadd.f32 %v2137_v24, %v2135_v47  ;;  %v1723_v41 = vadd.f32 %v1722_v42, %v6268_v16  ;;  %2596 = vst [vmem:[#allocation6 + $0x60] sm:$0xff] %v2572_v7  ;;  %v6487_v18 = vor.u32 %v5589_v61, %v5106_v15  ;;  %v6489_v21 = vor.u32 %v5588_v17, %v5108_v63 }
 0x1e5   :  { %v2248_v60 = vmul.f32 0.1, %v2234_v43  ;;  %v2256_v50 = vmul.f32 0.8, %v2234_v43  ;;  %v2540_v44 = vadd.f32 %v5044_v48, %v2492_v5 }
 0x1e6   :  { %vm2141_vm3 = vcmp.gt.f32.partialorder %v2139_v35, 0.23  ;;  %v1792_v2 = vadd.f32 %v1791_v34, %v1723_v41  ;;  %v1597_v56 = vpop.f32.mrf.mxu2  ;;  %2983 = vmatmul.bf16.gmra.mxu2 %v6487_v18  ;;  %3052 = vmatmul.bf16.gmra.mxu3 %v6489_v21  ;;  %v5669_v41 = vld [vmem:[#allocation19 + $0x58] sm:$0xff] }
 0x1e7   :  { %v2143_v12 = vsel %vm2141_vm3, 0.0, %v2139_v35  ;;  %v5043_v6 = vsel %vm2141_vm3, 1.0, %v5924_v39  ;;  %v6483_v8 = vadd.f32 %v2248_v60, %v2246_v51  ;;  %v1666_v13 = vpop.f32.mrf.mxu3  ;;  %v1598_v25 = vadd.f32 %v1597_v56, %v6198_v20  ;;  %v2455_v60 = vld [vmem:[#allocation4 + $0x78] sm:$0xff]  ;;  %4360 = vmatpush.bf16.msra.mxu3 %v5669_v41 }
 0x1e8   :  { %v2147_v14 = vadd.f32 %v2145_v53, %v1792_v2  ;;  %v2159_v62 = vmul.f32 0.9, %v2143_v12  ;;  %v2539_v28 = vadd.f32 %v5043_v6, %v2491_v1  ;;  %v5046_v12 = vsel %vm2184_vm14, 1.0, %v5924_v39 }
 0x1e9   :  { %vm2252_vm4 = vcmp.gt.f32.partialorder %v6483_v8, 0.23  ;;  %v1667_v49 = vadd.f32 %v1666_v13, %v1598_v25  ;;  %v2494_v13 = vunpack.c.l.bf16 %v2455_v60 }
 0x1ea   :  { %v2161_v23 = vmul.f32 0.1, %v2147_v14  ;;  %v2254_v27 = vsel %vm2252_vm4, 0.0, %v6483_v8  ;;  %v2169_v10 = vmul.f32 0.8, %v2147_v14  ;;  %v2573_v0 = vpack.c.bf16 %v2539_v28, %v2538_v33 }
 0x1eb   :  { %v1725_v26 = vpop.f32.mrf.mxu0  ;;  %v2258_v36 = vadd.f32 %v2256_v50, %v1667_v49  ;;  %v2266_v38 = vmul.f32 0.9, %v2254_v27  ;;  %v5114_v17 = vld [vmem:[#allocation6 + $0x60] sm:$0xf]  ;;  %v5590_v33 = vld [vmem:[#allocation6 + $0x64] sm:$0xf] }
 0x1ec   :  { %v1726_v32 = vadd.f32 %v1725_v26, %v6268_v16  ;;  %v1794_v55 = vpop.f32.mrf.mxu1  ;;  %v2163_v29 = vadd.f32 %v2161_v23, %v2159_v62  ;;  %2597 = vst [vmem:[#allocation6 + $0x68] sm:$0xff] %v2573_v0  ;;  %v2495_v26 = vunpack.c.h.bf16 %v2455_v60  ;;  %v6565_v8 = vld [vmem:[%s6916_s6] sm:$0x3]  ;;  %s5926_s6 = smov [#allocation21]  }
 0x1ed   :  { %v2268_v37 = vmul.f32 0.1, %v2258_v36  ;;  %v2276_v35 = vmul.f32 0.8, %v2258_v36  ;;  %s4597_s14 = sshll.u32 %s5926_s6, 4  ;;  %s4598_s14 = int_to_ptr.vmem [resolvable:$true] %s4597_s14 }
 0x1ee   :  { %v1795_v30 = vadd.f32 %v1794_v55, %v1726_v32  ;;  %3111 = vmatmul.bf16.gmra.mxu0 %v6422_v3  ;;  %vm2165_vm5 = vcmp.gt.f32.partialorder %v2163_v29, 0.23  ;;  %v1599_v42 = vpop.f32.mrf.mxu2 }
 0x1ef   :  { %3180 = vmatmul.bf16.gmra.mxu1 %v6424_v52  ;;  %v2167_v54 = vsel %vm2165_vm5, 0.0, %v2163_v29  ;;  %v5045_v24 = vsel %vm2165_vm5, 1.0, %v5924_v39  ;;  %v1668_v40 = vpop.f32.mrf.mxu3  ;;  %v1600_v3 = vadd.f32 %v1599_v42, %v6198_v20  ;;  %v6504_v43 = vadd.f32 %v2268_v37, %v2266_v38  ;;  %v2456_v42 = vld [vmem:[#allocation4 + $0x80] sm:$0xff] }
 0x1f0   :  { %v2171_v47 = vadd.f32 %v2169_v10, %v1795_v30  ;;  %v2179_v57 = vmul.f32 0.9, %v2167_v54  ;;  %v2541_v1 = vadd.f32 %v5045_v24, %v2493_v59  ;;  %v2542_v30 = vadd.f32 %v5046_v12, %v2494_v13  ;;  %v2457_v12 = vld [vmem:[#allocation4 + $0x88] sm:$0xff] }
 0x1f1   :  { %v1669_v46 = vadd.f32 %v1668_v40, %v1600_v3  ;;  %vm2272_vm6 = vcmp.gt.f32.partialorder %v6504_v43, 0.23  ;;  %v5048_v40 = vsel %vm2208_vm0, 1.0, %v5924_v39  ;;  %v2497_v9 = vunpack.c.h.bf16 %v2456_v42 }
 0x1f2   :  { %v2181_v34 = vmul.f32 0.1, %v2171_v47  ;;  %v2189_v61 = vmul.f32 0.8, %v2171_v47  ;;  %v2574_v56 = vpack.c.bf16 %v2541_v1, %v2540_v44  ;;  %v2274_v23 = vsel %vm2272_vm6, 0.0, %v6504_v43 }
 0x1f3   :  { %v1727_v52 = vpop.f32.mrf.mxu0  ;;  %v2278_v2 = vadd.f32 %v2276_v35, %v1669_v46  ;;  %v5591_v62 = vld [vmem:[#allocation6 + $0x64] sm:$0xf0]  ;;  %v5116_v27 = vld [vmem:[#allocation6 + $0x68] sm:$0xf0]  ;;  %v2290_v36 = vmul.f32 0.9, %v2274_v23 }
 0x1f4   :  { %v2183_v51 = vadd.f32 %v2181_v34, %v2179_v57  ;;  %v1728_v53 = vadd.f32 %v1727_v52, %v6268_v16  ;;  %v1796_v58 = vpop.f32.mrf.mxu1  ;;  %2598 = vst [vmem:[#allocation6 + $0x70] sm:$0xff] %v2574_v56  ;;  %v6515_v22 = vor.u32 %v5591_v62, %v5114_v17  ;;  %v6518_v29 = vor.u32 %v5590_v33, %v5116_v27  ;;  %v5660_v35 = vld [vmem:[#allocation19 + $0x10] sm:$0xff] }
 0x1f5   :  { %v2292_v14 = vmul.f32 0.1, %v2278_v2  ;;  %v2300_v5 = vmul.f32 0.8, %v2278_v2  ;;  %v5668_v46 = vld [vmem:[#allocation19 + $0x50] sm:$0xff]  ;;  %4292 = vmatpush.bf16.msra.mxu2 %v5660_v35  ;;  %v5050_v2 = vsel %vm2228_vm2, 1.0, %v5924_v39  ;;  %v2498_v62 = vunpack.c.l.bf16 %v2457_v12 }
 0x1f6   :  { %vm2185_vm7 = vcmp.gt.f32.partialorder %v2183_v51, 0.23  ;;  %v1797_v63 = vadd.f32 %v1796_v58, %v1728_v53  ;;  %v1602_v50 = vpop.f32.mrf.mxu2  ;;  %2988 = vmatmul.bf16.gmra.mxu2 %v6515_v22  ;;  %3057 = vmatmul.bf16.gmra.mxu3 %v6518_v29 }
 0x1f7   :  { %v2187_v6 = vsel %vm2185_vm7, 0.0, %v2183_v51  ;;  %v5047_v7 = vsel %vm2185_vm7, 1.0, %v5924_v39  ;;  %v1671_v15 = vpop.f32.mrf.mxu3  ;;  %v1603_v55 = vadd.f32 %v1602_v50, %v6198_v20  ;;  %v6523_v38 = vadd.f32 %v2292_v14, %v2290_v36  ;;  %4361 = vmatpush.bf16.msra.mxu3 %v5668_v46 }
 0x1f8   :  { %v2191_v25 = vadd.f32 %v2189_v61, %v1797_v63  ;;  %v2203_v49 = vmul.f32 0.9, %v2187_v6  ;;  %v2543_v10 = vadd.f32 %v5047_v7, %v2495_v26 }
 0x1f9   :  { %v1672_v54 = vadd.f32 %v1671_v15, %v1603_v55  ;;  %vm2296_vm9 = vcmp.gt.f32.partialorder %v6523_v38, 0.23  ;;  %v2499_v55 = vunpack.c.h.bf16 %v2457_v12 }
 0x1fa   :  { %v2205_v32 = vmul.f32 0.1, %v2191_v25  ;;  %v2575_v37 = vpack.c.bf16 %v2543_v10, %v2542_v30  ;;  %v2213_v24 = vmul.f32 0.8, %v2191_v25  ;;  %v2298_v58 = vsel %vm2296_vm9, 0.0, %v6523_v38  ;;  %v5667_v38 = vld [vmem:[#allocation19 + $0x48] sm:$0xff] }
 0x1fb   :  { %v1730_v28 = vpop.f32.mrf.mxu0  ;;  %v2310_v14 = vmul.f32 0.9, %v2298_v58  ;;  %v5122_v26 = vld [vmem:[#allocation6 + $0x70] sm:$0xf]  ;;  %v5592_v27 = vld [vmem:[#allocation6 + $0x74] sm:$0xf]  ;;  %4362 = vmatpush.bf16.msra.mxu3 %v5667_v38 }
 0x1fc   :  { %v2207_v31 = vadd.f32 %v2205_v32, %v2203_v49  ;;  %v1799_v48 = vpop.f32.mrf.mxu1  ;;  %v1731_v0 = vadd.f32 %v1730_v28, %v6268_v16  ;;  %2599 = vst [vmem:[#allocation6 + $0x78] sm:$0xff] %v2575_v37 }
 0x1fe   :  { %vm2209_vm8 = vcmp.gt.f32.partialorder %v2207_v31, 0.23  ;;  %3116 = vmatmul.bf16.gmra.mxu0 %v6454_v11  ;;  %v1800_v47 = vadd.f32 %v1799_v48, %v1731_v0  ;;  %v1604_v57 = vpop.f32.mrf.mxu2  ;;  %v2302_v11 = vadd.f32 %v2300_v5, %v1672_v54  ;;  %v2546_v0 = vadd.f32 %v5050_v2, %v2498_v62  ;;  %v2459_v2 = vld [vmem:[#allocation4 + $0x98] sm:$0xff] }
 0x1ff   :  { %3185 = vmatmul.bf16.gmra.mxu1 %v6456_v4  ;;  %v2211_v3 = vsel %vm2209_vm8, 0.0, %v2207_v31  ;;  %v5049_v19 = vsel %vm2209_vm8, 1.0, %v5924_v39  ;;  %v1673_v34 = vpop.f32.mrf.mxu3  ;;  %v2496_v4 = vunpack.c.l.bf16 %v2456_v42  ;;  %v1605_v23 = vadd.f32 %v1604_v57, %v6198_v20 }
 0x200   :  { %v2215_v59 = vadd.f32 %v2213_v24, %v1800_v47  ;;  %v2223_v52 = vmul.f32 0.9, %v2211_v3  ;;  %v2312_v61 = vmul.f32 0.1, %v2302_v11  ;;  %v2545_v6 = vadd.f32 %v5049_v19, %v2497_v9 }
 0x201   :  { %v2544_v44 = vadd.f32 %v5048_v40, %v2496_v4  ;;  %v1674_v54 = vadd.f32 %v1673_v34, %v1605_v23  ;;  %v2320_v40 = vmul.f32 0.8, %v2302_v11  ;;  %v5052_v3 = vsel %vm2252_vm4, 1.0, %v5924_v39 }
 0x202   :  { %v2225_v41 = vmul.f32 0.1, %v2215_v59  ;;  %v2233_v63 = vmul.f32 0.8, %v2215_v59  ;;  %v6543_v32 = vadd.f32 %v2312_v61, %v2310_v14  ;;  %v2458_v59 = vld [vmem:[#allocation4 + $0x90] sm:$0xff]  ;;  %v5054_v9 = vsel %vm2272_vm6, 1.0, %v5924_v39 }
 0x203   :  { %v1732_v51 = vpop.f32.mrf.mxu0  ;;  %v5593_v56 = vld [vmem:[#allocation6 + $0x74] sm:$0xf0]  ;;  %v5124_v13 = vld [vmem:[#allocation6 + $0x78] sm:$0xf0]  ;;  %v2576_v15 = vpack.c.bf16 %v2545_v6, %v2544_v44  ;;  %v2322_v46 = vadd.f32 %v2320_v40, %v1674_v54  ;;  %v2501_v4 = vunpack.c.h.bf16 %v2458_v59 }
 0x204   :  { %v1801_v53 = vpop.f32.mrf.mxu1  ;;  %v2227_v60 = vadd.f32 %v2225_v41, %v2223_v52  ;;  %v1733_v1 = vadd.f32 %v1732_v51, %v6268_v16  ;;  %v6545_v33 = vor.u32 %v5593_v56, %v5122_v26  ;;  %v6547_v28 = vor.u32 %v5592_v27, %v5124_v13 }
 0x205   :  { %2600 = vst [vmem:[#allocation6 + $0x80] sm:$0xff] %v2576_v15  ;;  %vm2316_vm11 = vcmp.gt.f32.partialorder %v6543_v32, 0.23  ;;  %v2503_v27 = vunpack.c.h.bf16 %v2459_v2  ;;  %v2344_v40 = vmul.f32 0.8, %v2322_v46 }
 0x206   :  { %vm2229_vm10 = vcmp.gt.f32.partialorder %v2227_v60, 0.23  ;;  %v1802_v7 = vadd.f32 %v1801_v53, %v1733_v1  ;;  %2993 = vmatmul.bf16.gmra.mxu2 %v6545_v33  ;;  %3062 = vmatmul.bf16.gmra.mxu3 %v6547_v28  ;;  %v2318_v11 = vsel %vm2316_vm11, 0.0, %v6543_v32  ;;  %v2336_v1 = vmul.f32 0.1, %v2322_v46 }
 0x207   :  { %v2231_v25 = vsel %vm2229_vm10, 0.0, %v2227_v60  ;;  %v5051_v50 = vsel %vm2229_vm10, 1.0, %v5924_v39  ;;  %v1607_v17 = vpop.f32.mrf.mxu2  ;;  %v6541_v45 = vpop.f32.mrf.mxu3  ;;  %v2334_v44 = vmul.f32 0.9, %v2318_v11 }
 0x208   :  { %v2235_v49 = vadd.f32 %v2233_v63, %v1802_v7  ;;  %v2247_v36 = vmul.f32 0.9, %v2231_v25  ;;  %v2547_v37 = vadd.f32 %v5051_v50, %v2499_v55  ;;  %v6572_v7 = vperm.slane %v6565_v8, 0 }
 0x209   :  { %v1608_v56 = vadd.f32 %v1607_v17, %v6198_v20  ;;  %v2502_v50 = vunpack.c.l.bf16 %v2459_v2  ;;  %v6576_v26 = vadd.f32 %v2336_v1, %v2334_v44 }
 0x20a   :  { %v2249_v30 = vmul.f32 0.1, %v2235_v49  ;;  %v2257_v42 = vmul.f32 0.8, %v2235_v49  ;;  %v2577_v5 = vpack.c.bf16 %v2547_v37, %v2546_v0 }
 0x20b   :  { %v1735_v10 = vpop.f32.mrf.mxu0  ;;  %v2550_v37 = vadd.f32 %v5054_v9, %v2502_v50  ;;  %vm2340_vm14 = vcmp.gt.f32.partialorder %v6576_v26, 0.23 }
 0x20c   :  { %v1736_v31 = vadd.f32 %v1735_v10, %v6268_v16  ;;  %v1804_v48 = vpop.f32.mrf.mxu1  ;;  %v2251_v47 = vadd.f32 %v2249_v30, %v2247_v36  ;;  %2601 = vst [vmem:[#allocation6 + $0x88] sm:$0xff] %v2577_v5  ;;  %v5130_v25 = vld [vmem:[#allocation6 + $0x80] sm:$0xf]  ;;  %v5594_v23 = vld [vmem:[#allocation6 + $0x84] sm:$0xf] }
 0x20e   :  { %v1805_v24 = vadd.f32 %v1804_v48, %v1736_v31  ;;  %3121 = vmatmul.bf16.gmra.mxu0 %v6487_v18  ;;  %vm2253_vm12 = vcmp.gt.f32.partialorder %v2251_v47, 0.23  ;;  %v1677_v31 = vadd.f32 %v6541_v45, %v1608_v56 }
 0x20f   :  { %3190 = vmatmul.bf16.gmra.mxu1 %v6489_v21  ;;  %v2255_v19 = vsel %vm2253_vm12, 0.0, %v2251_v47  ;;  %v5053_v34 = vsel %vm2253_vm12, 1.0, %v5924_v39  ;;  %v1609_v35 = vpop.f32.mrf.mxu2  ;;  %v1678_v18 = vpop.f32.mrf.mxu3  ;;  %v2500_v21 = vunpack.c.l.bf16 %v2458_v59 }
 0x210   :  { %v2259_v57 = vadd.f32 %v2257_v42, %v1805_v24  ;;  %v2267_v52 = vmul.f32 0.9, %v2255_v19  ;;  %v2549_v63 = vadd.f32 %v5053_v34, %v2501_v4  ;;  %v5056_v34 = vsel %vm2296_vm9, 1.0, %v5924_v39 }
 0x211   :  { %v2548_v61 = vadd.f32 %v5052_v3, %v2500_v21  ;;  %v2346_v18 = vadd.f32 %v2344_v40, %v1677_v31 }
 0x212   :  { %v2269_v41 = vmul.f32 0.1, %v2259_v57  ;;  %v2277_v12 = vmul.f32 0.8, %v2259_v57  ;;  %v2460_v57 = vld [vmem:[#allocation4 + $0xa0] sm:$0xff] }
 0x213   :  { %v1737_v51 = vpop.f32.mrf.mxu0  ;;  %v2578_v14 = vpack.c.bf16 %v2549_v63, %v2548_v61  ;;  %v5595_v62 = vld [vmem:[#allocation6 + $0x84] sm:$0xf0]  ;;  %v5132_v49 = vld [vmem:[#allocation6 + $0x88] sm:$0xf0]  ;;  %v2505_v21 = vunpack.c.h.bf16 %v2460_v57 }
 0x214   :  { %v2271_v53 = vadd.f32 %v2269_v41, %v2267_v52  ;;  %v1738_v58 = vadd.f32 %v1737_v51, %v6268_v16  ;;  %v1806_v60 = vpop.f32.mrf.mxu1  ;;  %v6578_v36 = vor.u32 %v5595_v62, %v5130_v25  ;;  %v6580_v30 = vor.u32 %v5594_v23, %v5132_v49  ;;  %v5659_v52 = vld [vmem:[#allocation19 + $0x8] sm:$0xff] }
 0x215   :  { %2602 = vst [vmem:[#allocation6 + $0x90] sm:$0xff] %v2578_v14  ;;  %v2342_v41 = vsel %vm2340_vm14, 0.0, %v6576_v26  ;;  %4293 = vmatpush.bf16.msra.mxu2 %v5659_v52  ;;  %v2461_v14 = vld [vmem:[#allocation4 + $0xa8] sm:$0xff]  ;;  %v2462_v52 = vld [vmem:[#allocation4 + $0xb0] sm:$0xff] }
 0x216   :  { %vm2273_vm13 = vcmp.gt.f32.partialorder %v2271_v53, 0.23  ;;  %v1807_v6 = vadd.f32 %v1806_v60, %v1738_v58  ;;  %2998 = vmatmul.bf16.gmra.mxu2 %v6578_v36  ;;  %3067 = vmatmul.bf16.gmra.mxu3 %v6580_v30  ;;  %v2354_v58 = vmul.f32 0.1, %v2346_v18  ;;  %v2352_v63 = vmul.f32 0.9, %v2342_v41 }
 0x217   :  { %v2275_v13 = vsel %vm2273_vm13, 0.0, %v2271_v53  ;;  %v5055_v43 = vsel %vm2273_vm13, 1.0, %v5924_v39  ;;  %v2959_v55 = vpop.f32.mrf.mxu2  ;;  %v3028_v10 = vpop.f32.mrf.mxu3  ;;  %v2507_v32 = vunpack.c.h.bf16 %v2461_v14  ;;  %v2509_v26 = vunpack.c.h.bf16 %v2462_v52 }
 0x218   :  { %v2279_v15 = vadd.f32 %v2277_v12, %v1807_v6  ;;  %v2291_v20 = vmul.f32 0.9, %v2275_v13  ;;  %v2960_v0 = vadd.f32 %v2959_v55, %v6572_v7  ;;  %v2551_v54 = vadd.f32 %v5055_v43, %v2503_v27 }
 0x21a   :  { %v2293_v17 = vmul.f32 0.1, %v2279_v15  ;;  %v3029_v5 = vadd.f32 %v3028_v10, %v2960_v0  ;;  %v2579_v3 = vpack.c.bf16 %v2551_v54, %v2550_v37  ;;  %v2301_v45 = vmul.f32 0.8, %v2279_v15 }
 0x21b   :  { %v1740_v48 = vpop.f32.mrf.mxu0  ;;  %v5058_v15 = vsel %vm2316_vm11, 1.0, %v5924_v39 }
 0x21c   :  { %v2295_v47 = vadd.f32 %v2293_v17, %v2291_v20  ;;  %v1741_v24 = vadd.f32 %v1740_v48, %v6268_v16  ;;  %v1809_v42 = vpop.f32.mrf.mxu1  ;;  %v6594_v46 = vmul.f32 0.1, %v3029_v5  ;;  %2603 = vst [vmem:[#allocation6 + $0x98] sm:$0xff] %v2579_v3  ;;  %v3288_v12 = vmul.f32 0.8, %v3029_v5 }
 0x21d   :  { %v5138_v13 = vld [vmem:[#allocation6 + $0x90] sm:$0xf]  ;;  %v2356_v20 = vadd.f32 %v2354_v58, %v2352_v63  ;;  %v5596_v31 = vld [vmem:[#allocation6 + $0x94] sm:$0xf] }
 0x21e   :  { %v1810_v19 = vadd.f32 %v1809_v42, %v1741_v24  ;;  %vm2297_vm15 = vcmp.gt.f32.partialorder %v2295_v47, 0.23  ;;  %3126 = vmatmul.bf16.gmra.mxu0 %v6515_v22  ;;  %v2504_v22 = vunpack.c.l.bf16 %v2460_v57  ;;  %vm3284_vm0 = vcmp.gt.f32.partialorder %v6594_v46, 0.23 }
 0x21f   :  { %v2299_v59 = vsel %vm2297_vm15, 0.0, %v2295_v47  ;;  %v5057_v35 = vsel %vm2297_vm15, 1.0, %v5924_v39  ;;  %3195 = vmatmul.bf16.gmra.mxu1 %v6518_v29  ;;  %v2961_v4 = vpop.f32.mrf.mxu2  ;;  %v3030_v61 = vpop.f32.mrf.mxu3  ;;  %v3286_v50 = vsel %vm3284_vm0, 0.0, %v6594_v46  ;;  %v2506_v47 = vunpack.c.l.bf16 %v2461_v14 }
 0x220   :  { %v2303_v11 = vadd.f32 %v2301_v45, %v1810_v19  ;;  %v2311_v51 = vmul.f32 0.9, %v2299_v59  ;;  %v2962_v53 = vadd.f32 %v2961_v4, %v6572_v7  ;;  %v2552_v44 = vadd.f32 %v5056_v34, %v2504_v22 }
 0x221   :  { %v2553_v1 = vadd.f32 %v5057_v35, %v2505_v21  ;;  %v3301_v48 = vmul.f32 0.9, %v3286_v50  ;;  %v2554_v3 = vadd.f32 %v5058_v15, %v2506_v47  ;;  %vm2358_vm2 = vcmp.gt.f32.partialorder %v2356_v20, 0.23 }
 0x222   :  { %v2313_v9 = vmul.f32 0.1, %v2303_v11  ;;  %v3031_v56 = vadd.f32 %v3030_v61, %v2962_v53  ;;  %v2321_v43 = vmul.f32 0.8, %v2303_v11 }
 0x223   :  { %v1742_v29 = vpop.f32.mrf.mxu0  ;;  %v2580_v25 = vpack.c.bf16 %v2553_v1, %v2552_v44  ;;  %v5597_v27 = vld [vmem:[#allocation6 + $0x94] sm:$0xf0]  ;;  %v5140_v55 = vld [vmem:[#allocation6 + $0x98] sm:$0xf0] }
 0x224   :  { %v2315_v60 = vadd.f32 %v2313_v9, %v2311_v51  ;;  %v1811_v2 = vpop.f32.mrf.mxu1  ;;  %v1743_v6 = vadd.f32 %v1742_v29, %v6268_v16  ;;  %v3290_v49 = vadd.f32 %v3288_v12, %v3031_v56  ;;  %v6609_v10 = vor.u32 %v5597_v27, %v5138_v13  ;;  %v5735_v56 = vld [vmem:[#allocation4] sm:$0xff] }
 0x225   :  { %2604 = vst [vmem:[#allocation6 + $0xa0] sm:$0xff] %v2580_v25  ;;  %v6611_v54 = vor.u32 %v5596_v31, %v5140_v55  ;;  %v2508_v29 = vunpack.c.l.bf16 %v2462_v52  ;;  %v3799_v13 = vunpack.c.l.bf16 %v5735_v56  ;;  %v3800_v50 = vunpack.c.h.bf16 %v5735_v56 }
 0x226   :  { %vm2317_vm1 = vcmp.gt.f32.partialorder %v2315_v60, 0.23  ;;  %v1812_v23 = vadd.f32 %v1811_v2, %v1743_v6  ;;  %v3303_v37 = vmul.f32 0.1, %v3290_v49  ;;  %3003 = vmatmul.bf16.gmra.mxu2 %v6609_v10  ;;  %v3311_v4 = vmul.f32 0.8, %v3290_v49 }
 0x227   :  { %v5059_v62 = vsel %vm2317_vm1, 1.0, %v5924_v39  ;;  %v2319_v17 = vsel %vm2317_vm1, 0.0, %v2315_v60  ;;  %3072 = vmatmul.bf16.gmra.mxu3 %v6611_v54  ;;  %v3847_v2 = vld [vmem:[#allocation6] sm:$0xff]  ;;  %v6636_v31 = vperm.slane %v6565_v8, 1 }
 0x228   :  { %v2323_v0 = vadd.f32 %v2321_v43, %v1812_v23  ;;  %v2335_v24 = vmul.f32 0.9, %v2319_v17  ;;  %v6613_v40 = vadd.f32 %v3303_v37, %v3301_v48  ;;  %v2555_v19 = vadd.f32 %v5059_v62, %v2507_v32  ;;  %v2463_v62 = vld [vmem:[#allocation4 + $0xb8] sm:$0xff] }
 0x229   :  { %v2964_v59 = vpop.f32.mrf.mxu2  ;;  %v3033_v22 = vpop.f32.mrf.mxu3  ;;  %v3871_v15 = vunpack.c.l.bf16 %v3847_v2  ;;  %v3872_v55 = vunpack.c.h.bf16 %v3847_v2 }
 0x22a   :  { %v2337_v42 = vmul.f32 0.1, %v2323_v0  ;;  %vm3307_vm3 = vcmp.gt.f32.partialorder %v6613_v40, 0.23  ;;  %v2581_v35 = vpack.c.bf16 %v2555_v19, %v2554_v3  ;;  %v2345_v11 = vmul.f32 0.8, %v2323_v0 }
 0x22b   :  { %v1745_v5 = vpop.f32.mrf.mxu0  ;;  %v2965_v41 = vadd.f32 %v2964_v59, %v6572_v7  ;;  %v3309_v21 = vsel %vm3307_vm3, 0.0, %v6613_v40  ;;  %v3919_v47 = vadd.f32 %v3871_v15, %v3799_v13  ;;  %v5666_v3 = vld [vmem:[#allocation19 + $0x40] sm:$0xff]  ;;  %v2510_v19 = vunpack.c.l.bf16 %v2463_v62 }
 0x22c   :  { %v1746_v45 = vadd.f32 %v1745_v5, %v6268_v16  ;;  %v1814_v57 = vpop.f32.mrf.mxu1  ;;  %v2339_v34 = vadd.f32 %v2337_v42, %v2335_v24  ;;  %v5060_v16 = vsel %vm2340_vm14, 1.0, %v5924_v39  ;;  %2605 = vst [vmem:[#allocation6 + $0xa8] sm:$0xff] %v2581_v35  ;;  %v3321_v1 = vmul.f32 0.9, %v3309_v21  ;;  %v5146_v27 = vld [vmem:[#allocation6 + $0xa0] sm:$0xf]  ;;  %4363 = vmatpush.bf16.msra.mxu3 %v5666_v3 }
 0x22d   :  { %v3034_v9 = vadd.f32 %v3033_v22, %v2965_v41  ;;  %v2556_v43 = vadd.f32 %v5060_v16, %v2508_v29  ;;  %v5598_v42 = vld [vmem:[#allocation6 + $0xa4] sm:$0xf]  ;;  %v5658_v5 = vld [vmem:[#allocation19] sm:$0xff] }
 0x22e   :  { %v1815_v18 = vadd.f32 %v1814_v57, %v1746_v45  ;;  %3131 = vmatmul.bf16.gmra.mxu0 %v6545_v33  ;;  %vm2341_vm4 = vcmp.gt.f32.partialorder %v2339_v34, 0.23  ;;  %v3920_v57 = vadd.f32 %v3872_v55, %v3800_v50  ;;  %4294 = vmatpush.bf16.msra.mxu2 %v5658_v5 }
 0x22f   :  { %3200 = vmatmul.bf16.gmra.mxu1 %v6547_v28  ;;  %v2343_v38 = vsel %vm2341_vm4, 0.0, %v2339_v34  ;;  %v5061_v33 = vsel %vm2341_vm4, 1.0, %v5924_v39  ;;  %v3313_v60 = vadd.f32 %v3311_v4, %v3034_v9  ;;  %v5062_v28 = vsel %vm2358_vm2, 1.0, %v5924_v39 }
 0x230   :  { %v2347_v51 = vadd.f32 %v2345_v11, %v1815_v18  ;;  %v2353_v53 = vmul.f32 0.9, %v2343_v38  ;;  %v2557_v14 = vadd.f32 %v5061_v33, %v2509_v26  ;;  %v2511_v34 = vunpack.c.h.bf16 %v2463_v62 }
 0x231   :  { %v3323_v12 = vmul.f32 0.1, %v3313_v60  ;;  %v3331_v6 = vmul.f32 0.8, %v3313_v60  ;;  %v2966_v25 = vpop.f32.mrf.mxu2  ;;  %v3035_v48 = vpop.f32.mrf.mxu3  ;;  %v3967_v11 = vpack.c.bf16 %v3920_v57, %v3919_v47  ;;  %v2558_v52 = vadd.f32 %v5062_v28, %v2510_v19  ;;  %v3848_v60 = vld [vmem:[#allocation6 + $0x8] sm:$0xff] }
 0x232   :  { %v2355_v58 = vmul.f32 0.1, %v2347_v51  ;;  %v2967_v49 = vadd.f32 %v2966_v25, %v6572_v7  ;;  %v2582_v17 = vpack.c.bf16 %v2557_v14, %v2556_v43 }
 0x233   :  { %v1747_v44 = vpop.f32.mrf.mxu0  ;;  %v6631_v23 = vadd.f32 %v3323_v12, %v3321_v1  ;;  %v5599_v0 = vld [vmem:[#allocation6 + $0xa4] sm:$0xf0]  ;;  %v5148_v37 = vld [vmem:[#allocation6 + $0xa8] sm:$0xf0]  ;;  %3991 = vst [vmem:[#allocation8] sm:$0xff] %v3967_v11  ;;  %v3874_v12 = vunpack.c.h.bf16 %v3848_v60 }
 0x234   :  { %v2357_v61 = vadd.f32 %v2355_v58, %v2353_v53  ;;  %v1816_v63 = vpop.f32.mrf.mxu1  ;;  %v3036_v32 = vadd.f32 %v3035_v48, %v2967_v49  ;;  %v6639_v24 = vor.u32 %v5599_v0, %v5146_v27  ;;  %2606 = vst [vmem:[#allocation6 + $0xb0] sm:$0xff] %v2582_v17  ;;  %v6644_v8 = vor.u32 %v5598_v42, %v5148_v37 }
 0x235   :  { %vm3327_vm6 = vcmp.gt.f32.partialorder %v6631_v23, 0.23  ;;  %v3873_v63 = vunpack.c.l.bf16 %v3848_v60 }
 0x236   :  { %vm2359_vm5 = vcmp.gt.f32.partialorder %v2357_v61, 0.23  ;;  %v3329_v45 = vsel %vm3327_vm6, 0.0, %v6631_v23  ;;  %v3333_v59 = vadd.f32 %v3331_v6, %v3036_v32  ;;  %3008 = vmatmul.bf16.gmra.mxu2 %v6639_v24 }
 0x237   :  { %v5063_v20 = vsel %vm2359_vm5, 1.0, %v5924_v39  ;;  %v3345_v35 = vmul.f32 0.9, %v3329_v45  ;;  %3077 = vmatmul.bf16.gmra.mxu3 %v6644_v8 }
 0x238   :  { %v2559_v41 = vadd.f32 %v5063_v20, %v2511_v34  ;;  %v3347_v21 = vmul.f32 0.1, %v3333_v59  ;;  %v3355_v26 = vmul.f32 0.8, %v3333_v59 }
 0x239   :  { %v2969_v33 = vpop.f32.mrf.mxu2  ;;  %v3038_v29 = vpop.f32.mrf.mxu3 }
 0x23a   :  { %v2583_v4 = vpack.c.bf16 %v2559_v41, %v2558_v52  ;;  %v6649_v51 = vadd.f32 %v3347_v21, %v3345_v35  ;;  %v2970_v9 = vadd.f32 %v2969_v33, %v6572_v7  ;;  %v3849_v52 = vld [vmem:[#allocation6 + $0x10] sm:$0xff] }
 0x23b   :  { %v3097_v18 = vpop.f32.mrf.mxu0  ;;  %v5154_v25 = vld [vmem:[#allocation6 + $0xb0] sm:$0xf]  ;;  %v5600_v0 = vld [vmem:[#allocation6 + $0xb4] sm:$0xf] }
 0x23c   :  { %v3098_v16 = vadd.f32 %v3097_v18, %v6636_v31  ;;  %v3166_v22 = vpop.f32.mrf.mxu1  ;;  %2607 = vst [vmem:[#allocation6 + $0xb8] sm:$0xff] %v2583_v4  ;;  %v3039_v58 = vadd.f32 %v3038_v29, %v2970_v9  ;;  %vm3351_vm7 = vcmp.gt.f32.partialorder %v6649_v51, 0.23 }
 0x23d   :  { %v3353_v28 = vsel %vm3351_vm7, 0.0, %v6649_v51 }
 0x23e   :  { %v3167_v38 = vadd.f32 %v3166_v22, %v3098_v16  ;;  %3136 = vmatmul.bf16.gmra.mxu0 %v6578_v36  ;;  %v5288_v36 = vsel %vm3284_vm0, 1.0, %v5924_v39  ;;  %v3357_v1 = vadd.f32 %v3355_v26, %v3039_v58  ;;  %v3365_v6 = vmul.f32 0.9, %v3353_v28 }
 0x23f   :  { %3205 = vmatmul.bf16.gmra.mxu1 %v6580_v30  ;;  %v3921_v55 = vadd.f32 %v5288_v36, %v3873_v63  ;;  %v5290_v22 = vsel %vm3307_vm3, 1.0, %v5924_v39  ;;  %v3875_v58 = vunpack.c.l.bf16 %v3849_v52  ;;  %v3876_v26 = vunpack.c.h.bf16 %v3849_v52 }
 0x240   :  { %v3281_v53 = vmul.f32 0.1, %v3167_v38  ;;  %v3367_v56 = vmul.f32 0.1, %v3357_v1  ;;  %v3289_v13 = vmul.f32 0.8, %v3167_v38 }
 0x241   :  { %v2971_v14 = vpop.f32.mrf.mxu2  ;;  %v3040_v62 = vpop.f32.mrf.mxu3  ;;  %v3375_v37 = vmul.f32 0.8, %v3357_v1  ;;  %v5292_v63 = vsel %vm3327_vm6, 1.0, %v5924_v39 }
 0x242   :  { %vm3285_vm8 = vcmp.gt.f32.partialorder %v3281_v53, 0.23  ;;  %v6665_v46 = vadd.f32 %v3367_v56, %v3365_v6  ;;  %v2972_v15 = vadd.f32 %v2971_v14, %v6572_v7  ;;  %v5336_v56 = vld [vmem:[#allocation8] sm:$0xf] }
 0x243   :  { %v5289_v30 = vsel %vm3285_vm8, 1.0, %v5924_v39  ;;  %v3099_v44 = vpop.f32.mrf.mxu0  ;;  %v3287_v50 = vsel %vm3285_vm8, 0.0, %v3281_v53  ;;  %v5601_v49 = vld [vmem:[#allocation6 + $0xb4] sm:$0xf0]  ;;  %v5156_v27 = vld [vmem:[#allocation6 + $0xb8] sm:$0xf0] }
 0x244   :  { %v3100_v2 = vadd.f32 %v3099_v44, %v6636_v31  ;;  %v3168_v61 = vpop.f32.mrf.mxu1  ;;  %v3922_v20 = vadd.f32 %v5289_v30, %v3874_v12  ;;  %v6668_v48 = vor.u32 %v5601_v49, %v5154_v25  ;;  %vm3371_vm9 = vcmp.gt.f32.partialorder %v6665_v46, 0.23  ;;  %v3850_v12 = vld [vmem:[#allocation6 + $0x18] sm:$0xff] }
 0x245   :  { %v3041_v47 = vadd.f32 %v3040_v62, %v2972_v15  ;;  %v6671_v32 = vor.u32 %v5600_v0, %v5156_v27  ;;  %v3302_v42 = vmul.f32 0.9, %v3287_v50  ;;  %v3373_v19 = vsel %vm3371_vm9, 0.0, %v6665_v46 }
 0x246   :  { %v3169_v43 = vadd.f32 %v3168_v61, %v3100_v2  ;;  %v3968_v5 = vpack.c.bf16 %v3922_v20, %v3921_v55  ;;  %3013 = vmatmul.bf16.gmra.mxu2 %v6668_v48  ;;  %v3389_v18 = vmul.f32 0.9, %v3373_v19  ;;  %v3923_v44 = vadd.f32 %v5290_v22, %v3875_v58  ;;  %v3851_v22 = vld [vmem:[#allocation6 + $0x20] sm:$0xff] }
 0x247   :  { %v3377_v57 = vadd.f32 %v3375_v37, %v3041_v47  ;;  %3082 = vmatmul.bf16.gmra.mxu3 %v6671_v32  ;;  %v3877_v37 = vunpack.c.l.bf16 %v3850_v12  ;;  %v3878_v47 = vunpack.c.h.bf16 %v3850_v12 }
 0x248   :  { %v3291_v17 = vadd.f32 %v3289_v13, %v3169_v43  ;;  %3992 = vst [vmem:[#allocation8 + $0x8] sm:$0xff] %v3968_v5 }
 0x249   :  { %v3391_v11 = vmul.f32 0.1, %v3377_v57  ;;  %v2974_v33 = vpop.f32.mrf.mxu2  ;;  %v3043_v9 = vpop.f32.mrf.mxu3  ;;  %v3399_v30 = vmul.f32 0.8, %v3377_v57 }
 0x24a   :  { %v3304_v3 = vmul.f32 0.1, %v3291_v17  ;;  %v3312_v16 = vmul.f32 0.8, %v3291_v17  ;;  %v2975_v53 = vadd.f32 %v2974_v33, %v6572_v7  ;;  %v5634_v17 = vld [vmem:[#allocation8 + $0x4] sm:$0xf] }
 0x24b   :  { %v3102_v45 = vpop.f32.mrf.mxu0  ;;  %v6684_v38 = vadd.f32 %v3391_v11, %v3389_v18 }
 0x24c   :  { %v3306_v34 = vadd.f32 %v3304_v3, %v3302_v42  ;;  %v3103_v59 = vadd.f32 %v3102_v45, %v6636_v31  ;;  %v3171_v35 = vpop.f32.mrf.mxu1  ;;  %v3044_v28 = vadd.f32 %v3043_v9, %v2975_v53 }
 0x24d   :  { %vm3395_vm11 = vcmp.gt.f32.partialorder %v6684_v38, 0.23 }
 0x24e   :  { %vm3308_vm10 = vcmp.gt.f32.partialorder %v3306_v34, 0.23  ;;  %v3172_v41 = vadd.f32 %v3171_v35, %v3103_v59  ;;  %3141 = vmatmul.bf16.gmra.mxu0 %v6609_v10  ;;  %v3397_v36 = vsel %vm3395_vm11, 0.0, %v6684_v38  ;;  %v3401_v6 = vadd.f32 %v3399_v30, %v3044_v28 }
 0x24f   :  { %v3310_v21 = vsel %vm3308_vm10, 0.0, %v3306_v34  ;;  %v5291_v4 = vsel %vm3308_vm10, 1.0, %v5924_v39  ;;  %3210 = vmatmul.bf16.gmra.mxu1 %v6611_v54  ;;  %v5635_v25 = vld [vmem:[#allocation8 + $0x4] sm:$0xf0]  ;;  %v3409_v62 = vmul.f32 0.9, %v3397_v36  ;;  %v3925_v35 = vadd.f32 %v5292_v63, %v3877_v37 }
 0x250   :  { %v3314_v29 = vadd.f32 %v3312_v16, %v3172_v41  ;;  %v3322_v10 = vmul.f32 0.9, %v3310_v21  ;;  %v3924_v54 = vadd.f32 %v5291_v4, %v3876_v26  ;;  %v3411_v49 = vmul.f32 0.1, %v3401_v6  ;;  %v5338_v0 = vld [vmem:[#allocation8 + $0x8] sm:$0xf0] }
 0x251   :  { %v2976_v27 = vpop.f32.mrf.mxu2  ;;  %v3045_v55 = vpop.f32.mrf.mxu3  ;;  %v5337_v5 = vor.u32 %v5635_v25, %v5336_v56  ;;  %v3419_v45 = vmul.f32 0.8, %v3401_v6  ;;  %v5341_v59 = vor.u32 %v5634_v17, %v5338_v0  ;;  %v5294_v16 = vsel %vm3351_vm7, 1.0, %v5924_v39 }
 0x252   :  { %v3324_v60 = vmul.f32 0.1, %v3314_v29  ;;  %v3969_v13 = vpack.c.bf16 %v3924_v54, %v3923_v44  ;;  %v3332_v14 = vmul.f32 0.8, %v3314_v29  ;;  %v2977_v23 = vadd.f32 %v2976_v27, %v6572_v7 }
 0x253   :  { %v3104_v40 = vpop.f32.mrf.mxu0  ;;  %v6698_v42 = vadd.f32 %v3411_v49, %v3409_v62  ;;  %v3879_v28 = vunpack.c.l.bf16 %v3851_v22  ;;  %v3880_v36 = vunpack.c.h.bf16 %v3851_v22  ;;  %v5296_v25 = vsel %vm3371_vm9, 1.0, %v5924_v39 }
 0x254   :  { %v3326_v1 = vadd.f32 %v3324_v60, %v3322_v10  ;;  %v3105_v2 = vadd.f32 %v3104_v40, %v6636_v31  ;;  %v3173_v61 = vpop.f32.mrf.mxu1  ;;  %3993 = vst [vmem:[#allocation8 + $0x10] sm:$0xff] %v3969_v13  ;;  %v3046_v34 = vadd.f32 %v3045_v55, %v2977_v23 }
 0x255   :  { %vm3415_vm13 = vcmp.gt.f32.partialorder %v6698_v42, 0.23  ;;  %v3927_v63 = vadd.f32 %v5294_v16, %v3879_v28 }
 0x256   :  { %vm3328_vm12 = vcmp.gt.f32.partialorder %v3326_v1, 0.23  ;;  %v3174_v43 = vadd.f32 %v3173_v61, %v3105_v2  ;;  %v3417_v52 = vsel %vm3415_vm13, 0.0, %v6698_v42  ;;  %4295 = vmatmul.bf16.vlgmr.msra.gmra.mxu2 %v5337_v5  ;;  %v3421_v4 = vadd.f32 %v3419_v45, %v3046_v34 }
 0x257   :  { %v3330_v50 = vsel %vm3328_vm12, 0.0, %v3326_v1  ;;  %v5293_v15 = vsel %vm3328_vm12, 1.0, %v5924_v39  ;;  %4364 = vmatmul.bf16.vlgmr.msra.gmra.mxu3 %v5341_v59  ;;  %v3433_v9 = vmul.f32 0.9, %v3417_v52 }
 0x258   :  { %v3334_v20 = vadd.f32 %v3332_v14, %v3174_v43  ;;  %v3346_v3 = vmul.f32 0.9, %v3330_v50  ;;  %v3926_v18 = vadd.f32 %v5293_v15, %v3878_v47  ;;  %v3435_v10 = vmul.f32 0.1, %v3421_v4 }
 0x259   :  { %v2979_v51 = vpop.f32.mrf.mxu2  ;;  %v3048_v60 = vpop.f32.mrf.mxu3  ;;  %v3443_v61 = vmul.f32 0.8, %v3421_v4 }
 0x25a   :  { %v3348_v19 = vmul.f32 0.1, %v3334_v20  ;;  %v3970_v33 = vpack.c.bf16 %v3926_v18, %v3925_v35  ;;  %v3356_v29 = vmul.f32 0.8, %v3334_v20  ;;  %v2980_v40 = vadd.f32 %v2979_v51, %v6572_v7 }
 0x25b   :  { %v3107_v57 = vpop.f32.mrf.mxu0  ;;  %v6712_v44 = vadd.f32 %v3435_v10, %v3433_v9  ;;  %v5344_v49 = vld [vmem:[#allocation8 + $0x10] sm:$0xf] }
 0x25c   :  { %v3350_v11 = vadd.f32 %v3348_v19, %v3346_v3  ;;  %v3176_v41 = vpop.f32.mrf.mxu1  ;;  %v3108_v21 = vadd.f32 %v3107_v57, %v6636_v31  ;;  %3994 = vst [vmem:[#allocation8 + $0x18] sm:$0xff] %v3970_v33  ;;  %v3049_v1 = vadd.f32 %v3048_v60, %v2980_v40  ;;  %v5636_v57 = vld [vmem:[#allocation8 + $0x14] sm:$0xf]  ;;  %v5298_v33 = vsel %vm3395_vm11, 1.0, %v5924_v39 }
 0x25d   :  { %vm3439_vm15 = vcmp.gt.f32.partialorder %v6712_v44, 0.23 }
 0x25e   :  { %vm3352_vm14 = vcmp.gt.f32.partialorder %v3350_v11, 0.23  ;;  %3146 = vmatmul.bf16.gmra.mxu0 %v6639_v24  ;;  %v3177_v26 = vadd.f32 %v3176_v41, %v3108_v21  ;;  %v3441_v13 = vsel %vm3439_vm15, 0.0, %v6712_v44  ;;  %v3445_v14 = vadd.f32 %v3443_v61, %v3049_v1 }
 0x25f   :  { %v3354_v53 = vsel %vm3352_vm14, 0.0, %v3350_v11  ;;  %v5295_v58 = vsel %vm3352_vm14, 1.0, %v5924_v39  ;;  %3215 = vmatmul.bf16.gmra.mxu1 %v6644_v8  ;;  %v3852_v8 = vld [vmem:[#allocation6 + $0x28] sm:$0xff]  ;;  %v3453_v55 = vmul.f32 0.9, %v3441_v13 }
 0x260   :  { %v3358_v30 = vadd.f32 %v3356_v29, %v3177_v26  ;;  %v3366_v54 = vmul.f32 0.9, %v3354_v53  ;;  %v3928_v12 = vadd.f32 %v5295_v58, %v3880_v36  ;;  %v3881_v27 = vunpack.c.l.bf16 %v3852_v8  ;;  %v3853_v53 = vld [vmem:[#allocation6 + $0x30] sm:$0xff] }
 0x261   :  { %v3455_v20 = vmul.f32 0.1, %v3445_v14  ;;  %v2981_v23 = vpop.f32.mrf.mxu2  ;;  %v3050_v17 = vpop.f32.mrf.mxu3  ;;  %v3882_v46 = vunpack.c.h.bf16 %v3852_v8  ;;  %v3463_v52 = vmul.f32 0.8, %v3445_v14 }
 0x262   :  { %v3368_v24 = vmul.f32 0.1, %v3358_v30  ;;  %v3971_v50 = vpack.c.bf16 %v3928_v12, %v3927_v63  ;;  %v3376_v62 = vmul.f32 0.8, %v3358_v30  ;;  %v2982_v5 = vadd.f32 %v2981_v23, %v6572_v7 }
 0x263   :  { %v3109_v2 = vpop.f32.mrf.mxu0  ;;  %v5637_v3 = vld [vmem:[#allocation8 + $0x14] sm:$0xf0]  ;;  %v6724_v19 = vadd.f32 %v3455_v20, %v3453_v55  ;;  %v5346_v34 = vld [vmem:[#allocation8 + $0x18] sm:$0xf0]  ;;  %v3929_v9 = vadd.f32 %v5296_v25, %v3881_v27  ;;  %v5300_v25 = vsel %vm3415_vm13, 1.0, %v5924_v39 }
 0x264   :  { %v3110_v6 = vadd.f32 %v3109_v2, %v6636_v31  ;;  %v3178_v56 = vpop.f32.mrf.mxu1  ;;  %v3370_v43 = vadd.f32 %v3368_v24, %v3366_v54  ;;  %3995 = vst [vmem:[#allocation8 + $0x20] sm:$0xff] %v3971_v50  ;;  %v5345_v45 = vor.u32 %v5637_v3, %v5344_v49  ;;  %v3051_v18 = vadd.f32 %v3050_v17, %v2982_v5  ;;  %v3854_v49 = vld [vmem:[#allocation6 + $0x38] sm:$0xff] }
 0x265   :  { %v5349_v11 = vor.u32 %v5636_v57, %v5346_v34  ;;  %vm3459_vm1 = vcmp.gt.f32.partialorder %v6724_v19, 0.23  ;;  %v3883_v24 = vunpack.c.l.bf16 %v3853_v53  ;;  %v3884_v2 = vunpack.c.h.bf16 %v3853_v53 }
 0x266   :  { %v3179_v15 = vadd.f32 %v3178_v56, %v3110_v6  ;;  %vm3372_vm0 = vcmp.gt.f32.partialorder %v3370_v43, 0.23  ;;  %v3461_v22 = vsel %vm3459_vm1, 0.0, %v6724_v19  ;;  %4300 = vmatmul.bf16.gmra.mxu2 %v5345_v45  ;;  %v3465_v58 = vadd.f32 %v3463_v52, %v3051_v18 }
 0x267   :  { %v3374_v0 = vsel %vm3372_vm0, 0.0, %v3370_v43  ;;  %v5297_v37 = vsel %vm3372_vm0, 1.0, %v5924_v39  ;;  %4369 = vmatmul.bf16.gmra.mxu3 %v5349_v11  ;;  %v3477_v26 = vmul.f32 0.9, %v3461_v22  ;;  %v3931_v56 = vadd.f32 %v5298_v33, %v3883_v24 }
 0x268   :  { %v3378_v47 = vadd.f32 %v3376_v62, %v3179_v15  ;;  %v3390_v59 = vmul.f32 0.9, %v3374_v0  ;;  %v3930_v29 = vadd.f32 %v5297_v37, %v3882_v46  ;;  %v3479_v36 = vmul.f32 0.1, %v3465_v58 }
 0x269   :  { %v2984_v38 = vpop.f32.mrf.mxu2  ;;  %v3053_v30 = vpop.f32.mrf.mxu3  ;;  %v3487_v6 = vmul.f32 0.8, %v3465_v58  ;;  %v3885_v45 = vunpack.c.l.bf16 %v3854_v49  ;;  %v3886_v57 = vunpack.c.h.bf16 %v3854_v49  ;;  %v5302_v58 = vsel %vm3439_vm15, 1.0, %v5924_v39 }
 0x26a   :  { %v3392_v35 = vmul.f32 0.1, %v3378_v47  ;;  %v3400_v51 = vmul.f32 0.8, %v3378_v47  ;;  %v3972_v60 = vpack.c.bf16 %v3930_v29, %v3929_v9  ;;  %v2985_v1 = vadd.f32 %v2984_v38, %v6572_v7 }
 0x26b   :  { %v3112_v41 = vpop.f32.mrf.mxu0  ;;  %v6738_v61 = vadd.f32 %v3479_v36, %v3477_v26  ;;  %v5352_v3 = vld [vmem:[#allocation8 + $0x20] sm:$0xf]  ;;  %v5638_v52 = vld [vmem:[#allocation8 + $0x24] sm:$0xf] }
 0x26c   :  { %v3394_v16 = vadd.f32 %v3392_v35, %v3390_v59  ;;  %v3113_v21 = vadd.f32 %v3112_v41, %v6636_v31  ;;  %v3181_v4 = vpop.f32.mrf.mxu1  ;;  %3996 = vst [vmem:[#allocation8 + $0x28] sm:$0xff] %v3972_v60  ;;  %v3054_v8 = vadd.f32 %v3053_v30, %v2985_v1  ;;  %v3855_v26 = vld [vmem:[#allocation6 + $0x40] sm:$0xff] }
 0x26d   :  { %vm3483_vm3 = vcmp.gt.f32.partialorder %v6738_v61, 0.23 }
 0x26e   :  { %vm3396_vm2 = vcmp.gt.f32.partialorder %v3394_v16, 0.23  ;;  %v3182_v10 = vadd.f32 %v3181_v4, %v3113_v21  ;;  %3151 = vmatmul.bf16.gmra.mxu0 %v6668_v48  ;;  %v3485_v50 = vsel %vm3483_vm3, 0.0, %v6738_v61  ;;  %v3489_v15 = vadd.f32 %v3487_v6, %v3054_v8 }
 0x26f   :  { %v3398_v40 = vsel %vm3396_vm2, 0.0, %v3394_v16  ;;  %v5299_v28 = vsel %vm3396_vm2, 1.0, %v5924_v39  ;;  %3220 = vmatmul.bf16.gmra.mxu1 %v6671_v32  ;;  %v3497_v17 = vmul.f32 0.9, %v3485_v50  ;;  %v3933_v4 = vadd.f32 %v5300_v25, %v3885_v45  ;;  %v3856_v25 = vld [vmem:[#allocation6 + $0x48] sm:$0xff] }
 0x270   :  { %v3402_v54 = vadd.f32 %v3400_v51, %v3182_v10  ;;  %v3410_v63 = vmul.f32 0.9, %v3398_v40  ;;  %v3932_v13 = vadd.f32 %v5299_v28, %v3884_v2  ;;  %v3499_v0 = vmul.f32 0.1, %v3489_v15 }
 0x271   :  { %v2986_v37 = vpop.f32.mrf.mxu2  ;;  %v3055_v47 = vpop.f32.mrf.mxu3  ;;  %v3507_v41 = vmul.f32 0.8, %v3489_v15  ;;  %v3887_v2 = vunpack.c.l.bf16 %v3855_v26  ;;  %v3890_v19 = vunpack.c.h.bf16 %v3856_v25 }
 0x272   :  { %v3412_v12 = vmul.f32 0.1, %v3402_v54  ;;  %v3973_v62 = vpack.c.bf16 %v3932_v13, %v3931_v56  ;;  %v3420_v55 = vmul.f32 0.8, %v3402_v54  ;;  %v2987_v5 = vadd.f32 %v2986_v37, %v6572_v7 }
 0x273   :  { %v3114_v48 = vpop.f32.mrf.mxu0  ;;  %v5639_v46 = vld [vmem:[#allocation8 + $0x24] sm:$0xf0]  ;;  %v6750_v34 = vadd.f32 %v3499_v0, %v3497_v17  ;;  %v5354_v35 = vld [vmem:[#allocation8 + $0x28] sm:$0xf0]  ;;  %v3889_v37 = vunpack.c.l.bf16 %v3856_v25 }
 0x274   :  { %v3414_v32 = vadd.f32 %v3412_v12, %v3410_v63  ;;  %v3115_v43 = vadd.f32 %v3114_v48, %v6636_v31  ;;  %v3183_v14 = vpop.f32.mrf.mxu1  ;;  %3997 = vst [vmem:[#allocation8 + $0x30] sm:$0xff] %v3973_v62  ;;  %v5353_v59 = vor.u32 %v5639_v46, %v5352_v3  ;;  %v3056_v22 = vadd.f32 %v3055_v47, %v2987_v5 }
 0x275   :  { %vm3503_vm5 = vcmp.gt.f32.partialorder %v6750_v34, 0.23  ;;  %v5357_v21 = vor.u32 %v5638_v52, %v5354_v35  ;;  %v3888_v63 = vunpack.c.h.bf16 %v3855_v26 }
 0x276   :  { %vm3416_vm4 = vcmp.gt.f32.partialorder %v3414_v32, 0.23  ;;  %v3184_v27 = vadd.f32 %v3183_v14, %v3115_v43  ;;  %v3505_v29 = vsel %vm3503_vm5, 0.0, %v6750_v34  ;;  %4305 = vmatmul.bf16.gmra.mxu2 %v5353_v59  ;;  %v3509_v51 = vadd.f32 %v3507_v41, %v3056_v22 }
 0x277   :  { %v3418_v20 = vsel %vm3416_vm4, 0.0, %v3414_v32  ;;  %v5301_v23 = vsel %vm3416_vm4, 1.0, %v5924_v39  ;;  %4374 = vmatmul.bf16.gmra.mxu3 %v5357_v21  ;;  %v3521_v40 = vmul.f32 0.9, %v3505_v29  ;;  %v3935_v43 = vadd.f32 %v5302_v58, %v3887_v2 }
 0x278   :  { %v3422_v42 = vadd.f32 %v3420_v55, %v3184_v27  ;;  %v3434_v18 = vmul.f32 0.9, %v3418_v20  ;;  %v3934_v33 = vadd.f32 %v5301_v23, %v3886_v57  ;;  %v3523_v54 = vmul.f32 0.1, %v3509_v51 }
 0x279   :  { %v2989_v1 = vpop.f32.mrf.mxu2  ;;  %v3058_v44 = vpop.f32.mrf.mxu3  ;;  %v3531_v32 = vmul.f32 0.8, %v3509_v51  ;;  %v5304_v55 = vsel %vm3459_vm1, 1.0, %v5924_v39 }
 0x27a   :  { %v3436_v11 = vmul.f32 0.1, %v3422_v42  ;;  %v3974_v60 = vpack.c.bf16 %v3934_v33, %v3933_v4  ;;  %v3444_v28 = vmul.f32 0.8, %v3422_v42  ;;  %v2990_v24 = vadd.f32 %v2989_v1, %v6572_v7 }
 0x27b   :  { %v3117_v16 = vpop.f32.mrf.mxu0  ;;  %v6762_v48 = vadd.f32 %v3523_v54, %v3521_v40  ;;  %v5360_v0 = vld [vmem:[#allocation8 + $0x30] sm:$0xf]  ;;  %v5640_v52 = vld [vmem:[#allocation8 + $0x34] sm:$0xf]  ;;  %v3937_v51 = vadd.f32 %v5304_v55, %v3889_v37  ;;  %v5308_v55 = vsel %vm3503_vm5, 1.0, %v5924_v39 }
 0x27c   :  { %v3438_v9 = vadd.f32 %v3436_v11, %v3434_v18  ;;  %v3186_v53 = vpop.f32.mrf.mxu1  ;;  %v3118_v10 = vadd.f32 %v3117_v16, %v6636_v31  ;;  %3998 = vst [vmem:[#allocation8 + $0x38] sm:$0xff] %v3974_v60  ;;  %v3059_v6 = vadd.f32 %v3058_v44, %v2990_v24  ;;  %v3857_v40 = vld [vmem:[#allocation6 + $0x50] sm:$0xff] }
 0x27d   :  { %vm3527_vm7 = vcmp.gt.f32.partialorder %v6762_v48, 0.23 }
 0x27e   :  { %vm3440_vm6 = vcmp.gt.f32.partialorder %v3438_v9, 0.23  ;;  %v3187_v30 = vadd.f32 %v3186_v53, %v3118_v10  ;;  %v3529_v62 = vsel %vm3527_vm7, 0.0, %v6762_v48  ;;  %v3533_v27 = vadd.f32 %v3531_v32, %v3059_v6 }
 0x27f   :  { %v3442_v36 = vsel %vm3440_vm6, 0.0, %v3438_v9  ;;  %v5303_v38 = vsel %vm3440_vm6, 1.0, %v5924_v39  ;;  %v3541_v47 = vmul.f32 0.9, %v3529_v62  ;;  %v5306_v10 = vsel %vm3483_vm3, 1.0, %v5924_v39 }
 0x280   :  { %v3446_v12 = vadd.f32 %v3444_v28, %v3187_v30  ;;  %v3454_v8 = vmul.f32 0.9, %v3442_v36  ;;  %v3936_v14 = vadd.f32 %v5303_v38, %v3888_v63  ;;  %v3543_v42 = vmul.f32 0.1, %v3533_v27 }
 0x281   :  { %v2991_v5 = vpop.f32.mrf.mxu2  ;;  %v3060_v59 = vpop.f32.mrf.mxu3  ;;  %v3551_v33 = vmul.f32 0.8, %v3533_v27  ;;  %v3892_v6 = vunpack.c.h.bf16 %v3857_v40 }
 0x282   :  { %v3456_v56 = vmul.f32 0.1, %v3446_v12  ;;  %v3975_v20 = vpack.c.bf16 %v3936_v14, %v3935_v43  ;;  %v3464_v17 = vmul.f32 0.8, %v3446_v12  ;;  %v2992_v57 = vadd.f32 %v2991_v5, %v6572_v7 }
 0x283   :  { %v3119_v13 = vpop.f32.mrf.mxu0  ;;  %v5641_v35 = vld [vmem:[#allocation8 + $0x34] sm:$0xf0]  ;;  %v6774_v18 = vadd.f32 %v3543_v42, %v3541_v47  ;;  %v5362_v41 = vld [vmem:[#allocation8 + $0x38] sm:$0xf0] }
 0x284   :  { %v3120_v50 = vadd.f32 %v3119_v13, %v6636_v31  ;;  %v3188_v15 = vpop.f32.mrf.mxu1  ;;  %v3458_v49 = vadd.f32 %v3456_v56, %v3454_v8  ;;  %3999 = vst [vmem:[#allocation8 + $0x40] sm:$0xff] %v3975_v20  ;;  %v5361_v11 = vor.u32 %v5641_v35, %v5360_v0  ;;  %v3061_v21 = vadd.f32 %v3060_v59, %v2992_v57  ;;  %v3858_v0 = vld [vmem:[#allocation6 + $0x58] sm:$0xff] }
 0x285   :  { %v5365_v4 = vor.u32 %v5640_v52, %v5362_v41  ;;  %vm3547_vm9 = vcmp.gt.f32.partialorder %v6774_v18, 0.23  ;;  %v3891_v8 = vunpack.c.l.bf16 %v3857_v40  ;;  %v3894_v52 = vunpack.c.h.bf16 %v3858_v0 }
 0x286   :  { %v3189_v23 = vadd.f32 %v3188_v15, %v3120_v50  ;;  %vm3460_vm8 = vcmp.gt.f32.partialorder %v3458_v49, 0.23  ;;  %v3549_v53 = vsel %vm3547_vm9, 0.0, %v6774_v18  ;;  %4310 = vmatmul.bf16.gmra.mxu2 %v5361_v11  ;;  %v3553_v28 = vadd.f32 %v3551_v33, %v3061_v21 }
 0x287   :  { %v3462_v3 = vsel %vm3460_vm8, 0.0, %v3458_v49  ;;  %v5305_v46 = vsel %vm3460_vm8, 1.0, %v5924_v39  ;;  %4379 = vmatmul.bf16.gmra.mxu3 %v5365_v4  ;;  %v3565_v36 = vmul.f32 0.9, %v3549_v53  ;;  %v3939_v50 = vadd.f32 %v5306_v10, %v3891_v8 }
 0x288   :  { %v3466_v45 = vadd.f32 %v3464_v17, %v3189_v23  ;;  %v3478_v16 = vmul.f32 0.9, %v3462_v3  ;;  %v3938_v60 = vadd.f32 %v5305_v46, %v3890_v19  ;;  %v3567_v44 = vmul.f32 0.1, %v3553_v28 }
 0x289   :  { %v2994_v2 = vpop.f32.mrf.mxu2  ;;  %v3063_v61 = vpop.f32.mrf.mxu3  ;;  %v3575_v25 = vmul.f32 0.8, %v3553_v28  ;;  %v3893_v11 = vunpack.c.l.bf16 %v3858_v0  ;;  %v5310_v28 = vsel %vm3527_vm7, 1.0, %v5924_v39 }
 0x28a   :  { %v3480_v22 = vmul.f32 0.1, %v3466_v45  ;;  %v3488_v30 = vmul.f32 0.8, %v3466_v45  ;;  %v3976_v54 = vpack.c.bf16 %v3938_v60, %v3937_v51  ;;  %v2995_v12 = vadd.f32 %v2994_v2, %v6572_v7 }
 0x28b   :  { %v3122_v9 = vpop.f32.mrf.mxu0  ;;  %v6786_v56 = vadd.f32 %v3567_v44, %v3565_v36  ;;  %v5368_v35 = vld [vmem:[#allocation8 + $0x40] sm:$0xf]  ;;  %v5642_v33 = vld [vmem:[#allocation8 + $0x44] sm:$0xf] }
 0x28c   :  { %v3482_v29 = vadd.f32 %v3480_v22, %v3478_v16  ;;  %v3123_v58 = vadd.f32 %v3122_v9, %v6636_v31  ;;  %v3191_v26 = vpop.f32.mrf.mxu1  ;;  %4000 = vst [vmem:[#allocation8 + $0x48] sm:$0xff] %v3976_v54  ;;  %v3064_v14 = vadd.f32 %v3063_v61, %v2995_v12  ;;  %v3859_v36 = vld [vmem:[#allocation6 + $0x60] sm:$0xff] }
 0x28d   :  { %vm3571_vm11 = vcmp.gt.f32.partialorder %v6786_v56, 0.23 }
 0x28e   :  { %vm3484_vm10 = vcmp.gt.f32.partialorder %v3482_v29, 0.23  ;;  %v3192_v38 = vadd.f32 %v3191_v26, %v3123_v58  ;;  %v3573_v20 = vsel %vm3571_vm11, 0.0, %v6786_v56  ;;  %v3577_v23 = vadd.f32 %v3575_v25, %v3064_v14 }
 0x28f   :  { %v3486_v1 = vsel %vm3484_vm10, 0.0, %v3482_v29  ;;  %v5307_v24 = vsel %vm3484_vm10, 1.0, %v5924_v39  ;;  %v3585_v3 = vmul.f32 0.9, %v3573_v20  ;;  %v3941_v26 = vadd.f32 %v5308_v55, %v3893_v11  ;;  %v3860_v55 = vld [vmem:[#allocation6 + $0x68] sm:$0xff] }
 0x290   :  { %v3490_v63 = vadd.f32 %v3488_v30, %v3192_v38  ;;  %v3498_v13 = vmul.f32 0.9, %v3486_v1  ;;  %v3940_v15 = vadd.f32 %v5307_v24, %v3892_v6  ;;  %v3587_v46 = vmul.f32 0.1, %v3577_v23 }
 0x291   :  { %v2996_v45 = vpop.f32.mrf.mxu2  ;;  %v3065_v59 = vpop.f32.mrf.mxu3  ;;  %v3595_v9 = vmul.f32 0.8, %v3577_v23  ;;  %v3895_v6 = vunpack.c.l.bf16 %v3859_v36  ;;  %v3898_v18 = vunpack.c.h.bf16 %v3860_v55 }
 0x292   :  { %v3500_v32 = vmul.f32 0.1, %v3490_v63  ;;  %v3977_v17 = vpack.c.bf16 %v3940_v15, %v3939_v50  ;;  %v3508_v47 = vmul.f32 0.8, %v3490_v63  ;;  %v2997_v34 = vadd.f32 %v2996_v45, %v6572_v7 }
 0x293   :  { %v3124_v43 = vpop.f32.mrf.mxu0  ;;  %v5643_v19 = vld [vmem:[#allocation8 + $0x44] sm:$0xf0]  ;;  %v6798_v41 = vadd.f32 %v3587_v46, %v3585_v3  ;;  %v5370_v22 = vld [vmem:[#allocation8 + $0x48] sm:$0xf0]  ;;  %v3897_v45 = vunpack.c.l.bf16 %v3860_v55 }
 0x294   :  { %v3502_v62 = vadd.f32 %v3500_v32, %v3498_v13  ;;  %v3125_v49 = vadd.f32 %v3124_v43, %v6636_v31  ;;  %v3193_v27 = vpop.f32.mrf.mxu1  ;;  %4001 = vst [vmem:[#allocation8 + $0x50] sm:$0xff] %v3977_v17  ;;  %v5369_v16 = vor.u32 %v5643_v19, %v5368_v35  ;;  %v3066_v53 = vadd.f32 %v3065_v59, %v2997_v34 }
 0x295   :  { %vm3591_vm13 = vcmp.gt.f32.partialorder %v6798_v41, 0.23  ;;  %v5373_v58 = vor.u32 %v5642_v33, %v5370_v22  ;;  %v3896_v13 = vunpack.c.h.bf16 %v3859_v36 }
 0x296   :  { %vm3504_vm12 = vcmp.gt.f32.partialorder %v3502_v62, 0.23  ;;  %v3194_v37 = vadd.f32 %v3193_v27, %v3125_v49  ;;  %v3593_v60 = vsel %vm3591_vm13, 0.0, %v6798_v41  ;;  %4315 = vmatmul.bf16.gmra.mxu2 %v5369_v16  ;;  %v3597_v30 = vadd.f32 %v3595_v9, %v3066_v53 }
 0x297   :  { %v3506_v42 = vsel %vm3504_vm12, 0.0, %v3502_v62  ;;  %v5309_v5 = vsel %vm3504_vm12, 1.0, %v5924_v39  ;;  %4384 = vmatmul.bf16.gmra.mxu3 %v5373_v58  ;;  %v3609_v1 = vmul.f32 0.9, %v3593_v60  ;;  %v3943_v49 = vadd.f32 %v5310_v28, %v3895_v6 }
 0x298   :  { %v3510_v57 = vadd.f32 %v3508_v47, %v3194_v37  ;;  %v3522_v21 = vmul.f32 0.9, %v3506_v42  ;;  %v3942_v10 = vadd.f32 %v5309_v5, %v3894_v52  ;;  %v3611_v12 = vmul.f32 0.1, %v3597_v30 }
 0x299   :  { %v2999_v61 = vpop.f32.mrf.mxu2  ;;  %v3068_v48 = vpop.f32.mrf.mxu3  ;;  %v3619_v62 = vmul.f32 0.8, %v3597_v30  ;;  %v5312_v47 = vsel %vm3547_vm9, 1.0, %v5924_v39 }
 0x29a   :  { %v3524_v4 = vmul.f32 0.1, %v3510_v57  ;;  %v3978_v54 = vpack.c.bf16 %v3942_v10, %v3941_v26  ;;  %v3532_v24 = vmul.f32 0.8, %v3510_v57  ;;  %v3000_v8 = vadd.f32 %v2999_v61, %v6572_v7 }
 0x29b   :  { %v3127_v29 = vpop.f32.mrf.mxu0  ;;  %v6810_v43 = vadd.f32 %v3611_v12, %v3609_v1  ;;  %v5376_v46 = vld [vmem:[#allocation8 + $0x50] sm:$0xf]  ;;  %v5644_v33 = vld [vmem:[#allocation8 + $0x54] sm:$0xf]  ;;  %v3945_v30 = vadd.f32 %v5312_v47, %v3897_v45 }
 0x29c   :  { %v3526_v51 = vadd.f32 %v3524_v4, %v3522_v21  ;;  %v3196_v40 = vpop.f32.mrf.mxu1  ;;  %v3128_v38 = vadd.f32 %v3127_v29, %v6636_v31  ;;  %4002 = vst [vmem:[#allocation8 + $0x58] sm:$0xff] %v3978_v54  ;;  %v3069_v25 = vadd.f32 %v3068_v48, %v3000_v8  ;;  %v3861_v1 = vld [vmem:[#allocation6 + $0x70] sm:$0xff] }
 0x29d   :  { %vm3615_vm15 = vcmp.gt.f32.partialorder %v6810_v43, 0.23 }
 0x29e   :  { %vm3528_vm14 = vcmp.gt.f32.partialorder %v3526_v51, 0.23  ;;  %v3197_v63 = vadd.f32 %v3196_v40, %v3128_v38  ;;  %v3617_v17 = vsel %vm3615_vm15, 0.0, %v6810_v43  ;;  %v3621_v37 = vadd.f32 %v3619_v62, %v3069_v25 }
 0x29f   :  { %v3530_v44 = vsel %vm3528_vm14, 0.0, %v3526_v51  ;;  %v5311_v2 = vsel %vm3528_vm14, 1.0, %v5924_v39  ;;  %v3629_v57 = vmul.f32 0.9, %v3617_v17  ;;  %v5314_v38 = vsel %vm3571_vm11, 1.0, %v5924_v39 }
 0x2a0   :  { %v3534_v32 = vadd.f32 %v3532_v24, %v3197_v63  ;;  %v3542_v14 = vmul.f32 0.9, %v3530_v44  ;;  %v3944_v27 = vadd.f32 %v5311_v2, %v3896_v13  ;;  %v3631_v34 = vmul.f32 0.1, %v3621_v37 }
 0x2a1   :  { %v3001_v59 = vpop.f32.mrf.mxu2  ;;  %v3070_v16 = vpop.f32.mrf.mxu3  ;;  %v3639_v10 = vmul.f32 0.8, %v3621_v37  ;;  %v3900_v25 = vunpack.c.h.bf16 %v3861_v1 }
 0x2a2   :  { %v3544_v50 = vmul.f32 0.1, %v3534_v32  ;;  %v3979_v42 = vpack.c.bf16 %v3944_v27, %v3943_v49  ;;  %v3552_v3 = vmul.f32 0.8, %v3534_v32  ;;  %v3002_v52 = vadd.f32 %v3001_v59, %v6572_v7 }
 0x2a3   :  { %v3129_v15 = vpop.f32.mrf.mxu0  ;;  %v5645_v22 = vld [vmem:[#allocation8 + $0x54] sm:$0xf0]  ;;  %v6822_v21 = vadd.f32 %v3631_v34, %v3629_v57  ;;  %v5378_v9 = vld [vmem:[#allocation8 + $0x58] sm:$0xf0]  ;;  %v5316_v57 = vsel %vm3591_vm13, 1.0, %v5924_v39 }
 0x2a4   :  { %v3130_v20 = vadd.f32 %v3129_v15, %v6636_v31  ;;  %v3198_v23 = vpop.f32.mrf.mxu1  ;;  %v3546_v0 = vadd.f32 %v3544_v50, %v3542_v14  ;;  %4003 = vst [vmem:[#allocation8 + $0x60] sm:$0xff] %v3979_v42  ;;  %v5377_v4 = vor.u32 %v5645_v22, %v5376_v46  ;;  %v3071_v58 = vadd.f32 %v3070_v16, %v3002_v52 }
 0x2a5   :  { %v5381_v26 = vor.u32 %v5644_v33, %v5378_v9  ;;  %vm3635_vm1 = vcmp.gt.f32.partialorder %v6822_v21, 0.23  ;;  %v3899_v14 = vunpack.c.l.bf16 %v3861_v1 }
 0x2a6   :  { %v3199_v5 = vadd.f32 %v3198_v23, %v3130_v20  ;;  %vm3548_vm0 = vcmp.gt.f32.partialorder %v3546_v0, 0.23  ;;  %v3637_v40 = vsel %vm3635_vm1, 0.0, %v6822_v21  ;;  %4320 = vmatmul.bf16.gmra.mxu2 %v5377_v4  ;;  %v3641_v24 = vadd.f32 %v3639_v10, %v3071_v58 }
 0x2a7   :  { %v3550_v35 = vsel %vm3548_vm0, 0.0, %v3546_v0  ;;  %v5313_v19 = vsel %vm3548_vm0, 1.0, %v5924_v39  ;;  %4389 = vmatmul.bf16.gmra.mxu3 %v5381_v26  ;;  %v3653_v44 = vmul.f32 0.9, %v3637_v40  ;;  %v3947_v20 = vadd.f32 %v5314_v38, %v3899_v14 }
 0x2a8   :  { %v3554_v11 = vadd.f32 %v3552_v3, %v3199_v5  ;;  %v3566_v29 = vmul.f32 0.9, %v3550_v35  ;;  %v3946_v54 = vadd.f32 %v5313_v19, %v3898_v18  ;;  %v3655_v48 = vmul.f32 0.1, %v3641_v24  ;;  %v3862_v3 = vld [vmem:[#allocation6 + $0x78] sm:$0xff] }
 0x2a9   :  { %v3004_v6 = vpop.f32.mrf.mxu2  ;;  %v3663_v55 = vmul.f32 0.8, %v3641_v24  ;;  %v3901_v4 = vunpack.c.l.bf16 %v3862_v3  ;;  %v3902_v33 = vunpack.c.h.bf16 %v3862_v3  ;;  %v5318_v24 = vsel %vm3615_vm15, 1.0, %v5924_v39 }
 0x2aa   :  { %v3568_v53 = vmul.f32 0.1, %v3554_v11  ;;  %v3576_v63 = vmul.f32 0.8, %v3554_v11  ;;  %v3980_v12 = vpack.c.bf16 %v3946_v54, %v3945_v30  ;;  %v3005_v32 = vadd.f32 %v3004_v6, %v6572_v7  ;;  %v3073_v56 = vpop.f32.mrf.mxu3 }
 0x2ab   :  { %v3132_v51 = vpop.f32.mrf.mxu0  ;;  %v6834_v50 = vadd.f32 %v3655_v48, %v3653_v44  ;;  %v5384_v22 = vld [vmem:[#allocation8 + $0x60] sm:$0xf]  ;;  %v5646_v26 = vld [vmem:[#allocation8 + $0x64] sm:$0xf] }
 0x2ac   :  { %v3570_v60 = vadd.f32 %v3568_v53, %v3566_v29  ;;  %v3133_v28 = vadd.f32 %v3132_v51, %v6636_v31  ;;  %v3201_v36 = vpop.f32.mrf.mxu1  ;;  %4004 = vst [vmem:[#allocation8 + $0x68] sm:$0xff] %v3980_v12  ;;  %v3074_v27 = vadd.f32 %v3073_v56, %v3005_v32 }
 0x2ad   :  { %vm3659_vm3 = vcmp.gt.f32.partialorder %v6834_v50, 0.23 }
 0x2ae   :  { %vm3572_vm2 = vcmp.gt.f32.partialorder %v3570_v60, 0.23  ;;  %v3202_v2 = vadd.f32 %v3201_v36, %v3133_v28  ;;  %v3665_v42 = vadd.f32 %v3663_v55, %v3074_v27  ;;  %v3661_v45 = vsel %vm3659_vm3, 0.0, %v6834_v50 }
 0x2af   :  { %v3574_v61 = vsel %vm3572_vm2, 0.0, %v3570_v60  ;;  %v5315_v8 = vsel %vm3572_vm2, 1.0, %v5924_v39  ;;  %v3673_v9 = vmul.f32 0.9, %v3661_v45  ;;  %v3949_v28 = vadd.f32 %v5316_v57, %v3901_v4 }
 0x2b0   :  { %v3578_v13 = vadd.f32 %v3576_v63, %v3202_v2  ;;  %v3586_v15 = vmul.f32 0.9, %v3574_v61  ;;  %v3948_v23 = vadd.f32 %v5315_v8, %v3900_v25  ;;  %v3675_v35 = vmul.f32 0.1, %v3665_v42  ;;  %v3863_v2 = vld [vmem:[#allocation6 + $0x80] sm:$0xff] }
 0x2b1   :  { %v3006_v19 = vpop.f32.mrf.mxu2  ;;  %v3683_v54 = vmul.f32 0.8, %v3665_v42  ;;  %v3903_v32 = vunpack.c.l.bf16 %v3863_v2  ;;  %v3904_v14 = vunpack.c.h.bf16 %v3863_v2  ;;  %v3864_v42 = vld [vmem:[#allocation6 + $0x88] sm:$0xff] }
 0x2b2   :  { %v3588_v62 = vmul.f32 0.1, %v3578_v13  ;;  %v3596_v47 = vmul.f32 0.8, %v3578_v13  ;;  %v3981_v5 = vpack.c.bf16 %v3948_v23, %v3947_v20  ;;  %v3007_v52 = vadd.f32 %v3006_v19, %v6572_v7  ;;  %v3075_v16 = vpop.f32.mrf.mxu3 }
 0x2b3   :  { %v3134_v49 = vpop.f32.mrf.mxu0  ;;  %v5647_v18 = vld [vmem:[#allocation8 + $0x64] sm:$0xf0]  ;;  %v5386_v53 = vld [vmem:[#allocation8 + $0x68] sm:$0xf0]  ;;  %v6846_v10 = vadd.f32 %v3675_v35, %v3673_v9  ;;  %v3951_v55 = vadd.f32 %v5318_v24, %v3903_v32 }
 0x2b4   :  { %v3590_v17 = vadd.f32 %v3588_v62, %v3586_v15  ;;  %v3135_v0 = vadd.f32 %v3134_v49, %v6636_v31  ;;  %v3203_v37 = vpop.f32.mrf.mxu1  ;;  %4005 = vst [vmem:[#allocation8 + $0x70] sm:$0xff] %v3981_v5  ;;  %v5385_v29 = vor.u32 %v5647_v18, %v5384_v22  ;;  %v3076_v60 = vadd.f32 %v3075_v16, %v3007_v52 }
 0x2b5   :  { %v5389_v40 = vor.u32 %v5646_v26, %v5386_v53  ;;  %vm3679_vm6 = vcmp.gt.f32.partialorder %v6846_v10, 0.23  ;;  %v3905_v22 = vunpack.c.l.bf16 %v3864_v42 }
 0x2b6   :  { %vm3592_vm4 = vcmp.gt.f32.partialorder %v3590_v17, 0.23  ;;  %v3204_v46 = vadd.f32 %v3203_v37, %v3135_v0  ;;  %4325 = vmatmul.bf16.gmra.mxu2 %v5385_v29  ;;  %v3685_v8 = vadd.f32 %v3683_v54, %v3076_v60  ;;  %v3681_v43 = vsel %vm3679_vm6, 0.0, %v6846_v10 }
 0x2b7   :  { %v3594_v34 = vsel %vm3592_vm4, 0.0, %v3590_v17  ;;  %v5317_v59 = vsel %vm3592_vm4, 1.0, %v5924_v39  ;;  %4394 = vmatmul.bf16.gmra.mxu3 %v5389_v40  ;;  %v3697_v0 = vmul.f32 0.9, %v3681_v43  ;;  %v3906_v29 = vunpack.c.h.bf16 %v3864_v42 }
 0x2b8   :  { %v3598_v11 = vadd.f32 %v3596_v47, %v3204_v46  ;;  %v3610_v58 = vmul.f32 0.9, %v3594_v34  ;;  %v3950_v36 = vadd.f32 %v5317_v59, %v3902_v33  ;;  %v3699_v62 = vmul.f32 0.1, %v3685_v8 }
 0x2b9   :  { %v3009_v48 = vpop.f32.mrf.mxu2  ;;  %v5320_v59 = vsel %vm3635_vm1, 1.0, %v5924_v39  ;;  %v3707_v18 = vmul.f32 0.8, %v3685_v8 }
 0x2ba   :  { %v3612_v41 = vmul.f32 0.1, %v3598_v11  ;;  %v3982_v44 = vpack.c.bf16 %v3950_v36, %v3949_v28  ;;  %v3620_v63 = vmul.f32 0.8, %v3598_v11  ;;  %v3078_v13 = vpop.f32.mrf.mxu3  ;;  %v3010_v27 = vadd.f32 %v3009_v48, %v6572_v7 }
 0x2bb   :  { %v3137_v51 = vpop.f32.mrf.mxu0  ;;  %v6859_v46 = vadd.f32 %v3699_v62, %v3697_v0  ;;  %v5392_v34 = vld [vmem:[#allocation8 + $0x70] sm:$0xf]  ;;  %v5648_v33 = vld [vmem:[#allocation8 + $0x74] sm:$0xf]  ;;  %v5322_v28 = vsel %vm3659_vm3, 1.0, %v5924_v39  ;;  %v3953_v36 = vadd.f32 %v5320_v59, %v3905_v22  ;;  %v3866_v0 = vld [vmem:[#allocation6 + $0x98] sm:$0xff] }
 0x2bc   :  { %v3614_v38 = vadd.f32 %v3612_v41, %v3610_v58  ;;  %v3206_v30 = vpop.f32.mrf.mxu1  ;;  %v3138_v1 = vadd.f32 %v3137_v51, %v6636_v31  ;;  %4006 = vst [vmem:[#allocation8 + $0x78] sm:$0xff] %v3982_v44  ;;  %v3079_v45 = vadd.f32 %v3078_v13, %v3010_v27  ;;  %v3909_v10 = vunpack.c.l.bf16 %v3866_v0 }
 0x2bd   :  { %vm3703_vm8 = vcmp.gt.f32.partialorder %v6859_v46, 0.23 }
 0x2be   :  { %vm3616_vm5 = vcmp.gt.f32.partialorder %v3614_v38, 0.23  ;;  %v3207_v61 = vadd.f32 %v3206_v30, %v3138_v1  ;;  %v3709_v21 = vadd.f32 %v3707_v18, %v3079_v45  ;;  %v3865_v30 = vld [vmem:[#allocation6 + $0x90] sm:$0xff]  ;;  %v3705_v54 = vsel %vm3703_vm8, 0.0, %v6859_v46 }
 0x2bf   :  { %v5319_v12 = vsel %vm3616_vm5, 1.0, %v5924_v39  ;;  %v3618_v6 = vsel %vm3616_vm5, 0.0, %v3614_v38  ;;  %v3907_v48 = vunpack.c.l.bf16 %v3865_v30  ;;  %v3717_v13 = vmul.f32 0.9, %v3705_v54 }
 0x2c0   :  { %v3622_v56 = vadd.f32 %v3620_v63, %v3207_v61  ;;  %v3630_v25 = vmul.f32 0.9, %v3618_v6  ;;  %v3952_v20 = vadd.f32 %v5319_v12, %v3904_v14  ;;  %v3719_v12 = vmul.f32 0.1, %v3709_v21 }
 0x2c1   :  { %v3011_v57 = vpop.f32.mrf.mxu2  ;;  %v3908_v6 = vunpack.c.h.bf16 %v3865_v30  ;;  %v3727_v42 = vmul.f32 0.8, %v3709_v21 }
 0x2c2   :  { %v3632_v15 = vmul.f32 0.1, %v3622_v56  ;;  %v3983_v47 = vpack.c.bf16 %v3952_v20, %v3951_v55  ;;  %v3640_v3 = vmul.f32 0.8, %v3622_v56  ;;  %v3080_v52 = vpop.f32.mrf.mxu3  ;;  %v3012_v32 = vadd.f32 %v3011_v57, %v6572_v7 }
 0x2c3   :  { %v3139_v49 = vpop.f32.mrf.mxu0  ;;  %v5649_v16 = vld [vmem:[#allocation8 + $0x74] sm:$0xf0]  ;;  %v5394_v9 = vld [vmem:[#allocation8 + $0x78] sm:$0xf0]  ;;  %v6877_v43 = vadd.f32 %v3719_v12, %v3717_v13  ;;  %v5324_v20 = vsel %vm3679_vm6, 1.0, %v5924_v39 }
 0x2c4   :  { %v3140_v23 = vadd.f32 %v3139_v49, %v6636_v31  ;;  %v3208_v17 = vpop.f32.mrf.mxu1  ;;  %v3634_v37 = vadd.f32 %v3632_v15, %v3630_v25  ;;  %4007 = vst [vmem:[#allocation8 + $0x80] sm:$0xff] %v3983_v47  ;;  %v5393_v4 = vor.u32 %v5649_v16, %v5392_v34  ;;  %v5397_v41 = vor.u32 %v5648_v33, %v5394_v9 }
 0x2c5   :  { %v3955_v15 = vadd.f32 %v5322_v28, %v3907_v48  ;;  %vm3723_vm11 = vcmp.gt.f32.partialorder %v6877_v43, 0.23 }
 0x2c6   :  { %v3209_v5 = vadd.f32 %v3208_v17, %v3140_v23  ;;  %vm3636_vm7 = vcmp.gt.f32.partialorder %v3634_v37, 0.23  ;;  %4330 = vmatmul.bf16.gmra.mxu2 %v5393_v4  ;;  %v3081_v23 = vadd.f32 %v3080_v52, %v3012_v32  ;;  %v3725_v33 = vsel %vm3723_vm11, 0.0, %v6877_v43 }
 0x2c7   :  { %v3638_v35 = vsel %vm3636_vm7, 0.0, %v3634_v37  ;;  %v5321_v19 = vsel %vm3636_vm7, 1.0, %v5924_v39  ;;  %4399 = vmatmul.bf16.gmra.mxu3 %v5397_v41 }
 0x2c8   :  { %v3642_v11 = vadd.f32 %v3640_v3, %v3209_v5  ;;  %v3654_v53 = vmul.f32 0.9, %v3638_v35  ;;  %v3954_v38 = vadd.f32 %v5321_v19, %v3906_v29  ;;  %v3910_v19 = vunpack.c.h.bf16 %v3866_v0 }
 0x2c9   :  { %v3014_v61 = vpop.f32.mrf.mxu2 }
 0x2ca   :  { %v3656_v58 = vmul.f32 0.1, %v3642_v11  ;;  %v3664_v24 = vmul.f32 0.8, %v3642_v11  ;;  %v3984_v44 = vpack.c.bf16 %v3954_v38, %v3953_v36  ;;  %v6874_v50 = vpop.f32.mrf.mxu3  ;;  %v3729_v11 = vadd.f32 %v3727_v42, %v3081_v23  ;;  %v3867_v38 = vld [vmem:[#allocation6 + $0xa0] sm:$0xff] }
 0x2cb   :  { %v3142_v26 = vpop.f32.mrf.mxu0  ;;  %v5400_v59 = vld [vmem:[#allocation8 + $0x80] sm:$0xf]  ;;  %v5650_v4 = vld [vmem:[#allocation8 + $0x84] sm:$0xf]  ;;  %v3015_v30 = vadd.f32 %v3014_v61, %v6572_v7  ;;  %v3911_v48 = vunpack.c.l.bf16 %v3867_v38  ;;  %v3912_v46 = vunpack.c.h.bf16 %v3867_v38 }
 0x2cc   :  { %v3658_v51 = vadd.f32 %v3656_v58, %v3654_v53  ;;  %v3143_v60 = vadd.f32 %v3142_v26, %v6636_v31  ;;  %v3211_v40 = vpop.f32.mrf.mxu1  ;;  %4008 = vst [vmem:[#allocation8 + $0x88] sm:$0xff] %v3984_v44  ;;  %v3957_v53 = vadd.f32 %v5324_v20, %v3909_v10  ;;  %v3743_v26 = vmul.f32 0.1, %v3729_v11 }
 0x2ce   :  { %vm3660_vm9 = vcmp.gt.f32.partialorder %v3658_v51, 0.23  ;;  %v3212_v1 = vadd.f32 %v3211_v40, %v3143_v60  ;;  %v5326_v60 = vsel %vm3703_vm8, 1.0, %v5924_v39  ;;  %v3741_v40 = vmul.f32 0.9, %v3725_v33 }
 0x2cf   :  { %v3662_v2 = vsel %vm3660_vm9, 0.0, %v3658_v51  ;;  %v5323_v63 = vsel %vm3660_vm9, 1.0, %v5924_v39 }
 0x2d0   :  { %v3666_v8 = vadd.f32 %v3664_v24, %v3212_v1  ;;  %v3674_v56 = vmul.f32 0.9, %v3662_v2  ;;  %v3956_v62 = vadd.f32 %v5323_v63, %v3908_v6  ;;  %v3745_v63 = vadd.f32 %v3743_v26, %v3741_v40 }
 0x2d1   :  { %v3016_v45 = vpop.f32.mrf.mxu2  ;;  %v3084_v6 = vadd.f32 %v6874_v50, %v3015_v30 }
 0x2d2   :  { %v3676_v14 = vmul.f32 0.1, %v3666_v8  ;;  %v3985_v17 = vpack.c.bf16 %v3956_v62, %v3955_v15  ;;  %v3684_v47 = vmul.f32 0.8, %v3666_v8  ;;  %v3085_v34 = vpop.f32.mrf.mxu3  ;;  %v5328_v15 = vsel %vm3723_vm11, 1.0, %v5924_v39 }
 0x2d3   :  { %v3144_v25 = vpop.f32.mrf.mxu0  ;;  %v5651_v35 = vld [vmem:[#allocation8 + $0x84] sm:$0xf0]  ;;  %v5402_v16 = vld [vmem:[#allocation8 + $0x88] sm:$0xf0]  ;;  %vm3747_vm13 = vcmp.gt.f32.partialorder %v3745_v63, 0.23 }
 0x2d4   :  { %v3678_v49 = vadd.f32 %v3676_v14, %v3674_v56  ;;  %v3145_v27 = vadd.f32 %v3144_v25, %v6636_v31  ;;  %v3213_v55 = vpop.f32.mrf.mxu1  ;;  %4009 = vst [vmem:[#allocation8 + $0x90] sm:$0xff] %v3985_v17  ;;  %v5401_v52 = vor.u32 %v5651_v35, %v5400_v59  ;;  %v5405_v29 = vor.u32 %v5650_v4, %v5402_v16 }
 0x2d5   :  { %v3959_v14 = vadd.f32 %v5326_v60, %v3911_v48  ;;  %v3751_v62 = vmul.f32 0.8, %v3729_v11  ;;  %v5330_v33 = vsel %vm3747_vm13, 1.0, %v5924_v39 }
 0x2d6   :  { %vm3680_vm10 = vcmp.gt.f32.partialorder %v3678_v49, 0.23  ;;  %v3214_v37 = vadd.f32 %v3213_v55, %v3145_v27  ;;  %4335 = vmatmul.bf16.gmra.mxu2 %v5401_v52  ;;  %v3868_v27 = vld [vmem:[#allocation6 + $0xa8] sm:$0xff] }
 0x2d7   :  { %v3682_v5 = vsel %vm3680_vm10, 0.0, %v3678_v49  ;;  %v5325_v3 = vsel %vm3680_vm10, 1.0, %v5924_v39  ;;  %4404 = vmatmul.bf16.gmra.mxu3 %v5405_v29  ;;  %v3753_v0 = vadd.f32 %v3751_v62, %v3084_v6  ;;  %v3914_v11 = vunpack.c.h.bf16 %v3868_v27  ;;  %v3870_v62 = vld [vmem:[#allocation6 + $0xb8] sm:$0xff] }
 0x2d8   :  { %v3686_v57 = vadd.f32 %v3684_v47, %v3214_v37  ;;  %v3698_v22 = vmul.f32 0.9, %v3682_v5  ;;  %v3958_v58 = vadd.f32 %v5325_v3, %v3910_v19  ;;  %v3913_v19 = vunpack.c.l.bf16 %v3868_v27 }
 0x2d9   :  { %v4296_v24 = vpop.f32.mrf.mxu2 }
 0x2da   :  { %v3700_v18 = vmul.f32 0.1, %v3686_v57  ;;  %v3986_v28 = vpack.c.bf16 %v3958_v58, %v3957_v53  ;;  %v3708_v1 = vmul.f32 0.8, %v3686_v57  ;;  %v4365_v2 = vpop.f32.mrf.mxu3 }
 0x2db   :  { %v3147_v9 = vpop.f32.mrf.mxu0  ;;  %v4366_v8 = vadd.f32 %v4365_v2, %v4296_v24  ;;  %v5408_v17 = vld [vmem:[#allocation8 + $0x90] sm:$0xf]  ;;  %v5652_v34 = vld [vmem:[#allocation8 + $0x94] sm:$0xf] }
 0x2dc   :  { %v3702_v41 = vadd.f32 %v3700_v18, %v3698_v22  ;;  %v3216_v21 = vpop.f32.mrf.mxu1  ;;  %v3148_v51 = vadd.f32 %v3147_v9, %v6636_v31  ;;  %4010 = vst [vmem:[#allocation8 + $0x98] sm:$0xff] %v3986_v28  ;;  %v3749_v22 = vsel %vm3747_vm13, 0.0, %v3745_v63  ;;  %v3761_v9 = vmul.f32 0.1, %v3753_v0 }
 0x2dd   :  { %v4451_v50 = vmul.f32 0.1, %v4366_v8  ;;  %v4453_v59 = vmul.f32 0.8, %v4366_v8  ;;  %v3759_v40 = vmul.f32 0.9, %v3749_v22 }
 0x2de   :  { %vm3704_vm12 = vcmp.gt.f32.partialorder %v3702_v41, 0.23  ;;  %v3217_v54 = vadd.f32 %v3216_v21, %v3148_v51  ;;  %v3869_v51 = vld [vmem:[#allocation6 + $0xb0] sm:$0xff] }
 0x2df   :  { %v5327_v36 = vsel %vm3704_vm12, 1.0, %v5924_v39  ;;  %v3706_v44 = vsel %vm3704_vm12, 0.0, %v3702_v41  ;;  %v3961_v41 = vadd.f32 %v5328_v15, %v3913_v19  ;;  %v4456_v26 = vmul.f32 0.9, %v4451_v50 }
 0x2e0   :  { %v3710_v12 = vadd.f32 %v3708_v1, %v3217_v54  ;;  %v3718_v13 = vmul.f32 0.9, %v3706_v44  ;;  %v3960_v25 = vadd.f32 %v5327_v36, %v3912_v46  ;;  %v3763_v44 = vadd.f32 %v3761_v9, %v3759_v40 }
 0x2e1   :  { %v4298_v37 = vpop.f32.mrf.mxu2  ;;  %v3915_v63 = vunpack.c.l.bf16 %v3869_v51 }
 0x2e2   :  { %v3720_v32 = vmul.f32 0.1, %v3710_v12  ;;  %v3987_v55 = vpack.c.bf16 %v3960_v25, %v3959_v14  ;;  %v3728_v23 = vmul.f32 0.8, %v3710_v12  ;;  %v4367_v45 = vpop.f32.mrf.mxu3  ;;  %v3916_v12 = vunpack.c.h.bf16 %v3869_v51 }
 0x2e3   :  { %v3149_v56 = vpop.f32.mrf.mxu0  ;;  %v5653_v47 = vld [vmem:[#allocation8 + $0x94] sm:$0xf0]  ;;  %v5410_v42 = vld [vmem:[#allocation8 + $0x98] sm:$0xf0]  ;;  %v4368_v35 = vadd.f32 %v4367_v45, %v4298_v37  ;;  %vm3765_vm0 = vcmp.gt.f32.partialorder %v3763_v44, 0.23  ;;  %v3963_v14 = vadd.f32 %v5330_v33, %v3915_v63  ;;  %v3917_v45 = vunpack.c.l.bf16 %v3870_v62 }
 0x2e4   :  { %v3150_v7 = vadd.f32 %v3149_v56, %v6636_v31  ;;  %v3218_v61 = vpop.f32.mrf.mxu1  ;;  %v3722_v49 = vadd.f32 %v3720_v32, %v3718_v13  ;;  %4011 = vst [vmem:[#allocation8 + $0xa0] sm:$0xff] %v3987_v55  ;;  %v5409_v57 = vor.u32 %v5653_v47, %v5408_v17  ;;  %v5413_v10 = vor.u32 %v5652_v34, %v5410_v42 }
 0x2e5   :  { %v4455_v4 = vadd.f32 %v4453_v59, %v4368_v35  ;;  %v5332_v27 = vsel %vm3765_vm0, 1.0, %v5924_v39 }
 0x2e6   :  { %v3219_v20 = vadd.f32 %v3218_v61, %v3150_v7  ;;  %vm3724_vm14 = vcmp.gt.f32.partialorder %v3722_v49, 0.23  ;;  %4340 = vmatmul.bf16.gmra.mxu2 %v5409_v57  ;;  %v3918_v57 = vunpack.c.h.bf16 %v3870_v62  ;;  %v3965_v59 = vadd.f32 %v5332_v27, %v3917_v45 }
 0x2e7   :  { %v3726_v5 = vsel %vm3724_vm14, 0.0, %v3722_v49  ;;  %v5329_v3 = vsel %vm3724_vm14, 1.0, %v5924_v39  ;;  %v4457_v60 = vmul.f32 0.1, %v4455_v4  ;;  %4409 = vmatmul.bf16.gmra.mxu3 %v5413_v10  ;;  %v4459_v48 = vmul.f32 0.8, %v4455_v4 }
 0x2e8   :  { %v3730_v43 = vadd.f32 %v3728_v23, %v3219_v20  ;;  %v3742_v52 = vmul.f32 0.9, %v3726_v5  ;;  %v3962_v21 = vadd.f32 %v5329_v3, %v3914_v11 }
 0x2e9   :  { %v4458_v1 = vadd.f32 %v4457_v60, %v4456_v26  ;;  %v4301_v24 = vpop.f32.mrf.mxu2 }
 0x2ea   :  { %v3744_v16 = vmul.f32 0.1, %v3730_v43  ;;  %v3752_v36 = vmul.f32 0.8, %v3730_v43  ;;  %v3988_v38 = vpack.c.bf16 %v3962_v21, %v3961_v41  ;;  %v4370_v2 = vpop.f32.mrf.mxu3 }
 0x2eb   :  { %v3152_v18 = vpop.f32.mrf.mxu0  ;;  %v4371_v8 = vadd.f32 %v4370_v2, %v4301_v24  ;;  %v4462_v61 = vmul.f32 0.9, %v4458_v1  ;;  %v5416_v50 = vld [vmem:[#allocation8 + $0xa0] sm:$0xf]  ;;  %v5654_v17 = vld [vmem:[#allocation8 + $0xa4] sm:$0xf] }
 0x2ec   :  { %v3746_v29 = vadd.f32 %v3744_v16, %v3742_v52  ;;  %v3153_v53 = vadd.f32 %v3152_v18, %v6636_v31  ;;  %v3221_v58 = vpop.f32.mrf.mxu1  ;;  %4012 = vst [vmem:[#allocation8 + $0xa8] sm:$0xff] %v3988_v38 }
 0x2ed   :  { %v4461_v32 = vadd.f32 %v4459_v48, %v4371_v8 }
 0x2ee   :  { %v3222_v28 = vadd.f32 %v3221_v58, %v3153_v53  ;;  %vm3748_vm15 = vcmp.gt.f32.partialorder %v3746_v29, 0.23 }
 0x2ef   :  { %v3750_v30 = vsel %vm3748_vm15, 0.0, %v3746_v29  ;;  %v5331_v54 = vsel %vm3748_vm15, 1.0, %v5924_v39  ;;  %v4463_v15 = vmul.f32 0.1, %v4461_v32  ;;  %v4465_v5 = vmul.f32 0.8, %v4461_v32 }
 0x2f0   :  { %v3754_v31 = vadd.f32 %v3752_v36, %v3222_v28  ;;  %v3760_v46 = vmul.f32 0.9, %v3750_v30  ;;  %v3964_v25 = vadd.f32 %v5331_v54, %v3916_v12 }
 0x2f1   :  { %v4464_v20 = vadd.f32 %v4463_v15, %v4462_v61  ;;  %v4303_v23 = vpop.f32.mrf.mxu2 }
 0x2f2   :  { %v3762_v6 = vmul.f32 0.1, %v3754_v31  ;;  %v3989_v49 = vpack.c.bf16 %v3964_v25, %v3963_v14  ;;  %v4372_v0 = vpop.f32.mrf.mxu3 }
 0x2f3   :  { %v3154_v13 = vpop.f32.mrf.mxu0  ;;  %v5655_v37 = vld [vmem:[#allocation8 + $0xa4] sm:$0xf0]  ;;  %v5418_v47 = vld [vmem:[#allocation8 + $0xa8] sm:$0xf0]  ;;  %v4373_v42 = vadd.f32 %v4372_v0, %v4303_v23  ;;  %v4468_v10 = vmul.f32 0.9, %v4464_v20 }
 0x2f4   :  { %v3764_v56 = vadd.f32 %v3762_v6, %v3760_v46  ;;  %v3223_v7 = vpop.f32.mrf.mxu1  ;;  %4013 = vst [vmem:[#allocation8 + $0xb0] sm:$0xff] %v3989_v49  ;;  %v5417_v3 = vor.u32 %v5655_v37, %v5416_v50  ;;  %v5421_v43 = vor.u32 %v5654_v17, %v5418_v47 }
 0x2f5   :  { %v4467_v34 = vadd.f32 %v4465_v5, %v4373_v42 }
 0x2f6   :  { %vm3766_vm1 = vcmp.gt.f32.partialorder %v3764_v56, 0.23  ;;  %4345 = vmatmul.bf16.gmra.mxu2 %v5417_v3 }
 0x2f7   :  { %v5333_v55 = vsel %vm3766_vm1, 1.0, %v5924_v39  ;;  %v4469_v39 = vmul.f32 0.1, %v4467_v34  ;;  %4414 = vmatmul.bf16.gmra.mxu3 %v5421_v43  ;;  %v4471_v18 = vmul.f32 0.8, %v4467_v34 }
 0x2f8   :  { %v3966_v35 = vadd.f32 %v5333_v55, %v3918_v57 }
 0x2f9   :  { %v4470_v11 = vadd.f32 %v4469_v39, %v4468_v10  ;;  %v4306_v52 = vpop.f32.mrf.mxu2 }
 0x2fa   :  { %v3990_v19 = vpack.c.bf16 %v3966_v35, %v3965_v59  ;;  %v4375_v16 = vpop.f32.mrf.mxu3 }
 0x2fb   :  { %v4376_v22 = vadd.f32 %v4375_v16, %v4306_v52  ;;  %v4474_v33 = vmul.f32 0.9, %v4470_v11  ;;  %v5424_v58 = vld [vmem:[#allocation8 + $0xb0] sm:$0xf]  ;;  %v5656_v60 = vld [vmem:[#allocation8 + $0xb4] sm:$0xf] }
 0x2fc   :  { %4014 = vst [vmem:[#allocation8 + $0xb8] sm:$0xff] %v3990_v19 }
 0x2fd   :  { %v4473_v4 = vadd.f32 %v4471_v18, %v4376_v22 }
 0x2ff   :  { %v4475_v9 = vmul.f32 0.1, %v4473_v4  ;;  %v4477_v28 = vmul.f32 0.8, %v4473_v4 }
 0x301   :  { %v4476_v29 = vadd.f32 %v4475_v9, %v4474_v33  ;;  %v4308_v53 = vpop.f32.mrf.mxu2 }
 0x302   :  { %v4377_v26 = vpop.f32.mrf.mxu3 }
 0x303   :  { %v5657_v41 = vld [vmem:[#allocation8 + $0xb4] sm:$0xf0]  ;;  %v5426_v21 = vld [vmem:[#allocation8 + $0xb8] sm:$0xf0]  ;;  %v4378_v40 = vadd.f32 %v4377_v26, %v4308_v53  ;;  %v4480_v30 = vmul.f32 0.9, %v4476_v29 }
 0x304   :  { %v5425_v51 = vor.u32 %v5657_v41, %v5424_v58  ;;  %v5429_v36 = vor.u32 %v5656_v60, %v5426_v21 }
 0x305   :  { %v4479_v38 = vadd.f32 %v4477_v28, %v4378_v40 }
 0x306   :  { %4350 = vmatmul.bf16.gmra.mxu2 %v5425_v51 }
 0x307   :  { %v4481_v54 = vmul.f32 0.1, %v4479_v38  ;;  %4419 = vmatmul.bf16.gmra.mxu3 %v5429_v36  ;;  %v4483_v2 = vmul.f32 0.8, %v4479_v38 }
 0x309   :  { %v4482_v1 = vadd.f32 %v4481_v54, %v4480_v30  ;;  %v4311_v24 = vpop.f32.mrf.mxu2 }
 0x30a   :  { %v4380_v44 = vpop.f32.mrf.mxu3 }
 0x30b   :  { %v4381_v31 = vadd.f32 %v4380_v44, %v4311_v24  ;;  %v4486_v12 = vmul.f32 0.9, %v4482_v1 }
 0x30d   :  { %v4485_v63 = vadd.f32 %v4483_v2, %v4381_v31 }
 0x30f   :  { %v4487_v8 = vmul.f32 0.1, %v4485_v63  ;;  %v4489_v32 = vmul.f32 0.8, %v4485_v63 }
 0x311   :  { %v4488_v48 = vadd.f32 %v4487_v8, %v4486_v12  ;;  %v4313_v46 = vpop.f32.mrf.mxu2 }
 0x312   :  { %v4382_v6 = vpop.f32.mrf.mxu3 }
 0x313   :  { %v4383_v13 = vadd.f32 %v4382_v6, %v4313_v46  ;;  %v4492_v14 = vmul.f32 0.9, %v4488_v48 }
 0x315   :  { %v4491_v56 = vadd.f32 %v4489_v32, %v4383_v13 }
 0x317   :  { %v4493_v25 = vmul.f32 0.1, %v4491_v56  ;;  %v4495_v49 = vmul.f32 0.8, %v4491_v56 }
 0x319   :  { %v4494_v7 = vadd.f32 %v4493_v25, %v4492_v14  ;;  %v4316_v61 = vpop.f32.mrf.mxu2 }
 0x31a   :  { %v4385_v15 = vpop.f32.mrf.mxu3 }
 0x31b   :  { %v4386_v62 = vadd.f32 %v4385_v15, %v4316_v61  ;;  %v4498_v55 = vmul.f32 0.9, %v4494_v7 }
 0x31d   :  { %v4497_v27 = vadd.f32 %v4495_v49, %v4386_v62 }
 0x31f   :  { %v4499_v20 = vmul.f32 0.1, %v4497_v27  ;;  %v4501_v37 = vmul.f32 0.8, %v4497_v27 }
 0x321   :  { %v4500_v23 = vadd.f32 %v4499_v20, %v4498_v55  ;;  %v4318_v50 = vpop.f32.mrf.mxu2 }
 0x322   :  { %v4387_v17 = vpop.f32.mrf.mxu3 }
 0x323   :  { %v4388_v0 = vadd.f32 %v4387_v17, %v4318_v50  ;;  %v4504_v42 = vmul.f32 0.9, %v4500_v23 }
 0x325   :  { %v4503_v47 = vadd.f32 %v4501_v37, %v4388_v0 }
 0x327   :  { %v4505_v5 = vmul.f32 0.1, %v4503_v47  ;;  %v4507_v34 = vmul.f32 0.8, %v4503_v47 }
 0x329   :  { %v4506_v3 = vadd.f32 %v4505_v5, %v4504_v42  ;;  %v4321_v43 = vpop.f32.mrf.mxu2 }
 0x32a   :  { %v4390_v45 = vpop.f32.mrf.mxu3 }
 0x32b   :  { %v4391_v57 = vadd.f32 %v4390_v45, %v4321_v43  ;;  %v4510_v35 = vmul.f32 0.9, %v4506_v3 }
 0x32d   :  { %v4509_v59 = vadd.f32 %v4507_v34, %v4391_v57 }
 0x32f   :  { %v4511_v10 = vmul.f32 0.1, %v4509_v59  ;;  %v4513_v16 = vmul.f32 0.8, %v4509_v59 }
 0x331   :  { %v4512_v39 = vadd.f32 %v4511_v10, %v4510_v35  ;;  %v4323_v19 = vpop.f32.mrf.mxu2 }
 0x332   :  { %v4392_v11 = vpop.f32.mrf.mxu3 }
 0x333   :  { %v4393_v52 = vadd.f32 %v4392_v11, %v4323_v19  ;;  %v4516_v18 = vmul.f32 0.9, %v4512_v39 }
 0x335   :  { %v4515_v22 = vadd.f32 %v4513_v16, %v4393_v52 }
 0x337   :  { %v4517_v4 = vmul.f32 0.1, %v4515_v22  ;;  %v4519_v58 = vmul.f32 0.8, %v4515_v22 }
 0x339   :  { %v4518_v33 = vadd.f32 %v4517_v4, %v4516_v18  ;;  %v4326_v9 = vpop.f32.mrf.mxu2 }
 0x33a   :  { %v4395_v29 = vpop.f32.mrf.mxu3 }
 0x33b   :  { %v4396_v53 = vadd.f32 %v4395_v29, %v4326_v9  ;;  %v4522_v21 = vmul.f32 0.9, %v4518_v33 }
 0x33d   :  { %v4521_v41 = vadd.f32 %v4519_v58, %v4396_v53 }
 0x33f   :  { %v4523_v26 = vmul.f32 0.1, %v4521_v41  ;;  %v4525_v36 = vmul.f32 0.8, %v4521_v41 }
 0x341   :  { %v4524_v51 = vadd.f32 %v4523_v26, %v4522_v21  ;;  %v4328_v60 = vpop.f32.mrf.mxu2 }
 0x342   :  { %v4397_v40 = vpop.f32.mrf.mxu3 }
 0x343   :  { %v4398_v28 = vadd.f32 %v4397_v40, %v4328_v60  ;;  %v4528_v30 = vmul.f32 0.9, %v4524_v51 }
 0x345   :  { %v4527_v38 = vadd.f32 %v4525_v36, %v4398_v28 }
 0x347   :  { %v4529_v54 = vmul.f32 0.1, %v4527_v38  ;;  %v4531_v2 = vmul.f32 0.8, %v4527_v38 }
 0x349   :  { %v4530_v1 = vadd.f32 %v4529_v54, %v4528_v30  ;;  %v4331_v24 = vpop.f32.mrf.mxu2 }
 0x34a   :  { %v4400_v44 = vpop.f32.mrf.mxu3 }
 0x34b   :  { %v4401_v31 = vadd.f32 %v4400_v44, %v4331_v24  ;;  %v4534_v12 = vmul.f32 0.9, %v4530_v1 }
 0x34d   :  { %v4533_v63 = vadd.f32 %v4531_v2, %v4401_v31 }
 0x34f   :  { %v4535_v8 = vmul.f32 0.1, %v4533_v63  ;;  %v4537_v32 = vmul.f32 0.8, %v4533_v63 }
 0x351   :  { %v4536_v48 = vadd.f32 %v4535_v8, %v4534_v12  ;;  %v4333_v46 = vpop.f32.mrf.mxu2 }
 0x352   :  { %v4402_v6 = vpop.f32.mrf.mxu3 }
 0x353   :  { %v4403_v13 = vadd.f32 %v4402_v6, %v4333_v46  ;;  %v4540_v14 = vmul.f32 0.9, %v4536_v48 }
 0x355   :  { %v4539_v56 = vadd.f32 %v4537_v32, %v4403_v13 }
 0x357   :  { %v4541_v25 = vmul.f32 0.1, %v4539_v56  ;;  %v4543_v49 = vmul.f32 0.8, %v4539_v56 }
 0x359   :  { %v4542_v7 = vadd.f32 %v4541_v25, %v4540_v14  ;;  %v4336_v61 = vpop.f32.mrf.mxu2 }
 0x35a   :  { %v4405_v15 = vpop.f32.mrf.mxu3 }
 0x35b   :  { %v4406_v62 = vadd.f32 %v4405_v15, %v4336_v61  ;;  %v4546_v55 = vmul.f32 0.9, %v4542_v7 }
 0x35d   :  { %v4545_v27 = vadd.f32 %v4543_v49, %v4406_v62 }
 0x35f   :  { %v4547_v20 = vmul.f32 0.1, %v4545_v27  ;;  %v4549_v37 = vmul.f32 0.8, %v4545_v27 }
 0x361   :  { %v4548_v23 = vadd.f32 %v4547_v20, %v4546_v55  ;;  %v4338_v50 = vpop.f32.mrf.mxu2 }
 0x362   :  { %v4407_v17 = vpop.f32.mrf.mxu3 }
 0x363   :  { %v4408_v0 = vadd.f32 %v4407_v17, %v4338_v50  ;;  %v4552_v42 = vmul.f32 0.9, %v4548_v23 }
 0x365   :  { %v4551_v47 = vadd.f32 %v4549_v37, %v4408_v0 }
 0x367   :  { %v4553_v5 = vmul.f32 0.1, %v4551_v47  ;;  %v4555_v34 = vmul.f32 0.8, %v4551_v47 }
 0x369   :  { %v4554_v3 = vadd.f32 %v4553_v5, %v4552_v42  ;;  %v4341_v43 = vpop.f32.mrf.mxu2 }
 0x36a   :  { %v4410_v45 = vpop.f32.mrf.mxu3 }
 0x36b   :  { %v4411_v57 = vadd.f32 %v4410_v45, %v4341_v43  ;;  %v4558_v35 = vmul.f32 0.9, %v4554_v3 }
 0x36d   :  { %v4557_v59 = vadd.f32 %v4555_v34, %v4411_v57 }
 0x36f   :  { %v4559_v10 = vmul.f32 0.1, %v4557_v59  ;;  %v4561_v16 = vmul.f32 0.8, %v4557_v59 }
 0x371   :  { %v4560_v39 = vadd.f32 %v4559_v10, %v4558_v35  ;;  %v4343_v19 = vpop.f32.mrf.mxu2 }
 0x372   :  { %v4412_v11 = vpop.f32.mrf.mxu3 }
 0x373   :  { %v4413_v52 = vadd.f32 %v4412_v11, %v4343_v19  ;;  %v4564_v18 = vmul.f32 0.9, %v4560_v39 }
 0x375   :  { %v4563_v22 = vadd.f32 %v4561_v16, %v4413_v52 }
 0x377   :  { %v4565_v4 = vmul.f32 0.1, %v4563_v22  ;;  %v4567_v58 = vmul.f32 0.8, %v4563_v22 }
 0x379   :  { %v4566_v33 = vadd.f32 %v4565_v4, %v4564_v18  ;;  %v4346_v9 = vpop.f32.mrf.mxu2 }
 0x37a   :  { %v4415_v29 = vpop.f32.mrf.mxu3 }
 0x37b   :  { %v4416_v53 = vadd.f32 %v4415_v29, %v4346_v9  ;;  %v4570_v21 = vmul.f32 0.9, %v4566_v33 }
 0x37d   :  { %v4569_v41 = vadd.f32 %v4567_v58, %v4416_v53 }
 0x37f   :  { %v4571_v26 = vmul.f32 0.1, %v4569_v41  ;;  %v4573_v36 = vmul.f32 0.8, %v4569_v41 }
 0x381   :  { %v4572_v51 = vadd.f32 %v4571_v26, %v4570_v21  ;;  %v4348_v60 = vpop.f32.mrf.mxu2 }
 0x382   :  { %v4417_v40 = vpop.f32.mrf.mxu3 }
 0x383   :  { %v4418_v28 = vadd.f32 %v4417_v40, %v4348_v60  ;;  %v4576_v30 = vmul.f32 0.9, %v4572_v51 }
 0x385   :  { %v4575_v38 = vadd.f32 %v4573_v36, %v4418_v28 }
 0x387   :  { %v4577_v54 = vmul.f32 0.1, %v4575_v38  ;;  %v4579_v2 = vmul.f32 0.8, %v4575_v38 }
 0x389   :  { %v4578_v1 = vadd.f32 %v4577_v54, %v4576_v30  ;;  %v4351_v24 = vpop.f32.mrf.mxu2 }
 0x38a   :  { %v4420_v44 = vpop.f32.mrf.mxu3 }
 0x38b   :  { %v4421_v31 = vadd.f32 %v4420_v44, %v4351_v24  ;;  %v4582_v12 = vmul.f32 0.9, %v4578_v1 }
 0x38d   :  { %v4581_v63 = vadd.f32 %v4579_v2, %v4421_v31 }
 0x38f   :  { %v4583_v8 = vmul.f32 0.1, %v4581_v63  ;;  %v4585_v32 = vmul.f32 0.8, %v4581_v63 }
 0x391   :  { %v4584_v48 = vadd.f32 %v4583_v8, %v4582_v12  ;;  %v4353_v46 = vpop.f32.mrf.mxu2 }
 0x392   :  { %v4422_v6 = vpop.f32.mrf.mxu3 }
 0x393   :  { %v4423_v13 = vadd.f32 %v4422_v6, %v4353_v46  ;;  %v4588_v14 = vmul.f32 0.9, %v4584_v48 }
 0x395   :  { %v4587_v56 = vadd.f32 %v4585_v32, %v4423_v13 }
 0x397   :  { %v4589_v25 = vmul.f32 0.1, %v4587_v56 }
 0x399   :  { %v4590_v7 = vadd.f32 %v4589_v25, %v4588_v14 }
 0x39b   :  { %4591 = vst [vmem:[#allocation21] sm:$0xff] %v4590_v7 }
 0x39c   :  { %4602 = dma.vmem_to_hbm [thread:$0]  %s4598_s14, 128, %s4600_s17, [#allocation12]  }
 0x39d   :  { %5912 = dma.done.wait [#allocation12], 128  }
 0x39e   :  { %5913 = vsyncadd [#allocation12], 4294967168 }
 0x39f   :  { %4607 = vsyncpa [#allocation11], 1 }
 0x3a0   :  { %4608 = vsyncpa [#allocation14], 1 }
 0x3a1   :  { %4609 = vsyncpa [#allocation17], 1 }
 0x3a2   :  { %4610 = vsyncpa [#allocation20], 1 }
 0x3a3   :  { %4611 = vsyncpa [#allocation12], 1 }

</bundles_post_ra>
